<compile_context>
chip_gen: v5e
topology: v5e:2x2
jax: 0.10.0
libtpu: 0.0.40
codegen_flags: <defaults>
</compile_context>

<pallas_src>
import math
import jax
import jax.numpy as jnp
from jax.experimental import pallas as pl
from jax.experimental.pallas import tpu as pltpu


_VMEM_LIMIT = 32 * 1024 * 1024


def _round_up(x, m):
    return (x + m - 1) // m * m


# ----------------------------------------------------------------------------
# Pallas kernels
# ----------------------------------------------------------------------------

def _mm_epilogue_body(a_ref, b_ref, s_ref, t_ref, r_ref, o_ref, acc_ref, relu):
    """acc += A@B over the K grid axis; epilogue out = [relu]((acc [+ r])*s + t)."""
    @pl.when(pl.program_id(2) == 0)
    def _init():
        acc_ref[...] = jnp.zeros_like(acc_ref)

    acc_ref[...] += jnp.dot(a_ref[...], b_ref[...],
                            preferred_element_type=jnp.float32)

    @pl.when(pl.program_id(2) == pl.num_programs(2) - 1)
    def _fin():
        acc = acc_ref[...]
        if r_ref is not None:
            acc = acc + r_ref[...]
        y = acc * s_ref[...] + t_ref[...]
        if relu:
            y = jnp.maximum(y, 0.0)
        o_ref[...] = y.astype(o_ref.dtype)


def _mm_linear_kernel(a_ref, b_ref, s_ref, t_ref, o_ref, acc_ref):
    _mm_epilogue_body(a_ref, b_ref, s_ref, t_ref, None, o_ref, acc_ref, False)


def _mm_relu_kernel(a_ref, b_ref, s_ref, t_ref, o_ref, acc_ref):
    _mm_epilogue_body(a_ref, b_ref, s_ref, t_ref, None, o_ref, acc_ref, True)


def _mm_res_relu_kernel(a_ref, b_ref, s_ref, t_ref, r_ref, o_ref, acc_ref):
    _mm_epilogue_body(a_ref, b_ref, s_ref, t_ref, r_ref, o_ref, acc_ref, True)


def _maxpool_kernel(p_ref, o_ref):
    kk = p_ref.shape[1]
    y = p_ref[:, 0, :]
    for t in range(1, kk):
        y = jnp.maximum(y, p_ref[:, t, :])
    o_ref[...] = y


def _avgpool_kernel(p_ref, o_ref):
    kk = p_ref.shape[1]
    y = p_ref[:, 0, :]
    for t in range(1, kk):
        y = y + p_ref[:, t, :]
    o_ref[...] = y * (1.0 / kk)


# index maps (module level so tracing/caching is stable)
def _a_map(i, j, k): return (i, k)
def _b_map(i, j, k): return (k, j)
def _vec_map(i, j, k): return (0, j)
def _o_map(i, j, k): return (i, j)
def _pool_in_map(i): return (i, 0, 0)
def _pool_out_map(i): return (i, 0)


# ----------------------------------------------------------------------------
# Pallas wrappers
# ----------------------------------------------------------------------------

def fused_matmul(a, w, scale, shift, residual=None, relu=False):
    """out = [relu]((a @ w [+ residual]) * scale + shift).

    a: (M, K) float (cast to bf16), w: (K, N) float (cast to bf16),
    scale/shift: (N,) f32, residual: (M, N) f32 or None. Returns (M, N) f32.
    """
    M, K = a.shape
    K2, N = w.shape
    assert K == K2

    # Tile sizes (per perf review): large K tiles, N up to 256, M up to 256.
    Kp = _round_up(K, 128)
    if Kp <= 1024:
        tk = Kp
    else:
        tk = 512
        Kp = _round_up(K, tk)
    tn = 256 if N > 128 else 128
    Np = _round_up(N, tn)
    tm = min(256, _round_up(M, 16))   # multiple of 16 for bf16 sublane packing
    Mp = _round_up(M, tm)

    a_p = jnp.pad(a.astype(jnp.bfloat16), ((0, Mp - M), (0, Kp - K)))
    w_p = jnp.pad(w.astype(jnp.bfloat16), ((0, Kp - K), (0, Np - N)))
    s_p = jnp.pad(scale.astype(jnp.float32).reshape(1, N), ((0, 0), (0, Np - N)))
    t_p = jnp.pad(shift.astype(jnp.float32).reshape(1, N), ((0, 0), (0, Np - N)))

    in_specs = [
        pl.BlockSpec((tm, tk), _a_map),
        pl.BlockSpec((tk, tn), _b_map),
        pl.BlockSpec((1, tn), _vec_map),
        pl.BlockSpec((1, tn), _vec_map),
    ]
    operands = [a_p, w_p, s_p, t_p]
    if residual is not None:
        r_p = jnp.pad(residual.astype(jnp.float32), ((0, Mp - M), (0, Np - N)))
        in_specs.append(pl.BlockSpec((tm, tn), _o_map))
        operands.append(r_p)
        kernel = _mm_res_relu_kernel
    else:
        kernel = _mm_relu_kernel if relu else _mm_linear_kernel

    out = pl.pallas_call(
        kernel,
        out_shape=jax.ShapeDtypeStruct((Mp, Np), jnp.float32),
        grid_spec=pltpu.PrefetchScalarGridSpec(
            num_scalar_prefetch=0,
            grid=(Mp // tm, Np // tn, Kp // tk),
            in_specs=in_specs,
            out_specs=pl.BlockSpec((tm, tn), _o_map),
            scratch_shapes=[pltpu.VMEM((tm, tn), jnp.float32)],
        ),
        compiler_params=pltpu.CompilerParams(
            dimension_semantics=("parallel", "parallel", "arbitrary"),
            vmem_limit_bytes=_VMEM_LIMIT),
    )(*operands)
    return out[:M, :N]


def _extract_patches(x, kh, kw, stride, pad, pad_value=0.0):
    """x: (N, H, W, C) -> patches (N, oh, ow, kh*kw, C)."""
    N, H, W, C = x.shape
    x_p = jnp.pad(x, ((0, 0), (pad, pad), (pad, pad), (0, 0)),
                  constant_values=pad_value)
    Hp, Wp = H + 2 * pad, W + 2 * pad
    oh = (Hp - kh) // stride + 1
    ow = (Wp - kw) // stride + 1
    cols = []
    for i in range(kh):
        for j in range(kw):
            cols.append(x_p[:, i:i + stride * oh:stride,
                            j:j + stride * ow:stride, :])
    patches = jnp.stack(cols, axis=3)  # (N, oh, ow, kh*kw, C)
    return patches, oh, ow


def conv2d(x, p, stride, pad, bn=None, relu=False, residual=None):
    """NHWC conv with fused bias / BN / ReLU / residual-add epilogue.

    p["wm"]: (kh*kw*Cin, O) bf16 matmul-layout weights, p["b"]: (O,) f32.
    """
    wm, b, kh, kw = p["wm"], p["b"], p["kh"], p["kw"]
    N, H, W, Cin = x.shape
    O = wm.shape[1]

    if kh == 1 and kw == 1:
        # 1x1 conv: no im2col at all.
        assert pad == 0
        xs = x if stride == 1 else x[:, ::stride, ::stride, :]
        oh, ow = xs.shape[1], xs.shape[2]
        a = xs.reshape(N * oh * ow, Cin)
    else:
        patches, oh, ow = _extract_patches(x.astype(jnp.bfloat16),
                                           kh, kw, stride, pad, 0.0)
        a = patches.reshape(N * oh * ow, kh * kw * Cin)

    if bn is not None:
        scale = bn["scale"]
        shift = bn["shift"] + b * bn["scale"]   # fold conv bias into BN shift
    else:
        scale = jnp.ones_like(b)
        shift = b

    res = None if residual is None else residual.reshape(N * oh * ow, O)
    y = fused_matmul(a, wm, scale, shift, residual=res, relu=relu)
    return y.reshape(N, oh, ow, O)


def _rowwise_pool(patches_2d, kernel):
    """patches_2d: (rows, kk, C) f32 -> (rows, C) f32, gridded over rows."""
    rows, kk, C = patches_2d.shape
    tr = min(512, _round_up(rows, 8))
    rp = _round_up(rows, tr)
    p = jnp.pad(patches_2d, ((0, rp - rows), (0, 0), (0, 0)))
    y = pl.pallas_call(
        kernel,
        out_shape=jax.ShapeDtypeStruct((rp, C), jnp.float32),
        grid_spec=pltpu.PrefetchScalarGridSpec(
            num_scalar_prefetch=0,
            grid=(rp // tr,),
            in_specs=[pl.BlockSpec((tr, kk, C), _pool_in_map)],
            out_specs=pl.BlockSpec((tr, C), _pool_out_map),
        ),
        compiler_params=pltpu.CompilerParams(
            dimension_semantics=("parallel",),
            vmem_limit_bytes=_VMEM_LIMIT),
    )(p)
    return y[:rows]


def maxpool2d(x):
    """MaxPool2d(kernel=3, stride=2, padding=1) in NHWC."""
    N, H, W, C = x.shape
    patches, oh, ow = _extract_patches(x, 3, 3, 2, 1, float("-inf"))
    y = _rowwise_pool(patches.reshape(N * oh * ow, 9, C), _maxpool_kernel)
    return y.reshape(N, oh, ow, C)


def avgpool2d_flatten(x, k):
    """AvgPool2d((k,k), stride=k) followed by torch-style .view(N, -1)."""
    N, H, W, C = x.shape
    patches, oh, ow = _extract_patches(x, k, k, k, 0, 0.0)
    avg = _rowwise_pool(patches.reshape(N * oh * ow, k * k, C), _avgpool_kernel)
    avg = avg.reshape(N, oh, ow, C)
    # match torch flatten of an NCHW tensor: channel-major ordering
    return jnp.transpose(avg, (0, 3, 1, 2)).reshape(N, -1)


# ----------------------------------------------------------------------------
# Parameters (deterministic synthetic init; weights pre-laid-out for the MXU)
# ----------------------------------------------------------------------------

def init_params(key, ch1, ch2):
    keys = iter(jax.random.split(key, 512))

    def conv(ich, och, k):
        kw_, kb_ = next(keys), next(keys)
        fan = ich * k * k
        w = jax.random.normal(kw_, (och, ich, k, k), jnp.float32) / math.sqrt(fan)
        b = jax.random.normal(kb_, (och,), jnp.float32) * 0.01
        # pre-transpose to matmul layout (kh*kw*Cin, O) and pre-cast to bf16
        wm = jnp.transpose(w, (2, 3, 1, 0)).reshape(k * k * ich, och)
        return {"wm": wm.astype(jnp.bfloat16), "b": b, "kh": k, "kw": k}

    def linear(ich, och):
        kw_, kb_ = next(keys), next(keys)
        w = jax.random.normal(kw_, (och, ich), jnp.float32) / math.sqrt(ich)
        b = jax.random.normal(kb_, (och,), jnp.float32) * 0.01
        return {"wt": jnp.transpose(w).astype(jnp.bfloat16), "b": b}  # (in, out)

    def bn(och):
        eps = 1e-5
        gamma = jnp.ones((och,), jnp.float32)
        beta = jnp.zeros((och,), jnp.float32)
        mean = jnp.zeros((och,), jnp.float32)
        var = jnp.ones((och,), jnp.float32)
        scale = gamma / jnp.sqrt(var + eps)
        shift = beta - mean * scale
        return {"scale": scale, "shift": shift}

    def resblk(ich, mch, och, down):
        p = {
            "down": down,
            "c1": conv(ich, mch, 1), "bn1": bn(mch),
            "c2": conv(mch, mch, 3), "bn2": bn(mch),
            "c3": conv(mch, och, 1),
            "bn_out": bn(och),
        }
        if down or (ich != och):
            p["skip"] = conv(ich, och, 1)
        else:
            p["skip"] = None
        return p

    def stage(ch):
        cfg = ([(ch, ch, 4 * ch, False),
                (4 * ch, ch, 4 * ch, False),
                (4 * ch, ch, 4 * ch, False),
                (4 * ch, 2 * ch, 8 * ch, True)]
               + [(8 * ch, 2 * ch, 8 * ch, False)] * 3
               + [(8 * ch, 4 * ch, 16 * ch, True)]
               + [(16 * ch, 4 * ch, 16 * ch, False)] * 5
               + [(16 * ch, 8 * ch, 32 * ch, True)]
               + [(32 * ch, 8 * ch, 32 * ch, False)] * 2)
        return {"stem": conv(3, ch, 7), "blocks": [resblk(*c) for c in cfg]}

    return {
        "layer1": [conv(3, 16, 3), conv(16, 16, 3), conv(16, 16, 3)],
        "layer2_1": conv(16, 3, 3),
        "layer2_2": conv(16, 3, 3),
        "stage1": stage(ch1),
        "stage2": stage(ch2),
        "fc1": linear(32 * ch1, 1000),
        "fc2": linear(32 * ch1 + 32 * ch2, 1000),
    }


# ----------------------------------------------------------------------------
# Forward pass
# ----------------------------------------------------------------------------

def resblock_fwd(x, p):
    s1 = 2 if p["down"] else 1
    if p["skip"] is not None:
        x2 = conv2d(x, p["skip"], s1, 0)                      # plain conv + bias
    else:
        x2 = x
    h = conv2d(x, p["c1"], s1, 0, bn=p["bn1"], relu=True)     # conv+BN+ReLU fused
    h = conv2d(h, p["c2"], 1, 1, bn=p["bn2"], relu=True)      # conv+BN+ReLU fused
    # conv3 + residual add + BN + ReLU fused in a single kernel
    return conv2d(h, p["c3"], 1, 0, bn=p["bn_out"], relu=True, residual=x2)


def stage_fwd(z, sp):
    z = conv2d(z, sp["stem"], 2, 3)       # 7x7, stride 2, pad 3 (no BN/ReLU)
    z = maxpool2d(z)                      # 3x3, stride 2, pad 1
    for bp in sp["blocks"]:
        z = resblock_fwd(z, bp)
    return z


def resnet50_forward(params, x_nchw, lastsize):
    # NCHW -> NHWC
    x = jnp.transpose(x_nchw.astype(jnp.float32), (0, 2, 3, 1))
    for p in params["layer1"]:
        x = conv2d(x, p, 1, 1)
    c = conv2d(x, params["layer2_1"], 2, 1)
    d = conv2d(x, params["layer2_2"], 2, 1)

    fL = stage_fwd(c, params["stage1"])
    fH = stage_fwd(d, params["stage2"])

    fLview = avgpool2d_flatten(fL, lastsize)
    fHview = avgpool2d_flatten(fH, lastsize)

    C = jnp.concatenate([fLview, fHview], axis=1)
    dH = fHview.shape[1]
    n_out = params["fc1"]["b"].shape[0]

    # Fuse the two FC heads into one GEMM over the concatenated features:
    #   sL = fLview @ W1.T + b1  ==  C @ [[W1.T],[0]] + b1
    w1_ext = jnp.pad(params["fc1"]["wt"], ((0, dH), (0, 0)))        # (dL+dH, n_out)
    w_cat = jnp.concatenate([w1_ext, params["fc2"]["wt"]], axis=1)  # (dL+dH, 2*n_out)
    b_cat = jnp.concatenate([params["fc1"]["b"], params["fc2"]["b"]])
    ones = jnp.ones((2 * n_out,), jnp.float32)
    s_all = fused_matmul(C, w_cat, ones, b_cat, relu=False)

    sL = s_all[:, :n_out]
    sC = s_all[:, n_out:]
    s = (sL + sC) * 0.5
    return sL, sC, s


# ----------------------------------------------------------------------------
# Main
# ----------------------------------------------------------------------------

if __name__ == "__main__":
    # Small configuration consistent with the module:
    #   resnet50(ch1=8, ch2=4, lastsize=1), input 16x16 -> final feature map 1x1
    CH1, CH2, LASTSIZE = 8, 4, 1
    BATCH, SPATIAL = 2, 16

    key = jax.random.PRNGKey(0)
    pkey, xkey = jax.random.split(key)
    params = init_params(pkey, CH1, CH2)
    x = jax.random.normal(xkey, (BATCH, 3, SPATIAL, SPATIAL), jnp.float32)  # NCHW

    fwd = jax.jit(lambda inp: resnet50_forward(params, inp, LASTSIZE))
    sL, sC, s = fwd(x)
    jax.block_until_ready((sL, sC, s))

    assert sL.shape == (BATCH, 1000)
    assert sC.shape == (BATCH, 1000)
    assert s.shape == (BATCH, 1000)
    assert bool(jnp.all(jnp.isfinite(s)))

    print("KERNEL_OK")
</pallas_src>

<mosaic_0001>
module attributes {stable_mosaic.version = 11 : i64} {
  func.func @_mm_linear_kernel(%arg0: i32, %arg1: i32, %arg2: i32, %arg3: memref<256x128xbf16, #tpu.memory_space<vmem>>, %arg4: memref<128x128xbf16, #tpu.memory_space<vmem>>, %arg5: memref<1x128xf32, #tpu.memory_space<vmem>>, %arg6: memref<1x128xf32, #tpu.memory_space<vmem>>, %arg7: memref<256x128xf32, #tpu.memory_space<vmem>>, %arg8: memref<256x128xf32, #tpu.memory_space<vmem>>) attributes {dimension_semantics = [#tpu.dimension_semantics<parallel>, #tpu.dimension_semantics<parallel>, #tpu.dimension_semantics<arbitrary>], iteration_bounds = array<i64: 2, 1, 1>, scalar_prefetch = 0 : i64, scratch_operands = 1 : i64, tpu.core_type = #tpu.core_type<tc>, window_params = [{transform_indices = @transform_0, window_bounds = array<i64: 256, 128>}, {transform_indices = @transform_1, window_bounds = array<i64: 128, 128>}, {transform_indices = @transform_2, window_bounds = array<i64: 1, 128>}, {transform_indices = @transform_3, window_bounds = array<i64: 1, 128>}, {transform_indices = @transform_4, window_bounds = array<i64: 256, 128>}]} {
    %c0_i32 = arith.constant 0 : i32
    %0 = arith.cmpi eq, %arg2, %c0_i32 : i32
    %1 = arith.extui %0 : i1 to i32
    %c0_i32_0 = arith.constant 0 : i32
    %2 = arith.cmpi ne, %1, %c0_i32_0 : i32
    scf.if %2 {
      %cst_10 = arith.constant 0.000000e+00 : f32
      %12 = vector.broadcast %cst_10 : f32 to vector<256x128xf32>
      %c0_11 = arith.constant 0 : index
      %c0_12 = arith.constant 0 : index
      %13 = vector.load %arg8[%c0_11, %c0_12] : memref<256x128xf32, #tpu.memory_space<vmem>>, vector<256x128xf32>
      tpu.vector_store %arg8[%c0_11, %c0_12], %12 {strides = array<i32>} : memref<256x128xf32, #tpu.memory_space<vmem>>, vector<256x128xf32>,
    } else {
    }
    %c0 = arith.constant 0 : index
    %c0_1 = arith.constant 0 : index
    %3 = vector.load %arg8[%c0, %c0_1] : memref<256x128xf32, #tpu.memory_space<vmem>>, vector<256x128xf32>
    %c0_2 = arith.constant 0 : index
    %c0_3 = arith.constant 0 : index
    %4 = vector.load %arg3[%c0_2, %c0_3] : memref<256x128xbf16, #tpu.memory_space<vmem>>, vector<256x128xbf16>
    %c0_4 = arith.constant 0 : index
    %c0_5 = arith.constant 0 : index
    %5 = vector.load %arg4[%c0_4, %c0_5] : memref<128x128xbf16, #tpu.memory_space<vmem>>, vector<128x128xbf16>
    %cst = arith.constant dense<0.000000e+00> : vector<256x128xf32>
    %6 = tpu.matmul %4, %5, %cst {dimension_numbers = #tpu.dot_dimension_numbers<[1], [0], [0], [1], [0, 0, 1, 1], [], []>} : vector<256x128xbf16>, vector<128x128xbf16>, vector<256x128xf32> -> vector<256x128xf32>
    %7 = arith.addf %3, %6 : vector<256x128xf32>
    %c0_6 = arith.constant 0 : index
    %c0_7 = arith.constant 0 : index
    %8 = vector.load %arg8[%c0_6, %c0_7] : memref<256x128xf32, #tpu.memory_space<vmem>>, vector<256x128xf32>
    tpu.vector_store %arg8[%c0_6, %c0_7], %7 {strides = array<i32>} : memref<256x128xf32, #tpu.memory_space<vmem>>, vector<256x128xf32>,
    %c0_i32_8 = arith.constant 0 : i32
    %9 = arith.cmpi eq, %arg2, %c0_i32_8 : i32
    %10 = arith.extui %9 : i1 to i32
    %c0_i32_9 = arith.constant 0 : i32
    %11 = arith.cmpi ne, %10, %c0_i32_9 : i32
    scf.if %11 {
      %c0_10 = arith.constant 0 : index
      %c0_11 = arith.constant 0 : index
      %12 = vector.load %arg8[%c0_10, %c0_11] : memref<256x128xf32, #tpu.memory_space<vmem>>, vector<256x128xf32>
      %c0_12 = arith.constant 0 : index
      %c0_13 = arith.constant 0 : index
      %13 = vector.load %arg5[%c0_12, %c0_13] : memref<1x128xf32, #tpu.memory_space<vmem>>, vector<1x128xf32>
      %14 = vector.broadcast %13 : vector<1x128xf32> to vector<256x128xf32>
      %15 = arith.mulf %12, %14 : vector<256x128xf32>
      %c0_14 = arith.constant 0 : index
      %c0_15 = arith.constant 0 : index
      %16 = vector.load %arg6[%c0_14, %c0_15] : memref<1x128xf32, #tpu.memory_space<vmem>>, vector<1x128xf32>
      %17 = vector.broadcast %16 : vector<1x128xf32> to vector<256x128xf32>
      %18 = arith.addf %15, %17 : vector<256x128xf32>
      %c0_16 = arith.constant 0 : index
      %c0_17 = arith.constant 0 : index
      %19 = vector.load %arg7[%c0_16, %c0_17] : memref<256x128xf32, #tpu.memory_space<vmem>>, vector<256x128xf32>
      tpu.vector_store %arg7[%c0_16, %c0_17], %18 {strides = array<i32>} : memref<256x128xf32, #tpu.memory_space<vmem>>, vector<256x128xf32>,
    } else {
    }
    return
  }
  func.func @transform_0(%arg0: i32, %arg1: i32, %arg2: i32) -> (i32, i32) {
    %c0_i32 = arith.constant 0 : i32
    return %arg0, %arg2 : i32, i32
  }
  func.func @transform_1(%arg0: i32, %arg1: i32, %arg2: i32) -> (i32, i32) {
    %c0_i32 = arith.constant 0 : i32
    return %arg2, %arg1 : i32, i32
  }
  func.func @transform_2(%arg0: i32, %arg1: i32, %arg2: i32) -> (i32, i32) {
    %c0_i32 = arith.constant 0 : i32
    %c0_i32_0 = arith.constant 0 : i32
    return %c0_i32, %arg1 : i32, i32
  }
  func.func @transform_3(%arg0: i32, %arg1: i32, %arg2: i32) -> (i32, i32) {
    %c0_i32 = arith.constant 0 : i32
    %c0_i32_0 = arith.constant 0 : i32
    return %c0_i32, %arg1 : i32, i32
  }
  func.func @transform_4(%arg0: i32, %arg1: i32, %arg2: i32) -> (i32, i32) {
    %c0_i32 = arith.constant 0 : i32
    return %arg0, %arg1 : i32, i32
  }
}

module attributes {stable_mosaic.version = 11 : i64} {
  func.func @_mm_linear_kernel(%arg0: i32, %arg1: i32, %arg2: i32, %arg3: memref<256x256xbf16, #tpu.memory_space<vmem>>, %arg4: memref<256x128xbf16, #tpu.memory_space<vmem>>, %arg5: memref<1x128xf32, #tpu.memory_space<vmem>>, %arg6: memref<1x128xf32, #tpu.memory_space<vmem>>, %arg7: memref<256x128xf32, #tpu.memory_space<vmem>>, %arg8: memref<256x128xf32, #tpu.memory_space<vmem>>) attributes {dimension_semantics = [#tpu.dimension_semantics<parallel>, #tpu.dimension_semantics<parallel>, #tpu.dimension_semantics<arbitrary>], iteration_bounds = array<i64: 2, 1, 1>, scalar_prefetch = 0 : i64, scratch_operands = 1 : i64, tpu.core_type = #tpu.core_type<tc>, window_params = [{transform_indices = @transform_0, window_bounds = array<i64: 256, 256>}, {transform_indices = @transform_1, window_bounds = array<i64: 256, 128>}, {transform_indices = @transform_2, window_bounds = array<i64: 1, 128>}, {transform_indices = @transform_3, window_bounds = array<i64: 1, 128>}, {transform_indices = @transform_4, window_bounds = array<i64: 256, 128>}]} {
    %c0_i32 = arith.constant 0 : i32
    %0 = arith.cmpi eq, %arg2, %c0_i32 : i32
    %1 = arith.extui %0 : i1 to i32
    %c0_i32_0 = arith.constant 0 : i32
    %2 = arith.cmpi ne, %1, %c0_i32_0 : i32
    scf.if %2 {
      %cst_10 = arith.constant 0.000000e+00 : f32
      %12 = vector.broadcast %cst_10 : f32 to vector<256x128xf32>
      %c0_11 = arith.constant 0 : index
      %c0_12 = arith.constant 0 : index
      %13 = vector.load %arg8[%c0_11, %c0_12] : memref<256x128xf32, #tpu.memory_space<vmem>>, vector<256x128xf32>
      tpu.vector_store %arg8[%c0_11, %c0_12], %12 {strides = array<i32>} : memref<256x128xf32, #tpu.memory_space<vmem>>, vector<256x128xf32>,
    } else {
    }
    %c0 = arith.constant 0 : index
    %c0_1 = arith.constant 0 : index
    %3 = vector.load %arg8[%c0, %c0_1] : memref<256x128xf32, #tpu.memory_space<vmem>>, vector<256x128xf32>
    %c0_2 = arith.constant 0 : index
    %c0_3 = arith.constant 0 : index
    %4 = vector.load %arg3[%c0_2, %c0_3] : memref<256x256xbf16, #tpu.memory_space<vmem>>, vector<256x256xbf16>
    %c0_4 = arith.constant 0 : index
    %c0_5 = arith.constant 0 : index
    %5 = vector.load %arg4[%c0_4, %c0_5] : memref<256x128xbf16, #tpu.memory_space<vmem>>, vector<256x128xbf16>
    %cst = arith.constant dense<0.000000e+00> : vector<256x128xf32>
    %6 = tpu.matmul %4, %5, %cst {dimension_numbers = #tpu.dot_dimension_numbers<[1], [0], [0], [1], [0, 0, 1, 1], [], []>} : vector<256x256xbf16>, vector<256x128xbf16>, vector<256x128xf32> -> vector<256x128xf32>
    %7 = arith.addf %3, %6 : vector<256x128xf32>
    %c0_6 = arith.constant 0 : index
    %c0_7 = arith.constant 0 : index
    %8 = vector.load %arg8[%c0_6, %c0_7] : memref<256x128xf32, #tpu.memory_space<vmem>>, vector<256x128xf32>
    tpu.vector_store %arg8[%c0_6, %c0_7], %7 {strides = array<i32>} : memref<256x128xf32, #tpu.memory_space<vmem>>, vector<256x128xf32>,
    %c0_i32_8 = arith.constant 0 : i32
    %9 = arith.cmpi eq, %arg2, %c0_i32_8 : i32
    %10 = arith.extui %9 : i1 to i32
    %c0_i32_9 = arith.constant 0 : i32
    %11 = arith.cmpi ne, %10, %c0_i32_9 : i32
    scf.if %11 {
      %c0_10 = arith.constant 0 : index
      %c0_11 = arith.constant 0 : index
      %12 = vector.load %arg8[%c0_10, %c0_11] : memref<256x128xf32, #tpu.memory_space<vmem>>, vector<256x128xf32>
      %c0_12 = arith.constant 0 : index
      %c0_13 = arith.constant 0 : index
      %13 = vector.load %arg5[%c0_12, %c0_13] : memref<1x128xf32, #tpu.memory_space<vmem>>, vector<1x128xf32>
      %14 = vector.broadcast %13 : vector<1x128xf32> to vector<256x128xf32>
      %15 = arith.mulf %12, %14 : vector<256x128xf32>
      %c0_14 = arith.constant 0 : index
      %c0_15 = arith.constant 0 : index
      %16 = vector.load %arg6[%c0_14, %c0_15] : memref<1x128xf32, #tpu.memory_space<vmem>>, vector<1x128xf32>
      %17 = vector.broadcast %16 : vector<1x128xf32> to vector<256x128xf32>
      %18 = arith.addf %15, %17 : vector<256x128xf32>
      %c0_16 = arith.constant 0 : index
      %c0_17 = arith.constant 0 : index
      %19 = vector.load %arg7[%c0_16, %c0_17] : memref<256x128xf32, #tpu.memory_space<vmem>>, vector<256x128xf32>
      tpu.vector_store %arg7[%c0_16, %c0_17], %18 {strides = array<i32>} : memref<256x128xf32, #tpu.memory_space<vmem>>, vector<256x128xf32>,
    } else {
    }
    return
  }
  func.func @transform_0(%arg0: i32, %arg1: i32, %arg2: i32) -> (i32, i32) {
    %c0_i32 = arith.constant 0 : i32
    return %arg0, %arg2 : i32, i32
  }
  func.func @transform_1(%arg0: i32, %arg1: i32, %arg2: i32) -> (i32, i32) {
    %c0_i32 = arith.constant 0 : i32
    return %arg2, %arg1 : i32, i32
  }
  func.func @transform_2(%arg0: i32, %arg1: i32, %arg2: i32) -> (i32, i32) {
    %c0_i32 = arith.constant 0 : i32
    %c0_i32_0 = arith.constant 0 : i32
    return %c0_i32, %arg1 : i32, i32
  }
  func.func @transform_3(%arg0: i32, %arg1: i32, %arg2: i32) -> (i32, i32) {
    %c0_i32 = arith.constant 0 : i32
    %c0_i32_0 = arith.constant 0 : i32
    return %c0_i32, %arg1 : i32, i32
  }
  func.func @transform_4(%arg0: i32, %arg1: i32, %arg2: i32) -> (i32, i32) {
    %c0_i32 = arith.constant 0 : i32
    return %arg0, %arg1 : i32, i32
  }
}

module attributes {stable_mosaic.version = 11 : i64} {
  func.func @_mm_linear_kernel(%arg0: i32, %arg1: i32, %arg2: i32, %arg3: memref<128x256xbf16, #tpu.memory_space<vmem>>, %arg4: memref<256x128xbf16, #tpu.memory_space<vmem>>, %arg5: memref<1x128xf32, #tpu.memory_space<vmem>>, %arg6: memref<1x128xf32, #tpu.memory_space<vmem>>, %arg7: memref<128x128xf32, #tpu.memory_space<vmem>>, %arg8: memref<128x128xf32, #tpu.memory_space<vmem>>) attributes {dimension_semantics = [#tpu.dimension_semantics<parallel>, #tpu.dimension_semantics<parallel>, #tpu.dimension_semantics<arbitrary>], iteration_bounds = array<i64: 1, 1, 1>, scalar_prefetch = 0 : i64, scratch_operands = 1 : i64, tpu.core_type = #tpu.core_type<tc>, window_params = [{transform_indices = @transform_0, window_bounds = array<i64: 128, 256>}, {transform_indices = @transform_1, window_bounds = array<i64: 256, 128>}, {transform_indices = @transform_2, window_bounds = array<i64: 1, 128>}, {transform_indices = @transform_3, window_bounds = array<i64: 1, 128>}, {transform_indices = @transform_4, window_bounds = array<i64: 128, 128>}]} {
    %c0_i32 = arith.constant 0 : i32
    %0 = arith.cmpi eq, %arg2, %c0_i32 : i32
    %1 = arith.extui %0 : i1 to i32
    %c0_i32_0 = arith.constant 0 : i32
    %2 = arith.cmpi ne, %1, %c0_i32_0 : i32
    scf.if %2 {
      %cst_10 = arith.constant 0.000000e+00 : f32
      %12 = vector.broadcast %cst_10 : f32 to vector<128x128xf32>
      %c0_11 = arith.constant 0 : index
      %c0_12 = arith.constant 0 : index
      %13 = vector.load %arg8[%c0_11, %c0_12] : memref<128x128xf32, #tpu.memory_space<vmem>>, vector<128x128xf32>
      tpu.vector_store %arg8[%c0_11, %c0_12], %12 {strides = array<i32>} : memref<128x128xf32, #tpu.memory_space<vmem>>, vector<128x128xf32>,
    } else {
    }
    %c0 = arith.constant 0 : index
    %c0_1 = arith.constant 0 : index
    %3 = vector.load %arg8[%c0, %c0_1] : memref<128x128xf32, #tpu.memory_space<vmem>>, vector<128x128xf32>
    %c0_2 = arith.constant 0 : index
    %c0_3 = arith.constant 0 : index
    %4 = vector.load %arg3[%c0_2, %c0_3] : memref<128x256xbf16, #tpu.memory_space<vmem>>, vector<128x256xbf16>
    %c0_4 = arith.constant 0 : index
    %c0_5 = arith.constant 0 : index
    %5 = vector.load %arg4[%c0_4, %c0_5] : memref<256x128xbf16, #tpu.memory_space<vmem>>, vector<256x128xbf16>
    %cst = arith.constant dense<0.000000e+00> : vector<128x128xf32>
    %6 = tpu.matmul %4, %5, %cst {dimension_numbers = #tpu.dot_dimension_numbers<[1], [0], [0], [1], [0, 0, 1, 1], [], []>} : vector<128x256xbf16>, vector<256x128xbf16>, vector<128x128xf32> -> vector<128x128xf32>
    %7 = arith.addf %3, %6 : vector<128x128xf32>
    %c0_6 = arith.constant 0 : index
    %c0_7 = arith.constant 0 : index
    %8 = vector.load %arg8[%c0_6, %c0_7] : memref<128x128xf32, #tpu.memory_space<vmem>>, vector<128x128xf32>
    tpu.vector_store %arg8[%c0_6, %c0_7], %7 {strides = array<i32>} : memref<128x128xf32, #tpu.memory_space<vmem>>, vector<128x128xf32>,
    %c0_i32_8 = arith.constant 0 : i32
    %9 = arith.cmpi eq, %arg2, %c0_i32_8 : i32
    %10 = arith.extui %9 : i1 to i32
    %c0_i32_9 = arith.constant 0 : i32
    %11 = arith.cmpi ne, %10, %c0_i32_9 : i32
    scf.if %11 {
      %c0_10 = arith.constant 0 : index
      %c0_11 = arith.constant 0 : index
      %12 = vector.load %arg8[%c0_10, %c0_11] : memref<128x128xf32, #tpu.memory_space<vmem>>, vector<128x128xf32>
      %c0_12 = arith.constant 0 : index
      %c0_13 = arith.constant 0 : index
      %13 = vector.load %arg5[%c0_12, %c0_13] : memref<1x128xf32, #tpu.memory_space<vmem>>, vector<1x128xf32>
      %14 = vector.broadcast %13 : vector<1x128xf32> to vector<128x128xf32>
      %15 = arith.mulf %12, %14 : vector<128x128xf32>
      %c0_14 = arith.constant 0 : index
      %c0_15 = arith.constant 0 : index
      %16 = vector.load %arg6[%c0_14, %c0_15] : memref<1x128xf32, #tpu.memory_space<vmem>>, vector<1x128xf32>
      %17 = vector.broadcast %16 : vector<1x128xf32> to vector<128x128xf32>
      %18 = arith.addf %15, %17 : vector<128x128xf32>
      %c0_16 = arith.constant 0 : index
      %c0_17 = arith.constant 0 : index
      %19 = vector.load %arg7[%c0_16, %c0_17] : memref<128x128xf32, #tpu.memory_space<vmem>>, vector<128x128xf32>
      tpu.vector_store %arg7[%c0_16, %c0_17], %18 {strides = array<i32>} : memref<128x128xf32, #tpu.memory_space<vmem>>, vector<128x128xf32>,
    } else {
    }
    return
  }
  func.func @transform_0(%arg0: i32, %arg1: i32, %arg2: i32) -> (i32, i32) {
    %c0_i32 = arith.constant 0 : i32
    return %arg0, %arg2 : i32, i32
  }
  func.func @transform_1(%arg0: i32, %arg1: i32, %arg2: i32) -> (i32, i32) {
    %c0_i32 = arith.constant 0 : i32
    return %arg2, %arg1 : i32, i32
  }
  func.func @transform_2(%arg0: i32, %arg1: i32, %arg2: i32) -> (i32, i32) {
    %c0_i32 = arith.constant 0 : i32
    %c0_i32_0 = arith.constant 0 : i32
    return %c0_i32, %arg1 : i32, i32
  }
  func.func @transform_3(%arg0: i32, %arg1: i32, %arg2: i32) -> (i32, i32) {
    %c0_i32 = arith.constant 0 : i32
    %c0_i32_0 = arith.constant 0 : i32
    return %c0_i32, %arg1 : i32, i32
  }
  func.func @transform_4(%arg0: i32, %arg1: i32, %arg2: i32) -> (i32, i32) {
    %c0_i32 = arith.constant 0 : i32
    return %arg0, %arg1 : i32, i32
  }
}

module attributes {stable_mosaic.version = 11 : i64} {
  func.func @_mm_linear_kernel(%arg0: i32, %arg1: i32, %arg2: i32, %arg3: memref<32x256xbf16, #tpu.memory_space<vmem>>, %arg4: memref<256x128xbf16, #tpu.memory_space<vmem>>, %arg5: memref<1x128xf32, #tpu.memory_space<vmem>>, %arg6: memref<1x128xf32, #tpu.memory_space<vmem>>, %arg7: memref<32x128xf32, #tpu.memory_space<vmem>>, %arg8: memref<32x128xf32, #tpu.memory_space<vmem>>) attributes {dimension_semantics = [#tpu.dimension_semantics<parallel>, #tpu.dimension_semantics<parallel>, #tpu.dimension_semantics<arbitrary>], iteration_bounds = array<i64: 1, 1, 1>, scalar_prefetch = 0 : i64, scratch_operands = 1 : i64, tpu.core_type = #tpu.core_type<tc>, window_params = [{transform_indices = @transform_0, window_bounds = array<i64: 32, 256>}, {transform_indices = @transform_1, window_bounds = array<i64: 256, 128>}, {transform_indices = @transform_2, window_bounds = array<i64: 1, 128>}, {transform_indices = @transform_3, window_bounds = array<i64: 1, 128>}, {transform_indices = @transform_4, window_bounds = array<i64: 32, 128>}]} {
    %c0_i32 = arith.constant 0 : i32
    %0 = arith.cmpi eq, %arg2, %c0_i32 : i32
    %1 = arith.extui %0 : i1 to i32
    %c0_i32_0 = arith.constant 0 : i32
    %2 = arith.cmpi ne, %1, %c0_i32_0 : i32
    scf.if %2 {
      %cst_10 = arith.constant 0.000000e+00 : f32
      %12 = vector.broadcast %cst_10 : f32 to vector<32x128xf32>
      %c0_11 = arith.constant 0 : index
      %c0_12 = arith.constant 0 : index
      %13 = vector.load %arg8[%c0_11, %c0_12] : memref<32x128xf32, #tpu.memory_space<vmem>>, vector<32x128xf32>
      tpu.vector_store %arg8[%c0_11, %c0_12], %12 {strides = array<i32>} : memref<32x128xf32, #tpu.memory_space<vmem>>, vector<32x128xf32>,
    } else {
    }
    %c0 = arith.constant 0 : index
    %c0_1 = arith.constant 0 : index
    %3 = vector.load %arg8[%c0, %c0_1] : memref<32x128xf32, #tpu.memory_space<vmem>>, vector<32x128xf32>
    %c0_2 = arith.constant 0 : index
    %c0_3 = arith.constant 0 : index
    %4 = vector.load %arg3[%c0_2, %c0_3] : memref<32x256xbf16, #tpu.memory_space<vmem>>, vector<32x256xbf16>
    %c0_4 = arith.constant 0 : index
    %c0_5 = arith.constant 0 : index
    %5 = vector.load %arg4[%c0_4, %c0_5] : memref<256x128xbf16, #tpu.memory_space<vmem>>, vector<256x128xbf16>
    %cst = arith.constant dense<0.000000e+00> : vector<32x128xf32>
    %6 = tpu.matmul %4, %5, %cst {dimension_numbers = #tpu.dot_dimension_numbers<[1], [0], [0], [1], [0, 0, 1, 1], [], []>} : vector<32x256xbf16>, vector<256x128xbf16>, vector<32x128xf32> -> vector<32x128xf32>
    %7 = arith.addf %3, %6 : vector<32x128xf32>
    %c0_6 = arith.constant 0 : index
    %c0_7 = arith.constant 0 : index
    %8 = vector.load %arg8[%c0_6, %c0_7] : memref<32x128xf32, #tpu.memory_space<vmem>>, vector<32x128xf32>
    tpu.vector_store %arg8[%c0_6, %c0_7], %7 {strides = array<i32>} : memref<32x128xf32, #tpu.memory_space<vmem>>, vector<32x128xf32>,
    %c0_i32_8 = arith.constant 0 : i32
    %9 = arith.cmpi eq, %arg2, %c0_i32_8 : i32
    %10 = arith.extui %9 : i1 to i32
    %c0_i32_9 = arith.constant 0 : i32
    %11 = arith.cmpi ne, %10, %c0_i32_9 : i32
    scf.if %11 {
      %c0_10 = arith.constant 0 : index
      %c0_11 = arith.constant 0 : index
      %12 = vector.load %arg8[%c0_10, %c0_11] : memref<32x128xf32, #tpu.memory_space<vmem>>, vector<32x128xf32>
      %c0_12 = arith.constant 0 : index
      %c0_13 = arith.constant 0 : index
      %13 = vector.load %arg5[%c0_12, %c0_13] : memref<1x128xf32, #tpu.memory_space<vmem>>, vector<1x128xf32>
      %14 = vector.broadcast %13 : vector<1x128xf32> to vector<32x128xf32>
      %15 = arith.mulf %12, %14 : vector<32x128xf32>
      %c0_14 = arith.constant 0 : index
      %c0_15 = arith.constant 0 : index
      %16 = vector.load %arg6[%c0_14, %c0_15] : memref<1x128xf32, #tpu.memory_space<vmem>>, vector<1x128xf32>
      %17 = vector.broadcast %16 : vector<1x128xf32> to vector<32x128xf32>
      %18 = arith.addf %15, %17 : vector<32x128xf32>
      %c0_16 = arith.constant 0 : index
      %c0_17 = arith.constant 0 : index
      %19 = vector.load %arg7[%c0_16, %c0_17] : memref<32x128xf32, #tpu.memory_space<vmem>>, vector<32x128xf32>
      tpu.vector_store %arg7[%c0_16, %c0_17], %18 {strides = array<i32>} : memref<32x128xf32, #tpu.memory_space<vmem>>, vector<32x128xf32>,
    } else {
    }
    return
  }
  func.func @transform_0(%arg0: i32, %arg1: i32, %arg2: i32) -> (i32, i32) {
    %c0_i32 = arith.constant 0 : i32
    return %arg0, %arg2 : i32, i32
  }
  func.func @transform_1(%arg0: i32, %arg1: i32, %arg2: i32) -> (i32, i32) {
    %c0_i32 = arith.constant 0 : i32
    return %arg2, %arg1 : i32, i32
  }
  func.func @transform_2(%arg0: i32, %arg1: i32, %arg2: i32) -> (i32, i32) {
    %c0_i32 = arith.constant 0 : i32
    %c0_i32_0 = arith.constant 0 : i32
    return %c0_i32, %arg1 : i32, i32
  }
  func.func @transform_3(%arg0: i32, %arg1: i32, %arg2: i32) -> (i32, i32) {
    %c0_i32 = arith.constant 0 : i32
    %c0_i32_0 = arith.constant 0 : i32
    return %c0_i32, %arg1 : i32, i32
  }
  func.func @transform_4(%arg0: i32, %arg1: i32, %arg2: i32) -> (i32, i32) {
    %c0_i32 = arith.constant 0 : i32
    return %arg0, %arg1 : i32, i32
  }
}

module attributes {stable_mosaic.version = 11 : i64} {
  func.func @_maxpool_kernel(%arg0: i32, %arg1: memref<8x9x4xf32, #tpu.memory_space<vmem>>, %arg2: memref<8x4xf32, #tpu.memory_space<vmem>>) attributes {dimension_semantics = [#tpu.dimension_semantics<parallel>], iteration_bounds = array<i64: 1>, scalar_prefetch = 0 : i64, scratch_operands = 0 : i64, tpu.core_type = #tpu.core_type<tc>, window_params = [{transform_indices = @transform_0, window_bounds = array<i64: 8, 9, 4>}, {transform_indices = @transform_1, window_bounds = array<i64: 8, 4>}]} {
    %c0 = arith.constant 0 : index
    %c0_0 = arith.constant 0 : index
    %c0_1 = arith.constant 0 : index
    %0 = vector.load %arg1[%c0, %c0_0, %c0_1] : memref<8x9x4xf32, #tpu.memory_space<vmem>>, vector<8x1x4xf32>
    %1 = vector.shape_cast %0 : vector<8x1x4xf32> to vector<8x4xf32>
    %c0_2 = arith.constant 0 : index
    %c1 = arith.constant 1 : index
    %c0_3 = arith.constant 0 : index
    %2 = vector.load %arg1[%c0_2, %c1, %c0_3] : memref<8x9x4xf32, #tpu.memory_space<vmem>>, vector<8x1x4xf32>
    %3 = vector.shape_cast %2 : vector<8x1x4xf32> to vector<8x4xf32>
    %4 = arith.maximumf %1, %3 : vector<8x4xf32>
    %c0_4 = arith.constant 0 : index
    %c2 = arith.constant 2 : index
    %c0_5 = arith.constant 0 : index
    %5 = vector.load %arg1[%c0_4, %c2, %c0_5] : memref<8x9x4xf32, #tpu.memory_space<vmem>>, vector<8x1x4xf32>
    %6 = vector.shape_cast %5 : vector<8x1x4xf32> to vector<8x4xf32>
    %7 = arith.maximumf %4, %6 : vector<8x4xf32>
    %c0_6 = arith.constant 0 : index
    %c3 = arith.constant 3 : index
    %c0_7 = arith.constant 0 : index
    %8 = vector.load %arg1[%c0_6, %c3, %c0_7] : memref<8x9x4xf32, #tpu.memory_space<vmem>>, vector<8x1x4xf32>
    %9 = vector.shape_cast %8 : vector<8x1x4xf32> to vector<8x4xf32>
    %10 = arith.maximumf %7, %9 : vector<8x4xf32>
    %c0_8 = arith.constant 0 : index
    %c4 = arith.constant 4 : index
    %c0_9 = arith.constant 0 : index
    %11 = vector.load %arg1[%c0_8, %c4, %c0_9] : memref<8x9x4xf32, #tpu.memory_space<vmem>>, vector<8x1x4xf32>
    %12 = vector.shape_cast %11 : vector<8x1x4xf32> to vector<8x4xf32>
    %13 = arith.maximumf %10, %12 : vector<8x4xf32>
    %c0_10 = arith.constant 0 : index
    %c5 = arith.constant 5 : index
    %c0_11 = arith.constant 0 : index
    %14 = vector.load %arg1[%c0_10, %c5, %c0_11] : memref<8x9x4xf32, #tpu.memory_space<vmem>>, vector<8x1x4xf32>
    %15 = vector.shape_cast %14 : vector<8x1x4xf32> to vector<8x4xf32>
    %16 = arith.maximumf %13, %15 : vector<8x4xf32>
    %c0_12 = arith.constant 0 : index
    %c6 = arith.constant 6 : index
    %c0_13 = arith.constant 0 : index
    %17 = vector.load %arg1[%c0_12, %c6, %c0_13] : memref<8x9x4xf32, #tpu.memory_space<vmem>>, vector<8x1x4xf32>
    %18 = vector.shape_cast %17 : vector<8x1x4xf32> to vector<8x4xf32>
    %19 = arith.maximumf %16, %18 : vector<8x4xf32>
    %c0_14 = arith.constant 0 : index
    %c7 = arith.constant 7 : index
    %c0_15 = arith.constant 0 : index
    %20 = vector.load %arg1[%c0_14, %c7, %c0_15] : memref<8x9x4xf32, #tpu.memory_space<vmem>>, vector<8x1x4xf32>
    %21 = vector.shape_cast %20 : vector<8x1x4xf32> to vector<8x4xf32>
    %22 = arith.maximumf %19, %21 : vector<8x4xf32>
    %c0_16 = arith.constant 0 : index
    %c8 = arith.constant 8 : index
    %c0_17 = arith.constant 0 : index
    %23 = vector.load %arg1[%c0_16, %c8, %c0_17] : memref<8x9x4xf32, #tpu.memory_space<vmem>>, vector<8x1x4xf32>
    %24 = vector.shape_cast %23 : vector<8x1x4xf32> to vector<8x4xf32>
    %25 = arith.maximumf %22, %24 : vector<8x4xf32>
    %c0_18 = arith.constant 0 : index
    %c0_19 = arith.constant 0 : index
    %26 = vector.load %arg2[%c0_18, %c0_19] : memref<8x4xf32, #tpu.memory_space<vmem>>, vector<8x4xf32>
    tpu.vector_store %arg2[%c0_18, %c0_19], %25 {strides = array<i32>} : memref<8x4xf32, #tpu.memory_space<vmem>>, vector<8x4xf32>,
    return
  }
  func.func @transform_0(%arg0: i32) -> (i32, i32, i32) {
    %c0_i32 = arith.constant 0 : i32
    %c0_i32_0 = arith.constant 0 : i32
    %c0_i32_1 = arith.constant 0 : i32
    return %arg0, %c0_i32, %c0_i32_0 : i32, i32, i32
  }
  func.func @transform_1(%arg0: i32) -> (i32, i32) {
    %c0_i32 = arith.constant 0 : i32
    %c0_i32_0 = arith.constant 0 : i32
    return %arg0, %c0_i32 : i32, i32
  }
}

module attributes {stable_mosaic.version = 11 : i64} {
  func.func @_mm_relu_kernel(%arg0: i32, %arg1: i32, %arg2: i32, %arg3: memref<16x128xbf16, #tpu.memory_space<vmem>>, %arg4: memref<128x128xbf16, #tpu.memory_space<vmem>>, %arg5: memref<1x128xf32, #tpu.memory_space<vmem>>, %arg6: memref<1x128xf32, #tpu.memory_space<vmem>>, %arg7: memref<16x128xf32, #tpu.memory_space<vmem>>, %arg8: memref<16x128xf32, #tpu.memory_space<vmem>>) attributes {dimension_semantics = [#tpu.dimension_semantics<parallel>, #tpu.dimension_semantics<parallel>, #tpu.dimension_semantics<arbitrary>], iteration_bounds = array<i64: 1, 1, 1>, scalar_prefetch = 0 : i64, scratch_operands = 1 : i64, tpu.core_type = #tpu.core_type<tc>, window_params = [{transform_indices = @transform_0, window_bounds = array<i64: 16, 128>}, {transform_indices = @transform_1, window_bounds = array<i64: 128, 128>}, {transform_indices = @transform_2, window_bounds = array<i64: 1, 128>}, {transform_indices = @transform_3, window_bounds = array<i64: 1, 128>}, {transform_indices = @transform_4, window_bounds = array<i64: 16, 128>}]} {
    %c0_i32 = arith.constant 0 : i32
    %0 = arith.cmpi eq, %arg2, %c0_i32 : i32
    %1 = arith.extui %0 : i1 to i32
    %c0_i32_0 = arith.constant 0 : i32
    %2 = arith.cmpi ne, %1, %c0_i32_0 : i32
    scf.if %2 {
      %cst_10 = arith.constant 0.000000e+00 : f32
      %12 = vector.broadcast %cst_10 : f32 to vector<16x128xf32>
      %c0_11 = arith.constant 0 : index
      %c0_12 = arith.constant 0 : index
      %13 = vector.load %arg8[%c0_11, %c0_12] : memref<16x128xf32, #tpu.memory_space<vmem>>, vector<16x128xf32>
      tpu.vector_store %arg8[%c0_11, %c0_12], %12 {strides = array<i32>} : memref<16x128xf32, #tpu.memory_space<vmem>>, vector<16x128xf32>,
    } else {
    }
    %c0 = arith.constant 0 : index
    %c0_1 = arith.constant 0 : index
    %3 = vector.load %arg8[%c0, %c0_1] : memref<16x128xf32, #tpu.memory_space<vmem>>, vector<16x128xf32>
    %c0_2 = arith.constant 0 : index
    %c0_3 = arith.constant 0 : index
    %4 = vector.load %arg3[%c0_2, %c0_3] : memref<16x128xbf16, #tpu.memory_space<vmem>>, vector<16x128xbf16>
    %c0_4 = arith.constant 0 : index
    %c0_5 = arith.constant 0 : index
    %5 = vector.load %arg4[%c0_4, %c0_5] : memref<128x128xbf16, #tpu.memory_space<vmem>>, vector<128x128xbf16>
    %cst = arith.constant dense<0.000000e+00> : vector<16x128xf32>
    %6 = tpu.matmul %4, %5, %cst {dimension_numbers = #tpu.dot_dimension_numbers<[1], [0], [0], [1], [0, 0, 1, 1], [], []>} : vector<16x128xbf16>, vector<128x128xbf16>, vector<16x128xf32> -> vector<16x128xf32>
    %7 = arith.addf %3, %6 : vector<16x128xf32>
    %c0_6 = arith.constant 0 : index
    %c0_7 = arith.constant 0 : index
    %8 = vector.load %arg8[%c0_6, %c0_7] : memref<16x128xf32, #tpu.memory_space<vmem>>, vector<16x128xf32>
    tpu.vector_store %arg8[%c0_6, %c0_7], %7 {strides = array<i32>} : memref<16x128xf32, #tpu.memory_space<vmem>>, vector<16x128xf32>,
    %c0_i32_8 = arith.constant 0 : i32
    %9 = arith.cmpi eq, %arg2, %c0_i32_8 : i32
    %10 = arith.extui %9 : i1 to i32
    %c0_i32_9 = arith.constant 0 : i32
    %11 = arith.cmpi ne, %10, %c0_i32_9 : i32
    scf.if %11 {
      %c0_10 = arith.constant 0 : index
      %c0_11 = arith.constant 0 : index
      %12 = vector.load %arg8[%c0_10, %c0_11] : memref<16x128xf32, #tpu.memory_space<vmem>>, vector<16x128xf32>
      %c0_12 = arith.constant 0 : index
      %c0_13 = arith.constant 0 : index
      %13 = vector.load %arg5[%c0_12, %c0_13] : memref<1x128xf32, #tpu.memory_space<vmem>>, vector<1x128xf32>
      %14 = vector.broadcast %13 : vector<1x128xf32> to vector<16x128xf32>
      %15 = arith.mulf %12, %14 : vector<16x128xf32>
      %c0_14 = arith.constant 0 : index
      %c0_15 = arith.constant 0 : index
      %16 = vector.load %arg6[%c0_14, %c0_15] : memref<1x128xf32, #tpu.memory_space<vmem>>, vector<1x128xf32>
      %17 = vector.broadcast %16 : vector<1x128xf32> to vector<16x128xf32>
      %18 = arith.addf %15, %17 : vector<16x128xf32>
      %cst_16 = arith.constant 0.000000e+00 : f32
      %19 = vector.broadcast %cst_16 : f32 to vector<16x128xf32>
      %20 = arith.maximumf %18, %19 : vector<16x128xf32>
      %c0_17 = arith.constant 0 : index
      %c0_18 = arith.constant 0 : index
      %21 = vector.load %arg7[%c0_17, %c0_18] : memref<16x128xf32, #tpu.memory_space<vmem>>, vector<16x128xf32>
      tpu.vector_store %arg7[%c0_17, %c0_18], %20 {strides = array<i32>} : memref<16x128xf32, #tpu.memory_space<vmem>>, vector<16x128xf32>,
    } else {
    }
    return
  }
  func.func @transform_0(%arg0: i32, %arg1: i32, %arg2: i32) -> (i32, i32) {
    %c0_i32 = arith.constant 0 : i32
    return %arg0, %arg2 : i32, i32
  }
  func.func @transform_1(%arg0: i32, %arg1: i32, %arg2: i32) -> (i32, i32) {
    %c0_i32 = arith.constant 0 : i32
    return %arg2, %arg1 : i32, i32
  }
  func.func @transform_2(%arg0: i32, %arg1: i32, %arg2: i32) -> (i32, i32) {
    %c0_i32 = arith.constant 0 : i32
    %c0_i32_0 = arith.constant 0 : i32
    return %c0_i32, %arg1 : i32, i32
  }
  func.func @transform_3(%arg0: i32, %arg1: i32, %arg2: i32) -> (i32, i32) {
    %c0_i32 = arith.constant 0 : i32
    %c0_i32_0 = arith.constant 0 : i32
    return %c0_i32, %arg1 : i32, i32
  }
  func.func @transform_4(%arg0: i32, %arg1: i32, %arg2: i32) -> (i32, i32) {
    %c0_i32 = arith.constant 0 : i32
    return %arg0, %arg1 : i32, i32
  }
}

module attributes {stable_mosaic.version = 11 : i64} {
  func.func @_mm_linear_kernel(%arg0: i32, %arg1: i32, %arg2: i32, %arg3: memref<16x128xbf16, #tpu.memory_space<vmem>>, %arg4: memref<128x128xbf16, #tpu.memory_space<vmem>>, %arg5: memref<1x128xf32, #tpu.memory_space<vmem>>, %arg6: memref<1x128xf32, #tpu.memory_space<vmem>>, %arg7: memref<16x128xf32, #tpu.memory_space<vmem>>, %arg8: memref<16x128xf32, #tpu.memory_space<vmem>>) attributes {dimension_semantics = [#tpu.dimension_semantics<parallel>, #tpu.dimension_semantics<parallel>, #tpu.dimension_semantics<arbitrary>], iteration_bounds = array<i64: 1, 1, 1>, scalar_prefetch = 0 : i64, scratch_operands = 1 : i64, tpu.core_type = #tpu.core_type<tc>, window_params = [{transform_indices = @transform_0, window_bounds = array<i64: 16, 128>}, {transform_indices = @transform_1, window_bounds = array<i64: 128, 128>}, {transform_indices = @transform_2, window_bounds = array<i64: 1, 128>}, {transform_indices = @transform_3, window_bounds = array<i64: 1, 128>}, {transform_indices = @transform_4, window_bounds = array<i64: 16, 128>}]} {
    %c0_i32 = arith.constant 0 : i32
    %0 = arith.cmpi eq, %arg2, %c0_i32 : i32
    %1 = arith.extui %0 : i1 to i32
    %c0_i32_0 = arith.constant 0 : i32
    %2 = arith.cmpi ne, %1, %c0_i32_0 : i32
    scf.if %2 {
      %cst_10 = arith.constant 0.000000e+00 : f32
      %12 = vector.broadcast %cst_10 : f32 to vector<16x128xf32>
      %c0_11 = arith.constant 0 : index
      %c0_12 = arith.constant 0 : index
      %13 = vector.load %arg8[%c0_11, %c0_12] : memref<16x128xf32, #tpu.memory_space<vmem>>, vector<16x128xf32>
      tpu.vector_store %arg8[%c0_11, %c0_12], %12 {strides = array<i32>} : memref<16x128xf32, #tpu.memory_space<vmem>>, vector<16x128xf32>,
    } else {
    }
    %c0 = arith.constant 0 : index
    %c0_1 = arith.constant 0 : index
    %3 = vector.load %arg8[%c0, %c0_1] : memref<16x128xf32, #tpu.memory_space<vmem>>, vector<16x128xf32>
    %c0_2 = arith.constant 0 : index
    %c0_3 = arith.constant 0 : index
    %4 = vector.load %arg3[%c0_2, %c0_3] : memref<16x128xbf16, #tpu.memory_space<vmem>>, vector<16x128xbf16>
    %c0_4 = arith.constant 0 : index
    %c0_5 = arith.constant 0 : index
    %5 = vector.load %arg4[%c0_4, %c0_5] : memref<128x128xbf16, #tpu.memory_space<vmem>>, vector<128x128xbf16>
    %cst = arith.constant dense<0.000000e+00> : vector<16x128xf32>
    %6 = tpu.matmul %4, %5, %cst {dimension_numbers = #tpu.dot_dimension_numbers<[1], [0], [0], [1], [0, 0, 1, 1], [], []>} : vector<16x128xbf16>, vector<128x128xbf16>, vector<16x128xf32> -> vector<16x128xf32>
    %7 = arith.addf %3, %6 : vector<16x128xf32>
    %c0_6 = arith.constant 0 : index
    %c0_7 = arith.constant 0 : index
    %8 = vector.load %arg8[%c0_6, %c0_7] : memref<16x128xf32, #tpu.memory_space<vmem>>, vector<16x128xf32>
    tpu.vector_store %arg8[%c0_6, %c0_7], %7 {strides = array<i32>} : memref<16x128xf32, #tpu.memory_space<vmem>>, vector<16x128xf32>,
    %c0_i32_8 = arith.constant 0 : i32
    %9 = arith.cmpi eq, %arg2, %c0_i32_8 : i32
    %10 = arith.extui %9 : i1 to i32
    %c0_i32_9 = arith.constant 0 : i32
    %11 = arith.cmpi ne, %10, %c0_i32_9 : i32
    scf.if %11 {
      %c0_10 = arith.constant 0 : index
      %c0_11 = arith.constant 0 : index
      %12 = vector.load %arg8[%c0_10, %c0_11] : memref<16x128xf32, #tpu.memory_space<vmem>>, vector<16x128xf32>
      %c0_12 = arith.constant 0 : index
      %c0_13 = arith.constant 0 : index
      %13 = vector.load %arg5[%c0_12, %c0_13] : memref<1x128xf32, #tpu.memory_space<vmem>>, vector<1x128xf32>
      %14 = vector.broadcast %13 : vector<1x128xf32> to vector<16x128xf32>
      %15 = arith.mulf %12, %14 : vector<16x128xf32>
      %c0_14 = arith.constant 0 : index
      %c0_15 = arith.constant 0 : index
      %16 = vector.load %arg6[%c0_14, %c0_15] : memref<1x128xf32, #tpu.memory_space<vmem>>, vector<1x128xf32>
      %17 = vector.broadcast %16 : vector<1x128xf32> to vector<16x128xf32>
      %18 = arith.addf %15, %17 : vector<16x128xf32>
      %c0_16 = arith.constant 0 : index
      %c0_17 = arith.constant 0 : index
      %19 = vector.load %arg7[%c0_16, %c0_17] : memref<16x128xf32, #tpu.memory_space<vmem>>, vector<16x128xf32>
      tpu.vector_store %arg7[%c0_16, %c0_17], %18 {strides = array<i32>} : memref<16x128xf32, #tpu.memory_space<vmem>>, vector<16x128xf32>,
    } else {
    }
    return
  }
  func.func @transform_0(%arg0: i32, %arg1: i32, %arg2: i32) -> (i32, i32) {
    %c0_i32 = arith.constant 0 : i32
    return %arg0, %arg2 : i32, i32
  }
  func.func @transform_1(%arg0: i32, %arg1: i32, %arg2: i32) -> (i32, i32) {
    %c0_i32 = arith.constant 0 : i32
    return %arg2, %arg1 : i32, i32
  }
  func.func @transform_2(%arg0: i32, %arg1: i32, %arg2: i32) -> (i32, i32) {
    %c0_i32 = arith.constant 0 : i32
    %c0_i32_0 = arith.constant 0 : i32
    return %c0_i32, %arg1 : i32, i32
  }
  func.func @transform_3(%arg0: i32, %arg1: i32, %arg2: i32) -> (i32, i32) {
    %c0_i32 = arith.constant 0 : i32
    %c0_i32_0 = arith.constant 0 : i32
    return %c0_i32, %arg1 : i32, i32
  }
  func.func @transform_4(%arg0: i32, %arg1: i32, %arg2: i32) -> (i32, i32) {
    %c0_i32 = arith.constant 0 : i32
    return %arg0, %arg1 : i32, i32
  }
}

module attributes {stable_mosaic.version = 11 : i64} {
  func.func @_mm_relu_kernel(%arg0: i32, %arg1: i32, %arg2: i32, %arg3: memref<16x128xbf16, #tpu.memory_space<vmem>>, %arg4: memref<128x128xbf16, #tpu.memory_space<vmem>>, %arg5: memref<1x128xf32, #tpu.memory_space<vmem>>, %arg6: memref<1x128xf32, #tpu.memory_space<vmem>>, %arg7: memref<16x128xf32, #tpu.memory_space<vmem>>, %arg8: memref<16x128xf32, #tpu.memory_space<vmem>>) attributes {dimension_semantics = [#tpu.dimension_semantics<parallel>, #tpu.dimension_semantics<parallel>, #tpu.dimension_semantics<arbitrary>], iteration_bounds = array<i64: 1, 1, 1>, scalar_prefetch = 0 : i64, scratch_operands = 1 : i64, tpu.core_type = #tpu.core_type<tc>, window_params = [{transform_indices = @transform_0, window_bounds = array<i64: 16, 128>}, {transform_indices = @transform_1, window_bounds = array<i64: 128, 128>}, {transform_indices = @transform_2, window_bounds = array<i64: 1, 128>}, {transform_indices = @transform_3, window_bounds = array<i64: 1, 128>}, {transform_indices = @transform_4, window_bounds = array<i64: 16, 128>}]} {
    %c0_i32 = arith.constant 0 : i32
    %0 = arith.cmpi eq, %arg2, %c0_i32 : i32
    %1 = arith.extui %0 : i1 to i32
    %c0_i32_0 = arith.constant 0 : i32
    %2 = arith.cmpi ne, %1, %c0_i32_0 : i32
    scf.if %2 {
      %cst_10 = arith.constant 0.000000e+00 : f32
      %12 = vector.broadcast %cst_10 : f32 to vector<16x128xf32>
      %c0_11 = arith.constant 0 : index
      %c0_12 = arith.constant 0 : index
      %13 = vector.load %arg8[%c0_11, %c0_12] : memref<16x128xf32, #tpu.memory_space<vmem>>, vector<16x128xf32>
      tpu.vector_store %arg8[%c0_11, %c0_12], %12 {strides = array<i32>} : memref<16x128xf32, #tpu.memory_space<vmem>>, vector<16x128xf32>,
    } else {
    }
    %c0 = arith.constant 0 : index
    %c0_1 = arith.constant 0 : index
    %3 = vector.load %arg8[%c0, %c0_1] : memref<16x128xf32, #tpu.memory_space<vmem>>, vector<16x128xf32>
    %c0_2 = arith.constant 0 : index
    %c0_3 = arith.constant 0 : index
    %4 = vector.load %arg3[%c0_2, %c0_3] : memref<16x128xbf16, #tpu.memory_space<vmem>>, vector<16x128xbf16>
    %c0_4 = arith.constant 0 : index
    %c0_5 = arith.constant 0 : index
    %5 = vector.load %arg4[%c0_4, %c0_5] : memref<128x128xbf16, #tpu.memory_space<vmem>>, vector<128x128xbf16>
    %cst = arith.constant dense<0.000000e+00> : vector<16x128xf32>
    %6 = tpu.matmul %4, %5, %cst {dimension_numbers = #tpu.dot_dimension_numbers<[1], [0], [0], [1], [0, 0, 1, 1], [], []>} : vector<16x128xbf16>, vector<128x128xbf16>, vector<16x128xf32> -> vector<16x128xf32>
    %7 = arith.addf %3, %6 : vector<16x128xf32>
    %c0_6 = arith.constant 0 : index
    %c0_7 = arith.constant 0 : index
    %8 = vector.load %arg8[%c0_6, %c0_7] : memref<16x128xf32, #tpu.memory_space<vmem>>, vector<16x128xf32>
    tpu.vector_store %arg8[%c0_6, %c0_7], %7 {strides = array<i32>} : memref<16x128xf32, #tpu.memory_space<vmem>>, vector<16x128xf32>,
    %c0_i32_8 = arith.constant 0 : i32
    %9 = arith.cmpi eq, %arg2, %c0_i32_8 : i32
    %10 = arith.extui %9 : i1 to i32
    %c0_i32_9 = arith.constant 0 : i32
    %11 = arith.cmpi ne, %10, %c0_i32_9 : i32
    scf.if %11 {
      %c0_10 = arith.constant 0 : index
      %c0_11 = arith.constant 0 : index
      %12 = vector.load %arg8[%c0_10, %c0_11] : memref<16x128xf32, #tpu.memory_space<vmem>>, vector<16x128xf32>
      %c0_12 = arith.constant 0 : index
      %c0_13 = arith.constant 0 : index
      %13 = vector.load %arg5[%c0_12, %c0_13] : memref<1x128xf32, #tpu.memory_space<vmem>>, vector<1x128xf32>
      %14 = vector.broadcast %13 : vector<1x128xf32> to vector<16x128xf32>
      %15 = arith.mulf %12, %14 : vector<16x128xf32>
      %c0_14 = arith.constant 0 : index
      %c0_15 = arith.constant 0 : index
      %16 = vector.load %arg6[%c0_14, %c0_15] : memref<1x128xf32, #tpu.memory_space<vmem>>, vector<1x128xf32>
      %17 = vector.broadcast %16 : vector<1x128xf32> to vector<16x128xf32>
      %18 = arith.addf %15, %17 : vector<16x128xf32>
      %cst_16 = arith.constant 0.000000e+00 : f32
      %19 = vector.broadcast %cst_16 : f32 to vector<16x128xf32>
      %20 = arith.maximumf %18, %19 : vector<16x128xf32>
      %c0_17 = arith.constant 0 : index
      %c0_18 = arith.constant 0 : index
      %21 = vector.load %arg7[%c0_17, %c0_18] : memref<16x128xf32, #tpu.memory_space<vmem>>, vector<16x128xf32>
      tpu.vector_store %arg7[%c0_17, %c0_18], %20 {strides = array<i32>} : memref<16x128xf32, #tpu.memory_space<vmem>>, vector<16x128xf32>,
    } else {
    }
    return
  }
  func.func @transform_0(%arg0: i32, %arg1: i32, %arg2: i32) -> (i32, i32) {
    %c0_i32 = arith.constant 0 : i32
    return %arg0, %arg2 : i32, i32
  }
  func.func @transform_1(%arg0: i32, %arg1: i32, %arg2: i32) -> (i32, i32) {
    %c0_i32 = arith.constant 0 : i32
    return %arg2, %arg1 : i32, i32
  }
  func.func @transform_2(%arg0: i32, %arg1: i32, %arg2: i32) -> (i32, i32) {
    %c0_i32 = arith.constant 0 : i32
    %c0_i32_0 = arith.constant 0 : i32
    return %c0_i32, %arg1 : i32, i32
  }
  func.func @transform_3(%arg0: i32, %arg1: i32, %arg2: i32) -> (i32, i32) {
    %c0_i32 = arith.constant 0 : i32
    %c0_i32_0 = arith.constant 0 : i32
    return %c0_i32, %arg1 : i32, i32
  }
  func.func @transform_4(%arg0: i32, %arg1: i32, %arg2: i32) -> (i32, i32) {
    %c0_i32 = arith.constant 0 : i32
    return %arg0, %arg1 : i32, i32
  }
}

module attributes {stable_mosaic.version = 11 : i64} {
  func.func @_mm_res_relu_kernel(%arg0: i32, %arg1: i32, %arg2: i32, %arg3: memref<16x128xbf16, #tpu.memory_space<vmem>>, %arg4: memref<128x128xbf16, #tpu.memory_space<vmem>>, %arg5: memref<1x128xf32, #tpu.memory_space<vmem>>, %arg6: memref<1x128xf32, #tpu.memory_space<vmem>>, %arg7: memref<16x128xf32, #tpu.memory_space<vmem>>, %arg8: memref<16x128xf32, #tpu.memory_space<vmem>>, %arg9: memref<16x128xf32, #tpu.memory_space<vmem>>) attributes {dimension_semantics = [#tpu.dimension_semantics<parallel>, #tpu.dimension_semantics<parallel>, #tpu.dimension_semantics<arbitrary>], iteration_bounds = array<i64: 1, 1, 1>, scalar_prefetch = 0 : i64, scratch_operands = 1 : i64, tpu.core_type = #tpu.core_type<tc>, window_params = [{transform_indices = @transform_0, window_bounds = array<i64: 16, 128>}, {transform_indices = @transform_1, window_bounds = array<i64: 128, 128>}, {transform_indices = @transform_2, window_bounds = array<i64: 1, 128>}, {transform_indices = @transform_3, window_bounds = array<i64: 1, 128>}, {transform_indices = @transform_4, window_bounds = array<i64: 16, 128>}, {transform_indices = @transform_5, window_bounds = array<i64: 16, 128>}]} {
    %c0_i32 = arith.constant 0 : i32
    %0 = arith.cmpi eq, %arg2, %c0_i32 : i32
    %1 = arith.extui %0 : i1 to i32
    %c0_i32_0 = arith.constant 0 : i32
    %2 = arith.cmpi ne, %1, %c0_i32_0 : i32
    scf.if %2 {
      %cst_10 = arith.constant 0.000000e+00 : f32
      %12 = vector.broadcast %cst_10 : f32 to vector<16x128xf32>
      %c0_11 = arith.constant 0 : index
      %c0_12 = arith.constant 0 : index
      %13 = vector.load %arg9[%c0_11, %c0_12] : memref<16x128xf32, #tpu.memory_space<vmem>>, vector<16x128xf32>
      tpu.vector_store %arg9[%c0_11, %c0_12], %12 {strides = array<i32>} : memref<16x128xf32, #tpu.memory_space<vmem>>, vector<16x128xf32>,
    } else {
    }
    %c0 = arith.constant 0 : index
    %c0_1 = arith.constant 0 : index
    %3 = vector.load %arg9[%c0, %c0_1] : memref<16x128xf32, #tpu.memory_space<vmem>>, vector<16x128xf32>
    %c0_2 = arith.constant 0 : index
    %c0_3 = arith.constant 0 : index
    %4 = vector.load %arg3[%c0_2, %c0_3] : memref<16x128xbf16, #tpu.memory_space<vmem>>, vector<16x128xbf16>
    %c0_4 = arith.constant 0 : index
    %c0_5 = arith.constant 0 : index
    %5 = vector.load %arg4[%c0_4, %c0_5] : memref<128x128xbf16, #tpu.memory_space<vmem>>, vector<128x128xbf16>
    %cst = arith.constant dense<0.000000e+00> : vector<16x128xf32>
    %6 = tpu.matmul %4, %5, %cst {dimension_numbers = #tpu.dot_dimension_numbers<[1], [0], [0], [1], [0, 0, 1, 1], [], []>} : vector<16x128xbf16>, vector<128x128xbf16>, vector<16x128xf32> -> vector<16x128xf32>
    %7 = arith.addf %3, %6 : vector<16x128xf32>
    %c0_6 = arith.constant 0 : index
    %c0_7 = arith.constant 0 : index
    %8 = vector.load %arg9[%c0_6, %c0_7] : memref<16x128xf32, #tpu.memory_space<vmem>>, vector<16x128xf32>
    tpu.vector_store %arg9[%c0_6, %c0_7], %7 {strides = array<i32>} : memref<16x128xf32, #tpu.memory_space<vmem>>, vector<16x128xf32>,
    %c0_i32_8 = arith.constant 0 : i32
    %9 = arith.cmpi eq, %arg2, %c0_i32_8 : i32
    %10 = arith.extui %9 : i1 to i32
    %c0_i32_9 = arith.constant 0 : i32
    %11 = arith.cmpi ne, %10, %c0_i32_9 : i32
    scf.if %11 {
      %c0_10 = arith.constant 0 : index
      %c0_11 = arith.constant 0 : index
      %12 = vector.load %arg9[%c0_10, %c0_11] : memref<16x128xf32, #tpu.memory_space<vmem>>, vector<16x128xf32>
      %c0_12 = arith.constant 0 : index
      %c0_13 = arith.constant 0 : index
      %13 = vector.load %arg7[%c0_12, %c0_13] : memref<16x128xf32, #tpu.memory_space<vmem>>, vector<16x128xf32>
      %14 = arith.addf %12, %13 : vector<16x128xf32>
      %c0_14 = arith.constant 0 : index
      %c0_15 = arith.constant 0 : index
      %15 = vector.load %arg5[%c0_14, %c0_15] : memref<1x128xf32, #tpu.memory_space<vmem>>, vector<1x128xf32>
      %16 = vector.broadcast %15 : vector<1x128xf32> to vector<16x128xf32>
      %17 = arith.mulf %14, %16 : vector<16x128xf32>
      %c0_16 = arith.constant 0 : index
      %c0_17 = arith.constant 0 : index
      %18 = vector.load %arg6[%c0_16, %c0_17] : memref<1x128xf32, #tpu.memory_space<vmem>>, vector<1x128xf32>
      %19 = vector.broadcast %18 : vector<1x128xf32> to vector<16x128xf32>
      %20 = arith.addf %17, %19 : vector<16x128xf32>
      %cst_18 = arith.constant 0.000000e+00 : f32
      %21 = vector.broadcast %cst_18 : f32 to vector<16x128xf32>
      %22 = arith.maximumf %20, %21 : vector<16x128xf32>
      %c0_19 = arith.constant 0 : index
      %c0_20 = arith.constant 0 : index
      %23 = vector.load %arg8[%c0_19, %c0_20] : memref<16x128xf32, #tpu.memory_space<vmem>>, vector<16x128xf32>
      tpu.vector_store %arg8[%c0_19, %c0_20], %22 {strides = array<i32>} : memref<16x128xf32, #tpu.memory_space<vmem>>, vector<16x128xf32>,
    } else {
    }
    return
  }
  func.func @transform_0(%arg0: i32, %arg1: i32, %arg2: i32) -> (i32, i32) {
    %c0_i32 = arith.constant 0 : i32
    return %arg0, %arg2 : i32, i32
  }
  func.func @transform_1(%arg0: i32, %arg1: i32, %arg2: i32) -> (i32, i32) {
    %c0_i32 = arith.constant 0 : i32
    return %arg2, %arg1 : i32, i32
  }
  func.func @transform_2(%arg0: i32, %arg1: i32, %arg2: i32) -> (i32, i32) {
    %c0_i32 = arith.constant 0 : i32
    %c0_i32_0 = arith.constant 0 : i32
    return %c0_i32, %arg1 : i32, i32
  }
  func.func @transform_3(%arg0: i32, %arg1: i32, %arg2: i32) -> (i32, i32) {
    %c0_i32 = arith.constant 0 : i32
    %c0_i32_0 = arith.constant 0 : i32
    return %c0_i32, %arg1 : i32, i32
  }
  func.func @transform_4(%arg0: i32, %arg1: i32, %arg2: i32) -> (i32, i32) {
    %c0_i32 = arith.constant 0 : i32
    return %arg0, %arg1 : i32, i32
  }
  func.func @transform_5(%arg0: i32, %arg1: i32, %arg2: i32) -> (i32, i32) {
    %c0_i32 = arith.constant 0 : i32
    return %arg0, %arg1 : i32, i32
  }
}

module attributes {stable_mosaic.version = 11 : i64} {
  func.func @_mm_res_relu_kernel(%arg0: i32, %arg1: i32, %arg2: i32, %arg3: memref<16x128xbf16, #tpu.memory_space<vmem>>, %arg4: memref<128x128xbf16, #tpu.memory_space<vmem>>, %arg5: memref<1x128xf32, #tpu.memory_space<vmem>>, %arg6: memref<1x128xf32, #tpu.memory_space<vmem>>, %arg7: memref<16x128xf32, #tpu.memory_space<vmem>>, %arg8: memref<16x128xf32, #tpu.memory_space<vmem>>, %arg9: memref<16x128xf32, #tpu.memory_space<vmem>>) attributes {dimension_semantics = [#tpu.dimension_semantics<parallel>, #tpu.dimension_semantics<parallel>, #tpu.dimension_semantics<arbitrary>], iteration_bounds = array<i64: 1, 1, 1>, scalar_prefetch = 0 : i64, scratch_operands = 1 : i64, tpu.core_type = #tpu.core_type<tc>, window_params = [{transform_indices = @transform_0, window_bounds = array<i64: 16, 128>}, {transform_indices = @transform_1, window_bounds = array<i64: 128, 128>}, {transform_indices = @transform_2, window_bounds = array<i64: 1, 128>}, {transform_indices = @transform_3, window_bounds = array<i64: 1, 128>}, {transform_indices = @transform_4, window_bounds = array<i64: 16, 128>}, {transform_indices = @transform_5, window_bounds = array<i64: 16, 128>}]} {
    %c0_i32 = arith.constant 0 : i32
    %0 = arith.cmpi eq, %arg2, %c0_i32 : i32
    %1 = arith.extui %0 : i1 to i32
    %c0_i32_0 = arith.constant 0 : i32
    %2 = arith.cmpi ne, %1, %c0_i32_0 : i32
    scf.if %2 {
      %cst_10 = arith.constant 0.000000e+00 : f32
      %12 = vector.broadcast %cst_10 : f32 to vector<16x128xf32>
      %c0_11 = arith.constant 0 : index
      %c0_12 = arith.constant 0 : index
      %13 = vector.load %arg9[%c0_11, %c0_12] : memref<16x128xf32, #tpu.memory_space<vmem>>, vector<16x128xf32>
      tpu.vector_store %arg9[%c0_11, %c0_12], %12 {strides = array<i32>} : memref<16x128xf32, #tpu.memory_space<vmem>>, vector<16x128xf32>,
    } else {
    }
    %c0 = arith.constant 0 : index
    %c0_1 = arith.constant 0 : index
    %3 = vector.load %arg9[%c0, %c0_1] : memref<16x128xf32, #tpu.memory_space<vmem>>, vector<16x128xf32>
    %c0_2 = arith.constant 0 : index
    %c0_3 = arith.constant 0 : index
    %4 = vector.load %arg3[%c0_2, %c0_3] : memref<16x128xbf16, #tpu.memory_space<vmem>>, vector<16x128xbf16>
    %c0_4 = arith.constant 0 : index
    %c0_5 = arith.constant 0 : index
    %5 = vector.load %arg4[%c0_4, %c0_5] : memref<128x128xbf16, #tpu.memory_space<vmem>>, vector<128x128xbf16>
    %cst = arith.constant dense<0.000000e+00> : vector<16x128xf32>
    %6 = tpu.matmul %4, %5, %cst {dimension_numbers = #tpu.dot_dimension_numbers<[1], [0], [0], [1], [0, 0, 1, 1], [], []>} : vector<16x128xbf16>, vector<128x128xbf16>, vector<16x128xf32> -> vector<16x128xf32>
    %7 = arith.addf %3, %6 : vector<16x128xf32>
    %c0_6 = arith.constant 0 : index
    %c0_7 = arith.constant 0 : index
    %8 = vector.load %arg9[%c0_6, %c0_7] : memref<16x128xf32, #tpu.memory_space<vmem>>, vector<16x128xf32>
    tpu.vector_store %arg9[%c0_6, %c0_7], %7 {strides = array<i32>} : memref<16x128xf32, #tpu.memory_space<vmem>>, vector<16x128xf32>,
    %c0_i32_8 = arith.constant 0 : i32
    %9 = arith.cmpi eq, %arg2, %c0_i32_8 : i32
    %10 = arith.extui %9 : i1 to i32
    %c0_i32_9 = arith.constant 0 : i32
    %11 = arith.cmpi ne, %10, %c0_i32_9 : i32
    scf.if %11 {
      %c0_10 = arith.constant 0 : index
      %c0_11 = arith.constant 0 : index
      %12 = vector.load %arg9[%c0_10, %c0_11] : memref<16x128xf32, #tpu.memory_space<vmem>>, vector<16x128xf32>
      %c0_12 = arith.constant 0 : index
      %c0_13 = arith.constant 0 : index
      %13 = vector.load %arg7[%c0_12, %c0_13] : memref<16x128xf32, #tpu.memory_space<vmem>>, vector<16x128xf32>
      %14 = arith.addf %12, %13 : vector<16x128xf32>
      %c0_14 = arith.constant 0 : index
      %c0_15 = arith.constant 0 : index
      %15 = vector.load %arg5[%c0_14, %c0_15] : memref<1x128xf32, #tpu.memory_space<vmem>>, vector<1x128xf32>
      %16 = vector.broadcast %15 : vector<1x128xf32> to vector<16x128xf32>
      %17 = arith.mulf %14, %16 : vector<16x128xf32>
      %c0_16 = arith.constant 0 : index
      %c0_17 = arith.constant 0 : index
      %18 = vector.load %arg6[%c0_16, %c0_17] : memref<1x128xf32, #tpu.memory_space<vmem>>, vector<1x128xf32>
      %19 = vector.broadcast %18 : vector<1x128xf32> to vector<16x128xf32>
      %20 = arith.addf %17, %19 : vector<16x128xf32>
      %cst_18 = arith.constant 0.000000e+00 : f32
      %21 = vector.broadcast %cst_18 : f32 to vector<16x128xf32>
      %22 = arith.maximumf %20, %21 : vector<16x128xf32>
      %c0_19 = arith.constant 0 : index
      %c0_20 = arith.constant 0 : index
      %23 = vector.load %arg8[%c0_19, %c0_20] : memref<16x128xf32, #tpu.memory_space<vmem>>, vector<16x128xf32>
      tpu.vector_store %arg8[%c0_19, %c0_20], %22 {strides = array<i32>} : memref<16x128xf32, #tpu.memory_space<vmem>>, vector<16x128xf32>,
    } else {
    }
    return
  }
  func.func @transform_0(%arg0: i32, %arg1: i32, %arg2: i32) -> (i32, i32) {
    %c0_i32 = arith.constant 0 : i32
    return %arg0, %arg2 : i32, i32
  }
  func.func @transform_1(%arg0: i32, %arg1: i32, %arg2: i32) -> (i32, i32) {
    %c0_i32 = arith.constant 0 : i32
    return %arg2, %arg1 : i32, i32
  }
  func.func @transform_2(%arg0: i32, %arg1: i32, %arg2: i32) -> (i32, i32) {
    %c0_i32 = arith.constant 0 : i32
    %c0_i32_0 = arith.constant 0 : i32
    return %c0_i32, %arg1 : i32, i32
  }
  func.func @transform_3(%arg0: i32, %arg1: i32, %arg2: i32) -> (i32, i32) {
    %c0_i32 = arith.constant 0 : i32
    %c0_i32_0 = arith.constant 0 : i32
    return %c0_i32, %arg1 : i32, i32
  }
  func.func @transform_4(%arg0: i32, %arg1: i32, %arg2: i32) -> (i32, i32) {
    %c0_i32 = arith.constant 0 : i32
    return %arg0, %arg1 : i32, i32
  }
  func.func @transform_5(%arg0: i32, %arg1: i32, %arg2: i32) -> (i32, i32) {
    %c0_i32 = arith.constant 0 : i32
    return %arg0, %arg1 : i32, i32
  }
}

module attributes {stable_mosaic.version = 11 : i64} {
  func.func @_mm_linear_kernel(%arg0: i32, %arg1: i32, %arg2: i32, %arg3: memref<16x128xbf16, #tpu.memory_space<vmem>>, %arg4: memref<128x128xbf16, #tpu.memory_space<vmem>>, %arg5: memref<1x128xf32, #tpu.memory_space<vmem>>, %arg6: memref<1x128xf32, #tpu.memory_space<vmem>>, %arg7: memref<16x128xf32, #tpu.memory_space<vmem>>, %arg8: memref<16x128xf32, #tpu.memory_space<vmem>>) attributes {dimension_semantics = [#tpu.dimension_semantics<parallel>, #tpu.dimension_semantics<parallel>, #tpu.dimension_semantics<arbitrary>], iteration_bounds = array<i64: 1, 1, 1>, scalar_prefetch = 0 : i64, scratch_operands = 1 : i64, tpu.core_type = #tpu.core_type<tc>, window_params = [{transform_indices = @transform_0, window_bounds = array<i64: 16, 128>}, {transform_indices = @transform_1, window_bounds = array<i64: 128, 128>}, {transform_indices = @transform_2, window_bounds = array<i64: 1, 128>}, {transform_indices = @transform_3, window_bounds = array<i64: 1, 128>}, {transform_indices = @transform_4, window_bounds = array<i64: 16, 128>}]} {
    %c0_i32 = arith.constant 0 : i32
    %0 = arith.cmpi eq, %arg2, %c0_i32 : i32
    %1 = arith.extui %0 : i1 to i32
    %c0_i32_0 = arith.constant 0 : i32
    %2 = arith.cmpi ne, %1, %c0_i32_0 : i32
    scf.if %2 {
      %cst_10 = arith.constant 0.000000e+00 : f32
      %12 = vector.broadcast %cst_10 : f32 to vector<16x128xf32>
      %c0_11 = arith.constant 0 : index
      %c0_12 = arith.constant 0 : index
      %13 = vector.load %arg8[%c0_11, %c0_12] : memref<16x128xf32, #tpu.memory_space<vmem>>, vector<16x128xf32>
      tpu.vector_store %arg8[%c0_11, %c0_12], %12 {strides = array<i32>} : memref<16x128xf32, #tpu.memory_space<vmem>>, vector<16x128xf32>,
    } else {
    }
    %c0 = arith.constant 0 : index
    %c0_1 = arith.constant 0 : index
    %3 = vector.load %arg8[%c0, %c0_1] : memref<16x128xf32, #tpu.memory_space<vmem>>, vector<16x128xf32>
    %c0_2 = arith.constant 0 : index
    %c0_3 = arith.constant 0 : index
    %4 = vector.load %arg3[%c0_2, %c0_3] : memref<16x128xbf16, #tpu.memory_space<vmem>>, vector<16x128xbf16>
    %c0_4 = arith.constant 0 : index
    %c0_5 = arith.constant 0 : index
    %5 = vector.load %arg4[%c0_4, %c0_5] : memref<128x128xbf16, #tpu.memory_space<vmem>>, vector<128x128xbf16>
    %cst = arith.constant dense<0.000000e+00> : vector<16x128xf32>
    %6 = tpu.matmul %4, %5, %cst {dimension_numbers = #tpu.dot_dimension_numbers<[1], [0], [0], [1], [0, 0, 1, 1], [], []>} : vector<16x128xbf16>, vector<128x128xbf16>, vector<16x128xf32> -> vector<16x128xf32>
    %7 = arith.addf %3, %6 : vector<16x128xf32>
    %c0_6 = arith.constant 0 : index
    %c0_7 = arith.constant 0 : index
    %8 = vector.load %arg8[%c0_6, %c0_7] : memref<16x128xf32, #tpu.memory_space<vmem>>, vector<16x128xf32>
    tpu.vector_store %arg8[%c0_6, %c0_7], %7 {strides = array<i32>} : memref<16x128xf32, #tpu.memory_space<vmem>>, vector<16x128xf32>,
    %c0_i32_8 = arith.constant 0 : i32
    %9 = arith.cmpi eq, %arg2, %c0_i32_8 : i32
    %10 = arith.extui %9 : i1 to i32
    %c0_i32_9 = arith.constant 0 : i32
    %11 = arith.cmpi ne, %10, %c0_i32_9 : i32
    scf.if %11 {
      %c0_10 = arith.constant 0 : index
      %c0_11 = arith.constant 0 : index
      %12 = vector.load %arg8[%c0_10, %c0_11] : memref<16x128xf32, #tpu.memory_space<vmem>>, vector<16x128xf32>
      %c0_12 = arith.constant 0 : index
      %c0_13 = arith.constant 0 : index
      %13 = vector.load %arg5[%c0_12, %c0_13] : memref<1x128xf32, #tpu.memory_space<vmem>>, vector<1x128xf32>
      %14 = vector.broadcast %13 : vector<1x128xf32> to vector<16x128xf32>
      %15 = arith.mulf %12, %14 : vector<16x128xf32>
      %c0_14 = arith.constant 0 : index
      %c0_15 = arith.constant 0 : index
      %16 = vector.load %arg6[%c0_14, %c0_15] : memref<1x128xf32, #tpu.memory_space<vmem>>, vector<1x128xf32>
      %17 = vector.broadcast %16 : vector<1x128xf32> to vector<16x128xf32>
      %18 = arith.addf %15, %17 : vector<16x128xf32>
      %c0_16 = arith.constant 0 : index
      %c0_17 = arith.constant 0 : index
      %19 = vector.load %arg7[%c0_16, %c0_17] : memref<16x128xf32, #tpu.memory_space<vmem>>, vector<16x128xf32>
      tpu.vector_store %arg7[%c0_16, %c0_17], %18 {strides = array<i32>} : memref<16x128xf32, #tpu.memory_space<vmem>>, vector<16x128xf32>,
    } else {
    }
    return
  }
  func.func @transform_0(%arg0: i32, %arg1: i32, %arg2: i32) -> (i32, i32) {
    %c0_i32 = arith.constant 0 : i32
    return %arg0, %arg2 : i32, i32
  }
  func.func @transform_1(%arg0: i32, %arg1: i32, %arg2: i32) -> (i32, i32) {
    %c0_i32 = arith.constant 0 : i32
    return %arg2, %arg1 : i32, i32
  }
  func.func @transform_2(%arg0: i32, %arg1: i32, %arg2: i32) -> (i32, i32) {
    %c0_i32 = arith.constant 0 : i32
    %c0_i32_0 = arith.constant 0 : i32
    return %c0_i32, %arg1 : i32, i32
  }
  func.func @transform_3(%arg0: i32, %arg1: i32, %arg2: i32) -> (i32, i32) {
    %c0_i32 = arith.constant 0 : i32
    %c0_i32_0 = arith.constant 0 : i32
    return %c0_i32, %arg1 : i32, i32
  }
  func.func @transform_4(%arg0: i32, %arg1: i32, %arg2: i32) -> (i32, i32) {
    %c0_i32 = arith.constant 0 : i32
    return %arg0, %arg1 : i32, i32
  }
}

module attributes {stable_mosaic.version = 11 : i64} {
  func.func @_mm_relu_kernel(%arg0: i32, %arg1: i32, %arg2: i32, %arg3: memref<16x256xbf16, #tpu.memory_space<vmem>>, %arg4: memref<256x128xbf16, #tpu.memory_space<vmem>>, %arg5: memref<1x128xf32, #tpu.memory_space<vmem>>, %arg6: memref<1x128xf32, #tpu.memory_space<vmem>>, %arg7: memref<16x128xf32, #tpu.memory_space<vmem>>, %arg8: memref<16x128xf32, #tpu.memory_space<vmem>>) attributes {dimension_semantics = [#tpu.dimension_semantics<parallel>, #tpu.dimension_semantics<parallel>, #tpu.dimension_semantics<arbitrary>], iteration_bounds = array<i64: 1, 1, 1>, scalar_prefetch = 0 : i64, scratch_operands = 1 : i64, tpu.core_type = #tpu.core_type<tc>, window_params = [{transform_indices = @transform_0, window_bounds = array<i64: 16, 256>}, {transform_indices = @transform_1, window_bounds = array<i64: 256, 128>}, {transform_indices = @transform_2, window_bounds = array<i64: 1, 128>}, {transform_indices = @transform_3, window_bounds = array<i64: 1, 128>}, {transform_indices = @transform_4, window_bounds = array<i64: 16, 128>}]} {
    %c0_i32 = arith.constant 0 : i32
    %0 = arith.cmpi eq, %arg2, %c0_i32 : i32
    %1 = arith.extui %0 : i1 to i32
    %c0_i32_0 = arith.constant 0 : i32
    %2 = arith.cmpi ne, %1, %c0_i32_0 : i32
    scf.if %2 {
      %cst_10 = arith.constant 0.000000e+00 : f32
      %12 = vector.broadcast %cst_10 : f32 to vector<16x128xf32>
      %c0_11 = arith.constant 0 : index
      %c0_12 = arith.constant 0 : index
      %13 = vector.load %arg8[%c0_11, %c0_12] : memref<16x128xf32, #tpu.memory_space<vmem>>, vector<16x128xf32>
      tpu.vector_store %arg8[%c0_11, %c0_12], %12 {strides = array<i32>} : memref<16x128xf32, #tpu.memory_space<vmem>>, vector<16x128xf32>,
    } else {
    }
    %c0 = arith.constant 0 : index
    %c0_1 = arith.constant 0 : index
    %3 = vector.load %arg8[%c0, %c0_1] : memref<16x128xf32, #tpu.memory_space<vmem>>, vector<16x128xf32>
    %c0_2 = arith.constant 0 : index
    %c0_3 = arith.constant 0 : index
    %4 = vector.load %arg3[%c0_2, %c0_3] : memref<16x256xbf16, #tpu.memory_space<vmem>>, vector<16x256xbf16>
    %c0_4 = arith.constant 0 : index
    %c0_5 = arith.constant 0 : index
    %5 = vector.load %arg4[%c0_4, %c0_5] : memref<256x128xbf16, #tpu.memory_space<vmem>>, vector<256x128xbf16>
    %cst = arith.constant dense<0.000000e+00> : vector<16x128xf32>
    %6 = tpu.matmul %4, %5, %cst {dimension_numbers = #tpu.dot_dimension_numbers<[1], [0], [0], [1], [0, 0, 1, 1], [], []>} : vector<16x256xbf16>, vector<256x128xbf16>, vector<16x128xf32> -> vector<16x128xf32>
    %7 = arith.addf %3, %6 : vector<16x128xf32>
    %c0_6 = arith.constant 0 : index
    %c0_7 = arith.constant 0 : index
    %8 = vector.load %arg8[%c0_6, %c0_7] : memref<16x128xf32, #tpu.memory_space<vmem>>, vector<16x128xf32>
    tpu.vector_store %arg8[%c0_6, %c0_7], %7 {strides = array<i32>} : memref<16x128xf32, #tpu.memory_space<vmem>>, vector<16x128xf32>,
    %c0_i32_8 = arith.constant 0 : i32
    %9 = arith.cmpi eq, %arg2, %c0_i32_8 : i32
    %10 = arith.extui %9 : i1 to i32
    %c0_i32_9 = arith.constant 0 : i32
    %11 = arith.cmpi ne, %10, %c0_i32_9 : i32
    scf.if %11 {
      %c0_10 = arith.constant 0 : index
      %c0_11 = arith.constant 0 : index
      %12 = vector.load %arg8[%c0_10, %c0_11] : memref<16x128xf32, #tpu.memory_space<vmem>>, vector<16x128xf32>
      %c0_12 = arith.constant 0 : index
      %c0_13 = arith.constant 0 : index
      %13 = vector.load %arg5[%c0_12, %c0_13] : memref<1x128xf32, #tpu.memory_space<vmem>>, vector<1x128xf32>
      %14 = vector.broadcast %13 : vector<1x128xf32> to vector<16x128xf32>
      %15 = arith.mulf %12, %14 : vector<16x128xf32>
      %c0_14 = arith.constant 0 : index
      %c0_15 = arith.constant 0 : index
      %16 = vector.load %arg6[%c0_14, %c0_15] : memref<1x128xf32, #tpu.memory_space<vmem>>, vector<1x128xf32>
      %17 = vector.broadcast %16 : vector<1x128xf32> to vector<16x128xf32>
      %18 = arith.addf %15, %17 : vector<16x128xf32>
      %cst_16 = arith.constant 0.000000e+00 : f32
      %19 = vector.broadcast %cst_16 : f32 to vector<16x128xf32>
      %20 = arith.maximumf %18, %19 : vector<16x128xf32>
      %c0_17 = arith.constant 0 : index
      %c0_18 = arith.constant 0 : index
      %21 = vector.load %arg7[%c0_17, %c0_18] : memref<16x128xf32, #tpu.memory_space<vmem>>, vector<16x128xf32>
      tpu.vector_store %arg7[%c0_17, %c0_18], %20 {strides = array<i32>} : memref<16x128xf32, #tpu.memory_space<vmem>>, vector<16x128xf32>,
    } else {
    }
    return
  }
  func.func @transform_0(%arg0: i32, %arg1: i32, %arg2: i32) -> (i32, i32) {
    %c0_i32 = arith.constant 0 : i32
    return %arg0, %arg2 : i32, i32
  }
  func.func @transform_1(%arg0: i32, %arg1: i32, %arg2: i32) -> (i32, i32) {
    %c0_i32 = arith.constant 0 : i32
    return %arg2, %arg1 : i32, i32
  }
  func.func @transform_2(%arg0: i32, %arg1: i32, %arg2: i32) -> (i32, i32) {
    %c0_i32 = arith.constant 0 : i32
    %c0_i32_0 = arith.constant 0 : i32
    return %c0_i32, %arg1 : i32, i32
  }
  func.func @transform_3(%arg0: i32, %arg1: i32, %arg2: i32) -> (i32, i32) {
    %c0_i32 = arith.constant 0 : i32
    %c0_i32_0 = arith.constant 0 : i32
    return %c0_i32, %arg1 : i32, i32
  }
  func.func @transform_4(%arg0: i32, %arg1: i32, %arg2: i32) -> (i32, i32) {
    %c0_i32 = arith.constant 0 : i32
    return %arg0, %arg1 : i32, i32
  }
}

module attributes {stable_mosaic.version = 11 : i64} {
  func.func @_maxpool_kernel(%arg0: i32, %arg1: memref<8x9x8xf32, #tpu.memory_space<vmem>>, %arg2: memref<8x8xf32, #tpu.memory_space<vmem>>) attributes {dimension_semantics = [#tpu.dimension_semantics<parallel>], iteration_bounds = array<i64: 1>, scalar_prefetch = 0 : i64, scratch_operands = 0 : i64, tpu.core_type = #tpu.core_type<tc>, window_params = [{transform_indices = @transform_0, window_bounds = array<i64: 8, 9, 8>}, {transform_indices = @transform_1, window_bounds = array<i64: 8, 8>}]} {
    %c0 = arith.constant 0 : index
    %c0_0 = arith.constant 0 : index
    %c0_1 = arith.constant 0 : index
    %0 = vector.load %arg1[%c0, %c0_0, %c0_1] : memref<8x9x8xf32, #tpu.memory_space<vmem>>, vector<8x1x8xf32>
    %1 = vector.shape_cast %0 : vector<8x1x8xf32> to vector<8x8xf32>
    %c0_2 = arith.constant 0 : index
    %c1 = arith.constant 1 : index
    %c0_3 = arith.constant 0 : index
    %2 = vector.load %arg1[%c0_2, %c1, %c0_3] : memref<8x9x8xf32, #tpu.memory_space<vmem>>, vector<8x1x8xf32>
    %3 = vector.shape_cast %2 : vector<8x1x8xf32> to vector<8x8xf32>
    %4 = arith.maximumf %1, %3 : vector<8x8xf32>
    %c0_4 = arith.constant 0 : index
    %c2 = arith.constant 2 : index
    %c0_5 = arith.constant 0 : index
    %5 = vector.load %arg1[%c0_4, %c2, %c0_5] : memref<8x9x8xf32, #tpu.memory_space<vmem>>, vector<8x1x8xf32>
    %6 = vector.shape_cast %5 : vector<8x1x8xf32> to vector<8x8xf32>
    %7 = arith.maximumf %4, %6 : vector<8x8xf32>
    %c0_6 = arith.constant 0 : index
    %c3 = arith.constant 3 : index
    %c0_7 = arith.constant 0 : index
    %8 = vector.load %arg1[%c0_6, %c3, %c0_7] : memref<8x9x8xf32, #tpu.memory_space<vmem>>, vector<8x1x8xf32>
    %9 = vector.shape_cast %8 : vector<8x1x8xf32> to vector<8x8xf32>
    %10 = arith.maximumf %7, %9 : vector<8x8xf32>
    %c0_8 = arith.constant 0 : index
    %c4 = arith.constant 4 : index
    %c0_9 = arith.constant 0 : index
    %11 = vector.load %arg1[%c0_8, %c4, %c0_9] : memref<8x9x8xf32, #tpu.memory_space<vmem>>, vector<8x1x8xf32>
    %12 = vector.shape_cast %11 : vector<8x1x8xf32> to vector<8x8xf32>
    %13 = arith.maximumf %10, %12 : vector<8x8xf32>
    %c0_10 = arith.constant 0 : index
    %c5 = arith.constant 5 : index
    %c0_11 = arith.constant 0 : index
    %14 = vector.load %arg1[%c0_10, %c5, %c0_11] : memref<8x9x8xf32, #tpu.memory_space<vmem>>, vector<8x1x8xf32>
    %15 = vector.shape_cast %14 : vector<8x1x8xf32> to vector<8x8xf32>
    %16 = arith.maximumf %13, %15 : vector<8x8xf32>
    %c0_12 = arith.constant 0 : index
    %c6 = arith.constant 6 : index
    %c0_13 = arith.constant 0 : index
    %17 = vector.load %arg1[%c0_12, %c6, %c0_13] : memref<8x9x8xf32, #tpu.memory_space<vmem>>, vector<8x1x8xf32>
    %18 = vector.shape_cast %17 : vector<8x1x8xf32> to vector<8x8xf32>
    %19 = arith.maximumf %16, %18 : vector<8x8xf32>
    %c0_14 = arith.constant 0 : index
    %c7 = arith.constant 7 : index
    %c0_15 = arith.constant 0 : index
    %20 = vector.load %arg1[%c0_14, %c7, %c0_15] : memref<8x9x8xf32, #tpu.memory_space<vmem>>, vector<8x1x8xf32>
    %21 = vector.shape_cast %20 : vector<8x1x8xf32> to vector<8x8xf32>
    %22 = arith.maximumf %19, %21 : vector<8x8xf32>
    %c0_16 = arith.constant 0 : index
    %c8 = arith.constant 8 : index
    %c0_17 = arith.constant 0 : index
    %23 = vector.load %arg1[%c0_16, %c8, %c0_17] : memref<8x9x8xf32, #tpu.memory_space<vmem>>, vector<8x1x8xf32>
    %24 = vector.shape_cast %23 : vector<8x1x8xf32> to vector<8x8xf32>
    %25 = arith.maximumf %22, %24 : vector<8x8xf32>
    %c0_18 = arith.constant 0 : index
    %c0_19 = arith.constant 0 : index
    %26 = vector.load %arg2[%c0_18, %c0_19] : memref<8x8xf32, #tpu.memory_space<vmem>>, vector<8x8xf32>
    tpu.vector_store %arg2[%c0_18, %c0_19], %25 {strides = array<i32>} : memref<8x8xf32, #tpu.memory_space<vmem>>, vector<8x8xf32>,
    return
  }
  func.func @transform_0(%arg0: i32) -> (i32, i32, i32) {
    %c0_i32 = arith.constant 0 : i32
    %c0_i32_0 = arith.constant 0 : i32
    %c0_i32_1 = arith.constant 0 : i32
    return %arg0, %c0_i32, %c0_i32_0 : i32, i32, i32
  }
  func.func @transform_1(%arg0: i32) -> (i32, i32) {
    %c0_i32 = arith.constant 0 : i32
    %c0_i32_0 = arith.constant 0 : i32
    return %arg0, %c0_i32 : i32, i32
  }
}

module attributes {stable_mosaic.version = 11 : i64} {
  func.func @_mm_relu_kernel(%arg0: i32, %arg1: i32, %arg2: i32, %arg3: memref<16x384xbf16, #tpu.memory_space<vmem>>, %arg4: memref<384x128xbf16, #tpu.memory_space<vmem>>, %arg5: memref<1x128xf32, #tpu.memory_space<vmem>>, %arg6: memref<1x128xf32, #tpu.memory_space<vmem>>, %arg7: memref<16x128xf32, #tpu.memory_space<vmem>>, %arg8: memref<16x128xf32, #tpu.memory_space<vmem>>) attributes {dimension_semantics = [#tpu.dimension_semantics<parallel>, #tpu.dimension_semantics<parallel>, #tpu.dimension_semantics<arbitrary>], iteration_bounds = array<i64: 1, 1, 1>, scalar_prefetch = 0 : i64, scratch_operands = 1 : i64, tpu.core_type = #tpu.core_type<tc>, window_params = [{transform_indices = @transform_0, window_bounds = array<i64: 16, 384>}, {transform_indices = @transform_1, window_bounds = array<i64: 384, 128>}, {transform_indices = @transform_2, window_bounds = array<i64: 1, 128>}, {transform_indices = @transform_3, window_bounds = array<i64: 1, 128>}, {transform_indices = @transform_4, window_bounds = array<i64: 16, 128>}]} {
    %c0_i32 = arith.constant 0 : i32
    %0 = arith.cmpi eq, %arg2, %c0_i32 : i32
    %1 = arith.extui %0 : i1 to i32
    %c0_i32_0 = arith.constant 0 : i32
    %2 = arith.cmpi ne, %1, %c0_i32_0 : i32
    scf.if %2 {
      %cst_10 = arith.constant 0.000000e+00 : f32
      %12 = vector.broadcast %cst_10 : f32 to vector<16x128xf32>
      %c0_11 = arith.constant 0 : index
      %c0_12 = arith.constant 0 : index
      %13 = vector.load %arg8[%c0_11, %c0_12] : memref<16x128xf32, #tpu.memory_space<vmem>>, vector<16x128xf32>
      tpu.vector_store %arg8[%c0_11, %c0_12], %12 {strides = array<i32>} : memref<16x128xf32, #tpu.memory_space<vmem>>, vector<16x128xf32>,
    } else {
    }
    %c0 = arith.constant 0 : index
    %c0_1 = arith.constant 0 : index
    %3 = vector.load %arg8[%c0, %c0_1] : memref<16x128xf32, #tpu.memory_space<vmem>>, vector<16x128xf32>
    %c0_2 = arith.constant 0 : index
    %c0_3 = arith.constant 0 : index
    %4 = vector.load %arg3[%c0_2, %c0_3] : memref<16x384xbf16, #tpu.memory_space<vmem>>, vector<16x384xbf16>
    %c0_4 = arith.constant 0 : index
    %c0_5 = arith.constant 0 : index
    %5 = vector.load %arg4[%c0_4, %c0_5] : memref<384x128xbf16, #tpu.memory_space<vmem>>, vector<384x128xbf16>
    %cst = arith.constant dense<0.000000e+00> : vector<16x128xf32>
    %6 = tpu.matmul %4, %5, %cst {dimension_numbers = #tpu.dot_dimension_numbers<[1], [0], [0], [1], [0, 0, 1, 1], [], []>} : vector<16x384xbf16>, vector<384x128xbf16>, vector<16x128xf32> -> vector<16x128xf32>
    %7 = arith.addf %3, %6 : vector<16x128xf32>
    %c0_6 = arith.constant 0 : index
    %c0_7 = arith.constant 0 : index
    %8 = vector.load %arg8[%c0_6, %c0_7] : memref<16x128xf32, #tpu.memory_space<vmem>>, vector<16x128xf32>
    tpu.vector_store %arg8[%c0_6, %c0_7], %7 {strides = array<i32>} : memref<16x128xf32, #tpu.memory_space<vmem>>, vector<16x128xf32>,
    %c0_i32_8 = arith.constant 0 : i32
    %9 = arith.cmpi eq, %arg2, %c0_i32_8 : i32
    %10 = arith.extui %9 : i1 to i32
    %c0_i32_9 = arith.constant 0 : i32
    %11 = arith.cmpi ne, %10, %c0_i32_9 : i32
    scf.if %11 {
      %c0_10 = arith.constant 0 : index
      %c0_11 = arith.constant 0 : index
      %12 = vector.load %arg8[%c0_10, %c0_11] : memref<16x128xf32, #tpu.memory_space<vmem>>, vector<16x128xf32>
      %c0_12 = arith.constant 0 : index
      %c0_13 = arith.constant 0 : index
      %13 = vector.load %arg5[%c0_12, %c0_13] : memref<1x128xf32, #tpu.memory_space<vmem>>, vector<1x128xf32>
      %14 = vector.broadcast %13 : vector<1x128xf32> to vector<16x128xf32>
      %15 = arith.mulf %12, %14 : vector<16x128xf32>
      %c0_14 = arith.constant 0 : index
      %c0_15 = arith.constant 0 : index
      %16 = vector.load %arg6[%c0_14, %c0_15] : memref<1x128xf32, #tpu.memory_space<vmem>>, vector<1x128xf32>
      %17 = vector.broadcast %16 : vector<1x128xf32> to vector<16x128xf32>
      %18 = arith.addf %15, %17 : vector<16x128xf32>
      %cst_16 = arith.constant 0.000000e+00 : f32
      %19 = vector.broadcast %cst_16 : f32 to vector<16x128xf32>
      %20 = arith.maximumf %18, %19 : vector<16x128xf32>
      %c0_17 = arith.constant 0 : index
      %c0_18 = arith.constant 0 : index
      %21 = vector.load %arg7[%c0_17, %c0_18] : memref<16x128xf32, #tpu.memory_space<vmem>>, vector<16x128xf32>
      tpu.vector_store %arg7[%c0_17, %c0_18], %20 {strides = array<i32>} : memref<16x128xf32, #tpu.memory_space<vmem>>, vector<16x128xf32>,
    } else {
    }
    return
  }
  func.func @transform_0(%arg0: i32, %arg1: i32, %arg2: i32) -> (i32, i32) {
    %c0_i32 = arith.constant 0 : i32
    return %arg0, %arg2 : i32, i32
  }
  func.func @transform_1(%arg0: i32, %arg1: i32, %arg2: i32) -> (i32, i32) {
    %c0_i32 = arith.constant 0 : i32
    return %arg2, %arg1 : i32, i32
  }
  func.func @transform_2(%arg0: i32, %arg1: i32, %arg2: i32) -> (i32, i32) {
    %c0_i32 = arith.constant 0 : i32
    %c0_i32_0 = arith.constant 0 : i32
    return %c0_i32, %arg1 : i32, i32
  }
  func.func @transform_3(%arg0: i32, %arg1: i32, %arg2: i32) -> (i32, i32) {
    %c0_i32 = arith.constant 0 : i32
    %c0_i32_0 = arith.constant 0 : i32
    return %c0_i32, %arg1 : i32, i32
  }
  func.func @transform_4(%arg0: i32, %arg1: i32, %arg2: i32) -> (i32, i32) {
    %c0_i32 = arith.constant 0 : i32
    return %arg0, %arg1 : i32, i32
  }
}

module attributes {stable_mosaic.version = 11 : i64} {
  func.func @_mm_linear_kernel(%arg0: i32, %arg1: i32, %arg2: i32, %arg3: memref<16x128xbf16, #tpu.memory_space<vmem>>, %arg4: memref<128x256xbf16, #tpu.memory_space<vmem>>, %arg5: memref<1x256xf32, #tpu.memory_space<vmem>>, %arg6: memref<1x256xf32, #tpu.memory_space<vmem>>, %arg7: memref<16x256xf32, #tpu.memory_space<vmem>>, %arg8: memref<16x256xf32, #tpu.memory_space<vmem>>) attributes {dimension_semantics = [#tpu.dimension_semantics<parallel>, #tpu.dimension_semantics<parallel>, #tpu.dimension_semantics<arbitrary>], iteration_bounds = array<i64: 1, 1, 1>, scalar_prefetch = 0 : i64, scratch_operands = 1 : i64, tpu.core_type = #tpu.core_type<tc>, window_params = [{transform_indices = @transform_0, window_bounds = array<i64: 16, 128>}, {transform_indices = @transform_1, window_bounds = array<i64: 128, 256>}, {transform_indices = @transform_2, window_bounds = array<i64: 1, 256>}, {transform_indices = @transform_3, window_bounds = array<i64: 1, 256>}, {transform_indices = @transform_4, window_bounds = array<i64: 16, 256>}]} {
    %c0_i32 = arith.constant 0 : i32
    %0 = arith.cmpi eq, %arg2, %c0_i32 : i32
    %1 = arith.extui %0 : i1 to i32
    %c0_i32_0 = arith.constant 0 : i32
    %2 = arith.cmpi ne, %1, %c0_i32_0 : i32
    scf.if %2 {
      %cst_10 = arith.constant 0.000000e+00 : f32
      %12 = vector.broadcast %cst_10 : f32 to vector<16x256xf32>
      %c0_11 = arith.constant 0 : index
      %c0_12 = arith.constant 0 : index
      %13 = vector.load %arg8[%c0_11, %c0_12] : memref<16x256xf32, #tpu.memory_space<vmem>>, vector<16x256xf32>
      tpu.vector_store %arg8[%c0_11, %c0_12], %12 {strides = array<i32>} : memref<16x256xf32, #tpu.memory_space<vmem>>, vector<16x256xf32>,
    } else {
    }
    %c0 = arith.constant 0 : index
    %c0_1 = arith.constant 0 : index
    %3 = vector.load %arg8[%c0, %c0_1] : memref<16x256xf32, #tpu.memory_space<vmem>>, vector<16x256xf32>
    %c0_2 = arith.constant 0 : index
    %c0_3 = arith.constant 0 : index
    %4 = vector.load %arg3[%c0_2, %c0_3] : memref<16x128xbf16, #tpu.memory_space<vmem>>, vector<16x128xbf16>
    %c0_4 = arith.constant 0 : index
    %c0_5 = arith.constant 0 : index
    %5 = vector.load %arg4[%c0_4, %c0_5] : memref<128x256xbf16, #tpu.memory_space<vmem>>, vector<128x256xbf16>
    %cst = arith.constant dense<0.000000e+00> : vector<16x256xf32>
    %6 = tpu.matmul %4, %5, %cst {dimension_numbers = #tpu.dot_dimension_numbers<[1], [0], [0], [1], [0, 0, 1, 1], [], []>} : vector<16x128xbf16>, vector<128x256xbf16>, vector<16x256xf32> -> vector<16x256xf32>
    %7 = arith.addf %3, %6 : vector<16x256xf32>
    %c0_6 = arith.constant 0 : index
    %c0_7 = arith.constant 0 : index
    %8 = vector.load %arg8[%c0_6, %c0_7] : memref<16x256xf32, #tpu.memory_space<vmem>>, vector<16x256xf32>
    tpu.vector_store %arg8[%c0_6, %c0_7], %7 {strides = array<i32>} : memref<16x256xf32, #tpu.memory_space<vmem>>, vector<16x256xf32>,
    %c0_i32_8 = arith.constant 0 : i32
    %9 = arith.cmpi eq, %arg2, %c0_i32_8 : i32
    %10 = arith.extui %9 : i1 to i32
    %c0_i32_9 = arith.constant 0 : i32
    %11 = arith.cmpi ne, %10, %c0_i32_9 : i32
    scf.if %11 {
      %c0_10 = arith.constant 0 : index
      %c0_11 = arith.constant 0 : index
      %12 = vector.load %arg8[%c0_10, %c0_11] : memref<16x256xf32, #tpu.memory_space<vmem>>, vector<16x256xf32>
      %c0_12 = arith.constant 0 : index
      %c0_13 = arith.constant 0 : index
      %13 = vector.load %arg5[%c0_12, %c0_13] : memref<1x256xf32, #tpu.memory_space<vmem>>, vector<1x256xf32>
      %14 = vector.broadcast %13 : vector<1x256xf32> to vector<16x256xf32>
      %15 = arith.mulf %12, %14 : vector<16x256xf32>
      %c0_14 = arith.constant 0 : index
      %c0_15 = arith.constant 0 : index
      %16 = vector.load %arg6[%c0_14, %c0_15] : memref<1x256xf32, #tpu.memory_space<vmem>>, vector<1x256xf32>
      %17 = vector.broadcast %16 : vector<1x256xf32> to vector<16x256xf32>
      %18 = arith.addf %15, %17 : vector<16x256xf32>
      %c0_16 = arith.constant 0 : index
      %c0_17 = arith.constant 0 : index
      %19 = vector.load %arg7[%c0_16, %c0_17] : memref<16x256xf32, #tpu.memory_space<vmem>>, vector<16x256xf32>
      tpu.vector_store %arg7[%c0_16, %c0_17], %18 {strides = array<i32>} : memref<16x256xf32, #tpu.memory_space<vmem>>, vector<16x256xf32>,
    } else {
    }
    return
  }
  func.func @transform_0(%arg0: i32, %arg1: i32, %arg2: i32) -> (i32, i32) {
    %c0_i32 = arith.constant 0 : i32
    return %arg0, %arg2 : i32, i32
  }
  func.func @transform_1(%arg0: i32, %arg1: i32, %arg2: i32) -> (i32, i32) {
    %c0_i32 = arith.constant 0 : i32
    return %arg2, %arg1 : i32, i32
  }
  func.func @transform_2(%arg0: i32, %arg1: i32, %arg2: i32) -> (i32, i32) {
    %c0_i32 = arith.constant 0 : i32
    %c0_i32_0 = arith.constant 0 : i32
    return %c0_i32, %arg1 : i32, i32
  }
  func.func @transform_3(%arg0: i32, %arg1: i32, %arg2: i32) -> (i32, i32) {
    %c0_i32 = arith.constant 0 : i32
    %c0_i32_0 = arith.constant 0 : i32
    return %c0_i32, %arg1 : i32, i32
  }
  func.func @transform_4(%arg0: i32, %arg1: i32, %arg2: i32) -> (i32, i32) {
    %c0_i32 = arith.constant 0 : i32
    return %arg0, %arg1 : i32, i32
  }
}

module attributes {stable_mosaic.version = 11 : i64} {
  func.func @_mm_relu_kernel(%arg0: i32, %arg1: i32, %arg2: i32, %arg3: memref<16x640xbf16, #tpu.memory_space<vmem>>, %arg4: memref<640x128xbf16, #tpu.memory_space<vmem>>, %arg5: memref<1x128xf32, #tpu.memory_space<vmem>>, %arg6: memref<1x128xf32, #tpu.memory_space<vmem>>, %arg7: memref<16x128xf32, #tpu.memory_space<vmem>>, %arg8: memref<16x128xf32, #tpu.memory_space<vmem>>) attributes {dimension_semantics = [#tpu.dimension_semantics<parallel>, #tpu.dimension_semantics<parallel>, #tpu.dimension_semantics<arbitrary>], iteration_bounds = array<i64: 1, 1, 1>, scalar_prefetch = 0 : i64, scratch_operands = 1 : i64, tpu.core_type = #tpu.core_type<tc>, window_params = [{transform_indices = @transform_0, window_bounds = array<i64: 16, 640>}, {transform_indices = @transform_1, window_bounds = array<i64: 640, 128>}, {transform_indices = @transform_2, window_bounds = array<i64: 1, 128>}, {transform_indices = @transform_3, window_bounds = array<i64: 1, 128>}, {transform_indices = @transform_4, window_bounds = array<i64: 16, 128>}]} {
    %c0_i32 = arith.constant 0 : i32
    %0 = arith.cmpi eq, %arg2, %c0_i32 : i32
    %1 = arith.extui %0 : i1 to i32
    %c0_i32_0 = arith.constant 0 : i32
    %2 = arith.cmpi ne, %1, %c0_i32_0 : i32
    scf.if %2 {
      %cst_10 = arith.constant 0.000000e+00 : f32
      %12 = vector.broadcast %cst_10 : f32 to vector<16x128xf32>
      %c0_11 = arith.constant 0 : index
      %c0_12 = arith.constant 0 : index
      %13 = vector.load %arg8[%c0_11, %c0_12] : memref<16x128xf32, #tpu.memory_space<vmem>>, vector<16x128xf32>
      tpu.vector_store %arg8[%c0_11, %c0_12], %12 {strides = array<i32>} : memref<16x128xf32, #tpu.memory_space<vmem>>, vector<16x128xf32>,
    } else {
    }
    %c0 = arith.constant 0 : index
    %c0_1 = arith.constant 0 : index
    %3 = vector.load %arg8[%c0, %c0_1] : memref<16x128xf32, #tpu.memory_space<vmem>>, vector<16x128xf32>
    %c0_2 = arith.constant 0 : index
    %c0_3 = arith.constant 0 : index
    %4 = vector.load %arg3[%c0_2, %c0_3] : memref<16x640xbf16, #tpu.memory_space<vmem>>, vector<16x640xbf16>
    %c0_4 = arith.constant 0 : index
    %c0_5 = arith.constant 0 : index
    %5 = vector.load %arg4[%c0_4, %c0_5] : memref<640x128xbf16, #tpu.memory_space<vmem>>, vector<640x128xbf16>
    %cst = arith.constant dense<0.000000e+00> : vector<16x128xf32>
    %6 = tpu.matmul %4, %5, %cst {dimension_numbers = #tpu.dot_dimension_numbers<[1], [0], [0], [1], [0, 0, 1, 1], [], []>} : vector<16x640xbf16>, vector<640x128xbf16>, vector<16x128xf32> -> vector<16x128xf32>
    %7 = arith.addf %3, %6 : vector<16x128xf32>
    %c0_6 = arith.constant 0 : index
    %c0_7 = arith.constant 0 : index
    %8 = vector.load %arg8[%c0_6, %c0_7] : memref<16x128xf32, #tpu.memory_space<vmem>>, vector<16x128xf32>
    tpu.vector_store %arg8[%c0_6, %c0_7], %7 {strides = array<i32>} : memref<16x128xf32, #tpu.memory_space<vmem>>, vector<16x128xf32>,
    %c0_i32_8 = arith.constant 0 : i32
    %9 = arith.cmpi eq, %arg2, %c0_i32_8 : i32
    %10 = arith.extui %9 : i1 to i32
    %c0_i32_9 = arith.constant 0 : i32
    %11 = arith.cmpi ne, %10, %c0_i32_9 : i32
    scf.if %11 {
      %c0_10 = arith.constant 0 : index
      %c0_11 = arith.constant 0 : index
      %12 = vector.load %arg8[%c0_10, %c0_11] : memref<16x128xf32, #tpu.memory_space<vmem>>, vector<16x128xf32>
      %c0_12 = arith.constant 0 : index
      %c0_13 = arith.constant 0 : index
      %13 = vector.load %arg5[%c0_12, %c0_13] : memref<1x128xf32, #tpu.memory_space<vmem>>, vector<1x128xf32>
      %14 = vector.broadcast %13 : vector<1x128xf32> to vector<16x128xf32>
      %15 = arith.mulf %12, %14 : vector<16x128xf32>
      %c0_14 = arith.constant 0 : index
      %c0_15 = arith.constant 0 : index
      %16 = vector.load %arg6[%c0_14, %c0_15] : memref<1x128xf32, #tpu.memory_space<vmem>>, vector<1x128xf32>
      %17 = vector.broadcast %16 : vector<1x128xf32> to vector<16x128xf32>
      %18 = arith.addf %15, %17 : vector<16x128xf32>
      %cst_16 = arith.constant 0.000000e+00 : f32
      %19 = vector.broadcast %cst_16 : f32 to vector<16x128xf32>
      %20 = arith.maximumf %18, %19 : vector<16x128xf32>
      %c0_17 = arith.constant 0 : index
      %c0_18 = arith.constant 0 : index
      %21 = vector.load %arg7[%c0_17, %c0_18] : memref<16x128xf32, #tpu.memory_space<vmem>>, vector<16x128xf32>
      tpu.vector_store %arg7[%c0_17, %c0_18], %20 {strides = array<i32>} : memref<16x128xf32, #tpu.memory_space<vmem>>, vector<16x128xf32>,
    } else {
    }
    return
  }
  func.func @transform_0(%arg0: i32, %arg1: i32, %arg2: i32) -> (i32, i32) {
    %c0_i32 = arith.constant 0 : i32
    return %arg0, %arg2 : i32, i32
  }
  func.func @transform_1(%arg0: i32, %arg1: i32, %arg2: i32) -> (i32, i32) {
    %c0_i32 = arith.constant 0 : i32
    return %arg2, %arg1 : i32, i32
  }
  func.func @transform_2(%arg0: i32, %arg1: i32, %arg2: i32) -> (i32, i32) {
    %c0_i32 = arith.constant 0 : i32
    %c0_i32_0 = arith.constant 0 : i32
    return %c0_i32, %arg1 : i32, i32
  }
  func.func @transform_3(%arg0: i32, %arg1: i32, %arg2: i32) -> (i32, i32) {
    %c0_i32 = arith.constant 0 : i32
    %c0_i32_0 = arith.constant 0 : i32
    return %c0_i32, %arg1 : i32, i32
  }
  func.func @transform_4(%arg0: i32, %arg1: i32, %arg2: i32) -> (i32, i32) {
    %c0_i32 = arith.constant 0 : i32
    return %arg0, %arg1 : i32, i32
  }
}

module attributes {stable_mosaic.version = 11 : i64} {
  func.func @_mm_res_relu_kernel(%arg0: i32, %arg1: i32, %arg2: i32, %arg3: memref<16x128xbf16, #tpu.memory_space<vmem>>, %arg4: memref<128x256xbf16, #tpu.memory_space<vmem>>, %arg5: memref<1x256xf32, #tpu.memory_space<vmem>>, %arg6: memref<1x256xf32, #tpu.memory_space<vmem>>, %arg7: memref<16x256xf32, #tpu.memory_space<vmem>>, %arg8: memref<16x256xf32, #tpu.memory_space<vmem>>, %arg9: memref<16x256xf32, #tpu.memory_space<vmem>>) attributes {dimension_semantics = [#tpu.dimension_semantics<parallel>, #tpu.dimension_semantics<parallel>, #tpu.dimension_semantics<arbitrary>], iteration_bounds = array<i64: 1, 1, 1>, scalar_prefetch = 0 : i64, scratch_operands = 1 : i64, tpu.core_type = #tpu.core_type<tc>, window_params = [{transform_indices = @transform_0, window_bounds = array<i64: 16, 128>}, {transform_indices = @transform_1, window_bounds = array<i64: 128, 256>}, {transform_indices = @transform_2, window_bounds = array<i64: 1, 256>}, {transform_indices = @transform_3, window_bounds = array<i64: 1, 256>}, {transform_indices = @transform_4, window_bounds = array<i64: 16, 256>}, {transform_indices = @transform_5, window_bounds = array<i64: 16, 256>}]} {
    %c0_i32 = arith.constant 0 : i32
    %0 = arith.cmpi eq, %arg2, %c0_i32 : i32
    %1 = arith.extui %0 : i1 to i32
    %c0_i32_0 = arith.constant 0 : i32
    %2 = arith.cmpi ne, %1, %c0_i32_0 : i32
    scf.if %2 {
      %cst_10 = arith.constant 0.000000e+00 : f32
      %12 = vector.broadcast %cst_10 : f32 to vector<16x256xf32>
      %c0_11 = arith.constant 0 : index
      %c0_12 = arith.constant 0 : index
      %13 = vector.load %arg9[%c0_11, %c0_12] : memref<16x256xf32, #tpu.memory_space<vmem>>, vector<16x256xf32>
      tpu.vector_store %arg9[%c0_11, %c0_12], %12 {strides = array<i32>} : memref<16x256xf32, #tpu.memory_space<vmem>>, vector<16x256xf32>,
    } else {
    }
    %c0 = arith.constant 0 : index
    %c0_1 = arith.constant 0 : index
    %3 = vector.load %arg9[%c0, %c0_1] : memref<16x256xf32, #tpu.memory_space<vmem>>, vector<16x256xf32>
    %c0_2 = arith.constant 0 : index
    %c0_3 = arith.constant 0 : index
    %4 = vector.load %arg3[%c0_2, %c0_3] : memref<16x128xbf16, #tpu.memory_space<vmem>>, vector<16x128xbf16>
    %c0_4 = arith.constant 0 : index
    %c0_5 = arith.constant 0 : index
    %5 = vector.load %arg4[%c0_4, %c0_5] : memref<128x256xbf16, #tpu.memory_space<vmem>>, vector<128x256xbf16>
    %cst = arith.constant dense<0.000000e+00> : vector<16x256xf32>
    %6 = tpu.matmul %4, %5, %cst {dimension_numbers = #tpu.dot_dimension_numbers<[1], [0], [0], [1], [0, 0, 1, 1], [], []>} : vector<16x128xbf16>, vector<128x256xbf16>, vector<16x256xf32> -> vector<16x256xf32>
    %7 = arith.addf %3, %6 : vector<16x256xf32>
    %c0_6 = arith.constant 0 : index
    %c0_7 = arith.constant 0 : index
    %8 = vector.load %arg9[%c0_6, %c0_7] : memref<16x256xf32, #tpu.memory_space<vmem>>, vector<16x256xf32>
    tpu.vector_store %arg9[%c0_6, %c0_7], %7 {strides = array<i32>} : memref<16x256xf32, #tpu.memory_space<vmem>>, vector<16x256xf32>,
    %c0_i32_8 = arith.constant 0 : i32
    %9 = arith.cmpi eq, %arg2, %c0_i32_8 : i32
    %10 = arith.extui %9 : i1 to i32
    %c0_i32_9 = arith.constant 0 : i32
    %11 = arith.cmpi ne, %10, %c0_i32_9 : i32
    scf.if %11 {
      %c0_10 = arith.constant 0 : index
      %c0_11 = arith.constant 0 : index
      %12 = vector.load %arg9[%c0_10, %c0_11] : memref<16x256xf32, #tpu.memory_space<vmem>>, vector<16x256xf32>
      %c0_12 = arith.constant 0 : index
      %c0_13 = arith.constant 0 : index
      %13 = vector.load %arg7[%c0_12, %c0_13] : memref<16x256xf32, #tpu.memory_space<vmem>>, vector<16x256xf32>
      %14 = arith.addf %12, %13 : vector<16x256xf32>
      %c0_14 = arith.constant 0 : index
      %c0_15 = arith.constant 0 : index
      %15 = vector.load %arg5[%c0_14, %c0_15] : memref<1x256xf32, #tpu.memory_space<vmem>>, vector<1x256xf32>
      %16 = vector.broadcast %15 : vector<1x256xf32> to vector<16x256xf32>
      %17 = arith.mulf %14, %16 : vector<16x256xf32>
      %c0_16 = arith.constant 0 : index
      %c0_17 = arith.constant 0 : index
      %18 = vector.load %arg6[%c0_16, %c0_17] : memref<1x256xf32, #tpu.memory_space<vmem>>, vector<1x256xf32>
      %19 = vector.broadcast %18 : vector<1x256xf32> to vector<16x256xf32>
      %20 = arith.addf %17, %19 : vector<16x256xf32>
      %cst_18 = arith.constant 0.000000e+00 : f32
      %21 = vector.broadcast %cst_18 : f32 to vector<16x256xf32>
      %22 = arith.maximumf %20, %21 : vector<16x256xf32>
      %c0_19 = arith.constant 0 : index
      %c0_20 = arith.constant 0 : index
      %23 = vector.load %arg8[%c0_19, %c0_20] : memref<16x256xf32, #tpu.memory_space<vmem>>, vector<16x256xf32>
      tpu.vector_store %arg8[%c0_19, %c0_20], %22 {strides = array<i32>} : memref<16x256xf32, #tpu.memory_space<vmem>>, vector<16x256xf32>,
    } else {
    }
    return
  }
  func.func @transform_0(%arg0: i32, %arg1: i32, %arg2: i32) -> (i32, i32) {
    %c0_i32 = arith.constant 0 : i32
    return %arg0, %arg2 : i32, i32
  }
  func.func @transform_1(%arg0: i32, %arg1: i32, %arg2: i32) -> (i32, i32) {
    %c0_i32 = arith.constant 0 : i32
    return %arg2, %arg1 : i32, i32
  }
  func.func @transform_2(%arg0: i32, %arg1: i32, %arg2: i32) -> (i32, i32) {
    %c0_i32 = arith.constant 0 : i32
    %c0_i32_0 = arith.constant 0 : i32
    return %c0_i32, %arg1 : i32, i32
  }
  func.func @transform_3(%arg0: i32, %arg1: i32, %arg2: i32) -> (i32, i32) {
    %c0_i32 = arith.constant 0 : i32
    %c0_i32_0 = arith.constant 0 : i32
    return %c0_i32, %arg1 : i32, i32
  }
  func.func @transform_4(%arg0: i32, %arg1: i32, %arg2: i32) -> (i32, i32) {
    %c0_i32 = arith.constant 0 : i32
    return %arg0, %arg1 : i32, i32
  }
  func.func @transform_5(%arg0: i32, %arg1: i32, %arg2: i32) -> (i32, i32) {
    %c0_i32 = arith.constant 0 : i32
    return %arg0, %arg1 : i32, i32
  }
}

module attributes {stable_mosaic.version = 11 : i64} {
  func.func @_avgpool_kernel(%arg0: i32, %arg1: memref<8x1x256xf32, #tpu.memory_space<vmem>>, %arg2: memref<8x256xf32, #tpu.memory_space<vmem>>) attributes {dimension_semantics = [#tpu.dimension_semantics<parallel>], iteration_bounds = array<i64: 1>, scalar_prefetch = 0 : i64, scratch_operands = 0 : i64, tpu.core_type = #tpu.core_type<tc>, window_params = [{transform_indices = @transform_0, window_bounds = array<i64: 8, 1, 256>}, {transform_indices = @transform_1, window_bounds = array<i64: 8, 256>}]} {
    %c0 = arith.constant 0 : index
    %c0_0 = arith.constant 0 : index
    %c0_1 = arith.constant 0 : index
    %0 = vector.load %arg1[%c0, %c0_0, %c0_1] : memref<8x1x256xf32, #tpu.memory_space<vmem>>, vector<8x1x256xf32>
    %1 = vector.shape_cast %0 : vector<8x1x256xf32> to vector<8x256xf32>
    %cst = arith.constant 1.000000e+00 : f32
    %2 = vector.broadcast %cst : f32 to vector<8x256xf32>
    %3 = arith.mulf %1, %2 : vector<8x256xf32>
    %c0_2 = arith.constant 0 : index
    %c0_3 = arith.constant 0 : index
    %4 = vector.load %arg2[%c0_2, %c0_3] : memref<8x256xf32, #tpu.memory_space<vmem>>, vector<8x256xf32>
    tpu.vector_store %arg2[%c0_2, %c0_3], %3 {strides = array<i32>} : memref<8x256xf32, #tpu.memory_space<vmem>>, vector<8x256xf32>,
    return
  }
  func.func @transform_0(%arg0: i32) -> (i32, i32, i32) {
    %c0_i32 = arith.constant 0 : i32
    %c0_i32_0 = arith.constant 0 : i32
    %c0_i32_1 = arith.constant 0 : i32
    return %arg0, %c0_i32, %c0_i32_0 : i32, i32, i32
  }
  func.func @transform_1(%arg0: i32) -> (i32, i32) {
    %c0_i32 = arith.constant 0 : i32
    %c0_i32_0 = arith.constant 0 : i32
    return %arg0, %c0_i32 : i32, i32
  }
}

module attributes {stable_mosaic.version = 11 : i64} {
  func.func @_mm_res_relu_kernel(%arg0: i32, %arg1: i32, %arg2: i32, %arg3: memref<16x128xbf16, #tpu.memory_space<vmem>>, %arg4: memref<128x256xbf16, #tpu.memory_space<vmem>>, %arg5: memref<1x256xf32, #tpu.memory_space<vmem>>, %arg6: memref<1x256xf32, #tpu.memory_space<vmem>>, %arg7: memref<16x256xf32, #tpu.memory_space<vmem>>, %arg8: memref<16x256xf32, #tpu.memory_space<vmem>>, %arg9: memref<16x256xf32, #tpu.memory_space<vmem>>) attributes {dimension_semantics = [#tpu.dimension_semantics<parallel>, #tpu.dimension_semantics<parallel>, #tpu.dimension_semantics<arbitrary>], iteration_bounds = array<i64: 1, 1, 1>, scalar_prefetch = 0 : i64, scratch_operands = 1 : i64, tpu.core_type = #tpu.core_type<tc>, window_params = [{transform_indices = @transform_0, window_bounds = array<i64: 16, 128>}, {transform_indices = @transform_1, window_bounds = array<i64: 128, 256>}, {transform_indices = @transform_2, window_bounds = array<i64: 1, 256>}, {transform_indices = @transform_3, window_bounds = array<i64: 1, 256>}, {transform_indices = @transform_4, window_bounds = array<i64: 16, 256>}, {transform_indices = @transform_5, window_bounds = array<i64: 16, 256>}]} {
    %c0_i32 = arith.constant 0 : i32
    %0 = arith.cmpi eq, %arg2, %c0_i32 : i32
    %1 = arith.extui %0 : i1 to i32
    %c0_i32_0 = arith.constant 0 : i32
    %2 = arith.cmpi ne, %1, %c0_i32_0 : i32
    scf.if %2 {
      %cst_10 = arith.constant 0.000000e+00 : f32
      %12 = vector.broadcast %cst_10 : f32 to vector<16x256xf32>
      %c0_11 = arith.constant 0 : index
      %c0_12 = arith.constant 0 : index
      %13 = vector.load %arg9[%c0_11, %c0_12] : memref<16x256xf32, #tpu.memory_space<vmem>>, vector<16x256xf32>
      tpu.vector_store %arg9[%c0_11, %c0_12], %12 {strides = array<i32>} : memref<16x256xf32, #tpu.memory_space<vmem>>, vector<16x256xf32>,
    } else {
    }
    %c0 = arith.constant 0 : index
    %c0_1 = arith.constant 0 : index
    %3 = vector.load %arg9[%c0, %c0_1] : memref<16x256xf32, #tpu.memory_space<vmem>>, vector<16x256xf32>
    %c0_2 = arith.constant 0 : index
    %c0_3 = arith.constant 0 : index
    %4 = vector.load %arg3[%c0_2, %c0_3] : memref<16x128xbf16, #tpu.memory_space<vmem>>, vector<16x128xbf16>
    %c0_4 = arith.constant 0 : index
    %c0_5 = arith.constant 0 : index
    %5 = vector.load %arg4[%c0_4, %c0_5] : memref<128x256xbf16, #tpu.memory_space<vmem>>, vector<128x256xbf16>
    %cst = arith.constant dense<0.000000e+00> : vector<16x256xf32>
    %6 = tpu.matmul %4, %5, %cst {dimension_numbers = #tpu.dot_dimension_numbers<[1], [0], [0], [1], [0, 0, 1, 1], [], []>} : vector<16x128xbf16>, vector<128x256xbf16>, vector<16x256xf32> -> vector<16x256xf32>
    %7 = arith.addf %3, %6 : vector<16x256xf32>
    %c0_6 = arith.constant 0 : index
    %c0_7 = arith.constant 0 : index
    %8 = vector.load %arg9[%c0_6, %c0_7] : memref<16x256xf32, #tpu.memory_space<vmem>>, vector<16x256xf32>
    tpu.vector_store %arg9[%c0_6, %c0_7], %7 {strides = array<i32>} : memref<16x256xf32, #tpu.memory_space<vmem>>, vector<16x256xf32>,
    %c0_i32_8 = arith.constant 0 : i32
    %9 = arith.cmpi eq, %arg2, %c0_i32_8 : i32
    %10 = arith.extui %9 : i1 to i32
    %c0_i32_9 = arith.constant 0 : i32
    %11 = arith.cmpi ne, %10, %c0_i32_9 : i32
    scf.if %11 {
      %c0_10 = arith.constant 0 : index
      %c0_11 = arith.constant 0 : index
      %12 = vector.load %arg9[%c0_10, %c0_11] : memref<16x256xf32, #tpu.memory_space<vmem>>, vector<16x256xf32>
      %c0_12 = arith.constant 0 : index
      %c0_13 = arith.constant 0 : index
      %13 = vector.load %arg7[%c0_12, %c0_13] : memref<16x256xf32, #tpu.memory_space<vmem>>, vector<16x256xf32>
      %14 = arith.addf %12, %13 : vector<16x256xf32>
      %c0_14 = arith.constant 0 : index
      %c0_15 = arith.constant 0 : index
      %15 = vector.load %arg5[%c0_14, %c0_15] : memref<1x256xf32, #tpu.memory_space<vmem>>, vector<1x256xf32>
      %16 = vector.broadcast %15 : vector<1x256xf32> to vector<16x256xf32>
      %17 = arith.mulf %14, %16 : vector<16x256xf32>
      %c0_16 = arith.constant 0 : index
      %c0_17 = arith.constant 0 : index
      %18 = vector.load %arg6[%c0_16, %c0_17] : memref<1x256xf32, #tpu.memory_space<vmem>>, vector<1x256xf32>
      %19 = vector.broadcast %18 : vector<1x256xf32> to vector<16x256xf32>
      %20 = arith.addf %17, %19 : vector<16x256xf32>
      %cst_18 = arith.constant 0.000000e+00 : f32
      %21 = vector.broadcast %cst_18 : f32 to vector<16x256xf32>
      %22 = arith.maximumf %20, %21 : vector<16x256xf32>
      %c0_19 = arith.constant 0 : index
      %c0_20 = arith.constant 0 : index
      %23 = vector.load %arg8[%c0_19, %c0_20] : memref<16x256xf32, #tpu.memory_space<vmem>>, vector<16x256xf32>
      tpu.vector_store %arg8[%c0_19, %c0_20], %22 {strides = array<i32>} : memref<16x256xf32, #tpu.memory_space<vmem>>, vector<16x256xf32>,
    } else {
    }
    return
  }
  func.func @transform_0(%arg0: i32, %arg1: i32, %arg2: i32) -> (i32, i32) {
    %c0_i32 = arith.constant 0 : i32
    return %arg0, %arg2 : i32, i32
  }
  func.func @transform_1(%arg0: i32, %arg1: i32, %arg2: i32) -> (i32, i32) {
    %c0_i32 = arith.constant 0 : i32
    return %arg2, %arg1 : i32, i32
  }
  func.func @transform_2(%arg0: i32, %arg1: i32, %arg2: i32) -> (i32, i32) {
    %c0_i32 = arith.constant 0 : i32
    %c0_i32_0 = arith.constant 0 : i32
    return %c0_i32, %arg1 : i32, i32
  }
  func.func @transform_3(%arg0: i32, %arg1: i32, %arg2: i32) -> (i32, i32) {
    %c0_i32 = arith.constant 0 : i32
    %c0_i32_0 = arith.constant 0 : i32
    return %c0_i32, %arg1 : i32, i32
  }
  func.func @transform_4(%arg0: i32, %arg1: i32, %arg2: i32) -> (i32, i32) {
    %c0_i32 = arith.constant 0 : i32
    return %arg0, %arg1 : i32, i32
  }
  func.func @transform_5(%arg0: i32, %arg1: i32, %arg2: i32) -> (i32, i32) {
    %c0_i32 = arith.constant 0 : i32
    return %arg0, %arg1 : i32, i32
  }
}

module attributes {stable_mosaic.version = 11 : i64} {
  func.func @_mm_res_relu_kernel(%arg0: i32, %arg1: i32, %arg2: i32, %arg3: memref<16x128xbf16, #tpu.memory_space<vmem>>, %arg4: memref<128x128xbf16, #tpu.memory_space<vmem>>, %arg5: memref<1x128xf32, #tpu.memory_space<vmem>>, %arg6: memref<1x128xf32, #tpu.memory_space<vmem>>, %arg7: memref<16x128xf32, #tpu.memory_space<vmem>>, %arg8: memref<16x128xf32, #tpu.memory_space<vmem>>, %arg9: memref<16x128xf32, #tpu.memory_space<vmem>>) attributes {dimension_semantics = [#tpu.dimension_semantics<parallel>, #tpu.dimension_semantics<parallel>, #tpu.dimension_semantics<arbitrary>], iteration_bounds = array<i64: 1, 1, 1>, scalar_prefetch = 0 : i64, scratch_operands = 1 : i64, tpu.core_type = #tpu.core_type<tc>, window_params = [{transform_indices = @transform_0, window_bounds = array<i64: 16, 128>}, {transform_indices = @transform_1, window_bounds = array<i64: 128, 128>}, {transform_indices = @transform_2, window_bounds = array<i64: 1, 128>}, {transform_indices = @transform_3, window_bounds = array<i64: 1, 128>}, {transform_indices = @transform_4, window_bounds = array<i64: 16, 128>}, {transform_indices = @transform_5, window_bounds = array<i64: 16, 128>}]} {
    %c0_i32 = arith.constant 0 : i32
    %0 = arith.cmpi eq, %arg2, %c0_i32 : i32
    %1 = arith.extui %0 : i1 to i32
    %c0_i32_0 = arith.constant 0 : i32
    %2 = arith.cmpi ne, %1, %c0_i32_0 : i32
    scf.if %2 {
      %cst_10 = arith.constant 0.000000e+00 : f32
      %12 = vector.broadcast %cst_10 : f32 to vector<16x128xf32>
      %c0_11 = arith.constant 0 : index
      %c0_12 = arith.constant 0 : index
      %13 = vector.load %arg9[%c0_11, %c0_12] : memref<16x128xf32, #tpu.memory_space<vmem>>, vector<16x128xf32>
      tpu.vector_store %arg9[%c0_11, %c0_12], %12 {strides = array<i32>} : memref<16x128xf32, #tpu.memory_space<vmem>>, vector<16x128xf32>,
    } else {
    }
    %c0 = arith.constant 0 : index
    %c0_1 = arith.constant 0 : index
    %3 = vector.load %arg9[%c0, %c0_1] : memref<16x128xf32, #tpu.memory_space<vmem>>, vector<16x128xf32>
    %c0_2 = arith.constant 0 : index
    %c0_3 = arith.constant 0 : index
    %4 = vector.load %arg3[%c0_2, %c0_3] : memref<16x128xbf16, #tpu.memory_space<vmem>>, vector<16x128xbf16>
    %c0_4 = arith.constant 0 : index
    %c0_5 = arith.constant 0 : index
    %5 = vector.load %arg4[%c0_4, %c0_5] : memref<128x128xbf16, #tpu.memory_space<vmem>>, vector<128x128xbf16>
    %cst = arith.constant dense<0.000000e+00> : vector<16x128xf32>
    %6 = tpu.matmul %4, %5, %cst {dimension_numbers = #tpu.dot_dimension_numbers<[1], [0], [0], [1], [0, 0, 1, 1], [], []>} : vector<16x128xbf16>, vector<128x128xbf16>, vector<16x128xf32> -> vector<16x128xf32>
    %7 = arith.addf %3, %6 : vector<16x128xf32>
    %c0_6 = arith.constant 0 : index
    %c0_7 = arith.constant 0 : index
    %8 = vector.load %arg9[%c0_6, %c0_7] : memref<16x128xf32, #tpu.memory_space<vmem>>, vector<16x128xf32>
    tpu.vector_store %arg9[%c0_6, %c0_7], %7 {strides = array<i32>} : memref<16x128xf32, #tpu.memory_space<vmem>>, vector<16x128xf32>,
    %c0_i32_8 = arith.constant 0 : i32
    %9 = arith.cmpi eq, %arg2, %c0_i32_8 : i32
    %10 = arith.extui %9 : i1 to i32
    %c0_i32_9 = arith.constant 0 : i32
    %11 = arith.cmpi ne, %10, %c0_i32_9 : i32
    scf.if %11 {
      %c0_10 = arith.constant 0 : index
      %c0_11 = arith.constant 0 : index
      %12 = vector.load %arg9[%c0_10, %c0_11] : memref<16x128xf32, #tpu.memory_space<vmem>>, vector<16x128xf32>
      %c0_12 = arith.constant 0 : index
      %c0_13 = arith.constant 0 : index
      %13 = vector.load %arg7[%c0_12, %c0_13] : memref<16x128xf32, #tpu.memory_space<vmem>>, vector<16x128xf32>
      %14 = arith.addf %12, %13 : vector<16x128xf32>
      %c0_14 = arith.constant 0 : index
      %c0_15 = arith.constant 0 : index
      %15 = vector.load %arg5[%c0_14, %c0_15] : memref<1x128xf32, #tpu.memory_space<vmem>>, vector<1x128xf32>
      %16 = vector.broadcast %15 : vector<1x128xf32> to vector<16x128xf32>
      %17 = arith.mulf %14, %16 : vector<16x128xf32>
      %c0_16 = arith.constant 0 : index
      %c0_17 = arith.constant 0 : index
      %18 = vector.load %arg6[%c0_16, %c0_17] : memref<1x128xf32, #tpu.memory_space<vmem>>, vector<1x128xf32>
      %19 = vector.broadcast %18 : vector<1x128xf32> to vector<16x128xf32>
      %20 = arith.addf %17, %19 : vector<16x128xf32>
      %cst_18 = arith.constant 0.000000e+00 : f32
      %21 = vector.broadcast %cst_18 : f32 to vector<16x128xf32>
      %22 = arith.maximumf %20, %21 : vector<16x128xf32>
      %c0_19 = arith.constant 0 : index
      %c0_20 = arith.constant 0 : index
      %23 = vector.load %arg8[%c0_19, %c0_20] : memref<16x128xf32, #tpu.memory_space<vmem>>, vector<16x128xf32>
      tpu.vector_store %arg8[%c0_19, %c0_20], %22 {strides = array<i32>} : memref<16x128xf32, #tpu.memory_space<vmem>>, vector<16x128xf32>,
    } else {
    }
    return
  }
  func.func @transform_0(%arg0: i32, %arg1: i32, %arg2: i32) -> (i32, i32) {
    %c0_i32 = arith.constant 0 : i32
    return %arg0, %arg2 : i32, i32
  }
  func.func @transform_1(%arg0: i32, %arg1: i32, %arg2: i32) -> (i32, i32) {
    %c0_i32 = arith.constant 0 : i32
    return %arg2, %arg1 : i32, i32
  }
  func.func @transform_2(%arg0: i32, %arg1: i32, %arg2: i32) -> (i32, i32) {
    %c0_i32 = arith.constant 0 : i32
    %c0_i32_0 = arith.constant 0 : i32
    return %c0_i32, %arg1 : i32, i32
  }
  func.func @transform_3(%arg0: i32, %arg1: i32, %arg2: i32) -> (i32, i32) {
    %c0_i32 = arith.constant 0 : i32
    %c0_i32_0 = arith.constant 0 : i32
    return %c0_i32, %arg1 : i32, i32
  }
  func.func @transform_4(%arg0: i32, %arg1: i32, %arg2: i32) -> (i32, i32) {
    %c0_i32 = arith.constant 0 : i32
    return %arg0, %arg1 : i32, i32
  }
  func.func @transform_5(%arg0: i32, %arg1: i32, %arg2: i32) -> (i32, i32) {
    %c0_i32 = arith.constant 0 : i32
    return %arg0, %arg1 : i32, i32
  }
}

module attributes {stable_mosaic.version = 11 : i64} {
  func.func @_avgpool_kernel(%arg0: i32, %arg1: memref<8x1x128xf32, #tpu.memory_space<vmem>>, %arg2: memref<8x128xf32, #tpu.memory_space<vmem>>) attributes {dimension_semantics = [#tpu.dimension_semantics<parallel>], iteration_bounds = array<i64: 1>, scalar_prefetch = 0 : i64, scratch_operands = 0 : i64, tpu.core_type = #tpu.core_type<tc>, window_params = [{transform_indices = @transform_0, window_bounds = array<i64: 8, 1, 128>}, {transform_indices = @transform_1, window_bounds = array<i64: 8, 128>}]} {
    %c0 = arith.constant 0 : index
    %c0_0 = arith.constant 0 : index
    %c0_1 = arith.constant 0 : index
    %0 = vector.load %arg1[%c0, %c0_0, %c0_1] : memref<8x1x128xf32, #tpu.memory_space<vmem>>, vector<8x1x128xf32>
    %1 = vector.shape_cast %0 : vector<8x1x128xf32> to vector<8x128xf32>
    %cst = arith.constant 1.000000e+00 : f32
    %2 = vector.broadcast %cst : f32 to vector<8x128xf32>
    %3 = arith.mulf %1, %2 : vector<8x128xf32>
    %c0_2 = arith.constant 0 : index
    %c0_3 = arith.constant 0 : index
    %4 = vector.load %arg2[%c0_2, %c0_3] : memref<8x128xf32, #tpu.memory_space<vmem>>, vector<8x128xf32>
    tpu.vector_store %arg2[%c0_2, %c0_3], %3 {strides = array<i32>} : memref<8x128xf32, #tpu.memory_space<vmem>>, vector<8x128xf32>,
    return
  }
  func.func @transform_0(%arg0: i32) -> (i32, i32, i32) {
    %c0_i32 = arith.constant 0 : i32
    %c0_i32_0 = arith.constant 0 : i32
    %c0_i32_1 = arith.constant 0 : i32
    return %arg0, %c0_i32, %c0_i32_0 : i32, i32, i32
  }
  func.func @transform_1(%arg0: i32) -> (i32, i32) {
    %c0_i32 = arith.constant 0 : i32
    %c0_i32_0 = arith.constant 0 : i32
    return %arg0, %c0_i32 : i32, i32
  }
}

module attributes {stable_mosaic.version = 11 : i64} {
  func.func @_mm_linear_kernel(%arg0: i32, %arg1: i32, %arg2: i32, %arg3: memref<16x384xbf16, #tpu.memory_space<vmem>>, %arg4: memref<384x256xbf16, #tpu.memory_space<vmem>>, %arg5: memref<1x256xf32, #tpu.memory_space<vmem>>, %arg6: memref<1x256xf32, #tpu.memory_space<vmem>>, %arg7: memref<16x256xf32, #tpu.memory_space<vmem>>, %arg8: memref<16x256xf32, #tpu.memory_space<vmem>>) attributes {dimension_semantics = [#tpu.dimension_semantics<parallel>, #tpu.dimension_semantics<parallel>, #tpu.dimension_semantics<arbitrary>], iteration_bounds = array<i64: 1, 8, 1>, scalar_prefetch = 0 : i64, scratch_operands = 1 : i64, tpu.core_type = #tpu.core_type<tc>, window_params = [{transform_indices = @transform_0, window_bounds = array<i64: 16, 384>}, {transform_indices = @transform_1, window_bounds = array<i64: 384, 256>}, {transform_indices = @transform_2, window_bounds = array<i64: 1, 256>}, {transform_indices = @transform_3, window_bounds = array<i64: 1, 256>}, {transform_indices = @transform_4, window_bounds = array<i64: 16, 256>}]} {
    %c0_i32 = arith.constant 0 : i32
    %0 = arith.cmpi eq, %arg2, %c0_i32 : i32
    %1 = arith.extui %0 : i1 to i32
    %c0_i32_0 = arith.constant 0 : i32
    %2 = arith.cmpi ne, %1, %c0_i32_0 : i32
    scf.if %2 {
      %cst_10 = arith.constant 0.000000e+00 : f32
      %12 = vector.broadcast %cst_10 : f32 to vector<16x256xf32>
      %c0_11 = arith.constant 0 : index
      %c0_12 = arith.constant 0 : index
      %13 = vector.load %arg8[%c0_11, %c0_12] : memref<16x256xf32, #tpu.memory_space<vmem>>, vector<16x256xf32>
      tpu.vector_store %arg8[%c0_11, %c0_12], %12 {strides = array<i32>} : memref<16x256xf32, #tpu.memory_space<vmem>>, vector<16x256xf32>,
    } else {
    }
    %c0 = arith.constant 0 : index
    %c0_1 = arith.constant 0 : index
    %3 = vector.load %arg8[%c0, %c0_1] : memref<16x256xf32, #tpu.memory_space<vmem>>, vector<16x256xf32>
    %c0_2 = arith.constant 0 : index
    %c0_3 = arith.constant 0 : index
    %4 = vector.load %arg3[%c0_2, %c0_3] : memref<16x384xbf16, #tpu.memory_space<vmem>>, vector<16x384xbf16>
    %c0_4 = arith.constant 0 : index
    %c0_5 = arith.constant 0 : index
    %5 = vector.load %arg4[%c0_4, %c0_5] : memref<384x256xbf16, #tpu.memory_space<vmem>>, vector<384x256xbf16>
    %cst = arith.constant dense<0.000000e+00> : vector<16x256xf32>
    %6 = tpu.matmul %4, %5, %cst {dimension_numbers = #tpu.dot_dimension_numbers<[1], [0], [0], [1], [0, 0, 1, 1], [], []>} : vector<16x384xbf16>, vector<384x256xbf16>, vector<16x256xf32> -> vector<16x256xf32>
    %7 = arith.addf %3, %6 : vector<16x256xf32>
    %c0_6 = arith.constant 0 : index
    %c0_7 = arith.constant 0 : index
    %8 = vector.load %arg8[%c0_6, %c0_7] : memref<16x256xf32, #tpu.memory_space<vmem>>, vector<16x256xf32>
    tpu.vector_store %arg8[%c0_6, %c0_7], %7 {strides = array<i32>} : memref<16x256xf32, #tpu.memory_space<vmem>>, vector<16x256xf32>,
    %c0_i32_8 = arith.constant 0 : i32
    %9 = arith.cmpi eq, %arg2, %c0_i32_8 : i32
    %10 = arith.extui %9 : i1 to i32
    %c0_i32_9 = arith.constant 0 : i32
    %11 = arith.cmpi ne, %10, %c0_i32_9 : i32
    scf.if %11 {
      %c0_10 = arith.constant 0 : index
      %c0_11 = arith.constant 0 : index
      %12 = vector.load %arg8[%c0_10, %c0_11] : memref<16x256xf32, #tpu.memory_space<vmem>>, vector<16x256xf32>
      %c0_12 = arith.constant 0 : index
      %c0_13 = arith.constant 0 : index
      %13 = vector.load %arg5[%c0_12, %c0_13] : memref<1x256xf32, #tpu.memory_space<vmem>>, vector<1x256xf32>
      %14 = vector.broadcast %13 : vector<1x256xf32> to vector<16x256xf32>
      %15 = arith.mulf %12, %14 : vector<16x256xf32>
      %c0_14 = arith.constant 0 : index
      %c0_15 = arith.constant 0 : index
      %16 = vector.load %arg6[%c0_14, %c0_15] : memref<1x256xf32, #tpu.memory_space<vmem>>, vector<1x256xf32>
      %17 = vector.broadcast %16 : vector<1x256xf32> to vector<16x256xf32>
      %18 = arith.addf %15, %17 : vector<16x256xf32>
      %c0_16 = arith.constant 0 : index
      %c0_17 = arith.constant 0 : index
      %19 = vector.load %arg7[%c0_16, %c0_17] : memref<16x256xf32, #tpu.memory_space<vmem>>, vector<16x256xf32>
      tpu.vector_store %arg7[%c0_16, %c0_17], %18 {strides = array<i32>} : memref<16x256xf32, #tpu.memory_space<vmem>>, vector<16x256xf32>,
    } else {
    }
    return
  }
  func.func @transform_0(%arg0: i32, %arg1: i32, %arg2: i32) -> (i32, i32) {
    %c0_i32 = arith.constant 0 : i32
    return %arg0, %arg2 : i32, i32
  }
  func.func @transform_1(%arg0: i32, %arg1: i32, %arg2: i32) -> (i32, i32) {
    %c0_i32 = arith.constant 0 : i32
    return %arg2, %arg1 : i32, i32
  }
  func.func @transform_2(%arg0: i32, %arg1: i32, %arg2: i32) -> (i32, i32) {
    %c0_i32 = arith.constant 0 : i32
    %c0_i32_0 = arith.constant 0 : i32
    return %c0_i32, %arg1 : i32, i32
  }
  func.func @transform_3(%arg0: i32, %arg1: i32, %arg2: i32) -> (i32, i32) {
    %c0_i32 = arith.constant 0 : i32
    %c0_i32_0 = arith.constant 0 : i32
    return %c0_i32, %arg1 : i32, i32
  }
  func.func @transform_4(%arg0: i32, %arg1: i32, %arg2: i32) -> (i32, i32) {
    %c0_i32 = arith.constant 0 : i32
    return %arg0, %arg1 : i32, i32
  }
}

</mosaic_0001>

<bundles_post_ra>
// kernel: _lambda_.116
= control target key start
LH: loop header
LB: loop body
LE: loop exit
PB: predicated region body
PF: predicated region fallthrough
CT: control target
= control target key end

     0   :  { %s1208_s15 = smov 0   ;;  %s1210_s16 = smov 0   ;;  %s1398_s0 = inlined_call_operand.vmem [shape: bf16[512,128], index: 0, kind: input, shape index: {}]   ;;  %s1399_s1 = inlined_call_operand.vmem [shape: bf16[128,128], index: 1, kind: input, shape index: {}]   ;;  %s1400_s2 = inlined_call_operand.vmem [shape: f32[1,128], index: 2, kind: input, shape index: {}]   ;;  %s1401_s3 = inlined_call_operand.vmem [shape: f32[1,128], index: 3, kind: input, shape index: {}]   ;;  %s1402_s4 = inlined_call_operand.vmem [shape: f32[512,128], index: 4, kind: output, shape index: {}]  }
   0x1   :  { %s1212_s17 = smov 0  }
   0x2 LB: > { %s33_s18 = sadd.s32 1, %s1177_s16  ;;  %p982_p0 = scmp.ge.s32.totalorder %s1181_s17, 1  ;;  %s1181_s17 = sphi %s1212_s17, %s14_s17   ;;  %s1177_s16 = sphi %s1210_s16, %s1404_s16   ;;  %s1173_s15 = sphi %s1208_s15, %s1403_s15  }
   0x3   : > { %p35_p1 = scmp.ge.s32.totalorder %s33_s18, 2  ;;  %p221_p2 = scmp.lt.s32.totalorder %s1181_s17, 3 }
   0x5   : > { %s1406_s18 = smov (%p35_p1, %s33_s18), 0  ;;  %p222_p3 = pnand %p982_p0, %p221_p2 }
   0x6   : > { %s983_s27 = sshll.u32 (!%p222_p3), %s1173_s15, 5 }
   0x7   : > { %225 = sbr.rel (%p222_p3) target bundleno = 239 (0xef), region = 36  ;;  %p268_p4 = scmp.lt.s32.totalorder (!%p222_p3), %s983_s27, 63 }
   0xc   : > { %v1108_v0 = vld [vmem:[%s1399_s1 + $0x38] sm:$0xff]  ;;  %v1107_v1 = vld [vmem:[%s1399_s1 + $0x30] sm:$0xff]  ;;  %v1106_v2 = vld [vmem:[%s1399_s1 + $0x28] sm:$0xff]  ;;  %s1408_s27 = smov (!%p268_p4, %s983_s27), 63 }
   0xd   : > { %560 = vmatpush.bf16.msra.mxu0 %v1108_v0  ;;  %1109 = vmatpush.bf16.msra.mxu1 %v1108_v0  ;;  %v1105_v3 = vld [vmem:[%s1399_s1 + $0x20] sm:$0xff]  ;;  %v1104_v4 = vld [vmem:[%s1399_s1 + $0x18] sm:$0xff]  ;;  %v1103_v5 = vld [vmem:[%s1399_s1 + $0x10] sm:$0xff]  ;;  %s984_s8 = sshll.u32 %s1408_s27, 2  ;;  %s986_s19 = sshll.u32 %s1408_s27, 3 }
   0xe   : > { %1110 = vmatpush.bf16.msra.mxu2 %v1108_v0  ;;  %1111 = vmatpush.bf16.msra.mxu3 %v1108_v0  ;;  %v1102_v6 = vld [vmem:[%s1399_s1 + $0x8] sm:$0xff]  ;;  %v1101_v7 = vld [vmem:[%s1399_s1] sm:$0xff]  ;;  %s1259_s13 = scalar_lea.vmem %s1398_s0, %s984_s8  ;;  %s1293_s24 = scalar_lea.vmem %s1402_s4, %s986_s19 }
   0xf   : > { %v1085_v8 = vld [vmem:[%s1259_s13] sm:$0xff]  ;;  %v1086_v12 = vld [vmem:[%s1259_s13 + $0x8] sm:$0xff]  ;;  %v1087_v16 = vld [vmem:[%s1259_s13 + $0x10] sm:$0xff] }
  0x10   : > { %v1089_v9 = vld [vmem:[%s1259_s13 + $0x20] sm:$0xff]  ;;  %v1090_v13 = vld [vmem:[%s1259_s13 + $0x28] sm:$0xff]  ;;  %v1091_v17 = vld [vmem:[%s1259_s13 + $0x30] sm:$0xff] }
  0x11   : > { %561 = vmatpush.bf16.msra.mxu0 %v1107_v1  ;;  %1112 = vmatpush.bf16.msra.mxu1 %v1107_v1  ;;  %v1093_v10 = vld [vmem:[%s1259_s13 + $0x40] sm:$0xff]  ;;  %v1094_v14 = vld [vmem:[%s1259_s13 + $0x48] sm:$0xff]  ;;  %v1095_v18 = vld [vmem:[%s1259_s13 + $0x50] sm:$0xff] }
  0x12   : > { %1113 = vmatpush.bf16.msra.mxu2 %v1107_v1  ;;  %1114 = vmatpush.bf16.msra.mxu3 %v1107_v1  ;;  %v1097_v11 = vld [vmem:[%s1259_s13 + $0x60] sm:$0xff]  ;;  %v1098_v15 = vld [vmem:[%s1259_s13 + $0x68] sm:$0xff]  ;;  %v1099_v19 = vld [vmem:[%s1259_s13 + $0x70] sm:$0xff] }
  0x13   : > { %v1088_v20 = vld [vmem:[%s1259_s13 + $0x18] sm:$0xff]  ;;  %v1280_v24 = vld [vmem:[%s1400_s2] ss:$0 sm:$0xff] }
  0x14   : > { %v1092_v21 = vld [vmem:[%s1259_s13 + $0x38] sm:$0xff]  ;;  %v1286_v25 = vld [vmem:[%s1401_s3] ss:$0 sm:$0xff] }
  0x15   : > { %562 = vmatpush.bf16.msra.mxu0 %v1106_v2  ;;  %1115 = vmatpush.bf16.msra.mxu1 %v1106_v2  ;;  %v1096_v22 = vld [vmem:[%s1259_s13 + $0x58] sm:$0xff] }
  0x16   : > { %1116 = vmatpush.bf16.msra.mxu2 %v1106_v2  ;;  %1117 = vmatpush.bf16.msra.mxu3 %v1106_v2  ;;  %v1100_v23 = vld [vmem:[%s1259_s13 + $0x78] sm:$0xff] }
  0x19   : > { %563 = vmatpush.bf16.msra.mxu0 %v1105_v3  ;;  %1118 = vmatpush.bf16.msra.mxu1 %v1105_v3 }
  0x1a   : > { %1119 = vmatpush.bf16.msra.mxu2 %v1105_v3  ;;  %1120 = vmatpush.bf16.msra.mxu3 %v1105_v3 }
  0x1d   : > { %564 = vmatpush.bf16.msra.mxu0 %v1104_v4  ;;  %1121 = vmatpush.bf16.msra.mxu1 %v1104_v4 }
  0x1e   : > { %1122 = vmatpush.bf16.msra.mxu2 %v1104_v4  ;;  %1123 = vmatpush.bf16.msra.mxu3 %v1104_v4 }
  0x21   : > { %565 = vmatpush.bf16.msra.mxu0 %v1103_v5  ;;  %1124 = vmatpush.bf16.msra.mxu1 %v1103_v5 }
  0x22   : > { %1125 = vmatpush.bf16.msra.mxu2 %v1103_v5  ;;  %1126 = vmatpush.bf16.msra.mxu3 %v1103_v5 }
  0x25   : > { %566 = vmatpush.bf16.msra.mxu0 %v1102_v6  ;;  %1127 = vmatpush.bf16.msra.mxu1 %v1102_v6 }
  0x26   : > { %1128 = vmatpush.bf16.msra.mxu2 %v1102_v6  ;;  %1129 = vmatpush.bf16.msra.mxu3 %v1102_v6 }
  0x29   : > { %567 = vmatpush.bf16.msra.mxu0 %v1101_v7  ;;  %1130 = vmatpush.bf16.msra.mxu1 %v1101_v7 }
  0x2a   : > { %1131 = vmatpush.bf16.msra.mxu2 %v1101_v7  ;;  %1132 = vmatpush.bf16.msra.mxu3 %v1101_v7 }
  0x2c   : > { %568 = vmatmul.bf16.vlgmr.msra.gmra.mxu0 %v1085_v8  ;;  %588 = vmatmul.bf16.vlgmr.msra.gmra.mxu1 %v1089_v9 }
  0x2d   : > { %608 = vmatmul.bf16.vlgmr.msra.gmra.mxu2 %v1093_v10  ;;  %628 = vmatmul.bf16.vlgmr.msra.gmra.mxu3 %v1097_v11 }
  0x3c   : > { %573 = vmatmul.bf16.gmra.mxu0 %v1086_v12  ;;  %593 = vmatmul.bf16.gmra.mxu1 %v1090_v13 }
  0x3d   : > { %613 = vmatmul.bf16.gmra.mxu2 %v1094_v14  ;;  %633 = vmatmul.bf16.gmra.mxu3 %v1098_v15 }
  0x4c   : > { %578 = vmatmul.bf16.gmra.mxu0 %v1087_v16  ;;  %598 = vmatmul.bf16.gmra.mxu1 %v1091_v17 }
  0x4d   : > { %618 = vmatmul.bf16.gmra.mxu2 %v1095_v18  ;;  %638 = vmatmul.bf16.gmra.mxu3 %v1099_v19 }
  0x5c   : > { %583 = vmatmul.bf16.gmra.mxu0 %v1088_v20  ;;  %603 = vmatmul.bf16.gmra.mxu1 %v1092_v21 }
  0x5d   : > { %623 = vmatmul.bf16.gmra.mxu2 %v1096_v22  ;;  %643 = vmatmul.bf16.gmra.mxu3 %v1100_v23 }
  0xa9   : > { %v569_v26 = vpop.f32.mrf.mxu0  ;;  %v589_v27 = vpop.f32.mrf.mxu1 }
  0xaa   : > { %v752_v28 = vmul.f32 %v1280_v24, %v569_v26  ;;  %v760_v29 = vmul.f32 %v1280_v24, %v589_v27 }
  0xac   : > { %v788_v30 = vadd.f32 %v1286_v25, %v752_v28  ;;  %v796_v31 = vadd.f32 %v1286_v25, %v760_v29 }
  0xae   : > { %820 = vst [vmem:[%s1293_s24] sm:$0xff] %v788_v30 }
  0xaf   : > { %828 = vst [vmem:[%s1293_s24 + $0x40] sm:$0xff] %v796_v31 }
  0xb0   : > { %v609_v32 = vpop.f32.mrf.mxu2  ;;  %v629_v33 = vpop.f32.mrf.mxu3 }
  0xb1   : > { %v768_v34 = vmul.f32 %v1280_v24, %v609_v32  ;;  %v776_v35 = vmul.f32 %v1280_v24, %v629_v33  ;;  %v571_v36 = vpop.f32.mrf.mxu0  ;;  %v591_v37 = vpop.f32.mrf.mxu1 }
  0xb2   : > { %v753_v38 = vmul.f32 %v1280_v24, %v571_v36  ;;  %v761_v39 = vmul.f32 %v1280_v24, %v591_v37 }
  0xb3   : > { %v804_v40 = vadd.f32 %v1286_v25, %v768_v34  ;;  %v812_v41 = vadd.f32 %v1286_v25, %v776_v35 }
  0xb4   : > { %v789_v42 = vadd.f32 %v1286_v25, %v753_v38  ;;  %v797_v43 = vadd.f32 %v1286_v25, %v761_v39 }
  0xb5   : > { %836 = vst [vmem:[%s1293_s24 + $0x80] sm:$0xff] %v804_v40 }
  0xb6   : > { %844 = vst [vmem:[%s1293_s24 + $0xc0] sm:$0xff] %v812_v41 }
  0xb7   : > { %821 = vst [vmem:[%s1293_s24 + $0x8] sm:$0xff] %v789_v42 }
  0xb8   : > { %829 = vst [vmem:[%s1293_s24 + $0x48] sm:$0xff] %v797_v43  ;;  %v611_v44 = vpop.f32.mrf.mxu2  ;;  %v631_v45 = vpop.f32.mrf.mxu3 }
  0xb9   : > { %v769_v46 = vmul.f32 %v1280_v24, %v611_v44  ;;  %v777_v47 = vmul.f32 %v1280_v24, %v631_v45  ;;  %v574_v48 = vpop.f32.mrf.mxu0  ;;  %v594_v49 = vpop.f32.mrf.mxu1 }
  0xba   : > { %v754_v50 = vmul.f32 %v1280_v24, %v574_v48  ;;  %v762_v51 = vmul.f32 %v1280_v24, %v594_v49 }
  0xbb   : > { %v805_v52 = vadd.f32 %v1286_v25, %v769_v46  ;;  %v813_v53 = vadd.f32 %v1286_v25, %v777_v47 }
  0xbc   : > { %v790_v54 = vadd.f32 %v1286_v25, %v754_v50  ;;  %v798_v55 = vadd.f32 %v1286_v25, %v762_v51 }
  0xbd   : > { %837 = vst [vmem:[%s1293_s24 + $0x88] sm:$0xff] %v805_v52 }
  0xbe   : > { %845 = vst [vmem:[%s1293_s24 + $0xc8] sm:$0xff] %v813_v53 }
  0xbf   : > { %822 = vst [vmem:[%s1293_s24 + $0x10] sm:$0xff] %v790_v54 }
  0xc0   : > { %830 = vst [vmem:[%s1293_s24 + $0x50] sm:$0xff] %v798_v55  ;;  %v614_v56 = vpop.f32.mrf.mxu2  ;;  %v634_v57 = vpop.f32.mrf.mxu3 }
  0xc1   : > { %v770_v58 = vmul.f32 %v1280_v24, %v614_v56  ;;  %v778_v59 = vmul.f32 %v1280_v24, %v634_v57  ;;  %v576_v60 = vpop.f32.mrf.mxu0  ;;  %v596_v61 = vpop.f32.mrf.mxu1 }
  0xc2   : > { %v755_v62 = vmul.f32 %v1280_v24, %v576_v60  ;;  %v763_v63 = vmul.f32 %v1280_v24, %v596_v61 }
  0xc3   : > { %v806_v0 = vadd.f32 %v1286_v25, %v770_v58  ;;  %v814_v1 = vadd.f32 %v1286_v25, %v778_v59 }
  0xc4   : > { %v791_v2 = vadd.f32 %v1286_v25, %v755_v62  ;;  %v799_v3 = vadd.f32 %v1286_v25, %v763_v63 }
  0xc5   : > { %838 = vst [vmem:[%s1293_s24 + $0x90] sm:$0xff] %v806_v0 }
  0xc6   : > { %846 = vst [vmem:[%s1293_s24 + $0xd0] sm:$0xff] %v814_v1 }
  0xc7   : > { %823 = vst [vmem:[%s1293_s24 + $0x18] sm:$0xff] %v791_v2 }
  0xc8   : > { %831 = vst [vmem:[%s1293_s24 + $0x58] sm:$0xff] %v799_v3  ;;  %v616_v4 = vpop.f32.mrf.mxu2  ;;  %v636_v5 = vpop.f32.mrf.mxu3 }
  0xc9   : > { %v771_v6 = vmul.f32 %v1280_v24, %v616_v4  ;;  %v779_v7 = vmul.f32 %v1280_v24, %v636_v5  ;;  %v579_v8 = vpop.f32.mrf.mxu0  ;;  %v599_v9 = vpop.f32.mrf.mxu1 }
  0xca   : > { %v756_v10 = vmul.f32 %v1280_v24, %v579_v8  ;;  %v764_v11 = vmul.f32 %v1280_v24, %v599_v9 }
  0xcb   : > { %v807_v12 = vadd.f32 %v1286_v25, %v771_v6  ;;  %v815_v13 = vadd.f32 %v1286_v25, %v779_v7 }
  0xcc   : > { %v792_v14 = vadd.f32 %v1286_v25, %v756_v10  ;;  %v800_v15 = vadd.f32 %v1286_v25, %v764_v11 }
  0xcd   : > { %839 = vst [vmem:[%s1293_s24 + $0x98] sm:$0xff] %v807_v12 }
  0xce   : > { %847 = vst [vmem:[%s1293_s24 + $0xd8] sm:$0xff] %v815_v13 }
  0xcf   : > { %824 = vst [vmem:[%s1293_s24 + $0x20] sm:$0xff] %v792_v14 }
  0xd0   : > { %832 = vst [vmem:[%s1293_s24 + $0x60] sm:$0xff] %v800_v15  ;;  %v619_v16 = vpop.f32.mrf.mxu2  ;;  %v639_v17 = vpop.f32.mrf.mxu3 }
  0xd1   : > { %v772_v18 = vmul.f32 %v1280_v24, %v619_v16  ;;  %v780_v19 = vmul.f32 %v1280_v24, %v639_v17  ;;  %v581_v20 = vpop.f32.mrf.mxu0  ;;  %v601_v21 = vpop.f32.mrf.mxu1 }
  0xd2   : > { %v757_v22 = vmul.f32 %v1280_v24, %v581_v20  ;;  %v765_v23 = vmul.f32 %v1280_v24, %v601_v21 }
  0xd3   : > { %v808_v26 = vadd.f32 %v1286_v25, %v772_v18  ;;  %v816_v27 = vadd.f32 %v1286_v25, %v780_v19 }
  0xd4   : > { %v793_v28 = vadd.f32 %v1286_v25, %v757_v22  ;;  %v801_v29 = vadd.f32 %v1286_v25, %v765_v23 }
  0xd5   : > { %840 = vst [vmem:[%s1293_s24 + $0xa0] sm:$0xff] %v808_v26 }
  0xd6   : > { %848 = vst [vmem:[%s1293_s24 + $0xe0] sm:$0xff] %v816_v27 }
  0xd7   : > { %825 = vst [vmem:[%s1293_s24 + $0x28] sm:$0xff] %v793_v28 }
  0xd8   : > { %833 = vst [vmem:[%s1293_s24 + $0x68] sm:$0xff] %v801_v29  ;;  %v621_v30 = vpop.f32.mrf.mxu2  ;;  %v641_v31 = vpop.f32.mrf.mxu3 }
  0xd9   : > { %v773_v32 = vmul.f32 %v1280_v24, %v621_v30  ;;  %v781_v33 = vmul.f32 %v1280_v24, %v641_v31  ;;  %v584_v34 = vpop.f32.mrf.mxu0  ;;  %v604_v35 = vpop.f32.mrf.mxu1 }
  0xda   : > { %v758_v36 = vmul.f32 %v1280_v24, %v584_v34  ;;  %v766_v37 = vmul.f32 %v1280_v24, %v604_v35 }
  0xdb   : > { %v809_v38 = vadd.f32 %v1286_v25, %v773_v32  ;;  %v817_v39 = vadd.f32 %v1286_v25, %v781_v33 }
  0xdc   : > { %v794_v40 = vadd.f32 %v1286_v25, %v758_v36  ;;  %v802_v41 = vadd.f32 %v1286_v25, %v766_v37 }
  0xdd   : > { %841 = vst [vmem:[%s1293_s24 + $0xa8] sm:$0xff] %v809_v38 }
  0xde   : > { %849 = vst [vmem:[%s1293_s24 + $0xe8] sm:$0xff] %v817_v39 }
  0xdf   : > { %826 = vst [vmem:[%s1293_s24 + $0x30] sm:$0xff] %v794_v40 }
  0xe0   : > { %834 = vst [vmem:[%s1293_s24 + $0x70] sm:$0xff] %v802_v41  ;;  %v624_v42 = vpop.f32.mrf.mxu2  ;;  %v644_v43 = vpop.f32.mrf.mxu3 }
  0xe1   : > { %v774_v44 = vmul.f32 %v1280_v24, %v624_v42  ;;  %v782_v45 = vmul.f32 %v1280_v24, %v644_v43  ;;  %v586_v46 = vpop.f32.mrf.mxu0  ;;  %v606_v47 = vpop.f32.mrf.mxu1 }
  0xe2   : > { %v759_v48 = vmul.f32 %v1280_v24, %v586_v46  ;;  %v767_v49 = vmul.f32 %v1280_v24, %v606_v47 }
  0xe3   : > { %v810_v50 = vadd.f32 %v1286_v25, %v774_v44  ;;  %v818_v51 = vadd.f32 %v1286_v25, %v782_v45 }
  0xe4   : > { %v795_v52 = vadd.f32 %v1286_v25, %v759_v48  ;;  %v803_v53 = vadd.f32 %v1286_v25, %v767_v49 }
  0xe5   : > { %842 = vst [vmem:[%s1293_s24 + $0xb0] sm:$0xff] %v810_v50 }
  0xe6   : > { %850 = vst [vmem:[%s1293_s24 + $0xf0] sm:$0xff] %v818_v51 }
  0xe7   : > { %827 = vst [vmem:[%s1293_s24 + $0x38] sm:$0xff] %v795_v52 }
  0xe8   : > { %835 = vst [vmem:[%s1293_s24 + $0x78] sm:$0xff] %v803_v53  ;;  %v626_v54 = vpop.f32.mrf.mxu2  ;;  %v646_v55 = vpop.f32.mrf.mxu3 }
  0xe9   : > { %v775_v56 = vmul.f32 %v1280_v24, %v626_v54  ;;  %v783_v57 = vmul.f32 %v1280_v24, %v646_v55 }
  0xeb   : > { %v811_v58 = vadd.f32 %v1286_v25, %v775_v56  ;;  %v819_v59 = vadd.f32 %v1286_v25, %v783_v57 }
  0xed   : > { %843 = vst [vmem:[%s1293_s24 + $0xb8] sm:$0xff] %v811_v58 }
  0xee   : > { %851 = vst [vmem:[%s1293_s24 + $0xf8] sm:$0xff] %v819_v59 }
  0xef PF: > { %s14_s17 = sadd.s32 1, %s1181_s17   ;;  %s1403_s15 = smov %s1177_s16 }
  0xf0   : > { %p11_p5 = scmp.ge.s32.totalorder %s14_s17, 4   ;;  %s1404_s16 = smov %s1406_s18 }
  0xf2   :  { %13 = sbr.rel (!%p11_p5) target bundleno = 2 (0x2), region = 83 }

// kernel: _lambda_.117
= control target key start
LH: loop header
LB: loop body
LE: loop exit
PB: predicated region body
PF: predicated region fallthrough
CT: control target
= control target key end

     0   :  { %s1550_s15 = smov 0   ;;  %s1552_s16 = smov 0   ;;  %s1815_s0 = inlined_call_operand.vmem [shape: bf16[512,256], index: 0, kind: input, shape index: {}]   ;;  %s1816_s1 = inlined_call_operand.vmem [shape: bf16[256,128], index: 1, kind: input, shape index: {}]   ;;  %s1817_s2 = inlined_call_operand.vmem [shape: f32[1,128], index: 2, kind: input, shape index: {}]   ;;  %s1818_s3 = inlined_call_operand.vmem [shape: f32[1,128], index: 3, kind: input, shape index: {}]   ;;  %s1819_s4 = inlined_call_operand.vmem [shape: f32[512,128], index: 4, kind: output, shape index: {}]  }
   0x1   :  { %s1554_s17 = smov 0  }
   0x2 LB: > { %s33_s18 = sadd.s32 1, %s1519_s16  ;;  %p1210_p0 = scmp.ge.s32.totalorder %s1523_s17, 1  ;;  %s1523_s17 = sphi %s1554_s17, %s14_s17   ;;  %s1519_s16 = sphi %s1552_s16, %s1821_s16   ;;  %s1515_s15 = sphi %s1550_s15, %s1820_s15  }
   0x3   : > { %p35_p1 = scmp.ge.s32.totalorder %s33_s18, 2  ;;  %p224_p2 = scmp.lt.s32.totalorder %s1523_s17, 3 }
   0x5   : > { %s1823_s18 = smov (%p35_p1, %s33_s18), 0  ;;  %p225_p3 = pnand %p1210_p0, %p224_p2 }
   0x6   : > { %s1211_s5 = sshll.u32 (!%p225_p3), %s1515_s15, 5 }
   0x7   : > { %228 = sbr.rel (%p225_p3) target bundleno = 304 (0x130), region = 36  ;;  %p274_p4 = scmp.lt.s32.totalorder (!%p225_p3), %s1211_s5, 63 }
   0xc   : > { %v1450_v0 = vld [vmem:[%s1816_s1 + $0x38] sm:$0xff]  ;;  %v1449_v2 = vld [vmem:[%s1816_s1 + $0x30] sm:$0xff]  ;;  %v1448_v4 = vld [vmem:[%s1816_s1 + $0x28] sm:$0xff]  ;;  %s1825_s5 = smov (!%p274_p4, %s1211_s5), 63 }
   0xd   : > { %v1458_v1 = vld [vmem:[%s1816_s1 + $0x78] sm:$0xff]  ;;  %696 = vmatpush.bf16.msra.mxu0 %v1450_v0  ;;  %1459 = vmatpush.bf16.msra.mxu2 %v1450_v0  ;;  %v1457_v3 = vld [vmem:[%s1816_s1 + $0x70] sm:$0xff]  ;;  %v1456_v5 = vld [vmem:[%s1816_s1 + $0x68] sm:$0xff]  ;;  %s1410_s21 = sshll.u32 %s1825_s5, 3 }
   0xe   : > { %785 = vmatpush.bf16.msra.mxu1 %v1458_v1  ;;  %1467 = vmatpush.bf16.msra.mxu3 %v1458_v1  ;;  %v1447_v6 = vld [vmem:[%s1816_s1 + $0x20] sm:$0xff]  ;;  %v1446_v8 = vld [vmem:[%s1816_s1 + $0x18] sm:$0xff]  ;;  %v1445_v10 = vld [vmem:[%s1816_s1 + $0x10] sm:$0xff]  ;;  %s1618_s26 = scalar_lea.vmem %s1815_s0, %s1410_s21  ;;  %s1709_s14 = scalar_lea.vmem %s1819_s4, %s1410_s21 }
   0xf   : > { %v1455_v7 = vld [vmem:[%s1816_s1 + $0x60] sm:$0xff]  ;;  %v1454_v9 = vld [vmem:[%s1816_s1 + $0x58] sm:$0xff]  ;;  %v1453_v11 = vld [vmem:[%s1816_s1 + $0x50] sm:$0xff] }
  0x10   : > { %v1444_v12 = vld [vmem:[%s1816_s1 + $0x8] sm:$0xff]  ;;  %v1443_v14 = vld [vmem:[%s1816_s1] sm:$0xff]  ;;  %v1226_v28 = vld [vmem:[%s1618_s26 + $0x10] sm:$0xf] }
  0x11   : > { %697 = vmatpush.bf16.msra.mxu0 %v1449_v2  ;;  %1460 = vmatpush.bf16.msra.mxu2 %v1449_v2  ;;  %v1452_v13 = vld [vmem:[%s1816_s1 + $0x48] sm:$0xff]  ;;  %v1451_v15 = vld [vmem:[%s1816_s1 + $0x40] sm:$0xff]  ;;  %v1414_v29 = vld [vmem:[%s1618_s26 + $0x14] sm:$0xf0] }
  0x12   : > { %786 = vmatpush.bf16.msra.mxu1 %v1457_v3  ;;  %1468 = vmatpush.bf16.msra.mxu3 %v1457_v3  ;;  %v1218_v16 = vld [vmem:[%s1618_s26] sm:$0xf]  ;;  %v1412_v17 = vld [vmem:[%s1618_s26 + $0x4] sm:$0xf0]  ;;  %v1411_v20 = vld [vmem:[%s1618_s26 + $0x4] sm:$0xf]  ;;  %v1227_v36 = vor.u32 %v1414_v29, %v1226_v28 }
  0x13   : > { %v1282_v18 = vld [vmem:[%s1618_s26 + $0x80] sm:$0xf]  ;;  %v1428_v19 = vld [vmem:[%s1618_s26 + $0x84] sm:$0xf0]  ;;  %v1220_v21 = vld [vmem:[%s1618_s26 + $0x8] sm:$0xf0]  ;;  %v1219_v24 = vor.u32 %v1412_v17, %v1218_v16 }
  0x14   : > { %v1427_v22 = vld [vmem:[%s1618_s26 + $0x84] sm:$0xf]  ;;  %v1284_v23 = vld [vmem:[%s1618_s26 + $0x88] sm:$0xf0]  ;;  %v1283_v25 = vor.u32 %v1428_v19, %v1282_v18  ;;  %v1223_v26 = vor.u32 %v1411_v20, %v1220_v21  ;;  %v1290_v30 = vld [vmem:[%s1618_s26 + $0x90] sm:$0xf] }
  0x15   : > { %698 = vmatpush.bf16.msra.mxu0 %v1448_v4  ;;  %1461 = vmatpush.bf16.msra.mxu2 %v1448_v4  ;;  %v1287_v27 = vor.u32 %v1427_v22, %v1284_v23  ;;  %v1430_v31 = vld [vmem:[%s1618_s26 + $0x94] sm:$0xf0]  ;;  %v1413_v32 = vld [vmem:[%s1618_s26 + $0x14] sm:$0xf]  ;;  %v1228_v33 = vld [vmem:[%s1618_s26 + $0x18] sm:$0xf0] }
  0x16   : > { %787 = vmatpush.bf16.msra.mxu1 %v1456_v5  ;;  %1469 = vmatpush.bf16.msra.mxu3 %v1456_v5  ;;  %v1429_v34 = vld [vmem:[%s1618_s26 + $0x94] sm:$0xf]  ;;  %v1292_v35 = vld [vmem:[%s1618_s26 + $0x98] sm:$0xf0]  ;;  %v1291_v37 = vor.u32 %v1430_v31, %v1290_v30  ;;  %v1231_v38 = vor.u32 %v1413_v32, %v1228_v33  ;;  %v1234_v40 = vld [vmem:[%s1618_s26 + $0x20] sm:$0xf] }
  0x17   : > { %v1295_v39 = vor.u32 %v1429_v34, %v1292_v35  ;;  %v1416_v41 = vld [vmem:[%s1618_s26 + $0x24] sm:$0xf0]  ;;  %v1298_v42 = vld [vmem:[%s1618_s26 + $0xa0] sm:$0xf]  ;;  %v1415_v44 = vld [vmem:[%s1618_s26 + $0x24] sm:$0xf] }
  0x18   : > { %v1432_v43 = vld [vmem:[%s1618_s26 + $0xa4] sm:$0xf0]  ;;  %v1236_v45 = vld [vmem:[%s1618_s26 + $0x28] sm:$0xf0]  ;;  %v1431_v46 = vld [vmem:[%s1618_s26 + $0xa4] sm:$0xf]  ;;  %v1235_v48 = vor.u32 %v1416_v41, %v1234_v40 }
  0x19   : > { %699 = vmatpush.bf16.msra.mxu0 %v1447_v6  ;;  %1462 = vmatpush.bf16.msra.mxu2 %v1447_v6  ;;  %v1300_v47 = vld [vmem:[%s1618_s26 + $0xa8] sm:$0xf0]  ;;  %v1299_v49 = vor.u32 %v1432_v43, %v1298_v42  ;;  %v1239_v50 = vor.u32 %v1415_v44, %v1236_v45  ;;  %v1242_v52 = vld [vmem:[%s1618_s26 + $0x30] sm:$0xf]  ;;  %v1418_v53 = vld [vmem:[%s1618_s26 + $0x34] sm:$0xf0] }
  0x1a   : > { %788 = vmatpush.bf16.msra.mxu1 %v1455_v7  ;;  %1470 = vmatpush.bf16.msra.mxu3 %v1455_v7  ;;  %v1303_v51 = vor.u32 %v1431_v46, %v1300_v47  ;;  %v1306_v54 = vld [vmem:[%s1618_s26 + $0xb0] sm:$0xf]  ;;  %v1434_v55 = vld [vmem:[%s1618_s26 + $0xb4] sm:$0xf0]  ;;  %v1417_v56 = vld [vmem:[%s1618_s26 + $0x34] sm:$0xf]  ;;  %v1243_v60 = vor.u32 %v1418_v53, %v1242_v52 }
  0x1b   : > { %v1244_v57 = vld [vmem:[%s1618_s26 + $0x38] sm:$0xf0]  ;;  %v1433_v58 = vld [vmem:[%s1618_s26 + $0xb4] sm:$0xf]  ;;  %v1307_v61 = vor.u32 %v1434_v55, %v1306_v54  ;;  %v1250_v0 = vld [vmem:[%s1618_s26 + $0x40] sm:$0xf] }
  0x1c   : > { %v1308_v59 = vld [vmem:[%s1618_s26 + $0xb8] sm:$0xf0]  ;;  %v1247_v62 = vor.u32 %v1417_v56, %v1244_v57  ;;  %v1420_v1 = vld [vmem:[%s1618_s26 + $0x44] sm:$0xf0]  ;;  %v1314_v2 = vld [vmem:[%s1618_s26 + $0xc0] sm:$0xf] }
  0x1d   : > { %700 = vmatpush.bf16.msra.mxu0 %v1446_v8  ;;  %1463 = vmatpush.bf16.msra.mxu2 %v1446_v8  ;;  %v1311_v63 = vor.u32 %v1433_v58, %v1308_v59  ;;  %v1436_v3 = vld [vmem:[%s1618_s26 + $0xc4] sm:$0xf0]  ;;  %v1419_v4 = vld [vmem:[%s1618_s26 + $0x44] sm:$0xf]  ;;  %v1252_v5 = vld [vmem:[%s1618_s26 + $0x48] sm:$0xf0]  ;;  %v1251_v8 = vor.u32 %v1420_v1, %v1250_v0 }
  0x1e   : > { %789 = vmatpush.bf16.msra.mxu1 %v1454_v9  ;;  %1471 = vmatpush.bf16.msra.mxu3 %v1454_v9  ;;  %v1435_v6 = vld [vmem:[%s1618_s26 + $0xc4] sm:$0xf]  ;;  %v1316_v7 = vld [vmem:[%s1618_s26 + $0xc8] sm:$0xf0]  ;;  %v1315_v9 = vor.u32 %v1436_v3, %v1314_v2  ;;  %v1421_v16 = vld [vmem:[%s1618_s26 + $0x54] sm:$0xf] }
  0x1f   : > { %v1260_v17 = vld [vmem:[%s1618_s26 + $0x58] sm:$0xf0]  ;;  %v1437_v18 = vld [vmem:[%s1618_s26 + $0xd4] sm:$0xf]  ;;  %v1423_v28 = vld [vmem:[%s1618_s26 + $0x64] sm:$0xf] }
  0x20   : > { %v1324_v19 = vld [vmem:[%s1618_s26 + $0xd8] sm:$0xf0]  ;;  %v1263_v22 = vor.u32 %v1421_v16, %v1260_v17  ;;  %v1268_v29 = vld [vmem:[%s1618_s26 + $0x68] sm:$0xf0]  ;;  %v1439_v30 = vld [vmem:[%s1618_s26 + $0xe4] sm:$0xf] }
  0x21   : > { %701 = vmatpush.bf16.msra.mxu0 %v1445_v10  ;;  %1464 = vmatpush.bf16.msra.mxu2 %v1445_v10  ;;  %v1255_v10 = vor.u32 %v1419_v4, %v1252_v5  ;;  %v1327_v23 = vor.u32 %v1437_v18, %v1324_v19  ;;  %v1332_v31 = vld [vmem:[%s1618_s26 + $0xe8] sm:$0xf0]  ;;  %v1271_v34 = vor.u32 %v1423_v28, %v1268_v29  ;;  %v1425_v40 = vld [vmem:[%s1618_s26 + $0x74] sm:$0xf]  ;;  %v1276_v41 = vld [vmem:[%s1618_s26 + $0x78] sm:$0xf0] }
  0x22   : > { %790 = vmatpush.bf16.msra.mxu1 %v1453_v11  ;;  %1472 = vmatpush.bf16.msra.mxu3 %v1453_v11  ;;  %v1319_v11 = vor.u32 %v1435_v6, %v1316_v7  ;;  %v1335_v35 = vor.u32 %v1439_v30, %v1332_v31  ;;  %v1441_v42 = vld [vmem:[%s1618_s26 + $0xf4] sm:$0xf]  ;;  %v1340_v43 = vld [vmem:[%s1618_s26 + $0xf8] sm:$0xf0]  ;;  %v1279_v46 = vor.u32 %v1425_v40, %v1276_v41  ;;  %v1701_v52 = vld [vmem:[%s1818_s3] ss:$0 sm:$0xff] }
  0x23   : > { %v1343_v47 = vor.u32 %v1441_v42, %v1340_v43 }
  0x25   : > { %702 = vmatpush.bf16.msra.mxu0 %v1444_v12  ;;  %1465 = vmatpush.bf16.msra.mxu2 %v1444_v12  ;;  %v1258_v12 = vld [vmem:[%s1618_s26 + $0x50] sm:$0xf] }
  0x26   : > { %791 = vmatpush.bf16.msra.mxu1 %v1452_v13  ;;  %1473 = vmatpush.bf16.msra.mxu3 %v1452_v13  ;;  %v1422_v13 = vld [vmem:[%s1618_s26 + $0x54] sm:$0xf0] }
  0x27   : > { %v1259_v20 = vor.u32 %v1422_v13, %v1258_v12 }
  0x29   : > { %703 = vmatpush.bf16.msra.mxu0 %v1443_v14  ;;  %1466 = vmatpush.bf16.msra.mxu2 %v1443_v14  ;;  %v1322_v14 = vld [vmem:[%s1618_s26 + $0xd0] sm:$0xf] }
  0x2a   : > { %792 = vmatpush.bf16.msra.mxu1 %v1451_v15  ;;  %1474 = vmatpush.bf16.msra.mxu3 %v1451_v15  ;;  %v1438_v15 = vld [vmem:[%s1618_s26 + $0xd4] sm:$0xf0] }
  0x2b   : > { %v1323_v21 = vor.u32 %v1438_v15, %v1322_v14 }
  0x2c   : > { %704 = vmatmul.bf16.vlgmr.msra.gmra.mxu0 %v1219_v24  ;;  %744 = vmatmul.bf16.vlgmr.msra.gmra.mxu2 %v1283_v25  ;;  %v1266_v24 = vld [vmem:[%s1618_s26 + $0x60] sm:$0xf]  ;;  %v1424_v25 = vld [vmem:[%s1618_s26 + $0x64] sm:$0xf0] }
  0x2d   : > { %793 = vmatmul.bf16.vlgmr.msra.gmra.mxu1 %v1223_v26  ;;  %833 = vmatmul.bf16.vlgmr.msra.gmra.mxu3 %v1287_v27  ;;  %v1330_v26 = vld [vmem:[%s1618_s26 + $0xe0] sm:$0xf]  ;;  %v1440_v27 = vld [vmem:[%s1618_s26 + $0xe4] sm:$0xf0]  ;;  %v1267_v32 = vor.u32 %v1424_v25, %v1266_v24 }
  0x2e   : > { %v1331_v33 = vor.u32 %v1440_v27, %v1330_v26 }
  0x3c   : > { %709 = vmatmul.bf16.gmra.mxu0 %v1227_v36  ;;  %749 = vmatmul.bf16.gmra.mxu2 %v1291_v37  ;;  %v1274_v36 = vld [vmem:[%s1618_s26 + $0x70] sm:$0xf]  ;;  %v1426_v37 = vld [vmem:[%s1618_s26 + $0x74] sm:$0xf0] }
  0x3d   : > { %798 = vmatmul.bf16.gmra.mxu1 %v1231_v38  ;;  %838 = vmatmul.bf16.gmra.mxu3 %v1295_v39  ;;  %v1338_v38 = vld [vmem:[%s1618_s26 + $0xf0] sm:$0xf]  ;;  %v1442_v39 = vld [vmem:[%s1618_s26 + $0xf4] sm:$0xf0]  ;;  %v1275_v44 = vor.u32 %v1426_v37, %v1274_v36 }
  0x3e   : > { %v1339_v45 = vor.u32 %v1442_v39, %v1338_v38 }
  0x4c   : > { %714 = vmatmul.bf16.gmra.mxu0 %v1235_v48  ;;  %754 = vmatmul.bf16.gmra.mxu2 %v1299_v49  ;;  %v1696_v49 = vld [vmem:[%s1817_s2] ss:$0 sm:$0xff] }
  0x4d   : > { %803 = vmatmul.bf16.gmra.mxu1 %v1239_v50  ;;  %843 = vmatmul.bf16.gmra.mxu3 %v1303_v51 }
  0x5c   : > { %719 = vmatmul.bf16.gmra.mxu0 %v1243_v60  ;;  %759 = vmatmul.bf16.gmra.mxu2 %v1307_v61 }
  0x5d   : > { %808 = vmatmul.bf16.gmra.mxu1 %v1247_v62  ;;  %848 = vmatmul.bf16.gmra.mxu3 %v1311_v63 }
  0x6c   : > { %724 = vmatmul.bf16.gmra.mxu0 %v1251_v8  ;;  %764 = vmatmul.bf16.gmra.mxu2 %v1315_v9 }
  0x6d   : > { %813 = vmatmul.bf16.gmra.mxu1 %v1255_v10  ;;  %853 = vmatmul.bf16.gmra.mxu3 %v1319_v11 }
  0x7c   : > { %729 = vmatmul.bf16.gmra.mxu0 %v1259_v20  ;;  %769 = vmatmul.bf16.gmra.mxu2 %v1323_v21 }
  0x7d   : > { %818 = vmatmul.bf16.gmra.mxu1 %v1263_v22  ;;  %858 = vmatmul.bf16.gmra.mxu3 %v1327_v23 }
  0x8c   : > { %734 = vmatmul.bf16.gmra.mxu0 %v1267_v32  ;;  %774 = vmatmul.bf16.gmra.mxu2 %v1331_v33 }
  0x8d   : > { %823 = vmatmul.bf16.gmra.mxu1 %v1271_v34  ;;  %863 = vmatmul.bf16.gmra.mxu3 %v1335_v35 }
  0x9c   : > { %739 = vmatmul.bf16.gmra.mxu0 %v1275_v44  ;;  %779 = vmatmul.bf16.gmra.mxu2 %v1339_v45 }
  0x9d   : > { %828 = vmatmul.bf16.gmra.mxu1 %v1279_v46  ;;  %868 = vmatmul.bf16.gmra.mxu3 %v1343_v47 }
  0xa9   : > { %v705_v48 = vpop.f32.mrf.mxu0 }
  0xaa   : > { %v794_v50 = vpop.f32.mrf.mxu1 }
  0xab   : > { %v795_v51 = vadd.f32 %v794_v50, %v705_v48 }
  0xad   : > { %v977_v53 = vmul.f32 %v1696_v49, %v795_v51 }
  0xaf   : > { %v1013_v54 = vadd.f32 %v1701_v52, %v977_v53  ;;  %v745_v55 = vpop.f32.mrf.mxu2 }
  0xb0   : > { %v834_v56 = vpop.f32.mrf.mxu3 }
  0xb1   : > { %1045 = vst [vmem:[%s1709_s14] sm:$0xff] %v1013_v54  ;;  %v835_v57 = vadd.f32 %v834_v56, %v745_v55  ;;  %v707_v58 = vpop.f32.mrf.mxu0 }
  0xb2   : > { %v796_v59 = vpop.f32.mrf.mxu1 }
  0xb3   : > { %v993_v60 = vmul.f32 %v1696_v49, %v835_v57  ;;  %v797_v61 = vadd.f32 %v796_v59, %v707_v58 }
  0xb5   : > { %v1029_v62 = vadd.f32 %v1701_v52, %v993_v60  ;;  %v978_v63 = vmul.f32 %v1696_v49, %v797_v61 }
  0xb7   : > { %1061 = vst [vmem:[%s1709_s14 + $0x80] sm:$0xff] %v1029_v62  ;;  %v1014_v0 = vadd.f32 %v1701_v52, %v978_v63  ;;  %v747_v1 = vpop.f32.mrf.mxu2 }
  0xb8   : > { %v836_v2 = vpop.f32.mrf.mxu3 }
  0xb9   : > { %1046 = vst [vmem:[%s1709_s14 + $0x8] sm:$0xff] %v1014_v0  ;;  %v837_v3 = vadd.f32 %v836_v2, %v747_v1  ;;  %v710_v4 = vpop.f32.mrf.mxu0 }
  0xba   : > { %v799_v5 = vpop.f32.mrf.mxu1 }
  0xbb   : > { %v994_v6 = vmul.f32 %v1696_v49, %v837_v3  ;;  %v800_v7 = vadd.f32 %v799_v5, %v710_v4 }
  0xbd   : > { %v1030_v8 = vadd.f32 %v1701_v52, %v994_v6  ;;  %v979_v9 = vmul.f32 %v1696_v49, %v800_v7 }
  0xbf   : > { %1062 = vst [vmem:[%s1709_s14 + $0x88] sm:$0xff] %v1030_v8  ;;  %v1015_v10 = vadd.f32 %v1701_v52, %v979_v9  ;;  %v750_v11 = vpop.f32.mrf.mxu2 }
  0xc0   : > { %v839_v12 = vpop.f32.mrf.mxu3 }
  0xc1   : > { %1047 = vst [vmem:[%s1709_s14 + $0x10] sm:$0xff] %v1015_v10  ;;  %v840_v13 = vadd.f32 %v839_v12, %v750_v11  ;;  %v712_v14 = vpop.f32.mrf.mxu0 }
  0xc2   : > { %v801_v15 = vpop.f32.mrf.mxu1 }
  0xc3   : > { %v995_v16 = vmul.f32 %v1696_v49, %v840_v13  ;;  %v802_v17 = vadd.f32 %v801_v15, %v712_v14 }
  0xc5   : > { %v1031_v18 = vadd.f32 %v1701_v52, %v995_v16  ;;  %v980_v19 = vmul.f32 %v1696_v49, %v802_v17 }
  0xc7   : > { %1063 = vst [vmem:[%s1709_s14 + $0x90] sm:$0xff] %v1031_v18  ;;  %v1016_v20 = vadd.f32 %v1701_v52, %v980_v19  ;;  %v752_v21 = vpop.f32.mrf.mxu2 }
  0xc8   : > { %v841_v22 = vpop.f32.mrf.mxu3 }
  0xc9   : > { %1048 = vst [vmem:[%s1709_s14 + $0x18] sm:$0xff] %v1016_v20  ;;  %v842_v23 = vadd.f32 %v841_v22, %v752_v21  ;;  %v715_v24 = vpop.f32.mrf.mxu0 }
  0xca   : > { %v804_v25 = vpop.f32.mrf.mxu1 }
  0xcb   : > { %v996_v26 = vmul.f32 %v1696_v49, %v842_v23  ;;  %v805_v27 = vadd.f32 %v804_v25, %v715_v24 }
  0xcd   : > { %v1032_v28 = vadd.f32 %v1701_v52, %v996_v26  ;;  %v981_v29 = vmul.f32 %v1696_v49, %v805_v27 }
  0xcf   : > { %1064 = vst [vmem:[%s1709_s14 + $0x98] sm:$0xff] %v1032_v28  ;;  %v1017_v30 = vadd.f32 %v1701_v52, %v981_v29  ;;  %v755_v31 = vpop.f32.mrf.mxu2 }
  0xd0   : > { %v844_v32 = vpop.f32.mrf.mxu3 }
  0xd1   : > { %1049 = vst [vmem:[%s1709_s14 + $0x20] sm:$0xff] %v1017_v30  ;;  %v845_v33 = vadd.f32 %v844_v32, %v755_v31  ;;  %v717_v34 = vpop.f32.mrf.mxu0 }
  0xd2   : > { %v806_v35 = vpop.f32.mrf.mxu1 }
  0xd3   : > { %v997_v36 = vmul.f32 %v1696_v49, %v845_v33  ;;  %v807_v37 = vadd.f32 %v806_v35, %v717_v34 }
  0xd5   : > { %v1033_v38 = vadd.f32 %v1701_v52, %v997_v36  ;;  %v982_v39 = vmul.f32 %v1696_v49, %v807_v37 }
  0xd7   : > { %1065 = vst [vmem:[%s1709_s14 + $0xa0] sm:$0xff] %v1033_v38  ;;  %v1018_v40 = vadd.f32 %v1701_v52, %v982_v39  ;;  %v757_v41 = vpop.f32.mrf.mxu2 }
  0xd8   : > { %v846_v42 = vpop.f32.mrf.mxu3 }
  0xd9   : > { %1050 = vst [vmem:[%s1709_s14 + $0x28] sm:$0xff] %v1018_v40  ;;  %v847_v43 = vadd.f32 %v846_v42, %v757_v41  ;;  %v720_v44 = vpop.f32.mrf.mxu0 }
  0xda   : > { %v809_v45 = vpop.f32.mrf.mxu1 }
  0xdb   : > { %v998_v46 = vmul.f32 %v1696_v49, %v847_v43  ;;  %v810_v47 = vadd.f32 %v809_v45, %v720_v44 }
  0xdd   : > { %v1034_v48 = vadd.f32 %v1701_v52, %v998_v46  ;;  %v983_v50 = vmul.f32 %v1696_v49, %v810_v47 }
  0xdf   : > { %1066 = vst [vmem:[%s1709_s14 + $0xa8] sm:$0xff] %v1034_v48  ;;  %v1019_v51 = vadd.f32 %v1701_v52, %v983_v50  ;;  %v760_v53 = vpop.f32.mrf.mxu2 }
  0xe0   : > { %v849_v54 = vpop.f32.mrf.mxu3 }
  0xe1   : > { %1051 = vst [vmem:[%s1709_s14 + $0x30] sm:$0xff] %v1019_v51  ;;  %v850_v55 = vadd.f32 %v849_v54, %v760_v53  ;;  %v722_v56 = vpop.f32.mrf.mxu0 }
  0xe2   : > { %v811_v57 = vpop.f32.mrf.mxu1 }
  0xe3   : > { %v999_v58 = vmul.f32 %v1696_v49, %v850_v55  ;;  %v812_v59 = vadd.f32 %v811_v57, %v722_v56 }
  0xe5   : > { %v1035_v60 = vadd.f32 %v1701_v52, %v999_v58  ;;  %v984_v61 = vmul.f32 %v1696_v49, %v812_v59 }
  0xe7   : > { %1067 = vst [vmem:[%s1709_s14 + $0xb0] sm:$0xff] %v1035_v60  ;;  %v1020_v62 = vadd.f32 %v1701_v52, %v984_v61  ;;  %v762_v63 = vpop.f32.mrf.mxu2 }
  0xe8   : > { %v851_v0 = vpop.f32.mrf.mxu3 }
  0xe9   : > { %1052 = vst [vmem:[%s1709_s14 + $0x38] sm:$0xff] %v1020_v62  ;;  %v852_v1 = vadd.f32 %v851_v0, %v762_v63  ;;  %v725_v2 = vpop.f32.mrf.mxu0 }
  0xea   : > { %v814_v3 = vpop.f32.mrf.mxu1 }
  0xeb   : > { %v1000_v4 = vmul.f32 %v1696_v49, %v852_v1  ;;  %v815_v5 = vadd.f32 %v814_v3, %v725_v2 }
  0xed   : > { %v1036_v6 = vadd.f32 %v1701_v52, %v1000_v4  ;;  %v985_v7 = vmul.f32 %v1696_v49, %v815_v5 }
  0xef   : > { %1068 = vst [vmem:[%s1709_s14 + $0xb8] sm:$0xff] %v1036_v6  ;;  %v1021_v8 = vadd.f32 %v1701_v52, %v985_v7  ;;  %v765_v9 = vpop.f32.mrf.mxu2 }
  0xf0   : > { %v854_v10 = vpop.f32.mrf.mxu3 }
  0xf1   : > { %1053 = vst [vmem:[%s1709_s14 + $0x40] sm:$0xff] %v1021_v8  ;;  %v855_v11 = vadd.f32 %v854_v10, %v765_v9  ;;  %v727_v12 = vpop.f32.mrf.mxu0 }
  0xf2   : > { %v816_v13 = vpop.f32.mrf.mxu1 }
  0xf3   : > { %v1001_v14 = vmul.f32 %v1696_v49, %v855_v11  ;;  %v817_v15 = vadd.f32 %v816_v13, %v727_v12 }
  0xf5   : > { %v1037_v16 = vadd.f32 %v1701_v52, %v1001_v14  ;;  %v986_v17 = vmul.f32 %v1696_v49, %v817_v15 }
  0xf7   : > { %1069 = vst [vmem:[%s1709_s14 + $0xc0] sm:$0xff] %v1037_v16  ;;  %v1022_v18 = vadd.f32 %v1701_v52, %v986_v17  ;;  %v767_v19 = vpop.f32.mrf.mxu2 }
  0xf8   : > { %v856_v20 = vpop.f32.mrf.mxu3 }
  0xf9   : > { %1054 = vst [vmem:[%s1709_s14 + $0x48] sm:$0xff] %v1022_v18  ;;  %v857_v21 = vadd.f32 %v856_v20, %v767_v19  ;;  %v730_v22 = vpop.f32.mrf.mxu0 }
  0xfa   : > { %v819_v23 = vpop.f32.mrf.mxu1 }
  0xfb   : > { %v1002_v24 = vmul.f32 %v1696_v49, %v857_v21  ;;  %v820_v25 = vadd.f32 %v819_v23, %v730_v22 }
  0xfd   : > { %v1038_v26 = vadd.f32 %v1701_v52, %v1002_v24  ;;  %v987_v27 = vmul.f32 %v1696_v49, %v820_v25 }
  0xff   : > { %1070 = vst [vmem:[%s1709_s14 + $0xc8] sm:$0xff] %v1038_v26  ;;  %v1023_v28 = vadd.f32 %v1701_v52, %v987_v27  ;;  %v770_v29 = vpop.f32.mrf.mxu2 }
 0x100   : > { %v859_v30 = vpop.f32.mrf.mxu3 }
 0x101   : > { %1055 = vst [vmem:[%s1709_s14 + $0x50] sm:$0xff] %v1023_v28  ;;  %v860_v31 = vadd.f32 %v859_v30, %v770_v29  ;;  %v732_v32 = vpop.f32.mrf.mxu0 }
 0x102   : > { %v821_v33 = vpop.f32.mrf.mxu1 }
 0x103   : > { %v1003_v34 = vmul.f32 %v1696_v49, %v860_v31  ;;  %v822_v35 = vadd.f32 %v821_v33, %v732_v32 }
 0x105   : > { %v1039_v36 = vadd.f32 %v1701_v52, %v1003_v34  ;;  %v988_v37 = vmul.f32 %v1696_v49, %v822_v35 }
 0x107   : > { %1071 = vst [vmem:[%s1709_s14 + $0xd0] sm:$0xff] %v1039_v36  ;;  %v1024_v38 = vadd.f32 %v1701_v52, %v988_v37  ;;  %v772_v39 = vpop.f32.mrf.mxu2 }
 0x108   : > { %v861_v40 = vpop.f32.mrf.mxu3 }
 0x109   : > { %1056 = vst [vmem:[%s1709_s14 + $0x58] sm:$0xff] %v1024_v38  ;;  %v862_v41 = vadd.f32 %v861_v40, %v772_v39  ;;  %v735_v42 = vpop.f32.mrf.mxu0 }
 0x10a   : > { %v824_v43 = vpop.f32.mrf.mxu1 }
 0x10b   : > { %v1004_v44 = vmul.f32 %v1696_v49, %v862_v41  ;;  %v825_v45 = vadd.f32 %v824_v43, %v735_v42 }
 0x10d   : > { %v1040_v46 = vadd.f32 %v1701_v52, %v1004_v44  ;;  %v989_v47 = vmul.f32 %v1696_v49, %v825_v45 }
 0x10f   : > { %1072 = vst [vmem:[%s1709_s14 + $0xd8] sm:$0xff] %v1040_v46  ;;  %v1025_v48 = vadd.f32 %v1701_v52, %v989_v47  ;;  %v775_v50 = vpop.f32.mrf.mxu2 }
 0x110   : > { %v864_v51 = vpop.f32.mrf.mxu3 }
 0x111   : > { %1057 = vst [vmem:[%s1709_s14 + $0x60] sm:$0xff] %v1025_v48  ;;  %v865_v53 = vadd.f32 %v864_v51, %v775_v50  ;;  %v737_v54 = vpop.f32.mrf.mxu0 }
 0x112   : > { %v826_v55 = vpop.f32.mrf.mxu1 }
 0x113   : > { %v1005_v56 = vmul.f32 %v1696_v49, %v865_v53  ;;  %v827_v57 = vadd.f32 %v826_v55, %v737_v54 }
 0x115   : > { %v1041_v58 = vadd.f32 %v1701_v52, %v1005_v56  ;;  %v990_v59 = vmul.f32 %v1696_v49, %v827_v57 }
 0x117   : > { %1073 = vst [vmem:[%s1709_s14 + $0xe0] sm:$0xff] %v1041_v58  ;;  %v1026_v60 = vadd.f32 %v1701_v52, %v990_v59  ;;  %v777_v61 = vpop.f32.mrf.mxu2 }
 0x118   : > { %v866_v62 = vpop.f32.mrf.mxu3 }
 0x119   : > { %1058 = vst [vmem:[%s1709_s14 + $0x68] sm:$0xff] %v1026_v60  ;;  %v867_v63 = vadd.f32 %v866_v62, %v777_v61  ;;  %v740_v0 = vpop.f32.mrf.mxu0 }
 0x11a   : > { %v829_v1 = vpop.f32.mrf.mxu1 }
 0x11b   : > { %v1006_v2 = vmul.f32 %v1696_v49, %v867_v63  ;;  %v830_v3 = vadd.f32 %v829_v1, %v740_v0 }
 0x11d   : > { %v1042_v4 = vadd.f32 %v1701_v52, %v1006_v2  ;;  %v991_v5 = vmul.f32 %v1696_v49, %v830_v3 }
 0x11f   : > { %1074 = vst [vmem:[%s1709_s14 + $0xe8] sm:$0xff] %v1042_v4  ;;  %v1027_v6 = vadd.f32 %v1701_v52, %v991_v5  ;;  %v780_v7 = vpop.f32.mrf.mxu2 }
 0x120   : > { %v869_v8 = vpop.f32.mrf.mxu3 }
 0x121   : > { %1059 = vst [vmem:[%s1709_s14 + $0x70] sm:$0xff] %v1027_v6  ;;  %v870_v9 = vadd.f32 %v869_v8, %v780_v7  ;;  %v742_v10 = vpop.f32.mrf.mxu0 }
 0x122   : > { %v831_v11 = vpop.f32.mrf.mxu1 }
 0x123   : > { %v1007_v12 = vmul.f32 %v1696_v49, %v870_v9  ;;  %v832_v13 = vadd.f32 %v831_v11, %v742_v10 }
 0x125   : > { %v1043_v14 = vadd.f32 %v1701_v52, %v1007_v12  ;;  %v992_v15 = vmul.f32 %v1696_v49, %v832_v13 }
 0x127   : > { %1075 = vst [vmem:[%s1709_s14 + $0xf0] sm:$0xff] %v1043_v14  ;;  %v1028_v16 = vadd.f32 %v1701_v52, %v992_v15  ;;  %v782_v17 = vpop.f32.mrf.mxu2 }
 0x128   : > { %v871_v18 = vpop.f32.mrf.mxu3 }
 0x129   : > { %1060 = vst [vmem:[%s1709_s14 + $0x78] sm:$0xff] %v1028_v16  ;;  %v872_v19 = vadd.f32 %v871_v18, %v782_v17 }
 0x12b   : > { %v1008_v20 = vmul.f32 %v1696_v49, %v872_v19 }
 0x12d   : > { %v1044_v21 = vadd.f32 %v1701_v52, %v1008_v20 }
 0x12f   : > { %1076 = vst [vmem:[%s1709_s14 + $0xf8] sm:$0xff] %v1044_v21 }
 0x130 PF: > { %s14_s17 = sadd.s32 1, %s1523_s17   ;;  %s1820_s15 = smov %s1519_s16 }
 0x131   : > { %p11_p5 = scmp.ge.s32.totalorder %s14_s17, 4   ;;  %s1821_s16 = smov %s1823_s18 }
 0x133   :  { %13 = sbr.rel (!%p11_p5) target bundleno = 2 (0x2), region = 83 }

// kernel: _lambda_.120
= control target key start
LH: loop header
LB: loop body
LE: loop exit
PB: predicated region body
PF: predicated region fallthrough
CT: control target
= control target key end

     0   :  { %s923_s1 = inlined_call_operand.vmem [shape: bf16[256,128], index: 1, kind: input, shape index: {}]   ;;  %s924_s0 = inlined_call_operand.vmem [shape: bf16[128,256], index: 0, kind: input, shape index: {}]   ;;  %s925_s2 = inlined_call_operand.vmem [shape: f32[1,128], index: 2, kind: input, shape index: {}]   ;;  %s926_s3 = inlined_call_operand.vmem [shape: f32[1,128], index: 3, kind: input, shape index: {}]   ;;  %s927_s4 = inlined_call_operand.vmem [shape: f32[128,128], index: 4, kind: output, shape index: {}]  }
   0x1   :  { %v637_v0 = vld [vmem:[%s923_s1 + $0x38] sm:$0xff]  ;;  %v636_v2 = vld [vmem:[%s923_s1 + $0x30] sm:$0xff]  ;;  %v635_v4 = vld [vmem:[%s923_s1 + $0x28] sm:$0xff] }
   0x2   :  { %v645_v1 = vld [vmem:[%s923_s1 + $0x78] sm:$0xff]  ;;  %277 = vmatpush.bf16.msra.mxu0 %v637_v0  ;;  %646 = vmatpush.bf16.msra.mxu2 %v637_v0  ;;  %v644_v3 = vld [vmem:[%s923_s1 + $0x70] sm:$0xff]  ;;  %v643_v5 = vld [vmem:[%s923_s1 + $0x68] sm:$0xff] }
   0x3   :  { %326 = vmatpush.bf16.msra.mxu1 %v645_v1  ;;  %654 = vmatpush.bf16.msra.mxu3 %v645_v1  ;;  %v634_v6 = vld [vmem:[%s923_s1 + $0x20] sm:$0xff]  ;;  %v633_v8 = vld [vmem:[%s923_s1 + $0x18] sm:$0xff]  ;;  %v632_v10 = vld [vmem:[%s923_s1 + $0x10] sm:$0xff] }
   0x4   :  { %v642_v7 = vld [vmem:[%s923_s1 + $0x60] sm:$0xff]  ;;  %v641_v9 = vld [vmem:[%s923_s1 + $0x58] sm:$0xff]  ;;  %v640_v11 = vld [vmem:[%s923_s1 + $0x50] sm:$0xff] }
   0x5   :  { %v631_v12 = vld [vmem:[%s923_s1 + $0x8] sm:$0xff]  ;;  %v630_v14 = vld [vmem:[%s923_s1] sm:$0xff]  ;;  %v496_v28 = vld [vmem:[%s924_s0 + $0x10] sm:$0xf] }
   0x6   :  { %278 = vmatpush.bf16.msra.mxu0 %v636_v2  ;;  %647 = vmatpush.bf16.msra.mxu2 %v636_v2  ;;  %v639_v13 = vld [vmem:[%s923_s1 + $0x48] sm:$0xff]  ;;  %v638_v15 = vld [vmem:[%s923_s1 + $0x40] sm:$0xff]  ;;  %v617_v29 = vld [vmem:[%s924_s0 + $0x14] sm:$0xf0] }
   0x7   :  { %327 = vmatpush.bf16.msra.mxu1 %v644_v3  ;;  %655 = vmatpush.bf16.msra.mxu3 %v644_v3  ;;  %v488_v16 = vld [vmem:[%s924_s0] sm:$0xf]  ;;  %v615_v17 = vld [vmem:[%s924_s0 + $0x4] sm:$0xf0]  ;;  %v614_v20 = vld [vmem:[%s924_s0 + $0x4] sm:$0xf]  ;;  %v497_v36 = vor.u32 %v617_v29, %v496_v28 }
   0x8   :  { %v520_v18 = vld [vmem:[%s924_s0 + $0x40] sm:$0xf]  ;;  %v623_v19 = vld [vmem:[%s924_s0 + $0x44] sm:$0xf0]  ;;  %v490_v21 = vld [vmem:[%s924_s0 + $0x8] sm:$0xf0]  ;;  %v489_v24 = vor.u32 %v615_v17, %v488_v16 }
   0x9   :  { %v622_v22 = vld [vmem:[%s924_s0 + $0x44] sm:$0xf]  ;;  %v522_v23 = vld [vmem:[%s924_s0 + $0x48] sm:$0xf0]  ;;  %v521_v25 = vor.u32 %v623_v19, %v520_v18  ;;  %v493_v26 = vor.u32 %v614_v20, %v490_v21  ;;  %v528_v30 = vld [vmem:[%s924_s0 + $0x50] sm:$0xf] }
   0xa   :  { %279 = vmatpush.bf16.msra.mxu0 %v635_v4  ;;  %648 = vmatpush.bf16.msra.mxu2 %v635_v4  ;;  %v525_v27 = vor.u32 %v622_v22, %v522_v23  ;;  %v625_v31 = vld [vmem:[%s924_s0 + $0x54] sm:$0xf0]  ;;  %v616_v32 = vld [vmem:[%s924_s0 + $0x14] sm:$0xf]  ;;  %v498_v33 = vld [vmem:[%s924_s0 + $0x18] sm:$0xf0] }
   0xb   :  { %328 = vmatpush.bf16.msra.mxu1 %v643_v5  ;;  %656 = vmatpush.bf16.msra.mxu3 %v643_v5  ;;  %v624_v34 = vld [vmem:[%s924_s0 + $0x54] sm:$0xf]  ;;  %v530_v35 = vld [vmem:[%s924_s0 + $0x58] sm:$0xf0]  ;;  %v529_v37 = vor.u32 %v625_v31, %v528_v30  ;;  %v501_v38 = vor.u32 %v616_v32, %v498_v33  ;;  %v504_v40 = vld [vmem:[%s924_s0 + $0x20] sm:$0xf] }
   0xc   :  { %v533_v39 = vor.u32 %v624_v34, %v530_v35  ;;  %v619_v41 = vld [vmem:[%s924_s0 + $0x24] sm:$0xf0]  ;;  %v536_v42 = vld [vmem:[%s924_s0 + $0x60] sm:$0xf]  ;;  %v618_v44 = vld [vmem:[%s924_s0 + $0x24] sm:$0xf] }
   0xd   :  { %v627_v43 = vld [vmem:[%s924_s0 + $0x64] sm:$0xf0]  ;;  %v506_v45 = vld [vmem:[%s924_s0 + $0x28] sm:$0xf0]  ;;  %v626_v46 = vld [vmem:[%s924_s0 + $0x64] sm:$0xf]  ;;  %v505_v48 = vor.u32 %v619_v41, %v504_v40 }
   0xe   :  { %280 = vmatpush.bf16.msra.mxu0 %v634_v6  ;;  %649 = vmatpush.bf16.msra.mxu2 %v634_v6  ;;  %v538_v47 = vld [vmem:[%s924_s0 + $0x68] sm:$0xf0]  ;;  %v537_v49 = vor.u32 %v627_v43, %v536_v42  ;;  %v509_v50 = vor.u32 %v618_v44, %v506_v45  ;;  %v512_v52 = vld [vmem:[%s924_s0 + $0x30] sm:$0xf]  ;;  %v621_v53 = vld [vmem:[%s924_s0 + $0x34] sm:$0xf0] }
   0xf   :  { %329 = vmatpush.bf16.msra.mxu1 %v642_v7  ;;  %657 = vmatpush.bf16.msra.mxu3 %v642_v7  ;;  %v541_v51 = vor.u32 %v626_v46, %v538_v47  ;;  %v544_v54 = vld [vmem:[%s924_s0 + $0x70] sm:$0xf]  ;;  %v629_v55 = vld [vmem:[%s924_s0 + $0x74] sm:$0xf0]  ;;  %v620_v56 = vld [vmem:[%s924_s0 + $0x34] sm:$0xf]  ;;  %v513_v60 = vor.u32 %v621_v53, %v512_v52 }
  0x10   :  { %v514_v57 = vld [vmem:[%s924_s0 + $0x38] sm:$0xf0]  ;;  %v628_v58 = vld [vmem:[%s924_s0 + $0x74] sm:$0xf]  ;;  %v545_v61 = vor.u32 %v629_v55, %v544_v54  ;;  %v836_v1 = vld [vmem:[%s925_s2] ss:$0 sm:$0xff] }
  0x11   :  { %v546_v59 = vld [vmem:[%s924_s0 + $0x78] sm:$0xf0]  ;;  %v517_v62 = vor.u32 %v620_v56, %v514_v57  ;;  %v841_v4 = vld [vmem:[%s926_s3] ss:$0 sm:$0xff] }
  0x12   :  { %281 = vmatpush.bf16.msra.mxu0 %v633_v8  ;;  %650 = vmatpush.bf16.msra.mxu2 %v633_v8  ;;  %v549_v63 = vor.u32 %v628_v58, %v546_v59 }
  0x13   :  { %330 = vmatpush.bf16.msra.mxu1 %v641_v9  ;;  %658 = vmatpush.bf16.msra.mxu3 %v641_v9 }
  0x16   :  { %282 = vmatpush.bf16.msra.mxu0 %v632_v10  ;;  %651 = vmatpush.bf16.msra.mxu2 %v632_v10 }
  0x17   :  { %331 = vmatpush.bf16.msra.mxu1 %v640_v11  ;;  %659 = vmatpush.bf16.msra.mxu3 %v640_v11 }
  0x1a   :  { %283 = vmatpush.bf16.msra.mxu0 %v631_v12  ;;  %652 = vmatpush.bf16.msra.mxu2 %v631_v12 }
  0x1b   :  { %332 = vmatpush.bf16.msra.mxu1 %v639_v13  ;;  %660 = vmatpush.bf16.msra.mxu3 %v639_v13 }
  0x1e   :  { %284 = vmatpush.bf16.msra.mxu0 %v630_v14  ;;  %653 = vmatpush.bf16.msra.mxu2 %v630_v14 }
  0x1f   :  { %333 = vmatpush.bf16.msra.mxu1 %v638_v15  ;;  %661 = vmatpush.bf16.msra.mxu3 %v638_v15 }
  0x21   :  { %285 = vmatmul.bf16.vlgmr.msra.gmra.mxu0 %v489_v24  ;;  %305 = vmatmul.bf16.vlgmr.msra.gmra.mxu2 %v521_v25 }
  0x22   :  { %334 = vmatmul.bf16.vlgmr.msra.gmra.mxu1 %v493_v26  ;;  %354 = vmatmul.bf16.vlgmr.msra.gmra.mxu3 %v525_v27 }
  0x31   :  { %290 = vmatmul.bf16.gmra.mxu0 %v497_v36  ;;  %310 = vmatmul.bf16.gmra.mxu2 %v529_v37 }
  0x32   :  { %339 = vmatmul.bf16.gmra.mxu1 %v501_v38  ;;  %359 = vmatmul.bf16.gmra.mxu3 %v533_v39 }
  0x41   :  { %295 = vmatmul.bf16.gmra.mxu0 %v505_v48  ;;  %315 = vmatmul.bf16.gmra.mxu2 %v537_v49 }
  0x42   :  { %344 = vmatmul.bf16.gmra.mxu1 %v509_v50  ;;  %364 = vmatmul.bf16.gmra.mxu3 %v541_v51 }
  0x51   :  { %300 = vmatmul.bf16.gmra.mxu0 %v513_v60  ;;  %320 = vmatmul.bf16.gmra.mxu2 %v545_v61 }
  0x52   :  { %349 = vmatmul.bf16.gmra.mxu1 %v517_v62  ;;  %369 = vmatmul.bf16.gmra.mxu3 %v549_v63 }
  0x9e   :  { %v286_v0 = vpop.f32.mrf.mxu0 }
  0x9f   :  { %v335_v2 = vpop.f32.mrf.mxu1 }
  0xa0   :  { %v336_v3 = vadd.f32 %v335_v2, %v286_v0 }
  0xa2   :  { %v430_v5 = vmul.f32 %v836_v1, %v336_v3 }
  0xa4   :  { %v450_v6 = vadd.f32 %v841_v4, %v430_v5  ;;  %v306_v7 = vpop.f32.mrf.mxu2 }
  0xa5   :  { %v355_v8 = vpop.f32.mrf.mxu3 }
  0xa6   :  { %466 = vst [vmem:[%s927_s4] sm:$0xff] %v450_v6  ;;  %v356_v9 = vadd.f32 %v355_v8, %v306_v7  ;;  %v288_v10 = vpop.f32.mrf.mxu0 }
  0xa7   :  { %v337_v11 = vpop.f32.mrf.mxu1 }
  0xa8   :  { %v438_v12 = vmul.f32 %v836_v1, %v356_v9  ;;  %v338_v13 = vadd.f32 %v337_v11, %v288_v10 }
  0xaa   :  { %v458_v14 = vadd.f32 %v841_v4, %v438_v12  ;;  %v431_v15 = vmul.f32 %v836_v1, %v338_v13 }
  0xac   :  { %474 = vst [vmem:[%s927_s4 + $0x40] sm:$0xff] %v458_v14  ;;  %v451_v16 = vadd.f32 %v841_v4, %v431_v15  ;;  %v308_v17 = vpop.f32.mrf.mxu2 }
  0xad   :  { %v357_v18 = vpop.f32.mrf.mxu3 }
  0xae   :  { %467 = vst [vmem:[%s927_s4 + $0x8] sm:$0xff] %v451_v16  ;;  %v358_v19 = vadd.f32 %v357_v18, %v308_v17  ;;  %v291_v20 = vpop.f32.mrf.mxu0 }
  0xaf   :  { %v340_v21 = vpop.f32.mrf.mxu1 }
  0xb0   :  { %v439_v22 = vmul.f32 %v836_v1, %v358_v19  ;;  %v341_v23 = vadd.f32 %v340_v21, %v291_v20 }
  0xb2   :  { %v459_v24 = vadd.f32 %v841_v4, %v439_v22  ;;  %v432_v25 = vmul.f32 %v836_v1, %v341_v23 }
  0xb4   :  { %475 = vst [vmem:[%s927_s4 + $0x48] sm:$0xff] %v459_v24  ;;  %v452_v26 = vadd.f32 %v841_v4, %v432_v25  ;;  %v311_v27 = vpop.f32.mrf.mxu2 }
  0xb5   :  { %v360_v28 = vpop.f32.mrf.mxu3 }
  0xb6   :  { %468 = vst [vmem:[%s927_s4 + $0x10] sm:$0xff] %v452_v26  ;;  %v361_v29 = vadd.f32 %v360_v28, %v311_v27  ;;  %v293_v30 = vpop.f32.mrf.mxu0 }
  0xb7   :  { %v342_v31 = vpop.f32.mrf.mxu1 }
  0xb8   :  { %v440_v32 = vmul.f32 %v836_v1, %v361_v29  ;;  %v343_v33 = vadd.f32 %v342_v31, %v293_v30 }
  0xba   :  { %v460_v34 = vadd.f32 %v841_v4, %v440_v32  ;;  %v433_v35 = vmul.f32 %v836_v1, %v343_v33 }
  0xbc   :  { %476 = vst [vmem:[%s927_s4 + $0x50] sm:$0xff] %v460_v34  ;;  %v453_v36 = vadd.f32 %v841_v4, %v433_v35  ;;  %v313_v37 = vpop.f32.mrf.mxu2 }
  0xbd   :  { %v362_v38 = vpop.f32.mrf.mxu3 }
  0xbe   :  { %469 = vst [vmem:[%s927_s4 + $0x18] sm:$0xff] %v453_v36  ;;  %v363_v39 = vadd.f32 %v362_v38, %v313_v37  ;;  %v296_v40 = vpop.f32.mrf.mxu0 }
  0xbf   :  { %v345_v41 = vpop.f32.mrf.mxu1 }
  0xc0   :  { %v441_v42 = vmul.f32 %v836_v1, %v363_v39  ;;  %v346_v43 = vadd.f32 %v345_v41, %v296_v40 }
  0xc2   :  { %v461_v44 = vadd.f32 %v841_v4, %v441_v42  ;;  %v434_v45 = vmul.f32 %v836_v1, %v346_v43 }
  0xc4   :  { %477 = vst [vmem:[%s927_s4 + $0x58] sm:$0xff] %v461_v44  ;;  %v454_v46 = vadd.f32 %v841_v4, %v434_v45  ;;  %v316_v47 = vpop.f32.mrf.mxu2 }
  0xc5   :  { %v365_v48 = vpop.f32.mrf.mxu3 }
  0xc6   :  { %470 = vst [vmem:[%s927_s4 + $0x20] sm:$0xff] %v454_v46  ;;  %v366_v49 = vadd.f32 %v365_v48, %v316_v47  ;;  %v298_v50 = vpop.f32.mrf.mxu0 }
  0xc7   :  { %v347_v51 = vpop.f32.mrf.mxu1 }
  0xc8   :  { %v442_v52 = vmul.f32 %v836_v1, %v366_v49  ;;  %v348_v53 = vadd.f32 %v347_v51, %v298_v50 }
  0xca   :  { %v462_v54 = vadd.f32 %v841_v4, %v442_v52  ;;  %v435_v55 = vmul.f32 %v836_v1, %v348_v53 }
  0xcc   :  { %478 = vst [vmem:[%s927_s4 + $0x60] sm:$0xff] %v462_v54  ;;  %v455_v56 = vadd.f32 %v841_v4, %v435_v55  ;;  %v318_v57 = vpop.f32.mrf.mxu2 }
  0xcd   :  { %v367_v58 = vpop.f32.mrf.mxu3 }
  0xce   :  { %471 = vst [vmem:[%s927_s4 + $0x28] sm:$0xff] %v455_v56  ;;  %v368_v59 = vadd.f32 %v367_v58, %v318_v57  ;;  %v301_v60 = vpop.f32.mrf.mxu0 }
  0xcf   :  { %v350_v61 = vpop.f32.mrf.mxu1 }
  0xd0   :  { %v443_v62 = vmul.f32 %v836_v1, %v368_v59  ;;  %v351_v63 = vadd.f32 %v350_v61, %v301_v60 }
  0xd2   :  { %v463_v0 = vadd.f32 %v841_v4, %v443_v62  ;;  %v436_v2 = vmul.f32 %v836_v1, %v351_v63 }
  0xd4   :  { %479 = vst [vmem:[%s927_s4 + $0x68] sm:$0xff] %v463_v0  ;;  %v456_v3 = vadd.f32 %v841_v4, %v436_v2  ;;  %v321_v5 = vpop.f32.mrf.mxu2 }
  0xd5   :  { %v370_v6 = vpop.f32.mrf.mxu3 }
  0xd6   :  { %472 = vst [vmem:[%s927_s4 + $0x30] sm:$0xff] %v456_v3  ;;  %v371_v7 = vadd.f32 %v370_v6, %v321_v5  ;;  %v303_v8 = vpop.f32.mrf.mxu0 }
  0xd7   :  { %v352_v9 = vpop.f32.mrf.mxu1 }
  0xd8   :  { %v444_v10 = vmul.f32 %v836_v1, %v371_v7  ;;  %v353_v11 = vadd.f32 %v352_v9, %v303_v8 }
  0xda   :  { %v464_v12 = vadd.f32 %v841_v4, %v444_v10  ;;  %v437_v13 = vmul.f32 %v836_v1, %v353_v11 }
  0xdc   :  { %480 = vst [vmem:[%s927_s4 + $0x70] sm:$0xff] %v464_v12  ;;  %v457_v14 = vadd.f32 %v841_v4, %v437_v13  ;;  %v323_v15 = vpop.f32.mrf.mxu2 }
  0xdd   :  { %v372_v16 = vpop.f32.mrf.mxu3 }
  0xde   :  { %473 = vst [vmem:[%s927_s4 + $0x38] sm:$0xff] %v457_v14  ;;  %v373_v17 = vadd.f32 %v372_v16, %v323_v15 }
  0xe0   :  { %v445_v18 = vmul.f32 %v836_v1, %v373_v17 }
  0xe2   :  { %v465_v19 = vadd.f32 %v841_v4, %v445_v18 }
  0xe4   :  { %481 = vst [vmem:[%s927_s4 + $0x78] sm:$0xff] %v465_v19 }

// kernel: _lambda_.175
= control target key start
LH: loop header
LB: loop body
LE: loop exit
PB: predicated region body
PF: predicated region fallthrough
CT: control target
= control target key end

     0   :  { %9 = vsyncpa [#allocation4], 0  ;;  %s418_s18 = smov [#allocation3]   ;;  %s534_s0 = inlined_call_operand.vmem [shape: bf16[32,256], index: 0, kind: input, shape index: {}]   ;;  %s535_s1 = inlined_call_operand.vmem [shape: bf16[256,128], index: 1, kind: input, shape index: {}]   ;;  %s536_s2 = inlined_call_operand.vmem [shape: f32[1,128], index: 2, kind: input, shape index: {}]   ;;  %s537_s3 = inlined_call_operand.hbm [shape: f32[1,128], index: 3, kind: input, shape index: {}]   ;;  %s538_s4 = inlined_call_operand.vmem [shape: f32[32,128], index: 4, kind: output, shape index: {}]  }
   0x1   :  { %s21_s17 = sshll.u32 %s537_s3, 4  ;;  %s23_s19 = sshll.u32 %s418_s18, 4  ;;  %s22_s17 = int_to_ptr.hbm [resolvable:$true] %s21_s17  ;;  %s24_s19 = int_to_ptr.vmem [resolvable:$true] %s23_s19 }
   0x2   :  { %26 = dma.hbm_to_vmem [thread:$0]  %s22_s17, 16, %s24_s19, [#allocation4]  }
   0x3   :  { %416 = dma.done.wait [#allocation4], 16  }
   0x4   :  { %417 = vsyncadd [#allocation4], 4294967280  ;;  %v364_v0 = vld [vmem:[%s535_s1 + $0x38] sm:$0xff]  ;;  %v363_v2 = vld [vmem:[%s535_s1 + $0x30] sm:$0xff] }
   0x5   :  { %v372_v1 = vld [vmem:[%s535_s1 + $0x78] sm:$0xff]  ;;  %195 = vmatpush.bf16.msra.mxu0 %v364_v0  ;;  %373 = vmatpush.bf16.msra.mxu2 %v364_v0  ;;  %v371_v3 = vld [vmem:[%s535_s1 + $0x70] sm:$0xff]  ;;  %v362_v4 = vld [vmem:[%s535_s1 + $0x28] sm:$0xff] }
   0x6   :  { %214 = vmatpush.bf16.msra.mxu1 %v372_v1  ;;  %381 = vmatpush.bf16.msra.mxu3 %v372_v1  ;;  %v370_v5 = vld [vmem:[%s535_s1 + $0x68] sm:$0xff]  ;;  %v361_v6 = vld [vmem:[%s535_s1 + $0x20] sm:$0xff]  ;;  %v360_v8 = vld [vmem:[%s535_s1 + $0x18] sm:$0xff] }
   0x7   :  { %v369_v7 = vld [vmem:[%s535_s1 + $0x60] sm:$0xff]  ;;  %v368_v9 = vld [vmem:[%s535_s1 + $0x58] sm:$0xff]  ;;  %v359_v10 = vld [vmem:[%s535_s1 + $0x10] sm:$0xff] }
   0x8   :  { %v367_v11 = vld [vmem:[%s535_s1 + $0x50] sm:$0xff]  ;;  %v358_v12 = vld [vmem:[%s535_s1 + $0x8] sm:$0xff]  ;;  %v357_v14 = vld [vmem:[%s535_s1] sm:$0xff] }
   0x9   :  { %196 = vmatpush.bf16.msra.mxu0 %v363_v2  ;;  %374 = vmatpush.bf16.msra.mxu2 %v363_v2  ;;  %v366_v13 = vld [vmem:[%s535_s1 + $0x48] sm:$0xff]  ;;  %v365_v15 = vld [vmem:[%s535_s1 + $0x40] sm:$0xff]  ;;  %v283_v18 = vld [vmem:[%s534_s0 + $0x10] sm:$0xf] }
   0xa   :  { %215 = vmatpush.bf16.msra.mxu1 %v371_v3  ;;  %382 = vmatpush.bf16.msra.mxu3 %v371_v3  ;;  %v275_v16 = vld [vmem:[%s534_s0] sm:$0xf]  ;;  %v354_v17 = vld [vmem:[%s534_s0 + $0x4] sm:$0xf0]  ;;  %v356_v19 = vld [vmem:[%s534_s0 + $0x14] sm:$0xf0] }
   0xb   :  { %v353_v20 = vld [vmem:[%s534_s0 + $0x4] sm:$0xf]  ;;  %v277_v21 = vld [vmem:[%s534_s0 + $0x8] sm:$0xf0]  ;;  %v355_v22 = vld [vmem:[%s534_s0 + $0x14] sm:$0xf]  ;;  %v276_v24 = vor.u32 %v354_v17, %v275_v16  ;;  %v284_v25 = vor.u32 %v356_v19, %v283_v18 }
   0xc   :  { %v285_v23 = vld [vmem:[%s534_s0 + $0x18] sm:$0xf0]  ;;  %v280_v26 = vor.u32 %v353_v20, %v277_v21  ;;  %v390_v29 = vld [vmem:[%s536_s2] ss:$0 sm:$0xff] }
   0xd   :  { %197 = vmatpush.bf16.msra.mxu0 %v362_v4  ;;  %375 = vmatpush.bf16.msra.mxu2 %v362_v4  ;;  %v288_v27 = vor.u32 %v355_v22, %v285_v23  ;;  %v391_v32 = vld [vmem:[#allocation3] ss:$0 sm:$0xff] }
   0xe   :  { %216 = vmatpush.bf16.msra.mxu1 %v370_v5  ;;  %383 = vmatpush.bf16.msra.mxu3 %v370_v5 }
  0x11   :  { %198 = vmatpush.bf16.msra.mxu0 %v361_v6  ;;  %376 = vmatpush.bf16.msra.mxu2 %v361_v6 }
  0x12   :  { %217 = vmatpush.bf16.msra.mxu1 %v369_v7  ;;  %384 = vmatpush.bf16.msra.mxu3 %v369_v7 }
  0x15   :  { %199 = vmatpush.bf16.msra.mxu0 %v360_v8  ;;  %377 = vmatpush.bf16.msra.mxu2 %v360_v8 }
  0x16   :  { %218 = vmatpush.bf16.msra.mxu1 %v368_v9  ;;  %385 = vmatpush.bf16.msra.mxu3 %v368_v9 }
  0x19   :  { %200 = vmatpush.bf16.msra.mxu0 %v359_v10  ;;  %378 = vmatpush.bf16.msra.mxu2 %v359_v10 }
  0x1a   :  { %219 = vmatpush.bf16.msra.mxu1 %v367_v11  ;;  %386 = vmatpush.bf16.msra.mxu3 %v367_v11 }
  0x1d   :  { %201 = vmatpush.bf16.msra.mxu0 %v358_v12  ;;  %379 = vmatpush.bf16.msra.mxu2 %v358_v12 }
  0x1e   :  { %220 = vmatpush.bf16.msra.mxu1 %v366_v13  ;;  %387 = vmatpush.bf16.msra.mxu3 %v366_v13 }
  0x21   :  { %202 = vmatpush.bf16.msra.mxu0 %v357_v14  ;;  %380 = vmatpush.bf16.msra.mxu2 %v357_v14 }
  0x22   :  { %221 = vmatpush.bf16.msra.mxu1 %v365_v15  ;;  %388 = vmatpush.bf16.msra.mxu3 %v365_v15 }
  0x24   :  { %203 = vmatmul.bf16.vlgmr.msra.gmra.mxu0 %v276_v24  ;;  %208 = vmatmul.bf16.vlgmr.msra.gmra.mxu2 %v284_v25 }
  0x25   :  { %222 = vmatmul.bf16.vlgmr.msra.gmra.mxu1 %v280_v26  ;;  %227 = vmatmul.bf16.vlgmr.msra.gmra.mxu3 %v288_v27 }
  0xa1   :  { %v204_v28 = vpop.f32.mrf.mxu0 }
  0xa2   :  { %v223_v30 = vpop.f32.mrf.mxu1 }
  0xa3   :  { %v224_v31 = vadd.f32 %v223_v30, %v204_v28 }
  0xa5   :  { %v252_v33 = vmul.f32 %v390_v29, %v224_v31 }
  0xa7   :  { %v260_v34 = vadd.f32 %v391_v32, %v252_v33  ;;  %v209_v35 = vpop.f32.mrf.mxu2 }
  0xa8   :  { %v228_v36 = vpop.f32.mrf.mxu3 }
  0xa9   :  { %264 = vst [vmem:[%s538_s4] sm:$0xff] %v260_v34  ;;  %v229_v37 = vadd.f32 %v228_v36, %v209_v35  ;;  %v206_v38 = vpop.f32.mrf.mxu0 }
  0xaa   :  { %v225_v39 = vpop.f32.mrf.mxu1 }
  0xab   :  { %v254_v40 = vmul.f32 %v390_v29, %v229_v37  ;;  %v226_v41 = vadd.f32 %v225_v39, %v206_v38 }
  0xad   :  { %v262_v42 = vadd.f32 %v391_v32, %v254_v40  ;;  %v253_v43 = vmul.f32 %v390_v29, %v226_v41 }
  0xaf   :  { %266 = vst [vmem:[%s538_s4 + $0x10] sm:$0xff] %v262_v42  ;;  %v261_v44 = vadd.f32 %v391_v32, %v253_v43  ;;  %v211_v45 = vpop.f32.mrf.mxu2 }
  0xb0   :  { %v230_v46 = vpop.f32.mrf.mxu3 }
  0xb1   :  { %265 = vst [vmem:[%s538_s4 + $0x8] sm:$0xff] %v261_v44  ;;  %v231_v47 = vadd.f32 %v230_v46, %v211_v45 }
  0xb3   :  { %v255_v48 = vmul.f32 %v390_v29, %v231_v47 }
  0xb5   :  { %v263_v49 = vadd.f32 %v391_v32, %v255_v48 }
  0xb7   :  { %267 = vst [vmem:[%s538_s4 + $0x18] sm:$0xff] %v263_v49 }
  0xb8   :  { %272 = vsyncpa [#allocation4], 1 }

// kernel: _lambda_.176
= control target key start
LH: loop header
LB: loop body
LE: loop exit
PB: predicated region body
PF: predicated region fallthrough
CT: control target
= control target key end

     0   :  { %vm153_vm0 = vcmask 1041409   ;;  %vm156_vm1 = vcmask 1042434   ;;  %vm159_vm2 = vcmask 1043459   ;;  %vm162_vm3 = vcmask 1044484   ;;  %s411_s0 = inlined_call_operand.vmem [shape: f32[8,9,4], index: 0, kind: input, shape index: {}]   ;;  %s412_s1 = inlined_call_operand.vmem [shape: f32[8,4], index: 1, kind: output, shape index: {}]  }
   0x1   :  { %v8_v0 = vld [vmem:[%s411_s0] sm:$0x1]  ;;  %v9_v1 = vld [vmem:[%s411_s0 + $0x10] sm:$0x1]  ;;  %v16_v8 = vld [vmem:[%s411_s0 + $0x1] sm:$0x1] }
   0x2   :  { %v10_v2 = vld [vmem:[%s411_s0 + $0x20] sm:$0x1]  ;;  %v11_v3 = vld [vmem:[%s411_s0 + $0x30] sm:$0x1]  ;;  %v17_v9 = vld [vmem:[%s411_s0 + $0x11] sm:$0x1]  ;;  %v24_v12 = vmax.f32 %v8_v0, %v16_v8 }
   0x3   :  { %v12_v4 = vld [vmem:[%s411_s0 + $0x40] sm:$0x1]  ;;  %v13_v5 = vld [vmem:[%s411_s0 + $0x50] sm:$0x1]  ;;  %v18_v10 = vld [vmem:[%s411_s0 + $0x21] sm:$0x1]  ;;  %v25_v16 = vmax.f32 %v9_v1, %v17_v9 }
   0x4   :  { %v14_v6 = vld [vmem:[%s411_s0 + $0x60] sm:$0x1]  ;;  %v15_v7 = vld [vmem:[%s411_s0 + $0x70] sm:$0x1]  ;;  %v19_v11 = vld [vmem:[%s411_s0 + $0x31] sm:$0x1]  ;;  %v26_v17 = vmax.f32 %v10_v2, %v18_v10 }
   0x5   :  { %v20_v13 = vld [vmem:[%s411_s0 + $0x41] sm:$0x1]  ;;  %v21_v14 = vld [vmem:[%s411_s0 + $0x51] sm:$0x1]  ;;  %v27_v18 = vmax.f32 %v11_v3, %v19_v11  ;;  %v32_v23 = vld [vmem:[%s411_s0 + $0x2] sm:$0x1] }
   0x6   :  { %v22_v15 = vld [vmem:[%s411_s0 + $0x61] sm:$0x1]  ;;  %v23_v19 = vld [vmem:[%s411_s0 + $0x71] sm:$0x1]  ;;  %v28_v20 = vmax.f32 %v12_v4, %v20_v13  ;;  %v29_v21 = vmax.f32 %v13_v5, %v21_v14  ;;  %v33_v24 = vld [vmem:[%s411_s0 + $0x12] sm:$0x1]  ;;  %v40_v29 = vmax.f32 %v24_v12, %v32_v23 }
   0x7   :  { %v30_v22 = vmax.f32 %v14_v6, %v22_v15  ;;  %v31_v25 = vmax.f32 %v15_v7, %v23_v19  ;;  %v34_v26 = vld [vmem:[%s411_s0 + $0x22] sm:$0x1]  ;;  %v35_v27 = vld [vmem:[%s411_s0 + $0x32] sm:$0x1]  ;;  %v41_v30 = vmax.f32 %v25_v16, %v33_v24  ;;  %v48_v40 = vld [vmem:[%s411_s0 + $0x3] sm:$0x1] }
   0x8   :  { %v36_v28 = vld [vmem:[%s411_s0 + $0x42] sm:$0x1]  ;;  %v37_v31 = vld [vmem:[%s411_s0 + $0x52] sm:$0x1]  ;;  %v42_v34 = vmax.f32 %v26_v17, %v34_v26  ;;  %v43_v35 = vmax.f32 %v27_v18, %v35_v27  ;;  %v49_v41 = vld [vmem:[%s411_s0 + $0x13] sm:$0x1]  ;;  %v56_v46 = vmax.f32 %v40_v29, %v48_v40 }
   0x9   :  { %v38_v32 = vld [vmem:[%s411_s0 + $0x62] sm:$0x1]  ;;  %v39_v33 = vld [vmem:[%s411_s0 + $0x72] sm:$0x1]  ;;  %v44_v36 = vmax.f32 %v28_v20, %v36_v28  ;;  %v45_v37 = vmax.f32 %v29_v21, %v37_v31  ;;  %v50_v42 = vld [vmem:[%s411_s0 + $0x23] sm:$0x1]  ;;  %v57_v47 = vmax.f32 %v41_v30, %v49_v41 }
   0xa   :  { %v46_v38 = vmax.f32 %v30_v22, %v38_v32  ;;  %v47_v39 = vmax.f32 %v31_v25, %v39_v33  ;;  %v51_v43 = vld [vmem:[%s411_s0 + $0x33] sm:$0x1]  ;;  %v52_v44 = vld [vmem:[%s411_s0 + $0x43] sm:$0x1]  ;;  %v58_v48 = vmax.f32 %v42_v34, %v50_v42  ;;  %v64_v54 = vld [vmem:[%s411_s0 + $0x4] sm:$0x1] }
   0xb   :  { %v53_v45 = vld [vmem:[%s411_s0 + $0x53] sm:$0x1]  ;;  %v54_v49 = vld [vmem:[%s411_s0 + $0x63] sm:$0x1]  ;;  %v59_v51 = vmax.f32 %v43_v35, %v51_v43  ;;  %v60_v52 = vmax.f32 %v44_v36, %v52_v44  ;;  %v65_v57 = vld [vmem:[%s411_s0 + $0x14] sm:$0x1]  ;;  %v72_v60 = vmax.f32 %v56_v46, %v64_v54 }
   0xc   :  { %v55_v50 = vld [vmem:[%s411_s0 + $0x73] sm:$0x1]  ;;  %v61_v53 = vmax.f32 %v45_v37, %v53_v45  ;;  %v62_v55 = vmax.f32 %v46_v38, %v54_v49  ;;  %v66_v58 = vld [vmem:[%s411_s0 + $0x24] sm:$0x1]  ;;  %v67_v59 = vld [vmem:[%s411_s0 + $0x34] sm:$0x1]  ;;  %v73_v0 = vmax.f32 %v57_v47, %v65_v57 }
   0xd   :  { %v63_v56 = vmax.f32 %v47_v39, %v55_v50  ;;  %v68_v61 = vld [vmem:[%s411_s0 + $0x44] sm:$0x1]  ;;  %v69_v62 = vld [vmem:[%s411_s0 + $0x54] sm:$0x1]  ;;  %v74_v1 = vmax.f32 %v58_v48, %v66_v58  ;;  %v75_v2 = vmax.f32 %v59_v51, %v67_v59  ;;  %v80_v7 = vld [vmem:[%s411_s0 + $0x5] sm:$0x1] }
   0xe   :  { %v70_v63 = vld [vmem:[%s411_s0 + $0x64] sm:$0x1]  ;;  %v71_v3 = vld [vmem:[%s411_s0 + $0x74] sm:$0x1]  ;;  %v76_v4 = vmax.f32 %v60_v52, %v68_v61  ;;  %v77_v5 = vmax.f32 %v61_v53, %v69_v62  ;;  %v81_v8 = vld [vmem:[%s411_s0 + $0x15] sm:$0x1]  ;;  %v88_v13 = vmax.f32 %v72_v60, %v80_v7 }
   0xf   :  { %v78_v6 = vmax.f32 %v62_v55, %v70_v63  ;;  %v79_v9 = vmax.f32 %v63_v56, %v71_v3  ;;  %v82_v10 = vld [vmem:[%s411_s0 + $0x25] sm:$0x1]  ;;  %v83_v11 = vld [vmem:[%s411_s0 + $0x35] sm:$0x1]  ;;  %v89_v14 = vmax.f32 %v73_v0, %v81_v8  ;;  %v96_v24 = vld [vmem:[%s411_s0 + $0x6] sm:$0x1] }
  0x10   :  { %v84_v12 = vld [vmem:[%s411_s0 + $0x45] sm:$0x1]  ;;  %v85_v15 = vld [vmem:[%s411_s0 + $0x55] sm:$0x1]  ;;  %v90_v18 = vmax.f32 %v74_v1, %v82_v10  ;;  %v91_v19 = vmax.f32 %v75_v2, %v83_v11  ;;  %v97_v25 = vld [vmem:[%s411_s0 + $0x16] sm:$0x1]  ;;  %v104_v30 = vmax.f32 %v88_v13, %v96_v24 }
  0x11   :  { %v86_v16 = vld [vmem:[%s411_s0 + $0x65] sm:$0x1]  ;;  %v87_v17 = vld [vmem:[%s411_s0 + $0x75] sm:$0x1]  ;;  %v92_v20 = vmax.f32 %v76_v4, %v84_v12  ;;  %v93_v21 = vmax.f32 %v77_v5, %v85_v15  ;;  %v98_v26 = vld [vmem:[%s411_s0 + $0x26] sm:$0x1]  ;;  %v105_v31 = vmax.f32 %v89_v14, %v97_v25 }
  0x12   :  { %v94_v22 = vmax.f32 %v78_v6, %v86_v16  ;;  %v95_v23 = vmax.f32 %v79_v9, %v87_v17  ;;  %v99_v27 = vld [vmem:[%s411_s0 + $0x36] sm:$0x1]  ;;  %v100_v28 = vld [vmem:[%s411_s0 + $0x46] sm:$0x1]  ;;  %v106_v32 = vmax.f32 %v90_v18, %v98_v26  ;;  %v112_v38 = vld [vmem:[%s411_s0 + $0x7] sm:$0x1] }
  0x13   :  { %v101_v29 = vld [vmem:[%s411_s0 + $0x56] sm:$0x1]  ;;  %v102_v33 = vld [vmem:[%s411_s0 + $0x66] sm:$0x1]  ;;  %v107_v35 = vmax.f32 %v91_v19, %v99_v27  ;;  %v108_v36 = vmax.f32 %v92_v20, %v100_v28  ;;  %v113_v41 = vld [vmem:[%s411_s0 + $0x17] sm:$0x1]  ;;  %v120_v44 = vmax.f32 %v104_v30, %v112_v38 }
  0x14   :  { %v103_v34 = vld [vmem:[%s411_s0 + $0x76] sm:$0x1]  ;;  %v109_v37 = vmax.f32 %v93_v21, %v101_v29  ;;  %v110_v39 = vmax.f32 %v94_v22, %v102_v33  ;;  %v114_v42 = vld [vmem:[%s411_s0 + $0x27] sm:$0x1]  ;;  %v115_v43 = vld [vmem:[%s411_s0 + $0x37] sm:$0x1]  ;;  %v121_v48 = vmax.f32 %v105_v31, %v113_v41 }
  0x15   :  { %v111_v40 = vmax.f32 %v95_v23, %v103_v34  ;;  %v116_v45 = vld [vmem:[%s411_s0 + $0x47] sm:$0x1]  ;;  %v117_v46 = vld [vmem:[%s411_s0 + $0x57] sm:$0x1]  ;;  %v122_v49 = vmax.f32 %v106_v32, %v114_v42  ;;  %v123_v50 = vmax.f32 %v107_v35, %v115_v43  ;;  %v128_v55 = vld [vmem:[%s411_s0 + $0x8] sm:$0x1] }
  0x16   :  { %v118_v47 = vld [vmem:[%s411_s0 + $0x67] sm:$0x1]  ;;  %v119_v51 = vld [vmem:[%s411_s0 + $0x77] sm:$0x1]  ;;  %v124_v52 = vmax.f32 %v108_v36, %v116_v45  ;;  %v125_v53 = vmax.f32 %v109_v37, %v117_v46  ;;  %v129_v56 = vld [vmem:[%s411_s0 + $0x18] sm:$0x1]  ;;  %v136_v61 = vmax.f32 %v120_v44, %v128_v55 }
  0x17   :  { %v126_v54 = vmax.f32 %v110_v39, %v118_v47  ;;  %v127_v57 = vmax.f32 %v111_v40, %v119_v51  ;;  %v130_v58 = vld [vmem:[%s411_s0 + $0x28] sm:$0x1]  ;;  %v131_v59 = vld [vmem:[%s411_s0 + $0x38] sm:$0x1]  ;;  %v137_v62 = vmax.f32 %v121_v48, %v129_v56  ;;  %vm165_vm4 = vcmask 1045509  }
  0x18   :  { %v132_v60 = vld [vmem:[%s411_s0 + $0x48] sm:$0x1]  ;;  %v133_v63 = vld [vmem:[%s411_s0 + $0x58] sm:$0x1]  ;;  %v138_v2 = vmax.f32 %v122_v49, %v130_v58  ;;  %v139_v3 = vmax.f32 %v123_v50, %v131_v59  ;;  %vm168_vm5 = vcmask 1046534   ;;  %vm171_vm6 = vcmask 1047559  }
  0x19   :  { %v134_v0 = vld [vmem:[%s411_s0 + $0x68] sm:$0x1]  ;;  %v135_v1 = vld [vmem:[%s411_s0 + $0x78] sm:$0x1]  ;;  %v140_v4 = vmax.f32 %v124_v52, %v132_v60  ;;  %v141_v5 = vmax.f32 %v125_v53, %v133_v63  ;;  %v152_v8 = vrot.slane %v137_v62, 7  ;;  %vm174_vm7 = vcmask 31744  }
  0x1a   :  { %v142_v6 = vmax.f32 %v126_v54, %v134_v0  ;;  %v143_v7 = vmax.f32 %v127_v57, %v135_v1  ;;  %v155_v9 = vrot.slane %v138_v2, 6  ;;  %v158_v10 = vrot.slane %v139_v3, 5 }
  0x1b   :  { %v161_v11 = vrot.slane %v140_v4, 4  ;;  %v154_v12 = vsel %vm153_vm0, %v152_v8, %v136_v61  ;;  %v164_v13 = vrot.slane %v141_v5, 3 }
  0x1c   :  { %v157_v14 = vsel %vm156_vm1, %v155_v9, %v154_v12  ;;  %v167_v15 = vrot.slane %v142_v6, 2  ;;  %v170_v17 = vrot.slane %v143_v7, 1 }
  0x1d   :  { %v160_v16 = vsel %vm159_vm2, %v158_v10, %v157_v14 }
  0x1e   :  { %v163_v18 = vsel %vm162_vm3, %v161_v11, %v160_v16 }
  0x1f   :  { %v166_v19 = vsel %vm165_vm4, %v164_v13, %v163_v18 }
  0x20   :  { %v169_v20 = vsel %vm168_vm5, %v167_v15, %v166_v19 }
  0x21   :  { %v172_v21 = vsel %vm171_vm6, %v170_v17, %v169_v20 }
  0x22   :  { %175 = vst.msk [vmem:[%s412_s1] sm:$0xff] %vm174_vm7, %v172_v21 }

// kernel: _lambda_.178
= control target key start
LH: loop header
LB: loop body
LE: loop exit
PB: predicated region body
PF: predicated region fallthrough
CT: control target
= control target key end

     0   :  { %9 = vsyncpa [#allocation4], 0  ;;  %s322_s0 = inlined_call_operand.vmem [shape: bf16[16,128], index: 0, kind: input, shape index: {}]   ;;  %s323_s1 = inlined_call_operand.hbm [shape: bf16[128,128], index: 1, kind: input, shape index: {}]   ;;  %s324_s2 = inlined_call_operand.vmem [shape: f32[1,128], index: 2, kind: input, shape index: {}]   ;;  %s325_s3 = inlined_call_operand.hbm [shape: f32[1,128], index: 3, kind: input, shape index: {}]   ;;  %s326_s4 = inlined_call_operand.vmem [shape: f32[16,128], index: 4, kind: output, shape index: {}]  }
   0x1   :  { %s17_s17 = sshll.u32 %s323_s1, 4  ;;  %s18_s17 = int_to_ptr.hbm [resolvable:$true] %s17_s17 }
   0x2   :  { %10 = vsyncpa [#allocation6], 0  ;;  %s275_s18 = smov [#allocation3]   ;;  %s33_s22 = sshll.u32 %s325_s3, 4  ;;  %s34_s22 = int_to_ptr.hbm [resolvable:$true] %s33_s22 }
   0x3   :  { %s19_s19 = sshll.u32 %s275_s18, 4  ;;  %s276_s23 = smov 64   ;;  %s20_s19 = int_to_ptr.vmem [resolvable:$true] %s19_s19 }
   0x4   :  { %s277_s24 = smov 4   ;;  %s278_s25 = smov [#allocation5]  }
   0x5   :  { %25 = dma.hbm_to_vmem [thread:$0]  %s18_s17, 1024, %s20_s19, [#allocation4], %s276_s23, %s276_s23, %s277_s24  }
   0x6   :  { %s35_s26 = sshll.u32 %s278_s25, 4  ;;  %s36_s26 = int_to_ptr.vmem [resolvable:$true] %s35_s26 }
   0x7   :  { %38 = dma.hbm_to_vmem [thread:$0]  %s34_s22, 16, %s36_s26, [#allocation6]  }
   0x8   :  { %271 = dma.done.wait [#allocation4], 1024  }
   0x9   :  { %272 = vsyncadd [#allocation4], 4294966272 }
   0xa   :  { %273 = dma.done.wait [#allocation6], 16  }
   0xb   :  { %274 = vsyncadd [#allocation6], 4294967280  ;;  %v216_v0 = vld [vmem:[#allocation3 + $0x38] sm:$0xff]  ;;  %v215_v1 = vld [vmem:[#allocation3 + $0x30] sm:$0xff] }
   0xc   :  { %127 = vmatpush.bf16.msra.mxu0 %v216_v0  ;;  %v214_v2 = vld [vmem:[#allocation3 + $0x28] sm:$0xff]  ;;  %v213_v3 = vld [vmem:[#allocation3 + $0x20] sm:$0xff]  ;;  %v212_v4 = vld [vmem:[#allocation3 + $0x18] sm:$0xff] }
   0xd   :  { %v211_v5 = vld [vmem:[#allocation3 + $0x10] sm:$0xff]  ;;  %v210_v6 = vld [vmem:[#allocation3 + $0x8] sm:$0xff]  ;;  %v209_v7 = vld [vmem:[#allocation3] sm:$0xff] }
   0xe   :  { %v208_v8 = vld [vmem:[%s322_s0] sm:$0xff] }
   0xf   :  { %v221_v9 = vld [vmem:[%s324_s2] ss:$0 sm:$0xff] }
  0x10   :  { %128 = vmatpush.bf16.msra.mxu0 %v215_v1  ;;  %v222_v10 = vld [vmem:[#allocation5] ss:$0 sm:$0xff] }
  0x14   :  { %129 = vmatpush.bf16.msra.mxu0 %v214_v2 }
  0x18   :  { %130 = vmatpush.bf16.msra.mxu0 %v213_v3 }
  0x1c   :  { %131 = vmatpush.bf16.msra.mxu0 %v212_v4 }
  0x20   :  { %132 = vmatpush.bf16.msra.mxu0 %v211_v5 }
  0x24   :  { %133 = vmatpush.bf16.msra.mxu0 %v210_v6 }
  0x28   :  { %134 = vmatpush.bf16.msra.mxu0 %v209_v7 }
  0x2b   :  { %135 = vmatmul.bf16.vlgmr.msra.gmra.mxu0 %v208_v8 }
  0xa8   :  { %v136_v11 = vpop.f32.mrf.mxu0 }
  0xa9   :  { %v154_v12 = vmul.f32 %v221_v9, %v136_v11 }
  0xab   :  { %v160_v13 = vadd.f32 %v222_v10, %v154_v12 }
  0xad   :  { %v162_v14 = vmax.f32 %v160_v13, 0.0 }
  0xaf   :  { %164 = vst [vmem:[%s326_s4] sm:$0xff] %v162_v14 }
  0xb0   :  { %v138_v15 = vpop.f32.mrf.mxu0 }
  0xb1   :  { %v155_v16 = vmul.f32 %v221_v9, %v138_v15 }
  0xb3   :  { %v161_v17 = vadd.f32 %v222_v10, %v155_v16 }
  0xb5   :  { %v163_v18 = vmax.f32 %v161_v17, 0.0 }
  0xb7   :  { %165 = vst [vmem:[%s326_s4 + $0x8] sm:$0xff] %v163_v18 }
  0xb8   :  { %170 = vsyncpa [#allocation4], 1 }
  0xb9   :  { %171 = vsyncpa [#allocation6], 1 }

// kernel: _lambda_.182
= control target key start
LH: loop header
LB: loop body
LE: loop exit
PB: predicated region body
PF: predicated region fallthrough
CT: control target
= control target key end

     0   :  { %9 = vsyncpa [#allocation4], 0  ;;  %s229_s18 = smov [#allocation3]   ;;  %s294_s0 = inlined_call_operand.vmem [shape: bf16[16,128], index: 0, kind: input, shape index: {}]   ;;  %s295_s1 = inlined_call_operand.vmem [shape: bf16[128,128], index: 1, kind: input, shape index: {}]   ;;  %s296_s2 = inlined_call_operand.vmem [shape: f32[1,128], index: 2, kind: input, shape index: {}]   ;;  %s297_s3 = inlined_call_operand.hbm [shape: f32[1,128], index: 3, kind: input, shape index: {}]   ;;  %s298_s4 = inlined_call_operand.vmem [shape: f32[16,128], index: 4, kind: output, shape index: {}]  }
   0x1   :  { %s21_s17 = sshll.u32 %s297_s3, 4  ;;  %s23_s19 = sshll.u32 %s229_s18, 4  ;;  %s22_s17 = int_to_ptr.hbm [resolvable:$true] %s21_s17  ;;  %s24_s19 = int_to_ptr.vmem [resolvable:$true] %s23_s19 }
   0x2   :  { %26 = dma.hbm_to_vmem [thread:$0]  %s22_s17, 16, %s24_s19, [#allocation4]  }
   0x3   :  { %227 = dma.done.wait [#allocation4], 16  }
   0x4   :  { %228 = vsyncadd [#allocation4], 4294967280  ;;  %v199_v0 = vld [vmem:[%s295_s1 + $0x38] sm:$0xff]  ;;  %v198_v1 = vld [vmem:[%s295_s1 + $0x30] sm:$0xff] }
   0x5   :  { %111 = vmatpush.bf16.msra.mxu0 %v199_v0  ;;  %v197_v2 = vld [vmem:[%s295_s1 + $0x28] sm:$0xff]  ;;  %v196_v3 = vld [vmem:[%s295_s1 + $0x20] sm:$0xff]  ;;  %v195_v4 = vld [vmem:[%s295_s1 + $0x18] sm:$0xff] }
   0x6   :  { %v194_v5 = vld [vmem:[%s295_s1 + $0x10] sm:$0xff]  ;;  %v193_v6 = vld [vmem:[%s295_s1 + $0x8] sm:$0xff]  ;;  %v192_v7 = vld [vmem:[%s295_s1] sm:$0xff] }
   0x7   :  { %v191_v8 = vld [vmem:[%s294_s0] sm:$0xff] }
   0x8   :  { %v201_v9 = vld [vmem:[%s296_s2] ss:$0 sm:$0xff] }
   0x9   :  { %112 = vmatpush.bf16.msra.mxu0 %v198_v1  ;;  %v202_v10 = vld [vmem:[#allocation3] ss:$0 sm:$0xff] }
   0xd   :  { %113 = vmatpush.bf16.msra.mxu0 %v197_v2 }
  0x11   :  { %114 = vmatpush.bf16.msra.mxu0 %v196_v3 }
  0x15   :  { %115 = vmatpush.bf16.msra.mxu0 %v195_v4 }
  0x19   :  { %116 = vmatpush.bf16.msra.mxu0 %v194_v5 }
  0x1d   :  { %117 = vmatpush.bf16.msra.mxu0 %v193_v6 }
  0x21   :  { %118 = vmatpush.bf16.msra.mxu0 %v192_v7 }
  0x24   :  { %119 = vmatmul.bf16.vlgmr.msra.gmra.mxu0 %v191_v8 }
  0xa1   :  { %v120_v11 = vpop.f32.mrf.mxu0 }
  0xa2   :  { %v138_v12 = vmul.f32 %v201_v9, %v120_v11 }
  0xa4   :  { %v144_v13 = vadd.f32 %v202_v10, %v138_v12 }
  0xa6   :  { %v146_v14 = vmax.f32 %v144_v13, 0.0 }
  0xa8   :  { %148 = vst [vmem:[%s298_s4] sm:$0xff] %v146_v14 }
  0xa9   :  { %v122_v15 = vpop.f32.mrf.mxu0 }
  0xaa   :  { %v139_v16 = vmul.f32 %v201_v9, %v122_v15 }
  0xac   :  { %v145_v17 = vadd.f32 %v202_v10, %v139_v16 }
  0xae   :  { %v147_v18 = vmax.f32 %v145_v17, 0.0 }
  0xb0   :  { %149 = vst [vmem:[%s298_s4 + $0x8] sm:$0xff] %v147_v18 }
  0xb1   :  { %154 = vsyncpa [#allocation4], 1 }

// kernel: _lambda_.180
= control target key start
LH: loop header
LB: loop body
LE: loop exit
PB: predicated region body
PF: predicated region fallthrough
CT: control target
= control target key end

     0   :  { %10 = vsyncpa [#allocation4], 0  ;;  %s340_s0 = inlined_call_operand.vmem [shape: bf16[16,128], index: 0, kind: input, shape index: {}]   ;;  %s341_s1 = inlined_call_operand.hbm [shape: bf16[128,128], index: 1, kind: input, shape index: {}]   ;;  %s342_s2 = inlined_call_operand.vmem [shape: f32[1,128], index: 2, kind: input, shape index: {}]   ;;  %s343_s3 = inlined_call_operand.hbm [shape: f32[1,128], index: 3, kind: input, shape index: {}]   ;;  %s344_s4 = inlined_call_operand.vmem [shape: f32[16,128], index: 4, kind: input, shape index: {}]   ;;  %s345_s5 = inlined_call_operand.vmem [shape: f32[16,128], index: 5, kind: output, shape index: {}]  }
   0x1   :  { %s18_s20 = sshll.u32 %s341_s1, 4  ;;  %s19_s20 = int_to_ptr.hbm [resolvable:$true] %s18_s20 }
   0x2   :  { %11 = vsyncpa [#allocation6], 0  ;;  %s282_s21 = smov [#allocation3]   ;;  %s34_s25 = sshll.u32 %s343_s3, 4  ;;  %s35_s25 = int_to_ptr.hbm [resolvable:$true] %s34_s25 }
   0x3   :  { %s20_s22 = sshll.u32 %s282_s21, 4  ;;  %s283_s26 = smov 64   ;;  %s21_s22 = int_to_ptr.vmem [resolvable:$true] %s20_s22 }
   0x4   :  { %s284_s27 = smov 4   ;;  %s285_s28 = smov [#allocation5]  }
   0x5   :  { %26 = dma.hbm_to_vmem [thread:$0]  %s19_s20, 1024, %s21_s22, [#allocation4], %s283_s26, %s283_s26, %s284_s27  }
   0x6   :  { %s36_s29 = sshll.u32 %s285_s28, 4  ;;  %s37_s29 = int_to_ptr.vmem [resolvable:$true] %s36_s29 }
   0x7   :  { %39 = dma.hbm_to_vmem [thread:$0]  %s35_s25, 16, %s37_s29, [#allocation6]  }
   0x8   :  { %278 = dma.done.wait [#allocation4], 1024  }
   0x9   :  { %279 = vsyncadd [#allocation4], 4294966272 }
   0xa   :  { %280 = dma.done.wait [#allocation6], 16  }
   0xb   :  { %281 = vsyncadd [#allocation6], 4294967280  ;;  %v223_v0 = vld [vmem:[#allocation3 + $0x38] sm:$0xff]  ;;  %v222_v1 = vld [vmem:[#allocation3 + $0x30] sm:$0xff] }
   0xc   :  { %130 = vmatpush.bf16.msra.mxu0 %v223_v0  ;;  %v221_v2 = vld [vmem:[#allocation3 + $0x28] sm:$0xff]  ;;  %v220_v3 = vld [vmem:[#allocation3 + $0x20] sm:$0xff]  ;;  %v219_v4 = vld [vmem:[#allocation3 + $0x18] sm:$0xff] }
   0xd   :  { %v218_v5 = vld [vmem:[#allocation3 + $0x10] sm:$0xff]  ;;  %v217_v6 = vld [vmem:[#allocation3 + $0x8] sm:$0xff]  ;;  %v216_v7 = vld [vmem:[#allocation3] sm:$0xff] }
   0xe   :  { %v215_v8 = vld [vmem:[%s340_s0] sm:$0xff]  ;;  %v154_v16 = vld [vmem:[%s344_s4 + $0x8] sm:$0xff] }
   0xf   :  { %v153_v9 = vld [vmem:[%s344_s4] sm:$0xff] }
  0x10   :  { %131 = vmatpush.bf16.msra.mxu0 %v222_v1  ;;  %v228_v10 = vld [vmem:[%s342_s2] ss:$0 sm:$0xff] }
  0x11   :  { %v229_v13 = vld [vmem:[#allocation5] ss:$0 sm:$0xff] }
  0x14   :  { %132 = vmatpush.bf16.msra.mxu0 %v221_v2 }
  0x18   :  { %133 = vmatpush.bf16.msra.mxu0 %v220_v3 }
  0x1c   :  { %134 = vmatpush.bf16.msra.mxu0 %v219_v4 }
  0x20   :  { %135 = vmatpush.bf16.msra.mxu0 %v218_v5 }
  0x24   :  { %136 = vmatpush.bf16.msra.mxu0 %v217_v6 }
  0x28   :  { %137 = vmatpush.bf16.msra.mxu0 %v216_v7 }
  0x2b   :  { %138 = vmatmul.bf16.vlgmr.msra.gmra.mxu0 %v215_v8 }
  0xa8   :  { %v139_v11 = vpop.f32.mrf.mxu0 }
  0xa9   :  { %v155_v12 = vadd.f32 %v153_v9, %v139_v11 }
  0xab   :  { %v161_v14 = vmul.f32 %v228_v10, %v155_v12 }
  0xad   :  { %v167_v15 = vadd.f32 %v229_v13, %v161_v14 }
  0xaf   :  { %v169_v17 = vmax.f32 %v167_v15, 0.0 }
  0xb0   :  { %v141_v18 = vpop.f32.mrf.mxu0 }
  0xb1   :  { %171 = vst [vmem:[%s345_s5] sm:$0xff] %v169_v17  ;;  %v156_v19 = vadd.f32 %v154_v16, %v141_v18 }
  0xb3   :  { %v162_v20 = vmul.f32 %v228_v10, %v156_v19 }
  0xb5   :  { %v168_v21 = vadd.f32 %v229_v13, %v162_v20 }
  0xb7   :  { %v170_v22 = vmax.f32 %v168_v21, 0.0 }
  0xb9   :  { %172 = vst [vmem:[%s345_s5 + $0x8] sm:$0xff] %v170_v22 }
  0xba   :  { %177 = vsyncpa [#allocation4], 1 }
  0xbb   :  { %178 = vsyncpa [#allocation6], 1 }

// kernel: _lambda_.177
= control target key start
LH: loop header
LB: loop body
LE: loop exit
PB: predicated region body
PF: predicated region fallthrough
CT: control target
= control target key end

     0   :  { %9 = vsyncpa [#allocation4], 0  ;;  %s320_s0 = inlined_call_operand.vmem [shape: bf16[16,128], index: 0, kind: input, shape index: {}]   ;;  %s321_s1 = inlined_call_operand.hbm [shape: bf16[128,128], index: 1, kind: input, shape index: {}]   ;;  %s322_s2 = inlined_call_operand.vmem [shape: f32[1,128], index: 2, kind: input, shape index: {}]   ;;  %s323_s3 = inlined_call_operand.hbm [shape: f32[1,128], index: 3, kind: input, shape index: {}]   ;;  %s324_s4 = inlined_call_operand.vmem [shape: f32[16,128], index: 4, kind: output, shape index: {}]  }
   0x1   :  { %s17_s17 = sshll.u32 %s321_s1, 4  ;;  %s18_s17 = int_to_ptr.hbm [resolvable:$true] %s17_s17 }
   0x2   :  { %10 = vsyncpa [#allocation6], 0  ;;  %s273_s18 = smov [#allocation3]   ;;  %s33_s22 = sshll.u32 %s323_s3, 4  ;;  %s34_s22 = int_to_ptr.hbm [resolvable:$true] %s33_s22 }
   0x3   :  { %s19_s19 = sshll.u32 %s273_s18, 4  ;;  %s274_s23 = smov 64   ;;  %s20_s19 = int_to_ptr.vmem [resolvable:$true] %s19_s19 }
   0x4   :  { %s275_s24 = smov 4   ;;  %s276_s25 = smov [#allocation5]  }
   0x5   :  { %25 = dma.hbm_to_vmem [thread:$0]  %s18_s17, 1024, %s20_s19, [#allocation4], %s274_s23, %s274_s23, %s275_s24  }
   0x6   :  { %s35_s26 = sshll.u32 %s276_s25, 4  ;;  %s36_s26 = int_to_ptr.vmem [resolvable:$true] %s35_s26 }
   0x7   :  { %38 = dma.hbm_to_vmem [thread:$0]  %s34_s22, 16, %s36_s26, [#allocation6]  }
   0x8   :  { %269 = dma.done.wait [#allocation4], 1024  }
   0x9   :  { %270 = vsyncadd [#allocation4], 4294966272 }
   0xa   :  { %271 = dma.done.wait [#allocation6], 16  }
   0xb   :  { %272 = vsyncadd [#allocation6], 4294967280  ;;  %v214_v0 = vld [vmem:[#allocation3 + $0x38] sm:$0xff]  ;;  %v213_v1 = vld [vmem:[#allocation3 + $0x30] sm:$0xff] }
   0xc   :  { %127 = vmatpush.bf16.msra.mxu0 %v214_v0  ;;  %v212_v2 = vld [vmem:[#allocation3 + $0x28] sm:$0xff]  ;;  %v211_v3 = vld [vmem:[#allocation3 + $0x20] sm:$0xff]  ;;  %v210_v4 = vld [vmem:[#allocation3 + $0x18] sm:$0xff] }
   0xd   :  { %v209_v5 = vld [vmem:[#allocation3 + $0x10] sm:$0xff]  ;;  %v208_v6 = vld [vmem:[#allocation3 + $0x8] sm:$0xff]  ;;  %v207_v7 = vld [vmem:[#allocation3] sm:$0xff] }
   0xe   :  { %v206_v8 = vld [vmem:[%s320_s0] sm:$0xff] }
   0xf   :  { %v219_v9 = vld [vmem:[%s322_s2] ss:$0 sm:$0xff] }
  0x10   :  { %128 = vmatpush.bf16.msra.mxu0 %v213_v1  ;;  %v220_v10 = vld [vmem:[#allocation5] ss:$0 sm:$0xff] }
  0x14   :  { %129 = vmatpush.bf16.msra.mxu0 %v212_v2 }
  0x18   :  { %130 = vmatpush.bf16.msra.mxu0 %v211_v3 }
  0x1c   :  { %131 = vmatpush.bf16.msra.mxu0 %v210_v4 }
  0x20   :  { %132 = vmatpush.bf16.msra.mxu0 %v209_v5 }
  0x24   :  { %133 = vmatpush.bf16.msra.mxu0 %v208_v6 }
  0x28   :  { %134 = vmatpush.bf16.msra.mxu0 %v207_v7 }
  0x2b   :  { %135 = vmatmul.bf16.vlgmr.msra.gmra.mxu0 %v206_v8 }
  0xa8   :  { %v136_v11 = vpop.f32.mrf.mxu0 }
  0xa9   :  { %v154_v12 = vmul.f32 %v219_v9, %v136_v11 }
  0xab   :  { %v160_v13 = vadd.f32 %v220_v10, %v154_v12 }
  0xad   :  { %162 = vst [vmem:[%s324_s4] sm:$0xff] %v160_v13 }
  0xb0   :  { %v138_v14 = vpop.f32.mrf.mxu0 }
  0xb1   :  { %v155_v15 = vmul.f32 %v219_v9, %v138_v14 }
  0xb3   :  { %v161_v16 = vadd.f32 %v220_v10, %v155_v15 }
  0xb5   :  { %163 = vst [vmem:[%s324_s4 + $0x8] sm:$0xff] %v161_v16 }
  0xb6   :  { %168 = vsyncpa [#allocation4], 1 }
  0xb7   :  { %169 = vsyncpa [#allocation6], 1 }

// kernel: _lambda_.183
= control target key start
LH: loop header
LB: loop body
LE: loop exit
PB: predicated region body
PF: predicated region fallthrough
CT: control target
= control target key end

     0   :  { %10 = vsyncpa [#allocation4], 0  ;;  %s236_s21 = smov [#allocation3]   ;;  %s312_s0 = inlined_call_operand.vmem [shape: bf16[16,128], index: 0, kind: input, shape index: {}]   ;;  %s313_s1 = inlined_call_operand.vmem [shape: bf16[128,128], index: 1, kind: input, shape index: {}]   ;;  %s314_s2 = inlined_call_operand.vmem [shape: f32[1,128], index: 2, kind: input, shape index: {}]   ;;  %s315_s3 = inlined_call_operand.hbm [shape: f32[1,128], index: 3, kind: input, shape index: {}]   ;;  %s316_s4 = inlined_call_operand.vmem [shape: f32[16,128], index: 4, kind: input, shape index: {}]   ;;  %s317_s5 = inlined_call_operand.vmem [shape: f32[16,128], index: 5, kind: output, shape index: {}]  }
   0x1   :  { %s22_s20 = sshll.u32 %s315_s3, 4  ;;  %s24_s22 = sshll.u32 %s236_s21, 4  ;;  %s23_s20 = int_to_ptr.hbm [resolvable:$true] %s22_s20  ;;  %s25_s22 = int_to_ptr.vmem [resolvable:$true] %s24_s22 }
   0x2   :  { %27 = dma.hbm_to_vmem [thread:$0]  %s23_s20, 16, %s25_s22, [#allocation4]  }
   0x3   :  { %234 = dma.done.wait [#allocation4], 16  }
   0x4   :  { %235 = vsyncadd [#allocation4], 4294967280  ;;  %v206_v0 = vld [vmem:[%s313_s1 + $0x38] sm:$0xff]  ;;  %v205_v1 = vld [vmem:[%s313_s1 + $0x30] sm:$0xff] }
   0x5   :  { %114 = vmatpush.bf16.msra.mxu0 %v206_v0  ;;  %v204_v2 = vld [vmem:[%s313_s1 + $0x28] sm:$0xff]  ;;  %v203_v3 = vld [vmem:[%s313_s1 + $0x20] sm:$0xff]  ;;  %v202_v4 = vld [vmem:[%s313_s1 + $0x18] sm:$0xff] }
   0x6   :  { %v201_v5 = vld [vmem:[%s313_s1 + $0x10] sm:$0xff]  ;;  %v200_v6 = vld [vmem:[%s313_s1 + $0x8] sm:$0xff]  ;;  %v199_v7 = vld [vmem:[%s313_s1] sm:$0xff] }
   0x7   :  { %v198_v8 = vld [vmem:[%s312_s0] sm:$0xff]  ;;  %v138_v16 = vld [vmem:[%s316_s4 + $0x8] sm:$0xff] }
   0x8   :  { %v137_v9 = vld [vmem:[%s316_s4] sm:$0xff] }
   0x9   :  { %115 = vmatpush.bf16.msra.mxu0 %v205_v1  ;;  %v208_v10 = vld [vmem:[%s314_s2] ss:$0 sm:$0xff] }
   0xa   :  { %v209_v13 = vld [vmem:[#allocation3] ss:$0 sm:$0xff] }
   0xd   :  { %116 = vmatpush.bf16.msra.mxu0 %v204_v2 }
  0x11   :  { %117 = vmatpush.bf16.msra.mxu0 %v203_v3 }
  0x15   :  { %118 = vmatpush.bf16.msra.mxu0 %v202_v4 }
  0x19   :  { %119 = vmatpush.bf16.msra.mxu0 %v201_v5 }
  0x1d   :  { %120 = vmatpush.bf16.msra.mxu0 %v200_v6 }
  0x21   :  { %121 = vmatpush.bf16.msra.mxu0 %v199_v7 }
  0x24   :  { %122 = vmatmul.bf16.vlgmr.msra.gmra.mxu0 %v198_v8 }
  0xa1   :  { %v123_v11 = vpop.f32.mrf.mxu0 }
  0xa2   :  { %v139_v12 = vadd.f32 %v137_v9, %v123_v11 }
  0xa4   :  { %v145_v14 = vmul.f32 %v208_v10, %v139_v12 }
  0xa6   :  { %v151_v15 = vadd.f32 %v209_v13, %v145_v14 }
  0xa8   :  { %v153_v17 = vmax.f32 %v151_v15, 0.0 }
  0xa9   :  { %v125_v18 = vpop.f32.mrf.mxu0 }
  0xaa   :  { %155 = vst [vmem:[%s317_s5] sm:$0xff] %v153_v17  ;;  %v140_v19 = vadd.f32 %v138_v16, %v125_v18 }
  0xac   :  { %v146_v20 = vmul.f32 %v208_v10, %v140_v19 }
  0xae   :  { %v152_v21 = vadd.f32 %v209_v13, %v146_v20 }
  0xb0   :  { %v154_v22 = vmax.f32 %v152_v21, 0.0 }
  0xb2   :  { %156 = vst [vmem:[%s317_s5 + $0x8] sm:$0xff] %v154_v22 }
  0xb3   :  { %161 = vsyncpa [#allocation4], 1 }

// kernel: _lambda_.187
= control target key start
LH: loop header
LB: loop body
LE: loop exit
PB: predicated region body
PF: predicated region fallthrough
CT: control target
= control target key end

     0   :  { %9 = vsyncpa [#allocation4], 0  ;;  %s227_s18 = smov [#allocation3]   ;;  %s292_s0 = inlined_call_operand.vmem [shape: bf16[16,128], index: 0, kind: input, shape index: {}]   ;;  %s293_s1 = inlined_call_operand.vmem [shape: bf16[128,128], index: 1, kind: input, shape index: {}]   ;;  %s294_s2 = inlined_call_operand.vmem [shape: f32[1,128], index: 2, kind: input, shape index: {}]   ;;  %s295_s3 = inlined_call_operand.hbm [shape: f32[1,128], index: 3, kind: input, shape index: {}]   ;;  %s296_s4 = inlined_call_operand.vmem [shape: f32[16,128], index: 4, kind: output, shape index: {}]  }
   0x1   :  { %s21_s17 = sshll.u32 %s295_s3, 4  ;;  %s23_s19 = sshll.u32 %s227_s18, 4  ;;  %s22_s17 = int_to_ptr.hbm [resolvable:$true] %s21_s17  ;;  %s24_s19 = int_to_ptr.vmem [resolvable:$true] %s23_s19 }
   0x2   :  { %26 = dma.hbm_to_vmem [thread:$0]  %s22_s17, 16, %s24_s19, [#allocation4]  }
   0x3   :  { %225 = dma.done.wait [#allocation4], 16  }
   0x4   :  { %226 = vsyncadd [#allocation4], 4294967280  ;;  %v197_v0 = vld [vmem:[%s293_s1 + $0x38] sm:$0xff]  ;;  %v196_v1 = vld [vmem:[%s293_s1 + $0x30] sm:$0xff] }
   0x5   :  { %111 = vmatpush.bf16.msra.mxu0 %v197_v0  ;;  %v195_v2 = vld [vmem:[%s293_s1 + $0x28] sm:$0xff]  ;;  %v194_v3 = vld [vmem:[%s293_s1 + $0x20] sm:$0xff]  ;;  %v193_v4 = vld [vmem:[%s293_s1 + $0x18] sm:$0xff] }
   0x6   :  { %v192_v5 = vld [vmem:[%s293_s1 + $0x10] sm:$0xff]  ;;  %v191_v6 = vld [vmem:[%s293_s1 + $0x8] sm:$0xff]  ;;  %v190_v7 = vld [vmem:[%s293_s1] sm:$0xff] }
   0x7   :  { %v189_v8 = vld [vmem:[%s292_s0] sm:$0xff] }
   0x8   :  { %v199_v9 = vld [vmem:[%s294_s2] ss:$0 sm:$0xff] }
   0x9   :  { %112 = vmatpush.bf16.msra.mxu0 %v196_v1  ;;  %v200_v10 = vld [vmem:[#allocation3] ss:$0 sm:$0xff] }
   0xd   :  { %113 = vmatpush.bf16.msra.mxu0 %v195_v2 }
  0x11   :  { %114 = vmatpush.bf16.msra.mxu0 %v194_v3 }
  0x15   :  { %115 = vmatpush.bf16.msra.mxu0 %v193_v4 }
  0x19   :  { %116 = vmatpush.bf16.msra.mxu0 %v192_v5 }
  0x1d   :  { %117 = vmatpush.bf16.msra.mxu0 %v191_v6 }
  0x21   :  { %118 = vmatpush.bf16.msra.mxu0 %v190_v7 }
  0x24   :  { %119 = vmatmul.bf16.vlgmr.msra.gmra.mxu0 %v189_v8 }
  0xa1   :  { %v120_v11 = vpop.f32.mrf.mxu0 }
  0xa2   :  { %v138_v12 = vmul.f32 %v199_v9, %v120_v11 }
  0xa4   :  { %v144_v13 = vadd.f32 %v200_v10, %v138_v12 }
  0xa6   :  { %146 = vst [vmem:[%s296_s4] sm:$0xff] %v144_v13 }
  0xa9   :  { %v122_v14 = vpop.f32.mrf.mxu0 }
  0xaa   :  { %v139_v15 = vmul.f32 %v199_v9, %v122_v14 }
  0xac   :  { %v145_v16 = vadd.f32 %v200_v10, %v139_v15 }
  0xae   :  { %147 = vst [vmem:[%s296_s4 + $0x8] sm:$0xff] %v145_v16 }
  0xaf   :  { %152 = vsyncpa [#allocation4], 1 }

// kernel: _lambda_.202
= control target key start
LH: loop header
LB: loop body
LE: loop exit
PB: predicated region body
PF: predicated region fallthrough
CT: control target
= control target key end

     0   :  { %9 = vsyncpa [#allocation4], 0  ;;  %s356_s18 = smov [#allocation3]   ;;  %s454_s0 = inlined_call_operand.vmem [shape: bf16[16,256], index: 0, kind: input, shape index: {}]   ;;  %s455_s1 = inlined_call_operand.vmem [shape: bf16[256,128], index: 1, kind: input, shape index: {}]   ;;  %s456_s2 = inlined_call_operand.vmem [shape: f32[1,128], index: 2, kind: input, shape index: {}]   ;;  %s457_s3 = inlined_call_operand.hbm [shape: f32[1,128], index: 3, kind: input, shape index: {}]   ;;  %s458_s4 = inlined_call_operand.vmem [shape: f32[16,128], index: 4, kind: output, shape index: {}]  }
   0x1   :  { %s21_s17 = sshll.u32 %s457_s3, 4  ;;  %s23_s19 = sshll.u32 %s356_s18, 4  ;;  %s22_s17 = int_to_ptr.hbm [resolvable:$true] %s21_s17  ;;  %s24_s19 = int_to_ptr.vmem [resolvable:$true] %s23_s19 }
   0x2   :  { %26 = dma.hbm_to_vmem [thread:$0]  %s22_s17, 16, %s24_s19, [#allocation4]  }
   0x3   :  { %354 = dma.done.wait [#allocation4], 16  }
   0x4   :  { %355 = vsyncadd [#allocation4], 4294967280  ;;  %v318_v0 = vld [vmem:[%s455_s1 + $0x38] sm:$0xff]  ;;  %v317_v2 = vld [vmem:[%s455_s1 + $0x30] sm:$0xff] }
   0x5   :  { %v326_v1 = vld [vmem:[%s455_s1 + $0x78] sm:$0xff]  ;;  %179 = vmatpush.bf16.msra.mxu0 %v318_v0  ;;  %v325_v3 = vld [vmem:[%s455_s1 + $0x70] sm:$0xff]  ;;  %v316_v4 = vld [vmem:[%s455_s1 + $0x28] sm:$0xff] }
   0x6   :  { %193 = vmatpush.bf16.msra.mxu1 %v326_v1  ;;  %v324_v5 = vld [vmem:[%s455_s1 + $0x68] sm:$0xff]  ;;  %v315_v6 = vld [vmem:[%s455_s1 + $0x20] sm:$0xff]  ;;  %v314_v8 = vld [vmem:[%s455_s1 + $0x18] sm:$0xff] }
   0x7   :  { %v323_v7 = vld [vmem:[%s455_s1 + $0x60] sm:$0xff]  ;;  %v322_v9 = vld [vmem:[%s455_s1 + $0x58] sm:$0xff]  ;;  %v313_v10 = vld [vmem:[%s455_s1 + $0x10] sm:$0xff] }
   0x8   :  { %v321_v11 = vld [vmem:[%s455_s1 + $0x50] sm:$0xff]  ;;  %v312_v12 = vld [vmem:[%s455_s1 + $0x8] sm:$0xff]  ;;  %v311_v14 = vld [vmem:[%s455_s1] sm:$0xff] }
   0x9   :  { %180 = vmatpush.bf16.msra.mxu0 %v317_v2  ;;  %v320_v13 = vld [vmem:[%s455_s1 + $0x48] sm:$0xff]  ;;  %v319_v15 = vld [vmem:[%s455_s1 + $0x40] sm:$0xff] }
   0xa   :  { %194 = vmatpush.bf16.msra.mxu1 %v325_v3  ;;  %v239_v16 = vld [vmem:[%s454_s0] sm:$0xf]  ;;  %v310_v17 = vld [vmem:[%s454_s0 + $0x4] sm:$0xf0]  ;;  %v309_v18 = vld [vmem:[%s454_s0 + $0x4] sm:$0xf] }
   0xb   :  { %v241_v19 = vld [vmem:[%s454_s0 + $0x8] sm:$0xf0]  ;;  %v240_v20 = vor.u32 %v310_v17, %v239_v16  ;;  %v328_v22 = vld [vmem:[%s456_s2] ss:$0 sm:$0xff] }
   0xc   :  { %v244_v21 = vor.u32 %v309_v18, %v241_v19  ;;  %v329_v26 = vld [vmem:[#allocation3] ss:$0 sm:$0xff] }
   0xd   :  { %181 = vmatpush.bf16.msra.mxu0 %v316_v4 }
   0xe   :  { %195 = vmatpush.bf16.msra.mxu1 %v324_v5 }
  0x11   :  { %182 = vmatpush.bf16.msra.mxu0 %v315_v6 }
  0x12   :  { %196 = vmatpush.bf16.msra.mxu1 %v323_v7 }
  0x15   :  { %183 = vmatpush.bf16.msra.mxu0 %v314_v8 }
  0x16   :  { %197 = vmatpush.bf16.msra.mxu1 %v322_v9 }
  0x19   :  { %184 = vmatpush.bf16.msra.mxu0 %v313_v10 }
  0x1a   :  { %198 = vmatpush.bf16.msra.mxu1 %v321_v11 }
  0x1d   :  { %185 = vmatpush.bf16.msra.mxu0 %v312_v12 }
  0x1e   :  { %199 = vmatpush.bf16.msra.mxu1 %v320_v13 }
  0x21   :  { %186 = vmatpush.bf16.msra.mxu0 %v311_v14 }
  0x22   :  { %200 = vmatpush.bf16.msra.mxu1 %v319_v15 }
  0x24   :  { %187 = vmatmul.bf16.vlgmr.msra.gmra.mxu0 %v240_v20 }
  0x25   :  { %201 = vmatmul.bf16.vlgmr.msra.gmra.mxu1 %v244_v21 }
  0xa1   :  { %v188_v23 = vpop.f32.mrf.mxu0 }
  0xa2   :  { %v202_v24 = vpop.f32.mrf.mxu1 }
  0xa3   :  { %v203_v25 = vadd.f32 %v202_v24, %v188_v23 }
  0xa5   :  { %v220_v27 = vmul.f32 %v328_v22, %v203_v25 }
  0xa7   :  { %v226_v28 = vadd.f32 %v329_v26, %v220_v27 }
  0xa9   :  { %v228_v29 = vmax.f32 %v226_v28, 0.0  ;;  %v190_v30 = vpop.f32.mrf.mxu0 }
  0xaa   :  { %v204_v31 = vpop.f32.mrf.mxu1 }
  0xab   :  { %230 = vst [vmem:[%s458_s4] sm:$0xff] %v228_v29  ;;  %v205_v32 = vadd.f32 %v204_v31, %v190_v30 }
  0xad   :  { %v221_v33 = vmul.f32 %v328_v22, %v205_v32 }
  0xaf   :  { %v227_v34 = vadd.f32 %v329_v26, %v221_v33 }
  0xb1   :  { %v229_v35 = vmax.f32 %v227_v34, 0.0 }
  0xb3   :  { %231 = vst [vmem:[%s458_s4 + $0x8] sm:$0xff] %v229_v35 }
  0xb4   :  { %236 = vsyncpa [#allocation4], 1 }

// kernel: _lambda_.122
= control target key start
LH: loop header
LB: loop body
LE: loop exit
PB: predicated region body
PF: predicated region fallthrough
CT: control target
= control target key end

     0   :  { %vm153_vm0 = vcmask 1041409   ;;  %vm156_vm1 = vcmask 1042434   ;;  %vm159_vm2 = vcmask 1043459   ;;  %vm162_vm3 = vcmask 1044484   ;;  %s411_s0 = inlined_call_operand.vmem [shape: f32[8,9,8], index: 0, kind: input, shape index: {}]   ;;  %s412_s1 = inlined_call_operand.vmem [shape: f32[8,8], index: 1, kind: output, shape index: {}]  }
   0x1   :  { %v8_v0 = vld [vmem:[%s411_s0] sm:$0x1]  ;;  %v9_v1 = vld [vmem:[%s411_s0 + $0x10] sm:$0x1]  ;;  %v16_v8 = vld [vmem:[%s411_s0 + $0x1] sm:$0x1] }
   0x2   :  { %v10_v2 = vld [vmem:[%s411_s0 + $0x20] sm:$0x1]  ;;  %v11_v3 = vld [vmem:[%s411_s0 + $0x30] sm:$0x1]  ;;  %v17_v9 = vld [vmem:[%s411_s0 + $0x11] sm:$0x1]  ;;  %v24_v12 = vmax.f32 %v8_v0, %v16_v8 }
   0x3   :  { %v12_v4 = vld [vmem:[%s411_s0 + $0x40] sm:$0x1]  ;;  %v13_v5 = vld [vmem:[%s411_s0 + $0x50] sm:$0x1]  ;;  %v18_v10 = vld [vmem:[%s411_s0 + $0x21] sm:$0x1]  ;;  %v25_v16 = vmax.f32 %v9_v1, %v17_v9 }
   0x4   :  { %v14_v6 = vld [vmem:[%s411_s0 + $0x60] sm:$0x1]  ;;  %v15_v7 = vld [vmem:[%s411_s0 + $0x70] sm:$0x1]  ;;  %v19_v11 = vld [vmem:[%s411_s0 + $0x31] sm:$0x1]  ;;  %v26_v17 = vmax.f32 %v10_v2, %v18_v10 }
   0x5   :  { %v20_v13 = vld [vmem:[%s411_s0 + $0x41] sm:$0x1]  ;;  %v21_v14 = vld [vmem:[%s411_s0 + $0x51] sm:$0x1]  ;;  %v27_v18 = vmax.f32 %v11_v3, %v19_v11  ;;  %v32_v23 = vld [vmem:[%s411_s0 + $0x2] sm:$0x1] }
   0x6   :  { %v22_v15 = vld [vmem:[%s411_s0 + $0x61] sm:$0x1]  ;;  %v23_v19 = vld [vmem:[%s411_s0 + $0x71] sm:$0x1]  ;;  %v28_v20 = vmax.f32 %v12_v4, %v20_v13  ;;  %v29_v21 = vmax.f32 %v13_v5, %v21_v14  ;;  %v33_v24 = vld [vmem:[%s411_s0 + $0x12] sm:$0x1]  ;;  %v40_v29 = vmax.f32 %v24_v12, %v32_v23 }
   0x7   :  { %v30_v22 = vmax.f32 %v14_v6, %v22_v15  ;;  %v31_v25 = vmax.f32 %v15_v7, %v23_v19  ;;  %v34_v26 = vld [vmem:[%s411_s0 + $0x22] sm:$0x1]  ;;  %v35_v27 = vld [vmem:[%s411_s0 + $0x32] sm:$0x1]  ;;  %v41_v30 = vmax.f32 %v25_v16, %v33_v24  ;;  %v48_v40 = vld [vmem:[%s411_s0 + $0x3] sm:$0x1] }
   0x8   :  { %v36_v28 = vld [vmem:[%s411_s0 + $0x42] sm:$0x1]  ;;  %v37_v31 = vld [vmem:[%s411_s0 + $0x52] sm:$0x1]  ;;  %v42_v34 = vmax.f32 %v26_v17, %v34_v26  ;;  %v43_v35 = vmax.f32 %v27_v18, %v35_v27  ;;  %v49_v41 = vld [vmem:[%s411_s0 + $0x13] sm:$0x1]  ;;  %v56_v46 = vmax.f32 %v40_v29, %v48_v40 }
   0x9   :  { %v38_v32 = vld [vmem:[%s411_s0 + $0x62] sm:$0x1]  ;;  %v39_v33 = vld [vmem:[%s411_s0 + $0x72] sm:$0x1]  ;;  %v44_v36 = vmax.f32 %v28_v20, %v36_v28  ;;  %v45_v37 = vmax.f32 %v29_v21, %v37_v31  ;;  %v50_v42 = vld [vmem:[%s411_s0 + $0x23] sm:$0x1]  ;;  %v57_v47 = vmax.f32 %v41_v30, %v49_v41 }
   0xa   :  { %v46_v38 = vmax.f32 %v30_v22, %v38_v32  ;;  %v47_v39 = vmax.f32 %v31_v25, %v39_v33  ;;  %v51_v43 = vld [vmem:[%s411_s0 + $0x33] sm:$0x1]  ;;  %v52_v44 = vld [vmem:[%s411_s0 + $0x43] sm:$0x1]  ;;  %v58_v48 = vmax.f32 %v42_v34, %v50_v42  ;;  %v64_v54 = vld [vmem:[%s411_s0 + $0x4] sm:$0x1] }
   0xb   :  { %v53_v45 = vld [vmem:[%s411_s0 + $0x53] sm:$0x1]  ;;  %v54_v49 = vld [vmem:[%s411_s0 + $0x63] sm:$0x1]  ;;  %v59_v51 = vmax.f32 %v43_v35, %v51_v43  ;;  %v60_v52 = vmax.f32 %v44_v36, %v52_v44  ;;  %v65_v57 = vld [vmem:[%s411_s0 + $0x14] sm:$0x1]  ;;  %v72_v60 = vmax.f32 %v56_v46, %v64_v54 }
   0xc   :  { %v55_v50 = vld [vmem:[%s411_s0 + $0x73] sm:$0x1]  ;;  %v61_v53 = vmax.f32 %v45_v37, %v53_v45  ;;  %v62_v55 = vmax.f32 %v46_v38, %v54_v49  ;;  %v66_v58 = vld [vmem:[%s411_s0 + $0x24] sm:$0x1]  ;;  %v67_v59 = vld [vmem:[%s411_s0 + $0x34] sm:$0x1]  ;;  %v73_v0 = vmax.f32 %v57_v47, %v65_v57 }
   0xd   :  { %v63_v56 = vmax.f32 %v47_v39, %v55_v50  ;;  %v68_v61 = vld [vmem:[%s411_s0 + $0x44] sm:$0x1]  ;;  %v69_v62 = vld [vmem:[%s411_s0 + $0x54] sm:$0x1]  ;;  %v74_v1 = vmax.f32 %v58_v48, %v66_v58  ;;  %v75_v2 = vmax.f32 %v59_v51, %v67_v59  ;;  %v80_v7 = vld [vmem:[%s411_s0 + $0x5] sm:$0x1] }
   0xe   :  { %v70_v63 = vld [vmem:[%s411_s0 + $0x64] sm:$0x1]  ;;  %v71_v3 = vld [vmem:[%s411_s0 + $0x74] sm:$0x1]  ;;  %v76_v4 = vmax.f32 %v60_v52, %v68_v61  ;;  %v77_v5 = vmax.f32 %v61_v53, %v69_v62  ;;  %v81_v8 = vld [vmem:[%s411_s0 + $0x15] sm:$0x1]  ;;  %v88_v13 = vmax.f32 %v72_v60, %v80_v7 }
   0xf   :  { %v78_v6 = vmax.f32 %v62_v55, %v70_v63  ;;  %v79_v9 = vmax.f32 %v63_v56, %v71_v3  ;;  %v82_v10 = vld [vmem:[%s411_s0 + $0x25] sm:$0x1]  ;;  %v83_v11 = vld [vmem:[%s411_s0 + $0x35] sm:$0x1]  ;;  %v89_v14 = vmax.f32 %v73_v0, %v81_v8  ;;  %v96_v24 = vld [vmem:[%s411_s0 + $0x6] sm:$0x1] }
  0x10   :  { %v84_v12 = vld [vmem:[%s411_s0 + $0x45] sm:$0x1]  ;;  %v85_v15 = vld [vmem:[%s411_s0 + $0x55] sm:$0x1]  ;;  %v90_v18 = vmax.f32 %v74_v1, %v82_v10  ;;  %v91_v19 = vmax.f32 %v75_v2, %v83_v11  ;;  %v97_v25 = vld [vmem:[%s411_s0 + $0x16] sm:$0x1]  ;;  %v104_v30 = vmax.f32 %v88_v13, %v96_v24 }
  0x11   :  { %v86_v16 = vld [vmem:[%s411_s0 + $0x65] sm:$0x1]  ;;  %v87_v17 = vld [vmem:[%s411_s0 + $0x75] sm:$0x1]  ;;  %v92_v20 = vmax.f32 %v76_v4, %v84_v12  ;;  %v93_v21 = vmax.f32 %v77_v5, %v85_v15  ;;  %v98_v26 = vld [vmem:[%s411_s0 + $0x26] sm:$0x1]  ;;  %v105_v31 = vmax.f32 %v89_v14, %v97_v25 }
  0x12   :  { %v94_v22 = vmax.f32 %v78_v6, %v86_v16  ;;  %v95_v23 = vmax.f32 %v79_v9, %v87_v17  ;;  %v99_v27 = vld [vmem:[%s411_s0 + $0x36] sm:$0x1]  ;;  %v100_v28 = vld [vmem:[%s411_s0 + $0x46] sm:$0x1]  ;;  %v106_v32 = vmax.f32 %v90_v18, %v98_v26  ;;  %v112_v38 = vld [vmem:[%s411_s0 + $0x7] sm:$0x1] }
  0x13   :  { %v101_v29 = vld [vmem:[%s411_s0 + $0x56] sm:$0x1]  ;;  %v102_v33 = vld [vmem:[%s411_s0 + $0x66] sm:$0x1]  ;;  %v107_v35 = vmax.f32 %v91_v19, %v99_v27  ;;  %v108_v36 = vmax.f32 %v92_v20, %v100_v28  ;;  %v113_v41 = vld [vmem:[%s411_s0 + $0x17] sm:$0x1]  ;;  %v120_v44 = vmax.f32 %v104_v30, %v112_v38 }
  0x14   :  { %v103_v34 = vld [vmem:[%s411_s0 + $0x76] sm:$0x1]  ;;  %v109_v37 = vmax.f32 %v93_v21, %v101_v29  ;;  %v110_v39 = vmax.f32 %v94_v22, %v102_v33  ;;  %v114_v42 = vld [vmem:[%s411_s0 + $0x27] sm:$0x1]  ;;  %v115_v43 = vld [vmem:[%s411_s0 + $0x37] sm:$0x1]  ;;  %v121_v48 = vmax.f32 %v105_v31, %v113_v41 }
  0x15   :  { %v111_v40 = vmax.f32 %v95_v23, %v103_v34  ;;  %v116_v45 = vld [vmem:[%s411_s0 + $0x47] sm:$0x1]  ;;  %v117_v46 = vld [vmem:[%s411_s0 + $0x57] sm:$0x1]  ;;  %v122_v49 = vmax.f32 %v106_v32, %v114_v42  ;;  %v123_v50 = vmax.f32 %v107_v35, %v115_v43  ;;  %v128_v55 = vld [vmem:[%s411_s0 + $0x8] sm:$0x1] }
  0x16   :  { %v118_v47 = vld [vmem:[%s411_s0 + $0x67] sm:$0x1]  ;;  %v119_v51 = vld [vmem:[%s411_s0 + $0x77] sm:$0x1]  ;;  %v124_v52 = vmax.f32 %v108_v36, %v116_v45  ;;  %v125_v53 = vmax.f32 %v109_v37, %v117_v46  ;;  %v129_v56 = vld [vmem:[%s411_s0 + $0x18] sm:$0x1]  ;;  %v136_v61 = vmax.f32 %v120_v44, %v128_v55 }
  0x17   :  { %v126_v54 = vmax.f32 %v110_v39, %v118_v47  ;;  %v127_v57 = vmax.f32 %v111_v40, %v119_v51  ;;  %v130_v58 = vld [vmem:[%s411_s0 + $0x28] sm:$0x1]  ;;  %v131_v59 = vld [vmem:[%s411_s0 + $0x38] sm:$0x1]  ;;  %v137_v62 = vmax.f32 %v121_v48, %v129_v56  ;;  %vm165_vm4 = vcmask 1045509  }
  0x18   :  { %v132_v60 = vld [vmem:[%s411_s0 + $0x48] sm:$0x1]  ;;  %v133_v63 = vld [vmem:[%s411_s0 + $0x58] sm:$0x1]  ;;  %v138_v2 = vmax.f32 %v122_v49, %v130_v58  ;;  %v139_v3 = vmax.f32 %v123_v50, %v131_v59  ;;  %vm168_vm5 = vcmask 1046534   ;;  %vm171_vm6 = vcmask 1047559  }
  0x19   :  { %v134_v0 = vld [vmem:[%s411_s0 + $0x68] sm:$0x1]  ;;  %v135_v1 = vld [vmem:[%s411_s0 + $0x78] sm:$0x1]  ;;  %v140_v4 = vmax.f32 %v124_v52, %v132_v60  ;;  %v141_v5 = vmax.f32 %v125_v53, %v133_v63  ;;  %v152_v8 = vrot.slane %v137_v62, 7  ;;  %vm174_vm7 = vcmask 64512  }
  0x1a   :  { %v142_v6 = vmax.f32 %v126_v54, %v134_v0  ;;  %v143_v7 = vmax.f32 %v127_v57, %v135_v1  ;;  %v155_v9 = vrot.slane %v138_v2, 6  ;;  %v158_v10 = vrot.slane %v139_v3, 5 }
  0x1b   :  { %v161_v11 = vrot.slane %v140_v4, 4  ;;  %v154_v12 = vsel %vm153_vm0, %v152_v8, %v136_v61  ;;  %v164_v13 = vrot.slane %v141_v5, 3 }
  0x1c   :  { %v157_v14 = vsel %vm156_vm1, %v155_v9, %v154_v12  ;;  %v167_v15 = vrot.slane %v142_v6, 2  ;;  %v170_v17 = vrot.slane %v143_v7, 1 }
  0x1d   :  { %v160_v16 = vsel %vm159_vm2, %v158_v10, %v157_v14 }
  0x1e   :  { %v163_v18 = vsel %vm162_vm3, %v161_v11, %v160_v16 }
  0x1f   :  { %v166_v19 = vsel %vm165_vm4, %v164_v13, %v163_v18 }
  0x20   :  { %v169_v20 = vsel %vm168_vm5, %v167_v15, %v166_v19 }
  0x21   :  { %v172_v21 = vsel %vm171_vm6, %v170_v17, %v169_v20 }
  0x22   :  { %175 = vst.msk [vmem:[%s412_s1] sm:$0xff] %vm174_vm7, %v172_v21 }

// kernel: _lambda_.148
= control target key start
LH: loop header
LB: loop body
LE: loop exit
PB: predicated region body
PF: predicated region fallthrough
CT: control target
= control target key end

     0   :  { %9 = vsyncpa [#allocation4], 0  ;;  %s487_s18 = smov [#allocation3]   ;;  %s615_s0 = inlined_call_operand.vmem [shape: bf16[16,384], index: 0, kind: input, shape index: {}]   ;;  %s616_s1 = inlined_call_operand.vmem [shape: bf16[384,128], index: 1, kind: input, shape index: {}]   ;;  %s617_s2 = inlined_call_operand.vmem [shape: f32[1,128], index: 2, kind: input, shape index: {}]   ;;  %s618_s3 = inlined_call_operand.hbm [shape: f32[1,128], index: 3, kind: input, shape index: {}]   ;;  %s619_s4 = inlined_call_operand.vmem [shape: f32[16,128], index: 4, kind: output, shape index: {}]  }
   0x1   :  { %s21_s17 = sshll.u32 %s618_s3, 4  ;;  %s23_s19 = sshll.u32 %s487_s18, 4  ;;  %s22_s17 = int_to_ptr.hbm [resolvable:$true] %s21_s17  ;;  %s24_s19 = int_to_ptr.vmem [resolvable:$true] %s23_s19 }
   0x2   :  { %26 = dma.hbm_to_vmem [thread:$0]  %s22_s17, 16, %s24_s19, [#allocation4]  }
   0x3   :  { %485 = dma.done.wait [#allocation4], 16  }
   0x4   :  { %486 = vsyncadd [#allocation4], 4294967280  ;;  %v441_v0 = vld [vmem:[%s616_s1 + $0x38] sm:$0xff]  ;;  %v440_v3 = vld [vmem:[%s616_s1 + $0x30] sm:$0xff] }
   0x5   :  { %v449_v1 = vld [vmem:[%s616_s1 + $0x78] sm:$0xff]  ;;  %251 = vmatpush.bf16.msra.mxu0 %v441_v0  ;;  %v448_v4 = vld [vmem:[%s616_s1 + $0x70] sm:$0xff]  ;;  %v439_v6 = vld [vmem:[%s616_s1 + $0x28] sm:$0xff] }
   0x6   :  { %v457_v2 = vld [vmem:[%s616_s1 + $0xb8] sm:$0xff]  ;;  %265 = vmatpush.bf16.msra.mxu1 %v449_v1  ;;  %v456_v5 = vld [vmem:[%s616_s1 + $0xb0] sm:$0xff]  ;;  %v447_v7 = vld [vmem:[%s616_s1 + $0x68] sm:$0xff] }
   0x7   :  { %279 = vmatpush.bf16.msra.mxu2 %v457_v2  ;;  %v455_v8 = vld [vmem:[%s616_s1 + $0xa8] sm:$0xff]  ;;  %v438_v9 = vld [vmem:[%s616_s1 + $0x20] sm:$0xff]  ;;  %v437_v12 = vld [vmem:[%s616_s1 + $0x18] sm:$0xff] }
   0x8   :  { %v446_v10 = vld [vmem:[%s616_s1 + $0x60] sm:$0xff]  ;;  %v445_v13 = vld [vmem:[%s616_s1 + $0x58] sm:$0xff]  ;;  %v436_v15 = vld [vmem:[%s616_s1 + $0x10] sm:$0xff] }
   0x9   :  { %252 = vmatpush.bf16.msra.mxu0 %v440_v3  ;;  %v454_v11 = vld [vmem:[%s616_s1 + $0xa0] sm:$0xff]  ;;  %v453_v14 = vld [vmem:[%s616_s1 + $0x98] sm:$0xff]  ;;  %v444_v16 = vld [vmem:[%s616_s1 + $0x50] sm:$0xff] }
   0xa   :  { %266 = vmatpush.bf16.msra.mxu1 %v448_v4  ;;  %v452_v17 = vld [vmem:[%s616_s1 + $0x90] sm:$0xff]  ;;  %v435_v18 = vld [vmem:[%s616_s1 + $0x8] sm:$0xff]  ;;  %v434_v21 = vld [vmem:[%s616_s1] sm:$0xff] }
   0xb   :  { %280 = vmatpush.bf16.msra.mxu2 %v456_v5  ;;  %v443_v19 = vld [vmem:[%s616_s1 + $0x48] sm:$0xff]  ;;  %v442_v22 = vld [vmem:[%s616_s1 + $0x40] sm:$0xff]  ;;  %v327_v26 = vld [vmem:[%s615_s0 + $0xc] sm:$0xf0] }
   0xc   :  { %v451_v20 = vld [vmem:[%s616_s1 + $0x88] sm:$0xff]  ;;  %v325_v23 = vld [vmem:[%s615_s0] sm:$0xf]  ;;  %v431_v25 = vld [vmem:[%s615_s0 + $0x4] sm:$0xf] }
   0xd   :  { %253 = vmatpush.bf16.msra.mxu0 %v439_v6  ;;  %v432_v24 = vld [vmem:[%s615_s0 + $0x8] sm:$0xf0]  ;;  %v450_v27 = vld [vmem:[%s616_s1 + $0x80] sm:$0xff]  ;;  %v333_v28 = vld [vmem:[%s615_s0 + $0x8] sm:$0xf]  ;;  %v330_v31 = vor.u32 %v431_v25, %v327_v26 }
   0xe   :  { %267 = vmatpush.bf16.msra.mxu1 %v447_v7  ;;  %v433_v29 = vld [vmem:[%s615_s0 + $0x10] sm:$0xf0]  ;;  %v326_v30 = vor.u32 %v432_v24, %v325_v23  ;;  %v459_v36 = vld [vmem:[%s617_s2] ss:$0 sm:$0xff] }
   0xf   :  { %281 = vmatpush.bf16.msra.mxu2 %v455_v8  ;;  %v334_v32 = vor.u32 %v433_v29, %v333_v28  ;;  %v460_v39 = vld [vmem:[#allocation3] ss:$0 sm:$0xff] }
  0x11   :  { %254 = vmatpush.bf16.msra.mxu0 %v438_v9 }
  0x12   :  { %268 = vmatpush.bf16.msra.mxu1 %v446_v10 }
  0x13   :  { %282 = vmatpush.bf16.msra.mxu2 %v454_v11 }
  0x15   :  { %255 = vmatpush.bf16.msra.mxu0 %v437_v12 }
  0x16   :  { %269 = vmatpush.bf16.msra.mxu1 %v445_v13 }
  0x17   :  { %283 = vmatpush.bf16.msra.mxu2 %v453_v14 }
  0x19   :  { %256 = vmatpush.bf16.msra.mxu0 %v436_v15 }
  0x1a   :  { %270 = vmatpush.bf16.msra.mxu1 %v444_v16 }
  0x1b   :  { %284 = vmatpush.bf16.msra.mxu2 %v452_v17 }
  0x1d   :  { %257 = vmatpush.bf16.msra.mxu0 %v435_v18 }
  0x1e   :  { %271 = vmatpush.bf16.msra.mxu1 %v443_v19 }
  0x1f   :  { %285 = vmatpush.bf16.msra.mxu2 %v451_v20 }
  0x21   :  { %258 = vmatpush.bf16.msra.mxu0 %v434_v21 }
  0x22   :  { %272 = vmatpush.bf16.msra.mxu1 %v442_v22 }
  0x23   :  { %286 = vmatpush.bf16.msra.mxu2 %v450_v27 }
  0x24   :  { %259 = vmatmul.bf16.vlgmr.msra.gmra.mxu0 %v326_v30 }
  0x25   :  { %273 = vmatmul.bf16.vlgmr.msra.gmra.mxu1 %v330_v31 }
  0x26   :  { %287 = vmatmul.bf16.vlgmr.msra.gmra.mxu2 %v334_v32 }
  0xa1   :  { %v260_v33 = vpop.f32.mrf.mxu0 }
  0xa2   :  { %v274_v34 = vpop.f32.mrf.mxu1 }
  0xa3   :  { %v275_v35 = vadd.f32 %v274_v34, %v260_v33 }
  0xa9   :  { %v288_v37 = vpop.f32.mrf.mxu2  ;;  %v262_v41 = vpop.f32.mrf.mxu0 }
  0xaa   :  { %v289_v38 = vadd.f32 %v288_v37, %v275_v35  ;;  %v276_v42 = vpop.f32.mrf.mxu1 }
  0xab   :  { %v277_v45 = vadd.f32 %v276_v42, %v262_v41 }
  0xac   :  { %v306_v40 = vmul.f32 %v459_v36, %v289_v38 }
  0xae   :  { %v312_v43 = vadd.f32 %v460_v39, %v306_v40 }
  0xb0   :  { %v314_v44 = vmax.f32 %v312_v43, 0.0 }
  0xb1   :  { %v290_v46 = vpop.f32.mrf.mxu2 }
  0xb2   :  { %316 = vst [vmem:[%s619_s4] sm:$0xff] %v314_v44  ;;  %v291_v47 = vadd.f32 %v290_v46, %v277_v45 }
  0xb4   :  { %v307_v48 = vmul.f32 %v459_v36, %v291_v47 }
  0xb6   :  { %v313_v49 = vadd.f32 %v460_v39, %v307_v48 }
  0xb8   :  { %v315_v50 = vmax.f32 %v313_v49, 0.0 }
  0xba   :  { %317 = vst [vmem:[%s619_s4 + $0x8] sm:$0xff] %v315_v50 }
  0xbb   :  { %322 = vsyncpa [#allocation4], 1 }

// kernel: _lambda_.165
= control target key start
LH: loop header
LB: loop body
LE: loop exit
PB: predicated region body
PF: predicated region fallthrough
CT: control target
= control target key end

     0   :  { %9 = vsyncpa [#allocation4], 0  ;;  %s331_s18 = smov [#allocation3]   ;;  %s474_s0 = inlined_call_operand.vmem [shape: bf16[16,128], index: 0, kind: input, shape index: {}]   ;;  %s475_s1 = inlined_call_operand.vmem [shape: bf16[128,256], index: 1, kind: input, shape index: {}]   ;;  %s476_s2 = inlined_call_operand.vmem [shape: f32[1,256], index: 2, kind: input, shape index: {}]   ;;  %s477_s3 = inlined_call_operand.hbm [shape: f32[1,256], index: 3, kind: input, shape index: {}]   ;;  %s478_s4 = inlined_call_operand.vmem [shape: f32[16,256], index: 4, kind: output, shape index: {}]  }
   0x1   :  { %s21_s17 = sshll.u32 %s477_s3, 4  ;;  %s23_s19 = sshll.u32 %s331_s18, 4  ;;  %s22_s17 = int_to_ptr.hbm [resolvable:$true] %s21_s17  ;;  %s24_s19 = int_to_ptr.vmem [resolvable:$true] %s23_s19 }
   0x2   :  { %26 = dma.hbm_to_vmem [thread:$0]  %s22_s17, 32, %s24_s19, [#allocation4]  }
   0x3   :  { %329 = dma.done.wait [#allocation4], 32  }
   0x4   :  { %330 = vsyncadd [#allocation4], 4294967264  ;;  %v281_v0 = vld [vmem:[%s475_s1 + $0x70] sm:$0xf]  ;;  %v303_v1 = vld [vmem:[%s475_s1 + $0x74] sm:$0xf0] }
   0x5   :  { %v302_v2 = vld [vmem:[%s475_s1 + $0x74] sm:$0xf]  ;;  %v282_v3 = vor.u32 %v303_v1, %v281_v0  ;;  %v283_v4 = vld [vmem:[%s475_s1 + $0x78] sm:$0xf0]  ;;  %v273_v5 = vld [vmem:[%s475_s1 + $0x60] sm:$0xf] }
   0x6   :  { %v301_v6 = vld [vmem:[%s475_s1 + $0x64] sm:$0xf0]  ;;  %v286_v7 = vor.u32 %v302_v2, %v283_v4  ;;  %v300_v8 = vld [vmem:[%s475_s1 + $0x64] sm:$0xf]  ;;  %v275_v9 = vld [vmem:[%s475_s1 + $0x68] sm:$0xf0] }
   0x7   :  { %147 = vmatpush.bf16.msra.mxu0 %v282_v3  ;;  %v274_v10 = vor.u32 %v301_v6, %v273_v5  ;;  %v278_v11 = vor.u32 %v300_v8, %v275_v9  ;;  %v265_v12 = vld [vmem:[%s475_s1 + $0x50] sm:$0xf]  ;;  %v299_v13 = vld [vmem:[%s475_s1 + $0x54] sm:$0xf0]  ;;  %v298_v14 = vld [vmem:[%s475_s1 + $0x54] sm:$0xf] }
   0x8   :  { %161 = vmatpush.bf16.msra.mxu1 %v286_v7  ;;  %v267_v15 = vld [vmem:[%s475_s1 + $0x58] sm:$0xf0]  ;;  %v266_v16 = vor.u32 %v299_v13, %v265_v12  ;;  %v257_v18 = vld [vmem:[%s475_s1 + $0x40] sm:$0xf]  ;;  %v297_v19 = vld [vmem:[%s475_s1 + $0x44] sm:$0xf0] }
   0x9   :  { %v270_v17 = vor.u32 %v298_v14, %v267_v15  ;;  %v296_v20 = vld [vmem:[%s475_s1 + $0x44] sm:$0xf]  ;;  %v259_v21 = vld [vmem:[%s475_s1 + $0x48] sm:$0xf0]  ;;  %v258_v22 = vor.u32 %v297_v19, %v257_v18  ;;  %v249_v24 = vld [vmem:[%s475_s1 + $0x30] sm:$0xf] }
   0xa   :  { %v262_v23 = vor.u32 %v296_v20, %v259_v21  ;;  %v295_v25 = vld [vmem:[%s475_s1 + $0x34] sm:$0xf0]  ;;  %v294_v26 = vld [vmem:[%s475_s1 + $0x34] sm:$0xf]  ;;  %v251_v27 = vld [vmem:[%s475_s1 + $0x38] sm:$0xf0] }
   0xb   :  { %148 = vmatpush.bf16.msra.mxu0 %v274_v10  ;;  %v250_v28 = vor.u32 %v295_v25, %v249_v24  ;;  %v254_v29 = vor.u32 %v294_v26, %v251_v27  ;;  %v241_v30 = vld [vmem:[%s475_s1 + $0x20] sm:$0xf]  ;;  %v293_v31 = vld [vmem:[%s475_s1 + $0x24] sm:$0xf0]  ;;  %v292_v32 = vld [vmem:[%s475_s1 + $0x24] sm:$0xf] }
   0xc   :  { %162 = vmatpush.bf16.msra.mxu1 %v278_v11  ;;  %v243_v33 = vld [vmem:[%s475_s1 + $0x28] sm:$0xf0]  ;;  %v242_v34 = vor.u32 %v293_v31, %v241_v30  ;;  %v233_v36 = vld [vmem:[%s475_s1 + $0x10] sm:$0xf]  ;;  %v291_v37 = vld [vmem:[%s475_s1 + $0x14] sm:$0xf0] }
   0xd   :  { %v246_v35 = vor.u32 %v292_v32, %v243_v33  ;;  %v290_v38 = vld [vmem:[%s475_s1 + $0x14] sm:$0xf]  ;;  %v235_v39 = vld [vmem:[%s475_s1 + $0x18] sm:$0xf0]  ;;  %v234_v40 = vor.u32 %v291_v37, %v233_v36  ;;  %v225_v42 = vld [vmem:[%s475_s1] sm:$0xf] }
   0xe   :  { %v238_v41 = vor.u32 %v290_v38, %v235_v39  ;;  %v289_v43 = vld [vmem:[%s475_s1 + $0x4] sm:$0xf0]  ;;  %v288_v44 = vld [vmem:[%s475_s1 + $0x4] sm:$0xf]  ;;  %v227_v45 = vld [vmem:[%s475_s1 + $0x8] sm:$0xf0] }
   0xf   :  { %149 = vmatpush.bf16.msra.mxu0 %v266_v16  ;;  %v226_v46 = vor.u32 %v289_v43, %v225_v42  ;;  %v230_v47 = vor.u32 %v288_v44, %v227_v45  ;;  %v287_v48 = vld [vmem:[%s474_s0] sm:$0xff] }
  0x10   :  { %163 = vmatpush.bf16.msra.mxu1 %v270_v17  ;;  %v190_v49 = vld [vmem:[%s476_s2] sm:$0x3] }
  0x11   :  { %v200_v50 = vld [vmem:[#allocation3] sm:$0x3]  ;;  %v192_v51 = vperm.slane %v190_v49, 0  ;;  %v193_v52 = vperm.slane %v190_v49, 1 }
  0x12   :  { %v202_v53 = vperm.slane %v200_v50, 0  ;;  %v203_v55 = vperm.slane %v200_v50, 1 }
  0x13   :  { %150 = vmatpush.bf16.msra.mxu0 %v258_v22 }
  0x14   :  { %164 = vmatpush.bf16.msra.mxu1 %v262_v23 }
  0x17   :  { %151 = vmatpush.bf16.msra.mxu0 %v250_v28 }
  0x18   :  { %165 = vmatpush.bf16.msra.mxu1 %v254_v29 }
  0x1b   :  { %152 = vmatpush.bf16.msra.mxu0 %v242_v34 }
  0x1c   :  { %166 = vmatpush.bf16.msra.mxu1 %v246_v35 }
  0x1f   :  { %153 = vmatpush.bf16.msra.mxu0 %v234_v40 }
  0x20   :  { %167 = vmatpush.bf16.msra.mxu1 %v238_v41 }
  0x23   :  { %154 = vmatpush.bf16.msra.mxu0 %v226_v46 }
  0x24   :  { %168 = vmatpush.bf16.msra.mxu1 %v230_v47 }
  0x26   :  { %155 = vmatmul.bf16.vlgmr.msra.gmra.mxu0 %v287_v48 }
  0x27   :  { %169 = vmatmul.bf16.vlgmr.msra.gmra.mxu1 %v287_v48 }
  0xa3   :  { %v156_v54 = vpop.f32.mrf.mxu0 }
  0xa4   :  { %v196_v56 = vmul.f32 %v192_v51, %v156_v54  ;;  %v170_v57 = vpop.f32.mrf.mxu1 }
  0xa5   :  { %v197_v58 = vmul.f32 %v193_v52, %v170_v57 }
  0xa6   :  { %v206_v59 = vadd.f32 %v202_v53, %v196_v56 }
  0xa7   :  { %v207_v60 = vadd.f32 %v203_v55, %v197_v58 }
  0xa8   :  { %210 = vst [vmem:[%s478_s4] sm:$0xff] %v206_v59 }
  0xa9   :  { %211 = vst [vmem:[%s478_s4 + $0x8] sm:$0xff] %v207_v60 }
  0xab   :  { %v158_v61 = vpop.f32.mrf.mxu0 }
  0xac   :  { %v198_v62 = vmul.f32 %v192_v51, %v158_v61  ;;  %v172_v63 = vpop.f32.mrf.mxu1 }
  0xad   :  { %v199_v0 = vmul.f32 %v193_v52, %v172_v63 }
  0xae   :  { %v208_v1 = vadd.f32 %v202_v53, %v198_v62 }
  0xaf   :  { %v209_v2 = vadd.f32 %v203_v55, %v199_v0 }
  0xb0   :  { %212 = vst [vmem:[%s478_s4 + $0x10] sm:$0xff] %v208_v1 }
  0xb1   :  { %213 = vst [vmem:[%s478_s4 + $0x18] sm:$0xff] %v209_v2 }
  0xb2   :  { %218 = vsyncpa [#allocation4], 1 }

// kernel: _lambda_.167
= control target key start
LH: loop header
LB: loop body
LE: loop exit
PB: predicated region body
PF: predicated region fallthrough
CT: control target
= control target key end

     0   :  { %9 = vsyncpa [#allocation4], 0  ;;  %s745_s18 = smov [#allocation3]   ;;  %s933_s0 = inlined_call_operand.vmem [shape: bf16[16,640], index: 0, kind: input, shape index: {}]   ;;  %s934_s1 = inlined_call_operand.vmem [shape: bf16[640,128], index: 1, kind: input, shape index: {}]   ;;  %s935_s2 = inlined_call_operand.vmem [shape: f32[1,128], index: 2, kind: input, shape index: {}]   ;;  %s936_s3 = inlined_call_operand.hbm [shape: f32[1,128], index: 3, kind: input, shape index: {}]   ;;  %s937_s4 = inlined_call_operand.vmem [shape: f32[16,128], index: 4, kind: output, shape index: {}]  }
   0x1   :  { %s21_s17 = sshll.u32 %s936_s3, 4  ;;  %s23_s19 = sshll.u32 %s745_s18, 4  ;;  %s22_s17 = int_to_ptr.hbm [resolvable:$true] %s21_s17  ;;  %s24_s19 = int_to_ptr.vmem [resolvable:$true] %s23_s19 }
   0x2   :  { %26 = dma.hbm_to_vmem [thread:$0]  %s22_s17, 16, %s24_s19, [#allocation4]  }
   0x3   :  { %743 = dma.done.wait [#allocation4], 16  }
   0x4   :  { %744 = vsyncadd [#allocation4], 4294967280  ;;  %v683_v0 = vld [vmem:[%s934_s1 + $0x38] sm:$0xff]  ;;  %v682_v4 = vld [vmem:[%s934_s1 + $0x30] sm:$0xff] }
   0x5   :  { %v699_v1 = vld [vmem:[%s934_s1 + $0xb8] sm:$0xff]  ;;  %391 = vmatpush.bf16.msra.mxu0 %v683_v0  ;;  %v698_v5 = vld [vmem:[%s934_s1 + $0xb0] sm:$0xff]  ;;  %v681_v8 = vld [vmem:[%s934_s1 + $0x28] sm:$0xff] }
   0x6   :  { %v707_v2 = vld [vmem:[%s934_s1 + $0xf8] sm:$0xff]  ;;  %419 = vmatpush.bf16.msra.mxu2 %v699_v1  ;;  %v706_v6 = vld [vmem:[%s934_s1 + $0xf0] sm:$0xff]  ;;  %v697_v9 = vld [vmem:[%s934_s1 + $0xa8] sm:$0xff] }
   0x7   :  { %v691_v3 = vld [vmem:[%s934_s1 + $0x78] sm:$0xff]  ;;  %433 = vmatpush.bf16.msra.mxu3 %v707_v2  ;;  %v690_v7 = vld [vmem:[%s934_s1 + $0x70] sm:$0xff]  ;;  %v705_v10 = vld [vmem:[%s934_s1 + $0xe8] sm:$0xff] }
   0x8   :  { %405 = vmatpush.bf16.msra.mxu1 %v691_v3  ;;  %v689_v11 = vld [vmem:[%s934_s1 + $0x68] sm:$0xff]  ;;  %v680_v12 = vld [vmem:[%s934_s1 + $0x20] sm:$0xff]  ;;  %v679_v16 = vld [vmem:[%s934_s1 + $0x18] sm:$0xff] }
   0x9   :  { %392 = vmatpush.bf16.msra.mxu0 %v682_v4  ;;  %v696_v13 = vld [vmem:[%s934_s1 + $0xa0] sm:$0xff]  ;;  %v695_v17 = vld [vmem:[%s934_s1 + $0x98] sm:$0xff]  ;;  %v678_v20 = vld [vmem:[%s934_s1 + $0x10] sm:$0xff] }
   0xa   :  { %420 = vmatpush.bf16.msra.mxu2 %v698_v5  ;;  %v704_v14 = vld [vmem:[%s934_s1 + $0xe0] sm:$0xff]  ;;  %v703_v18 = vld [vmem:[%s934_s1 + $0xd8] sm:$0xff]  ;;  %v694_v21 = vld [vmem:[%s934_s1 + $0x90] sm:$0xff] }
   0xb   :  { %434 = vmatpush.bf16.msra.mxu3 %v706_v6  ;;  %v688_v15 = vld [vmem:[%s934_s1 + $0x60] sm:$0xff]  ;;  %v687_v19 = vld [vmem:[%s934_s1 + $0x58] sm:$0xff]  ;;  %v702_v22 = vld [vmem:[%s934_s1 + $0xd0] sm:$0xff] }
   0xc   :  { %406 = vmatpush.bf16.msra.mxu1 %v690_v7  ;;  %v686_v23 = vld [vmem:[%s934_s1 + $0x50] sm:$0xff]  ;;  %v677_v24 = vld [vmem:[%s934_s1 + $0x8] sm:$0xff]  ;;  %v676_v28 = vld [vmem:[%s934_s1] sm:$0xff] }
   0xd   :  { %393 = vmatpush.bf16.msra.mxu0 %v681_v8  ;;  %v693_v25 = vld [vmem:[%s934_s1 + $0x88] sm:$0xff]  ;;  %v692_v29 = vld [vmem:[%s934_s1 + $0x80] sm:$0xff]  ;;  %v715_v30 = vld [vmem:[%s934_s1 + $0x138] sm:$0xff] }
   0xe   :  { %421 = vmatpush.bf16.msra.mxu2 %v697_v9  ;;  %v701_v26 = vld [vmem:[%s934_s1 + $0xc8] sm:$0xff]  ;;  %v674_v32 = vld [vmem:[%s933_s0 + $0x18] sm:$0xf0]  ;;  %v493_v33 = vld [vmem:[%s933_s0] sm:$0xf] }
   0xf   :  { %435 = vmatpush.bf16.msra.mxu3 %v705_v10  ;;  %v685_v27 = vld [vmem:[%s934_s1 + $0x48] sm:$0xff]  ;;  %v673_v34 = vld [vmem:[%s933_s0 + $0x10] sm:$0xf0]  ;;  %v700_v35 = vld [vmem:[%s934_s1 + $0xc0] sm:$0xff] }
  0x10   :  { %407 = vmatpush.bf16.msra.mxu1 %v689_v11  ;;  %v501_v31 = vld [vmem:[%s933_s0 + $0x8] sm:$0xf]  ;;  %v672_v36 = vld [vmem:[%s933_s0 + $0xc] sm:$0xf]  ;;  %v503_v37 = vld [vmem:[%s933_s0 + $0x1c] sm:$0xf0]  ;;  %v494_v42 = vor.u32 %v673_v34, %v493_v33 }
  0x11   :  { %394 = vmatpush.bf16.msra.mxu0 %v680_v12  ;;  %v684_v38 = vld [vmem:[%s934_s1 + $0x40] sm:$0xff]  ;;  %v495_v40 = vld [vmem:[%s933_s0 + $0x14] sm:$0xf0]  ;;  %v502_v41 = vor.u32 %v674_v32, %v501_v31  ;;  %v506_v43 = vor.u32 %v672_v36, %v503_v37  ;;  %v714_v44 = vld [vmem:[%s934_s1 + $0x130] sm:$0xff] }
  0x12   :  { %422 = vmatpush.bf16.msra.mxu2 %v696_v13  ;;  %v671_v39 = vld [vmem:[%s933_s0 + $0x4] sm:$0xf]  ;;  %v713_v46 = vld [vmem:[%s934_s1 + $0x128] sm:$0xff]  ;;  %v711_v48 = vld [vmem:[%s934_s1 + $0x118] sm:$0xff] }
  0x13   :  { %436 = vmatpush.bf16.msra.mxu3 %v704_v14  ;;  %v498_v45 = vor.u32 %v671_v39, %v495_v40  ;;  %v712_v47 = vld [vmem:[%s934_s1 + $0x120] sm:$0xff]  ;;  %v710_v49 = vld [vmem:[%s934_s1 + $0x110] sm:$0xff]  ;;  %v709_v50 = vld [vmem:[%s934_s1 + $0x108] sm:$0xff] }
  0x14   :  { %408 = vmatpush.bf16.msra.mxu1 %v688_v15  ;;  %v708_v51 = vld [vmem:[%s934_s1 + $0x100] sm:$0xff]  ;;  %v509_v52 = vld [vmem:[%s933_s0 + $0x10] sm:$0xf] }
  0x15   :  { %395 = vmatpush.bf16.msra.mxu0 %v679_v16  ;;  %v675_v53 = vld [vmem:[%s933_s0 + $0x20] sm:$0xf0]  ;;  %v717_v1 = vld [vmem:[%s935_s2] ss:$0 sm:$0xff] }
  0x16   :  { %423 = vmatpush.bf16.msra.mxu2 %v695_v17  ;;  %v510_v54 = vor.u32 %v675_v53, %v509_v52  ;;  %v718_v5 = vld [vmem:[#allocation3] ss:$0 sm:$0xff] }
  0x17   :  { %437 = vmatpush.bf16.msra.mxu3 %v703_v18 }
  0x18   :  { %409 = vmatpush.bf16.msra.mxu1 %v687_v19 }
  0x19   :  { %396 = vmatpush.bf16.msra.mxu0 %v678_v20 }
  0x1a   :  { %424 = vmatpush.bf16.msra.mxu2 %v694_v21 }
  0x1b   :  { %438 = vmatpush.bf16.msra.mxu3 %v702_v22 }
  0x1c   :  { %410 = vmatpush.bf16.msra.mxu1 %v686_v23 }
  0x1d   :  { %397 = vmatpush.bf16.msra.mxu0 %v677_v24 }
  0x1e   :  { %425 = vmatpush.bf16.msra.mxu2 %v693_v25 }
  0x1f   :  { %439 = vmatpush.bf16.msra.mxu3 %v701_v26 }
  0x20   :  { %411 = vmatpush.bf16.msra.mxu1 %v685_v27 }
  0x21   :  { %398 = vmatpush.bf16.msra.mxu0 %v676_v28 }
  0x22   :  { %426 = vmatpush.bf16.msra.mxu2 %v692_v29 }
  0x23   :  { %440 = vmatpush.bf16.msra.mxu3 %v700_v35 }
  0x24   :  { %412 = vmatpush.bf16.msra.mxu1 %v684_v38  ;;  %399 = vmatmul.bf16.vlgmr.msra.gmra.mxu0 %v494_v42 }
  0x25   :  { %447 = vmatpush.bf16.msrb.mxu0 %v715_v30  ;;  %427 = vmatmul.bf16.vlgmr.msra.gmra.mxu2 %v502_v41 }
  0x26   :  { %441 = vmatmul.bf16.vlgmr.msra.gmra.mxu3 %v506_v43 }
  0x27   :  { %413 = vmatmul.bf16.vlgmr.msra.gmra.mxu1 %v498_v45 }
  0x29   :  { %448 = vmatpush.bf16.msrb.mxu0 %v714_v44 }
  0x2d   :  { %449 = vmatpush.bf16.msrb.mxu0 %v713_v46 }
  0x31   :  { %450 = vmatpush.bf16.msrb.mxu0 %v712_v47 }
  0x35   :  { %451 = vmatpush.bf16.msrb.mxu0 %v711_v48 }
  0x39   :  { %452 = vmatpush.bf16.msrb.mxu0 %v710_v49 }
  0x3d   :  { %453 = vmatpush.bf16.msrb.mxu0 %v709_v50 }
  0x41   :  { %454 = vmatpush.bf16.msrb.mxu0 %v708_v51 }
  0x44   :  { %455 = vmatmul.bf16.vlgmr.msrb.gmra.mxu0 %v510_v54 }
  0xa1   :  { %v400_v55 = vpop.f32.mrf.mxu0 }
  0xa4   :  { %v414_v56 = vpop.f32.mrf.mxu1 }
  0xa5   :  { %v415_v58 = vadd.f32 %v414_v56, %v400_v55 }
  0xa8   :  { %v428_v57 = vpop.f32.mrf.mxu2 }
  0xa9   :  { %v402_v59 = vpop.f32.mrf.mxu0  ;;  %v442_v60 = vpop.f32.mrf.mxu3  ;;  %v429_v61 = vadd.f32 %v428_v57, %v415_v58 }
  0xab   :  { %v443_v63 = vadd.f32 %v442_v60, %v429_v61 }
  0xac   :  { %v416_v62 = vpop.f32.mrf.mxu1 }
  0xad   :  { %v417_v0 = vadd.f32 %v416_v62, %v402_v59 }
  0xb0   :  { %v430_v2 = vpop.f32.mrf.mxu2 }
  0xb1   :  { %v431_v6 = vadd.f32 %v430_v2, %v417_v0  ;;  %v444_v8 = vpop.f32.mrf.mxu3 }
  0xb3   :  { %v445_v10 = vadd.f32 %v444_v8, %v431_v6 }
  0xc1   :  { %v456_v3 = vpop.f32.mrf.mxu0 }
  0xc2   :  { %v457_v4 = vadd.f32 %v456_v3, %v443_v63 }
  0xc4   :  { %v474_v7 = vmul.f32 %v717_v1, %v457_v4 }
  0xc6   :  { %v480_v9 = vadd.f32 %v718_v5, %v474_v7 }
  0xc8   :  { %v482_v11 = vmax.f32 %v480_v9, 0.0 }
  0xc9   :  { %v458_v12 = vpop.f32.mrf.mxu0 }
  0xca   :  { %484 = vst [vmem:[%s937_s4] sm:$0xff] %v482_v11  ;;  %v459_v13 = vadd.f32 %v458_v12, %v445_v10 }
  0xcc   :  { %v475_v14 = vmul.f32 %v717_v1, %v459_v13 }
  0xce   :  { %v481_v15 = vadd.f32 %v718_v5, %v475_v14 }
  0xd0   :  { %v483_v16 = vmax.f32 %v481_v15, 0.0 }
  0xd2   :  { %485 = vst [vmem:[%s937_s4 + $0x8] sm:$0xff] %v483_v16 }
  0xd3   :  { %490 = vsyncpa [#allocation4], 1 }

// kernel: _lambda_.168
= control target key start
LH: loop header
LB: loop body
LE: loop exit
PB: predicated region body
PF: predicated region fallthrough
CT: control target
= control target key end

     0   :  { %10 = vsyncpa [#allocation4], 0  ;;  %s346_s21 = smov [#allocation3]   ;;  %s506_s0 = inlined_call_operand.vmem [shape: bf16[16,128], index: 0, kind: input, shape index: {}]   ;;  %s507_s1 = inlined_call_operand.vmem [shape: bf16[128,256], index: 1, kind: input, shape index: {}]   ;;  %s508_s2 = inlined_call_operand.vmem [shape: f32[1,256], index: 2, kind: input, shape index: {}]   ;;  %s509_s3 = inlined_call_operand.hbm [shape: f32[1,256], index: 3, kind: input, shape index: {}]   ;;  %s510_s4 = inlined_call_operand.vmem [shape: f32[16,256], index: 4, kind: input, shape index: {}]   ;;  %s511_s5 = inlined_call_operand.vmem [shape: f32[16,256], index: 5, kind: output, shape index: {}]  }
   0x1   :  { %s22_s20 = sshll.u32 %s509_s3, 4  ;;  %s24_s22 = sshll.u32 %s346_s21, 4  ;;  %s23_s20 = int_to_ptr.hbm [resolvable:$true] %s22_s20  ;;  %s25_s22 = int_to_ptr.vmem [resolvable:$true] %s24_s22 }
   0x2   :  { %27 = dma.hbm_to_vmem [thread:$0]  %s23_s20, 32, %s25_s22, [#allocation4]  }
   0x3   :  { %344 = dma.done.wait [#allocation4], 32  }
   0x4   :  { %345 = vsyncadd [#allocation4], 4294967264  ;;  %v296_v0 = vld [vmem:[%s507_s1 + $0x70] sm:$0xf]  ;;  %v318_v1 = vld [vmem:[%s507_s1 + $0x74] sm:$0xf0] }
   0x5   :  { %v317_v2 = vld [vmem:[%s507_s1 + $0x74] sm:$0xf]  ;;  %v297_v3 = vor.u32 %v318_v1, %v296_v0  ;;  %v298_v4 = vld [vmem:[%s507_s1 + $0x78] sm:$0xf0]  ;;  %v288_v5 = vld [vmem:[%s507_s1 + $0x60] sm:$0xf] }
   0x6   :  { %v316_v6 = vld [vmem:[%s507_s1 + $0x64] sm:$0xf0]  ;;  %v301_v7 = vor.u32 %v317_v2, %v298_v4  ;;  %v315_v8 = vld [vmem:[%s507_s1 + $0x64] sm:$0xf]  ;;  %v290_v9 = vld [vmem:[%s507_s1 + $0x68] sm:$0xf0] }
   0x7   :  { %150 = vmatpush.bf16.msra.mxu0 %v297_v3  ;;  %v289_v10 = vor.u32 %v316_v6, %v288_v5  ;;  %v293_v11 = vor.u32 %v315_v8, %v290_v9  ;;  %v280_v12 = vld [vmem:[%s507_s1 + $0x50] sm:$0xf]  ;;  %v314_v13 = vld [vmem:[%s507_s1 + $0x54] sm:$0xf0]  ;;  %v313_v14 = vld [vmem:[%s507_s1 + $0x54] sm:$0xf] }
   0x8   :  { %164 = vmatpush.bf16.msra.mxu1 %v301_v7  ;;  %v282_v15 = vld [vmem:[%s507_s1 + $0x58] sm:$0xf0]  ;;  %v281_v16 = vor.u32 %v314_v13, %v280_v12  ;;  %v272_v18 = vld [vmem:[%s507_s1 + $0x40] sm:$0xf]  ;;  %v312_v19 = vld [vmem:[%s507_s1 + $0x44] sm:$0xf0] }
   0x9   :  { %v285_v17 = vor.u32 %v313_v14, %v282_v15  ;;  %v311_v20 = vld [vmem:[%s507_s1 + $0x44] sm:$0xf]  ;;  %v274_v21 = vld [vmem:[%s507_s1 + $0x48] sm:$0xf0]  ;;  %v273_v22 = vor.u32 %v312_v19, %v272_v18  ;;  %v264_v24 = vld [vmem:[%s507_s1 + $0x30] sm:$0xf] }
   0xa   :  { %v277_v23 = vor.u32 %v311_v20, %v274_v21  ;;  %v310_v25 = vld [vmem:[%s507_s1 + $0x34] sm:$0xf0]  ;;  %v309_v26 = vld [vmem:[%s507_s1 + $0x34] sm:$0xf]  ;;  %v266_v27 = vld [vmem:[%s507_s1 + $0x38] sm:$0xf0] }
   0xb   :  { %151 = vmatpush.bf16.msra.mxu0 %v289_v10  ;;  %v265_v28 = vor.u32 %v310_v25, %v264_v24  ;;  %v269_v29 = vor.u32 %v309_v26, %v266_v27  ;;  %v256_v30 = vld [vmem:[%s507_s1 + $0x20] sm:$0xf]  ;;  %v308_v31 = vld [vmem:[%s507_s1 + $0x24] sm:$0xf0]  ;;  %v307_v32 = vld [vmem:[%s507_s1 + $0x24] sm:$0xf] }
   0xc   :  { %165 = vmatpush.bf16.msra.mxu1 %v293_v11  ;;  %v258_v33 = vld [vmem:[%s507_s1 + $0x28] sm:$0xf0]  ;;  %v257_v34 = vor.u32 %v308_v31, %v256_v30  ;;  %v248_v36 = vld [vmem:[%s507_s1 + $0x10] sm:$0xf]  ;;  %v306_v37 = vld [vmem:[%s507_s1 + $0x14] sm:$0xf0] }
   0xd   :  { %v261_v35 = vor.u32 %v307_v32, %v258_v33  ;;  %v305_v38 = vld [vmem:[%s507_s1 + $0x14] sm:$0xf]  ;;  %v250_v39 = vld [vmem:[%s507_s1 + $0x18] sm:$0xf0]  ;;  %v249_v40 = vor.u32 %v306_v37, %v248_v36  ;;  %v240_v42 = vld [vmem:[%s507_s1] sm:$0xf] }
   0xe   :  { %v253_v41 = vor.u32 %v305_v38, %v250_v39  ;;  %v304_v43 = vld [vmem:[%s507_s1 + $0x4] sm:$0xf0]  ;;  %v303_v44 = vld [vmem:[%s507_s1 + $0x4] sm:$0xf]  ;;  %v242_v45 = vld [vmem:[%s507_s1 + $0x8] sm:$0xf0] }
   0xf   :  { %152 = vmatpush.bf16.msra.mxu0 %v281_v16  ;;  %v241_v46 = vor.u32 %v304_v43, %v240_v42  ;;  %v245_v47 = vor.u32 %v303_v44, %v242_v45  ;;  %v302_v48 = vld [vmem:[%s506_s0] sm:$0xff]  ;;  %v194_v53 = vld [vmem:[%s510_s4 + $0x8] sm:$0xff]  ;;  %v195_v1 = vld [vmem:[%s510_s4 + $0x10] sm:$0xff] }
  0x10   :  { %166 = vmatpush.bf16.msra.mxu1 %v285_v17  ;;  %v201_v49 = vld [vmem:[%s508_s2] sm:$0x3]  ;;  %v196_v3 = vld [vmem:[%s510_s4 + $0x18] sm:$0xff] }
  0x11   :  { %v193_v50 = vld [vmem:[%s510_s4] sm:$0xff]  ;;  %v203_v52 = vperm.slane %v201_v49, 0  ;;  %v204_v55 = vperm.slane %v201_v49, 1 }
  0x12   :  { %v211_v51 = vld [vmem:[#allocation3] sm:$0x3] }
  0x13   :  { %153 = vmatpush.bf16.msra.mxu0 %v273_v22  ;;  %v213_v57 = vperm.slane %v211_v51, 0  ;;  %v214_v60 = vperm.slane %v211_v51, 1 }
  0x14   :  { %167 = vmatpush.bf16.msra.mxu1 %v277_v23 }
  0x17   :  { %154 = vmatpush.bf16.msra.mxu0 %v265_v28 }
  0x18   :  { %168 = vmatpush.bf16.msra.mxu1 %v269_v29 }
  0x1b   :  { %155 = vmatpush.bf16.msra.mxu0 %v257_v34 }
  0x1c   :  { %169 = vmatpush.bf16.msra.mxu1 %v261_v35 }
  0x1f   :  { %156 = vmatpush.bf16.msra.mxu0 %v249_v40 }
  0x20   :  { %170 = vmatpush.bf16.msra.mxu1 %v253_v41 }
  0x23   :  { %157 = vmatpush.bf16.msra.mxu0 %v241_v46 }
  0x24   :  { %171 = vmatpush.bf16.msra.mxu1 %v245_v47 }
  0x26   :  { %158 = vmatmul.bf16.vlgmr.msra.gmra.mxu0 %v302_v48 }
  0x27   :  { %172 = vmatmul.bf16.vlgmr.msra.gmra.mxu1 %v302_v48 }
  0xa3   :  { %v159_v54 = vpop.f32.mrf.mxu0 }
  0xa4   :  { %v197_v56 = vadd.f32 %v193_v50, %v159_v54  ;;  %v173_v58 = vpop.f32.mrf.mxu1 }
  0xa5   :  { %v198_v59 = vadd.f32 %v194_v53, %v173_v58 }
  0xa6   :  { %v207_v61 = vmul.f32 %v203_v52, %v197_v56 }
  0xa7   :  { %v208_v62 = vmul.f32 %v204_v55, %v198_v59 }
  0xa8   :  { %v217_v63 = vadd.f32 %v213_v57, %v207_v61 }
  0xa9   :  { %v218_v0 = vadd.f32 %v214_v60, %v208_v62 }
  0xaa   :  { %v221_v2 = vmax.f32 %v217_v63, 0.0 }
  0xab   :  { %v222_v4 = vmax.f32 %v218_v0, 0.0  ;;  %v161_v5 = vpop.f32.mrf.mxu0 }
  0xac   :  { %225 = vst [vmem:[%s511_s5] sm:$0xff] %v221_v2  ;;  %v199_v6 = vadd.f32 %v195_v1, %v161_v5  ;;  %v175_v7 = vpop.f32.mrf.mxu1 }
  0xad   :  { %226 = vst [vmem:[%s511_s5 + $0x8] sm:$0xff] %v222_v4  ;;  %v200_v8 = vadd.f32 %v196_v3, %v175_v7 }
  0xae   :  { %v209_v9 = vmul.f32 %v203_v52, %v199_v6 }
  0xaf   :  { %v210_v10 = vmul.f32 %v204_v55, %v200_v8 }
  0xb0   :  { %v219_v11 = vadd.f32 %v213_v57, %v209_v9 }
  0xb1   :  { %v220_v12 = vadd.f32 %v214_v60, %v210_v10 }
  0xb2   :  { %v223_v13 = vmax.f32 %v219_v11, 0.0 }
  0xb3   :  { %v224_v14 = vmax.f32 %v220_v12, 0.0 }
  0xb4   :  { %227 = vst [vmem:[%s511_s5 + $0x10] sm:$0xff] %v223_v13 }
  0xb5   :  { %228 = vst [vmem:[%s511_s5 + $0x18] sm:$0xff] %v224_v14 }
  0xb6   :  { %233 = vsyncpa [#allocation4], 1 }

// kernel: _lambda_.229
= control target key start
LH: loop header
LB: loop body
LE: loop exit
PB: predicated region body
PF: predicated region fallthrough
CT: control target
= control target key end

     0   :  { %s89_s0 = inlined_call_operand.vmem [shape: f32[8,1,256], index: 0, kind: input, shape index: {}]   ;;  %s90_s1 = inlined_call_operand.vmem [shape: f32[8,256], index: 1, kind: output, shape index: {}]  }
   0x1   :  { %v8_v0 = vld [vmem:[%s89_s0] sm:$0x3]  ;;  %v9_v1 = vld [vmem:[%s89_s0 + $0x2] sm:$0x3]  ;;  %v10_v2 = vld [vmem:[%s89_s0 + $0x4] sm:$0x3] }
   0x2   :  { %24 = vst [vmem:[#allocation1] ss:$9 sm:$0xff] %v8_v0  ;;  %v11_v3 = vld [vmem:[%s89_s0 + $0x6] sm:$0x3]  ;;  %v12_v4 = vld [vmem:[%s89_s0 + $0x8] sm:$0x3] }
   0x3   :  { %26 = vst [vmem:[#allocation1 + $0x1] ss:$9 sm:$0xff] %v9_v1  ;;  %v13_v5 = vld [vmem:[%s89_s0 + $0xa] sm:$0x3]  ;;  %v14_v6 = vld [vmem:[%s89_s0 + $0xc] sm:$0x3] }
   0x4   :  { %28 = vst [vmem:[#allocation1 + $0x2] ss:$9 sm:$0xff] %v10_v2  ;;  %v15_v7 = vld [vmem:[%s89_s0 + $0xe] sm:$0x3] }
   0x5   :  { %30 = vst [vmem:[#allocation1 + $0x3] ss:$9 sm:$0xff] %v11_v3 }
   0x6   :  { %32 = vst [vmem:[#allocation1 + $0x4] ss:$9 sm:$0xff] %v12_v4 }
   0x7   :  { %34 = vst [vmem:[#allocation1 + $0x5] ss:$9 sm:$0xff] %v13_v5 }
   0x8   :  { %36 = vst [vmem:[#allocation1 + $0x6] ss:$9 sm:$0xff] %v14_v6 }
   0x9   :  { %38 = vst [vmem:[#allocation1 + $0x7] ss:$9 sm:$0xff] %v15_v7 }
  0x10   :  { %v39_v8 = vld [vmem:[#allocation1] sm:$0xff]  ;;  %v40_v9 = vld [vmem:[#allocation1 + $0x9] sm:$0xff] }
  0x11   :  { %43 = vst [vmem:[%s90_s1] sm:$0xff] %v39_v8 }
  0x12   :  { %44 = vst [vmem:[%s90_s1 + $0x8] sm:$0xff] %v40_v9 }

// kernel: _lambda_.174
= control target key start
LH: loop header
LB: loop body
LE: loop exit
PB: predicated region body
PF: predicated region fallthrough
CT: control target
= control target key end

     0   :  { %s463_s1 = inlined_call_operand.vmem [shape: bf16[128,256], index: 1, kind: input, shape index: {}]   ;;  %s464_s0 = inlined_call_operand.vmem [shape: bf16[16,128], index: 0, kind: input, shape index: {}]   ;;  %s465_s2 = inlined_call_operand.vmem [shape: f32[1,256], index: 2, kind: input, shape index: {}]   ;;  %s466_s3 = inlined_call_operand.vmem [shape: f32[1,256], index: 3, kind: input, shape index: {}]   ;;  %s467_s4 = inlined_call_operand.vmem [shape: f32[16,256], index: 4, kind: input, shape index: {}]   ;;  %s468_s5 = inlined_call_operand.vmem [shape: f32[16,256], index: 5, kind: output, shape index: {}]  }
   0x1   :  { %v281_v0 = vld [vmem:[%s463_s1 + $0x70] sm:$0xf]  ;;  %v303_v1 = vld [vmem:[%s463_s1 + $0x74] sm:$0xf0]  ;;  %v302_v2 = vld [vmem:[%s463_s1 + $0x74] sm:$0xf] }
   0x2   :  { %v282_v3 = vor.u32 %v303_v1, %v281_v0  ;;  %v283_v4 = vld [vmem:[%s463_s1 + $0x78] sm:$0xf0]  ;;  %v273_v5 = vld [vmem:[%s463_s1 + $0x60] sm:$0xf]  ;;  %v301_v6 = vld [vmem:[%s463_s1 + $0x64] sm:$0xf0] }
   0x3   :  { %v286_v7 = vor.u32 %v302_v2, %v283_v4  ;;  %v300_v8 = vld [vmem:[%s463_s1 + $0x64] sm:$0xf]  ;;  %v275_v9 = vld [vmem:[%s463_s1 + $0x68] sm:$0xf0]  ;;  %v274_v10 = vor.u32 %v301_v6, %v273_v5  ;;  %v265_v12 = vld [vmem:[%s463_s1 + $0x50] sm:$0xf] }
   0x4   :  { %136 = vmatpush.bf16.msra.mxu0 %v282_v3  ;;  %v278_v11 = vor.u32 %v300_v8, %v275_v9  ;;  %v299_v13 = vld [vmem:[%s463_s1 + $0x54] sm:$0xf0]  ;;  %v298_v14 = vld [vmem:[%s463_s1 + $0x54] sm:$0xf]  ;;  %v267_v15 = vld [vmem:[%s463_s1 + $0x58] sm:$0xf0] }
   0x5   :  { %150 = vmatpush.bf16.msra.mxu1 %v286_v7  ;;  %v266_v16 = vor.u32 %v299_v13, %v265_v12  ;;  %v270_v17 = vor.u32 %v298_v14, %v267_v15  ;;  %v257_v18 = vld [vmem:[%s463_s1 + $0x40] sm:$0xf]  ;;  %v297_v19 = vld [vmem:[%s463_s1 + $0x44] sm:$0xf0]  ;;  %v296_v20 = vld [vmem:[%s463_s1 + $0x44] sm:$0xf] }
   0x6   :  { %v259_v21 = vld [vmem:[%s463_s1 + $0x48] sm:$0xf0]  ;;  %v258_v22 = vor.u32 %v297_v19, %v257_v18  ;;  %v249_v24 = vld [vmem:[%s463_s1 + $0x30] sm:$0xf]  ;;  %v295_v25 = vld [vmem:[%s463_s1 + $0x34] sm:$0xf0] }
   0x7   :  { %v262_v23 = vor.u32 %v296_v20, %v259_v21  ;;  %v294_v26 = vld [vmem:[%s463_s1 + $0x34] sm:$0xf]  ;;  %v251_v27 = vld [vmem:[%s463_s1 + $0x38] sm:$0xf0]  ;;  %v250_v28 = vor.u32 %v295_v25, %v249_v24  ;;  %v241_v30 = vld [vmem:[%s463_s1 + $0x20] sm:$0xf] }
   0x8   :  { %137 = vmatpush.bf16.msra.mxu0 %v274_v10  ;;  %v254_v29 = vor.u32 %v294_v26, %v251_v27  ;;  %v293_v31 = vld [vmem:[%s463_s1 + $0x24] sm:$0xf0]  ;;  %v292_v32 = vld [vmem:[%s463_s1 + $0x24] sm:$0xf]  ;;  %v243_v33 = vld [vmem:[%s463_s1 + $0x28] sm:$0xf0] }
   0x9   :  { %151 = vmatpush.bf16.msra.mxu1 %v278_v11  ;;  %v242_v34 = vor.u32 %v293_v31, %v241_v30  ;;  %v246_v35 = vor.u32 %v292_v32, %v243_v33  ;;  %v233_v36 = vld [vmem:[%s463_s1 + $0x10] sm:$0xf]  ;;  %v291_v37 = vld [vmem:[%s463_s1 + $0x14] sm:$0xf0]  ;;  %v290_v38 = vld [vmem:[%s463_s1 + $0x14] sm:$0xf] }
   0xa   :  { %v235_v39 = vld [vmem:[%s463_s1 + $0x18] sm:$0xf0]  ;;  %v234_v40 = vor.u32 %v291_v37, %v233_v36  ;;  %v225_v42 = vld [vmem:[%s463_s1] sm:$0xf]  ;;  %v289_v43 = vld [vmem:[%s463_s1 + $0x4] sm:$0xf0] }
   0xb   :  { %v238_v41 = vor.u32 %v290_v38, %v235_v39  ;;  %v288_v44 = vld [vmem:[%s463_s1 + $0x4] sm:$0xf]  ;;  %v227_v45 = vld [vmem:[%s463_s1 + $0x8] sm:$0xf0]  ;;  %v226_v46 = vor.u32 %v289_v43, %v225_v42  ;;  %v187_v49 = vld [vmem:[%s465_s2] sm:$0x3] }
   0xc   :  { %138 = vmatpush.bf16.msra.mxu0 %v266_v16  ;;  %v230_v47 = vor.u32 %v288_v44, %v227_v45  ;;  %v287_v48 = vld [vmem:[%s464_s0] sm:$0xff]  ;;  %v189_v52 = vperm.slane %v187_v49, 0  ;;  %v180_v53 = vld [vmem:[%s467_s4 + $0x8] sm:$0xff]  ;;  %v190_v55 = vperm.slane %v187_v49, 1  ;;  %v181_v1 = vld [vmem:[%s467_s4 + $0x10] sm:$0xff] }
   0xd   :  { %152 = vmatpush.bf16.msra.mxu1 %v270_v17  ;;  %v179_v50 = vld [vmem:[%s467_s4] sm:$0xff]  ;;  %v182_v3 = vld [vmem:[%s467_s4 + $0x18] sm:$0xff] }
   0xe   :  { %v197_v51 = vld [vmem:[%s466_s3] sm:$0x3] }
   0xf   :  { %v199_v57 = vperm.slane %v197_v51, 0  ;;  %v200_v60 = vperm.slane %v197_v51, 1 }
  0x10   :  { %139 = vmatpush.bf16.msra.mxu0 %v258_v22 }
  0x11   :  { %153 = vmatpush.bf16.msra.mxu1 %v262_v23 }
  0x14   :  { %140 = vmatpush.bf16.msra.mxu0 %v250_v28 }
  0x15   :  { %154 = vmatpush.bf16.msra.mxu1 %v254_v29 }
  0x18   :  { %141 = vmatpush.bf16.msra.mxu0 %v242_v34 }
  0x19   :  { %155 = vmatpush.bf16.msra.mxu1 %v246_v35 }
  0x1c   :  { %142 = vmatpush.bf16.msra.mxu0 %v234_v40 }
  0x1d   :  { %156 = vmatpush.bf16.msra.mxu1 %v238_v41 }
  0x20   :  { %143 = vmatpush.bf16.msra.mxu0 %v226_v46 }
  0x21   :  { %157 = vmatpush.bf16.msra.mxu1 %v230_v47 }
  0x23   :  { %144 = vmatmul.bf16.vlgmr.msra.gmra.mxu0 %v287_v48 }
  0x24   :  { %158 = vmatmul.bf16.vlgmr.msra.gmra.mxu1 %v287_v48 }
  0xa0   :  { %v145_v54 = vpop.f32.mrf.mxu0 }
  0xa1   :  { %v183_v56 = vadd.f32 %v179_v50, %v145_v54  ;;  %v159_v58 = vpop.f32.mrf.mxu1 }
  0xa2   :  { %v184_v59 = vadd.f32 %v180_v53, %v159_v58 }
  0xa3   :  { %v193_v61 = vmul.f32 %v189_v52, %v183_v56 }
  0xa4   :  { %v194_v62 = vmul.f32 %v190_v55, %v184_v59 }
  0xa5   :  { %v203_v63 = vadd.f32 %v199_v57, %v193_v61 }
  0xa6   :  { %v204_v0 = vadd.f32 %v200_v60, %v194_v62 }
  0xa7   :  { %v207_v2 = vmax.f32 %v203_v63, 0.0 }
  0xa8   :  { %v208_v4 = vmax.f32 %v204_v0, 0.0  ;;  %v147_v5 = vpop.f32.mrf.mxu0 }
  0xa9   :  { %211 = vst [vmem:[%s468_s5] sm:$0xff] %v207_v2  ;;  %v185_v6 = vadd.f32 %v181_v1, %v147_v5  ;;  %v161_v7 = vpop.f32.mrf.mxu1 }
  0xaa   :  { %212 = vst [vmem:[%s468_s5 + $0x8] sm:$0xff] %v208_v4  ;;  %v186_v8 = vadd.f32 %v182_v3, %v161_v7 }
  0xab   :  { %v195_v9 = vmul.f32 %v189_v52, %v185_v6 }
  0xac   :  { %v196_v10 = vmul.f32 %v190_v55, %v186_v8 }
  0xad   :  { %v205_v11 = vadd.f32 %v199_v57, %v195_v9 }
  0xae   :  { %v206_v12 = vadd.f32 %v200_v60, %v196_v10 }
  0xaf   :  { %v209_v13 = vmax.f32 %v205_v11, 0.0 }
  0xb0   :  { %v210_v14 = vmax.f32 %v206_v12, 0.0 }
  0xb1   :  { %213 = vst [vmem:[%s468_s5 + $0x10] sm:$0xff] %v209_v13 }
  0xb2   :  { %214 = vst [vmem:[%s468_s5 + $0x18] sm:$0xff] %v210_v14 }

// kernel: _lambda_.228
= control target key start
LH: loop header
LB: loop body
LE: loop exit
PB: predicated region body
PF: predicated region fallthrough
CT: control target
= control target key end

     0   :  { %s269_s1 = inlined_call_operand.vmem [shape: bf16[128,128], index: 1, kind: input, shape index: {}]   ;;  %s270_s2 = inlined_call_operand.vmem [shape: f32[1,128], index: 2, kind: input, shape index: {}]   ;;  %s271_s3 = inlined_call_operand.vmem [shape: f32[1,128], index: 3, kind: input, shape index: {}]   ;;  %s272_s0 = inlined_call_operand.vmem [shape: bf16[16,128], index: 0, kind: input, shape index: {}]   ;;  %s273_s4 = inlined_call_operand.vmem [shape: f32[16,128], index: 4, kind: input, shape index: {}]   ;;  %s274_s5 = inlined_call_operand.vmem [shape: f32[16,128], index: 5, kind: output, shape index: {}]  }
   0x1   :  { %v191_v0 = vld [vmem:[%s269_s1 + $0x38] sm:$0xff]  ;;  %v190_v1 = vld [vmem:[%s269_s1 + $0x30] sm:$0xff]  ;;  %v189_v2 = vld [vmem:[%s269_s1 + $0x28] sm:$0xff] }
   0x2   :  { %100 = vmatpush.bf16.msra.mxu0 %v191_v0  ;;  %v188_v3 = vld [vmem:[%s269_s1 + $0x20] sm:$0xff]  ;;  %v187_v4 = vld [vmem:[%s269_s1 + $0x18] sm:$0xff]  ;;  %v186_v5 = vld [vmem:[%s269_s1 + $0x10] sm:$0xff] }
   0x3   :  { %v185_v6 = vld [vmem:[%s269_s1 + $0x8] sm:$0xff]  ;;  %v184_v7 = vld [vmem:[%s269_s1] sm:$0xff] }
   0x4   :  { %v183_v8 = vld [vmem:[%s272_s0] sm:$0xff]  ;;  %v124_v16 = vld [vmem:[%s273_s4 + $0x8] sm:$0xff] }
   0x5   :  { %v123_v9 = vld [vmem:[%s273_s4] sm:$0xff] }
   0x6   :  { %101 = vmatpush.bf16.msra.mxu0 %v190_v1  ;;  %v192_v10 = vld [vmem:[%s270_s2] ss:$0 sm:$0xff] }
   0x7   :  { %v193_v13 = vld [vmem:[%s271_s3] ss:$0 sm:$0xff] }
   0xa   :  { %102 = vmatpush.bf16.msra.mxu0 %v189_v2 }
   0xe   :  { %103 = vmatpush.bf16.msra.mxu0 %v188_v3 }
  0x12   :  { %104 = vmatpush.bf16.msra.mxu0 %v187_v4 }
  0x16   :  { %105 = vmatpush.bf16.msra.mxu0 %v186_v5 }
  0x1a   :  { %106 = vmatpush.bf16.msra.mxu0 %v185_v6 }
  0x1e   :  { %107 = vmatpush.bf16.msra.mxu0 %v184_v7 }
  0x21   :  { %108 = vmatmul.bf16.vlgmr.msra.gmra.mxu0 %v183_v8 }
  0x9e   :  { %v109_v11 = vpop.f32.mrf.mxu0 }
  0x9f   :  { %v125_v12 = vadd.f32 %v123_v9, %v109_v11 }
  0xa1   :  { %v131_v14 = vmul.f32 %v192_v10, %v125_v12 }
  0xa3   :  { %v137_v15 = vadd.f32 %v193_v13, %v131_v14 }
  0xa5   :  { %v139_v17 = vmax.f32 %v137_v15, 0.0 }
  0xa6   :  { %v111_v18 = vpop.f32.mrf.mxu0 }
  0xa7   :  { %141 = vst [vmem:[%s274_s5] sm:$0xff] %v139_v17  ;;  %v126_v19 = vadd.f32 %v124_v16, %v111_v18 }
  0xa9   :  { %v132_v20 = vmul.f32 %v192_v10, %v126_v19 }
  0xab   :  { %v138_v21 = vadd.f32 %v193_v13, %v132_v20 }
  0xad   :  { %v140_v22 = vmax.f32 %v138_v21, 0.0 }
  0xaf   :  { %142 = vst [vmem:[%s274_s5 + $0x8] sm:$0xff] %v140_v22 }

// kernel: _lambda_.230
= control target key start
LH: loop header
LB: loop body
LE: loop exit
PB: predicated region body
PF: predicated region fallthrough
CT: control target
= control target key end

     0   :  { %s83_s0 = inlined_call_operand.vmem [shape: f32[8,1,128], index: 0, kind: input, shape index: {}]   ;;  %s84_s1 = inlined_call_operand.vmem [shape: f32[8,128], index: 1, kind: output, shape index: {}]  }
   0x1   :  { %v8_v0 = vld [vmem:[%s83_s0] sm:$0x1]  ;;  %v9_v1 = vld [vmem:[%s83_s0 + $0x1] sm:$0x1]  ;;  %v10_v2 = vld [vmem:[%s83_s0 + $0x2] sm:$0x1] }
   0x2   :  { %24 = vst [vmem:[#allocation1] ss:$9 sm:$0xff] %v8_v0  ;;  %v11_v3 = vld [vmem:[%s83_s0 + $0x3] sm:$0x1]  ;;  %v12_v4 = vld [vmem:[%s83_s0 + $0x4] sm:$0x1] }
   0x3   :  { %26 = vst [vmem:[#allocation1 + $0x1] ss:$9 sm:$0xff] %v9_v1  ;;  %v13_v5 = vld [vmem:[%s83_s0 + $0x5] sm:$0x1]  ;;  %v14_v6 = vld [vmem:[%s83_s0 + $0x6] sm:$0x1] }
   0x4   :  { %28 = vst [vmem:[#allocation1 + $0x2] ss:$9 sm:$0xff] %v10_v2  ;;  %v15_v7 = vld [vmem:[%s83_s0 + $0x7] sm:$0x1] }
   0x5   :  { %30 = vst [vmem:[#allocation1 + $0x3] ss:$9 sm:$0xff] %v11_v3 }
   0x6   :  { %32 = vst [vmem:[#allocation1 + $0x4] ss:$9 sm:$0xff] %v12_v4 }
   0x7   :  { %34 = vst [vmem:[#allocation1 + $0x5] ss:$9 sm:$0xff] %v13_v5 }
   0x8   :  { %36 = vst [vmem:[#allocation1 + $0x6] ss:$9 sm:$0xff] %v14_v6 }
   0x9   :  { %38 = vst [vmem:[#allocation1 + $0x7] ss:$9 sm:$0xff] %v15_v7 }
  0x10   :  { %v39_v8 = vld [vmem:[#allocation1] sm:$0xff] }
  0x11   :  { %41 = vst [vmem:[%s84_s1] sm:$0xff] %v39_v8 }

// kernel: _lambda_.231
= control target key start
LH: loop header
LB: loop body
LE: loop exit
PB: predicated region body
PF: predicated region fallthrough
CT: control target
= control target key end

     0   :  { %9 = vsyncpa [#allocation5], 0  ;;  %s1931_s0 = inlined_call_operand.vmem [shape: bf16[16,384], index: 0, kind: input, shape index: {}]   ;;  %s1932_s1 = inlined_call_operand.vmem [shape: bf16[384,2048], index: 1, kind: input, shape index: {}]   ;;  %s1933_s2 = inlined_call_operand.vmem [shape: f32[1,2048], index: 2, kind: input, shape index: {}]   ;;  %s1934_s3 = inlined_call_operand.hbm [shape: f32[1,2048], index: 3, kind: input, shape index: {}]   ;;  %s1935_s4 = inlined_call_operand.vmem [shape: f32[16,2048], index: 4, kind: output, shape index: {}]  }
   0x1   :  { %11 = vsyncpa [#allocation5 + $0x1], 0  ;;  %s1584_s15 = smov 0   ;;  %s1586_s16 = smov 0  }
   0x2   :  { %s1588_s17 = smov 0   ;;  %s1590_s18 = smov 0  }
   0x3   :  { %s1592_s19 = smov 0   ;;  %s1594_s20 = smov 0  }
   0x4 LB: > { %s1152_s21 = sadd.s32 4294967295, %s1557_s20   ;;  %s32_s22 = sadd.s32 1, %s1553_s19  ;;  %s1557_s20 = sphi %s1594_s20, %s17_s20   ;;  %s1553_s19 = sphi %s1592_s19, %s1943_s19   ;;  %s1549_s18 = sphi %s1590_s18, %s1942_s18   ;;  %s1545_s17 = sphi %s1588_s17, %s1941_s17   ;;  %s1541_s16 = sphi %s1586_s16, %s1940_s16   ;;  %s1537_s15 = sphi %s1584_s15, %s1939_s15  }
   0x5   : > { %p34_p0 = scmp.ge.s32.totalorder %s32_s22, 8  ;;  %s73_s23 = sadd.s32 1, %s1545_s17 }
   0x6   : > { %p80_p1 = scmp.ne.s32.totalorder %s1545_s17, %s1541_s16  ;;  %p81_p2 = scmp.eq.s32.totalorder %s1557_s20, 0 }
   0x7   : > { %s1945_s22 = smov (%p34_p0, %s32_s22), 0  ;;  %p138_p4 = scmp.ne.s32.totalorder %s1541_s16, %s1537_s15 }
   0x8   : > { %p1620_p3 = por %p81_p2, %p80_p1  ;;  %s69_s25 = ssub.s32 %s1553_s19, %s1945_s22 }
   0x9   : > { %p139_p5 = scmp.eq.s32.totalorder %s1152_s21, 0  ;;  %p71_p6 = scmp.eq.s32.totalorder %s69_s25, 0 }
   0xa   : > { %p164_p7 = scmp.eq.s32.totalorder %s1152_s21, 7  ;;  %p1156_p10 = scmp.ge.s32.totalorder %s1557_s20, 8 }
   0xb   : > { %p1627_p8 = por %p139_p5, %p138_p4 }
   0xc   : > { %s1632_s27 = scalar_select %p71_p6, %s1545_s17, %s73_s23  }
   0xd   : > { %p1634_p9 = por %p164_p7, %p80_p1  ;;  %201 = sbr.rel (%p1156_p10) target bundleno = 75 (0x4b), region = 20 }
  0x12   : > { %204 = sbr.rel (!%p1620_p3) target bundleno = 70 (0x46), region = 24  ;;  %s206_s29 = sand.u32 (%p1620_p3), 1, %s1545_s17  }
  0x13   : > { %s1374_s30 = sshll.u32 (%p1620_p3), %s1553_s19, 3  ;;  %s1427_s5 = smul.u32 (%p1620_p3), 384, %s206_s29 }
  0x14   : > { %s1646_s8 = scalar_lea.vmem (%p1620_p3), %s1932_s1, %s1374_s30 }
  0x15   : > { %v337_v0 = vld [vmem:[%s1646_s8] sm:$0xff] (%p1620_p3)  ;;  %s1651_s9 = scalar_lea.vmem (%p1620_p3), [#allocation3], %s1427_s5 }
  0x16   : > { %v339_v1 = vld [vmem:[%s1646_s8 + $0x40] sm:$0xff] (%p1620_p3)  ;;  %338 = vst [vmem:[%s1651_s9] sm:$0xff] (%p1620_p3), %v337_v0 }
  0x17   : > { %v341_v2 = vld [vmem:[%s1646_s8 + $0x80] sm:$0xff]  ;;  %340 = vst [vmem:[%s1651_s9 + $0x8] sm:$0xff] %v339_v1 }
  0x18   : > { %v343_v3 = vld [vmem:[%s1646_s8 + $0xc0] sm:$0xff]  ;;  %342 = vst [vmem:[%s1651_s9 + $0x10] sm:$0xff] %v341_v2 }
  0x19   : > { %v345_v4 = vld [vmem:[%s1646_s8 + $0x100] sm:$0xff]  ;;  %344 = vst [vmem:[%s1651_s9 + $0x18] sm:$0xff] %v343_v3 }
  0x1a   : > { %v347_v5 = vld [vmem:[%s1646_s8 + $0x140] sm:$0xff]  ;;  %346 = vst [vmem:[%s1651_s9 + $0x20] sm:$0xff] %v345_v4 }
  0x1b   : > { %v349_v6 = vld [vmem:[%s1646_s8 + $0x180] sm:$0xff]  ;;  %348 = vst [vmem:[%s1651_s9 + $0x28] sm:$0xff] %v347_v5 }
  0x1c   : > { %v351_v7 = vld [vmem:[%s1646_s8 + $0x1c0] sm:$0xff]  ;;  %350 = vst [vmem:[%s1651_s9 + $0x30] sm:$0xff] %v349_v6 }
  0x1d   : > { %v353_v8 = vld [vmem:[%s1646_s8 + $0x200] sm:$0xff]  ;;  %352 = vst [vmem:[%s1651_s9 + $0x38] sm:$0xff] %v351_v7 }
  0x1e   : > { %v355_v9 = vld [vmem:[%s1646_s8 + $0x240] sm:$0xff]  ;;  %354 = vst [vmem:[%s1651_s9 + $0x40] sm:$0xff] %v353_v8 }
  0x1f   : > { %v357_v10 = vld [vmem:[%s1646_s8 + $0x280] sm:$0xff]  ;;  %356 = vst [vmem:[%s1651_s9 + $0x48] sm:$0xff] %v355_v9 }
  0x20   : > { %v359_v11 = vld [vmem:[%s1646_s8 + $0x2c0] sm:$0xff]  ;;  %358 = vst [vmem:[%s1651_s9 + $0x50] sm:$0xff] %v357_v10 }
  0x21   : > { %v361_v12 = vld [vmem:[%s1646_s8 + $0x300] sm:$0xff]  ;;  %360 = vst [vmem:[%s1651_s9 + $0x58] sm:$0xff] %v359_v11 }
  0x22   : > { %v363_v13 = vld [vmem:[%s1646_s8 + $0x340] sm:$0xff]  ;;  %362 = vst [vmem:[%s1651_s9 + $0x60] sm:$0xff] %v361_v12 }
  0x23   : > { %v365_v14 = vld [vmem:[%s1646_s8 + $0x380] sm:$0xff]  ;;  %364 = vst [vmem:[%s1651_s9 + $0x68] sm:$0xff] %v363_v13 }
  0x24   : > { %v367_v15 = vld [vmem:[%s1646_s8 + $0x3c0] sm:$0xff]  ;;  %366 = vst [vmem:[%s1651_s9 + $0x70] sm:$0xff] %v365_v14 }
  0x25   : > { %v369_v16 = vld [vmem:[%s1646_s8 + $0x400] sm:$0xff]  ;;  %368 = vst [vmem:[%s1651_s9 + $0x78] sm:$0xff] %v367_v15 }
  0x26   : > { %v371_v17 = vld [vmem:[%s1646_s8 + $0x440] sm:$0xff]  ;;  %370 = vst [vmem:[%s1651_s9 + $0x80] sm:$0xff] %v369_v16 }
  0x27   : > { %v373_v18 = vld [vmem:[%s1646_s8 + $0x480] sm:$0xff]  ;;  %372 = vst [vmem:[%s1651_s9 + $0x88] sm:$0xff] %v371_v17 }
  0x28   : > { %v375_v19 = vld [vmem:[%s1646_s8 + $0x4c0] sm:$0xff]  ;;  %374 = vst [vmem:[%s1651_s9 + $0x90] sm:$0xff] %v373_v18 }
  0x29   : > { %v377_v20 = vld [vmem:[%s1646_s8 + $0x500] sm:$0xff]  ;;  %376 = vst [vmem:[%s1651_s9 + $0x98] sm:$0xff] %v375_v19 }
  0x2a   : > { %v379_v21 = vld [vmem:[%s1646_s8 + $0x540] sm:$0xff]  ;;  %378 = vst [vmem:[%s1651_s9 + $0xa0] sm:$0xff] %v377_v20 }
  0x2b   : > { %v381_v22 = vld [vmem:[%s1646_s8 + $0x580] sm:$0xff]  ;;  %380 = vst [vmem:[%s1651_s9 + $0xa8] sm:$0xff] %v379_v21 }
  0x2c   : > { %v383_v23 = vld [vmem:[%s1646_s8 + $0x5c0] sm:$0xff]  ;;  %382 = vst [vmem:[%s1651_s9 + $0xb0] sm:$0xff] %v381_v22 }
  0x2d   : > { %v385_v24 = vld [vmem:[%s1646_s8 + $0x600] sm:$0xff]  ;;  %384 = vst [vmem:[%s1651_s9 + $0xb8] sm:$0xff] %v383_v23 }
  0x2e   : > { %v387_v25 = vld [vmem:[%s1646_s8 + $0x640] sm:$0xff]  ;;  %386 = vst [vmem:[%s1651_s9 + $0xc0] sm:$0xff] %v385_v24 }
  0x2f   : > { %v389_v26 = vld [vmem:[%s1646_s8 + $0x680] sm:$0xff]  ;;  %388 = vst [vmem:[%s1651_s9 + $0xc8] sm:$0xff] %v387_v25 }
  0x30   : > { %v391_v27 = vld [vmem:[%s1646_s8 + $0x6c0] sm:$0xff]  ;;  %390 = vst [vmem:[%s1651_s9 + $0xd0] sm:$0xff] %v389_v26 }
  0x31   : > { %v393_v28 = vld [vmem:[%s1646_s8 + $0x700] sm:$0xff]  ;;  %392 = vst [vmem:[%s1651_s9 + $0xd8] sm:$0xff] %v391_v27 }
  0x32   : > { %v395_v29 = vld [vmem:[%s1646_s8 + $0x740] sm:$0xff]  ;;  %394 = vst [vmem:[%s1651_s9 + $0xe0] sm:$0xff] %v393_v28 }
  0x33   : > { %v397_v30 = vld [vmem:[%s1646_s8 + $0x780] sm:$0xff]  ;;  %396 = vst [vmem:[%s1651_s9 + $0xe8] sm:$0xff] %v395_v29 }
  0x34   : > { %v399_v31 = vld [vmem:[%s1646_s8 + $0x7c0] sm:$0xff]  ;;  %398 = vst [vmem:[%s1651_s9 + $0xf0] sm:$0xff] %v397_v30 }
  0x35   : > { %v401_v32 = vld [vmem:[%s1646_s8 + $0x800] sm:$0xff]  ;;  %400 = vst [vmem:[%s1651_s9 + $0xf8] sm:$0xff] %v399_v31 }
  0x36   : > { %v403_v33 = vld [vmem:[%s1646_s8 + $0x840] sm:$0xff]  ;;  %402 = vst [vmem:[%s1651_s9 + $0x100] sm:$0xff] %v401_v32 }
  0x37   : > { %v405_v34 = vld [vmem:[%s1646_s8 + $0x880] sm:$0xff]  ;;  %404 = vst [vmem:[%s1651_s9 + $0x108] sm:$0xff] %v403_v33 }
  0x38   : > { %v407_v35 = vld [vmem:[%s1646_s8 + $0x8c0] sm:$0xff]  ;;  %406 = vst [vmem:[%s1651_s9 + $0x110] sm:$0xff] %v405_v34 }
  0x39   : > { %v409_v36 = vld [vmem:[%s1646_s8 + $0x900] sm:$0xff]  ;;  %408 = vst [vmem:[%s1651_s9 + $0x118] sm:$0xff] %v407_v35 }
  0x3a   : > { %v411_v37 = vld [vmem:[%s1646_s8 + $0x940] sm:$0xff]  ;;  %410 = vst [vmem:[%s1651_s9 + $0x120] sm:$0xff] %v409_v36 }
  0x3b   : > { %v413_v38 = vld [vmem:[%s1646_s8 + $0x980] sm:$0xff]  ;;  %412 = vst [vmem:[%s1651_s9 + $0x128] sm:$0xff] %v411_v37 }
  0x3c   : > { %v415_v39 = vld [vmem:[%s1646_s8 + $0x9c0] sm:$0xff]  ;;  %414 = vst [vmem:[%s1651_s9 + $0x130] sm:$0xff] %v413_v38 }
  0x3d   : > { %v417_v40 = vld [vmem:[%s1646_s8 + $0xa00] sm:$0xff]  ;;  %416 = vst [vmem:[%s1651_s9 + $0x138] sm:$0xff] %v415_v39 }
  0x3e   : > { %v419_v41 = vld [vmem:[%s1646_s8 + $0xa40] sm:$0xff]  ;;  %418 = vst [vmem:[%s1651_s9 + $0x140] sm:$0xff] %v417_v40 }
  0x3f   : > { %v421_v42 = vld [vmem:[%s1646_s8 + $0xa80] sm:$0xff]  ;;  %420 = vst [vmem:[%s1651_s9 + $0x148] sm:$0xff] %v419_v41 }
  0x40   : > { %v423_v43 = vld [vmem:[%s1646_s8 + $0xac0] sm:$0xff]  ;;  %422 = vst [vmem:[%s1651_s9 + $0x150] sm:$0xff] %v421_v42 }
  0x41   : > { %v425_v44 = vld [vmem:[%s1646_s8 + $0xb00] sm:$0xff]  ;;  %424 = vst [vmem:[%s1651_s9 + $0x158] sm:$0xff] %v423_v43 }
  0x42   : > { %v427_v45 = vld [vmem:[%s1646_s8 + $0xb40] sm:$0xff]  ;;  %426 = vst [vmem:[%s1651_s9 + $0x160] sm:$0xff] %v425_v44 }
  0x43   : > { %v429_v46 = vld [vmem:[%s1646_s8 + $0xb80] sm:$0xff]  ;;  %428 = vst [vmem:[%s1651_s9 + $0x168] sm:$0xff] %v427_v45 }
  0x44   : > { %v431_v47 = vld [vmem:[%s1646_s8 + $0xbc0] sm:$0xff]  ;;  %430 = vst [vmem:[%s1651_s9 + $0x170] sm:$0xff] %v429_v46 }
  0x45   : > { %432 = vst [vmem:[%s1651_s9 + $0x178] sm:$0xff] %v431_v47 }
  0x46 PF: > { %s447_s10 = sand.u32 1, %s1545_s17   ;;  %s1160_s11 = sshll.u32 %s1553_s19, 1 }
  0x47   : > { %s1159_s12 = sshll.u32 %s447_s10, 1  ;;  %s455_s15 = scalar_lea.hbm %s1934_s3, %s1160_s11 }
  0x48   : > { %s457_s21 = sshll.u32 %s455_s15, 4  ;;  %s451_s23 = scalar_lea.vmem [#allocation4], %s1159_s12  ;;  %s458_s21 = int_to_ptr.hbm [resolvable:$true] %s457_s21 }
  0x49   : > { %s459_s25 = sshll.u32 %s451_s23, 4  ;;  %s448_s29 = scalar_lea.sflag [#allocation5], %s447_s10  ;;  %s460_s25 = int_to_ptr.vmem [resolvable:$true] %s459_s25 }
  0x4a   : > { %1429 = dma.hbm_to_vmem [thread:$0]  (%p1620_p3), %s458_s21, 32, %s460_s25, %s448_s29  }
  0x4b PF: > { %p1161_p11 = scmp.ge.s32.totalorder %s1557_s20, 1  ;;  %p464_p12 = scmp.lt.s32.totalorder %s1557_s20, 9 }
  0x4d   : > { %p465_p13 = pnand %p1161_p11, %p464_p12 }
  0x4e   : > { %s1756_s30 = sand.u32 (!%p465_p13), 1, %s1541_s16  }
  0x4f   : > { %468 = sbr.rel (%p465_p13) target bundleno = 302 (0x12e), region = 70  ;;  %s1162_s6 = sshll.u32 (!%p465_p13), %s1756_s30, 1 }
  0x50   : > { %s1428_s5 = smul.u32 (!%p465_p13), 384, %s1756_s30  ;;  %s478_s24 = scalar_lea.sflag (!%p465_p13), [#allocation5], %s1756_s30 }
  0x51   : > { %s1763_s8 = scalar_lea.vmem (!%p465_p13), [#allocation4], %s1162_s6 }
  0x52   : > { %s1760_s7 = scalar_lea.vmem (!%p465_p13), [#allocation3], %s1428_s5 }
  0x54   : > { %1532 = dma.done.wait (%p1627_p8), %s478_s24, 32  }
  0x55   : > { %1534 = vsyncadd (%p1627_p8), %s478_s24, 4294967264  ;;  %v1235_v48 = vld [vmem:[%s1760_s7 + $0x70] sm:$0xf]  ;;  %v1393_v49 = vld [vmem:[%s1760_s7 + $0x74] sm:$0xf0]  ;;  %s1164_s5 = sshll.u32 %s1549_s18, 1 }
  0x56   : > { %v1299_v50 = vld [vmem:[%s1760_s7 + $0xf0] sm:$0xf]  ;;  %v1236_v51 = vor.u32 %v1393_v49, %v1235_v48  ;;  %v1409_v52 = vld [vmem:[%s1760_s7 + $0xf4] sm:$0xf0]  ;;  %v1227_v57 = vld [vmem:[%s1760_s7 + $0x60] sm:$0xf] }
  0x57   : > { %v1363_v53 = vld [vmem:[%s1760_s7 + $0x170] sm:$0xf]  ;;  %v1425_v54 = vld [vmem:[%s1760_s7 + $0x174] sm:$0xf0]  ;;  %v1300_v55 = vor.u32 %v1409_v52, %v1299_v50  ;;  %v1391_v58 = vld [vmem:[%s1760_s7 + $0x64] sm:$0xf0] }
  0x58   : > { %v1364_v56 = vor.u32 %v1425_v54, %v1363_v53  ;;  %v1291_v59 = vld [vmem:[%s1760_s7 + $0xe0] sm:$0xf]  ;;  %866 = vmatpush.bf16.msra.mxu0 %v1236_v51  ;;  %v1228_v60 = vor.u32 %v1391_v58, %v1227_v57  ;;  %v1407_v61 = vld [vmem:[%s1760_s7 + $0xe4] sm:$0xf0]  ;;  %v1219_v2 = vld [vmem:[%s1760_s7 + $0x50] sm:$0xf] }
  0x59   : > { %v1355_v62 = vld [vmem:[%s1760_s7 + $0x160] sm:$0xf]  ;;  %v1423_v63 = vld [vmem:[%s1760_s7 + $0x164] sm:$0xf0]  ;;  %880 = vmatpush.bf16.msra.mxu1 %v1300_v55  ;;  %v1292_v0 = vor.u32 %v1407_v61, %v1291_v59  ;;  %v1389_v3 = vld [vmem:[%s1760_s7 + $0x54] sm:$0xf0] }
  0x5a   : > { %894 = vmatpush.bf16.msra.mxu2 %v1364_v56  ;;  %v1356_v1 = vor.u32 %v1423_v63, %v1355_v62  ;;  %v1283_v4 = vld [vmem:[%s1760_s7 + $0xd0] sm:$0xf]  ;;  %v1405_v5 = vld [vmem:[%s1760_s7 + $0xd4] sm:$0xf0]  ;;  %v1220_v8 = vor.u32 %v1389_v3, %v1219_v2  ;;  %v1211_v9 = vld [vmem:[%s1760_s7 + $0x40] sm:$0xf] }
  0x5b   : > { %v1347_v6 = vld [vmem:[%s1760_s7 + $0x150] sm:$0xf]  ;;  %v1421_v7 = vld [vmem:[%s1760_s7 + $0x154] sm:$0xf0]  ;;  %v1387_v10 = vld [vmem:[%s1760_s7 + $0x44] sm:$0xf0]  ;;  %v1284_v11 = vor.u32 %v1405_v5, %v1283_v4 }
  0x5c   : > { %867 = vmatpush.bf16.msra.mxu0 %v1228_v60  ;;  %v1348_v12 = vor.u32 %v1421_v7, %v1347_v6  ;;  %v1275_v13 = vld [vmem:[%s1760_s7 + $0xc0] sm:$0xf]  ;;  %v1392_v14 = vld [vmem:[%s1760_s7 + $0x74] sm:$0xf]  ;;  %v1237_v15 = vld [vmem:[%s1760_s7 + $0x78] sm:$0xf0]  ;;  %v1212_v21 = vor.u32 %v1387_v10, %v1211_v9 }
  0x5d   : > { %881 = vmatpush.bf16.msra.mxu1 %v1292_v0  ;;  %v1403_v16 = vld [vmem:[%s1760_s7 + $0xc4] sm:$0xf0]  ;;  %v1339_v17 = vld [vmem:[%s1760_s7 + $0x140] sm:$0xf]  ;;  %v1240_v19 = vor.u32 %v1392_v14, %v1237_v15  ;;  %v1390_v20 = vld [vmem:[%s1760_s7 + $0x64] sm:$0xf] }
  0x5e   : > { %895 = vmatpush.bf16.msra.mxu2 %v1356_v1  ;;  %v1419_v18 = vld [vmem:[%s1760_s7 + $0x144] sm:$0xf0]  ;;  %v1203_v22 = vld [vmem:[%s1760_s7 + $0x30] sm:$0xf]  ;;  %v1385_v23 = vld [vmem:[%s1760_s7 + $0x34] sm:$0xf0]  ;;  %v1276_v25 = vor.u32 %v1403_v16, %v1275_v13 }
  0x5f   : > { %908 = vmatpush.bf16.msra.mxu3 %v1240_v19  ;;  %v1229_v24 = vld [vmem:[%s1760_s7 + $0x68] sm:$0xf0]  ;;  %v1340_v26 = vor.u32 %v1419_v18, %v1339_v17  ;;  %v1267_v27 = vld [vmem:[%s1760_s7 + $0xb0] sm:$0xf]  ;;  %v1401_v28 = vld [vmem:[%s1760_s7 + $0xb4] sm:$0xf0]  ;;  %v1204_v34 = vor.u32 %v1385_v23, %v1203_v22 }
  0x60   : > { %868 = vmatpush.bf16.msra.mxu0 %v1220_v8  ;;  %v1331_v29 = vld [vmem:[%s1760_s7 + $0x130] sm:$0xf]  ;;  %v1232_v30 = vor.u32 %v1390_v20, %v1229_v24  ;;  %v1417_v31 = vld [vmem:[%s1760_s7 + $0x134] sm:$0xf0]  ;;  %v1388_v32 = vld [vmem:[%s1760_s7 + $0x54] sm:$0xf]  ;;  %v1268_v38 = vor.u32 %v1401_v28, %v1267_v27 }
  0x61   : > { %882 = vmatpush.bf16.msra.mxu1 %v1284_v11  ;;  %v1221_v33 = vld [vmem:[%s1760_s7 + $0x58] sm:$0xf0]  ;;  %v1195_v35 = vld [vmem:[%s1760_s7 + $0x20] sm:$0xf]  ;;  %v1383_v36 = vld [vmem:[%s1760_s7 + $0x24] sm:$0xf0]  ;;  %v1332_v39 = vor.u32 %v1417_v31, %v1331_v29 }
  0x62   : > { %896 = vmatpush.bf16.msra.mxu2 %v1348_v12  ;;  %v1224_v37 = vor.u32 %v1388_v32, %v1221_v33  ;;  %v1259_v40 = vld [vmem:[%s1760_s7 + $0xa0] sm:$0xf]  ;;  %v1386_v41 = vld [vmem:[%s1760_s7 + $0x44] sm:$0xf]  ;;  %v1213_v42 = vld [vmem:[%s1760_s7 + $0x48] sm:$0xf0]  ;;  %v1196_v46 = vor.u32 %v1383_v36, %v1195_v35 }
  0x63   : > { %909 = vmatpush.bf16.msra.mxu3 %v1232_v30  ;;  %v1399_v43 = vld [vmem:[%s1760_s7 + $0xa4] sm:$0xf0]  ;;  %v1323_v44 = vld [vmem:[%s1760_s7 + $0x120] sm:$0xf]  ;;  %v1187_v47 = vld [vmem:[%s1760_s7 + $0x10] sm:$0xf]  ;;  %v1216_v49 = vor.u32 %v1386_v41, %v1213_v42 }
  0x64   : > { %869 = vmatpush.bf16.msra.mxu0 %v1212_v21  ;;  %v1415_v45 = vld [vmem:[%s1760_s7 + $0x124] sm:$0xf0]  ;;  %v1381_v48 = vld [vmem:[%s1760_s7 + $0x14] sm:$0xf0]  ;;  %v1260_v50 = vor.u32 %v1399_v43, %v1259_v40  ;;  %v1251_v52 = vld [vmem:[%s1760_s7 + $0x90] sm:$0xf] }
  0x65   : > { %883 = vmatpush.bf16.msra.mxu1 %v1276_v25  ;;  %v1324_v51 = vor.u32 %v1415_v45, %v1323_v44  ;;  %v1384_v53 = vld [vmem:[%s1760_s7 + $0x34] sm:$0xf]  ;;  %v1205_v54 = vld [vmem:[%s1760_s7 + $0x38] sm:$0xf0]  ;;  %v1397_v55 = vld [vmem:[%s1760_s7 + $0x94] sm:$0xf0]  ;;  %v1188_v58 = vor.u32 %v1381_v48, %v1187_v47 }
  0x66   : > { %897 = vmatpush.bf16.msra.mxu2 %v1340_v26  ;;  %v1315_v56 = vld [vmem:[%s1760_s7 + $0x110] sm:$0xf]  ;;  %v1413_v57 = vld [vmem:[%s1760_s7 + $0x114] sm:$0xf0]  ;;  %v1179_v59 = vld [vmem:[%s1760_s7] sm:$0xf]  ;;  %v1208_v62 = vor.u32 %v1384_v53, %v1205_v54  ;;  %v1252_v63 = vor.u32 %v1397_v55, %v1251_v52 }
  0x67   : > { %910 = vmatpush.bf16.msra.mxu3 %v1224_v37  ;;  %v1379_v60 = vld [vmem:[%s1760_s7 + $0x4] sm:$0xf0]  ;;  %v1243_v61 = vld [vmem:[%s1760_s7 + $0x80] sm:$0xf]  ;;  %v1316_v0 = vor.u32 %v1413_v57, %v1315_v56  ;;  %v1382_v2 = vld [vmem:[%s1760_s7 + $0x24] sm:$0xf] }
  0x68   : > { %870 = vmatpush.bf16.msra.mxu0 %v1204_v34  ;;  %v1395_v1 = vld [vmem:[%s1760_s7 + $0x84] sm:$0xf0]  ;;  %v1197_v3 = vld [vmem:[%s1760_s7 + $0x28] sm:$0xf0]  ;;  %v1307_v4 = vld [vmem:[%s1760_s7 + $0x100] sm:$0xf]  ;;  %v1180_v10 = vor.u32 %v1379_v60, %v1179_v59 }
  0x69   : > { %884 = vmatpush.bf16.msra.mxu1 %v1268_v38  ;;  %v1411_v5 = vld [vmem:[%s1760_s7 + $0x104] sm:$0xf0]  ;;  %v1408_v6 = vld [vmem:[%s1760_s7 + $0xf4] sm:$0xf]  ;;  %v1301_v7 = vld [vmem:[%s1760_s7 + $0xf8] sm:$0xf0]  ;;  %v1200_v12 = vor.u32 %v1382_v2, %v1197_v3  ;;  %v1244_v15 = vor.u32 %v1395_v1, %v1243_v61 }
  0x6a   : > { %898 = vmatpush.bf16.msra.mxu2 %v1332_v39  ;;  %v1424_v8 = vld [vmem:[%s1760_s7 + $0x174] sm:$0xf]  ;;  %v1365_v9 = vld [vmem:[%s1760_s7 + $0x178] sm:$0xf0]  ;;  %v1175_v11 = vld [vmem:[%s1931_s0 + $0x8] sm:$0xf]  ;;  %v1308_v16 = vor.u32 %v1411_v5, %v1307_v4  ;;  %v1304_v20 = vor.u32 %v1408_v6, %v1301_v7 }
  0x6b   : > { %911 = vmatpush.bf16.msra.mxu3 %v1216_v49  ;;  %v1167_v13 = vld [vmem:[%s1931_s0] sm:$0xf]  ;;  %v1376_v14 = vld [vmem:[%s1931_s0 + $0x8] sm:$0xf0]  ;;  %v1377_v17 = vld [vmem:[%s1931_s0 + $0x10] sm:$0xf0]  ;;  %v1368_v21 = vor.u32 %v1424_v8, %v1365_v9 }
  0x6c   : > { %871 = vmatpush.bf16.msra.mxu0 %v1196_v46  ;;  %v1375_v18 = vld [vmem:[%s1931_s0 + $0x4] sm:$0xf]  ;;  %v1169_v19 = vld [vmem:[%s1931_s0 + $0xc] sm:$0xf0]  ;;  %v1380_v23 = vld [vmem:[%s1760_s7 + $0x14] sm:$0xf]  ;;  %v1168_v28 = vor.u32 %v1376_v14, %v1167_v13  ;;  %v1857_v29 = vor.u32 %v1377_v17, %v1175_v11 }
  0x6d   : > { %885 = vmatpush.bf16.msra.mxu1 %v1260_v50  ;;  %v1406_v22 = vld [vmem:[%s1760_s7 + $0xe4] sm:$0xf]  ;;  %v1189_v24 = vld [vmem:[%s1760_s7 + $0x18] sm:$0xf0]  ;;  %v1293_v25 = vld [vmem:[%s1760_s7 + $0xe8] sm:$0xf0]  ;;  %v1859_v30 = vor.u32 %v1375_v18, %v1169_v19 }
  0x6e   : > { %899 = vmatpush.bf16.msra.mxu2 %v1324_v51  ;;  %v1422_v26 = vld [vmem:[%s1760_s7 + $0x164] sm:$0xf]  ;;  %v1357_v27 = vld [vmem:[%s1760_s7 + $0x168] sm:$0xf0]  ;;  %v1192_v31 = vor.u32 %v1380_v23, %v1189_v24  ;;  %v1296_v32 = vor.u32 %v1406_v22, %v1293_v25  ;;  %v1404_v34 = vld [vmem:[%s1760_s7 + $0xd4] sm:$0xf] }
  0x6f   : > { %912 = vmatpush.bf16.msra.mxu3 %v1208_v62  ;;  %v1360_v33 = vor.u32 %v1422_v26, %v1357_v27  ;;  %v1378_v35 = vld [vmem:[%s1760_s7 + $0x4] sm:$0xf]  ;;  %v1181_v36 = vld [vmem:[%s1760_s7 + $0x8] sm:$0xf0]  ;;  %v1285_v37 = vld [vmem:[%s1760_s7 + $0xd8] sm:$0xf0] }
  0x70   : > { %872 = vmatpush.bf16.msra.mxu0 %v1188_v58  ;;  %v1420_v38 = vld [vmem:[%s1760_s7 + $0x154] sm:$0xf]  ;;  %v1349_v39 = vld [vmem:[%s1760_s7 + $0x158] sm:$0xf0]  ;;  %v1184_v40 = vor.u32 %v1378_v35, %v1181_v36  ;;  %v1288_v41 = vor.u32 %v1404_v34, %v1285_v37  ;;  %v1402_v43 = vld [vmem:[%s1760_s7 + $0xc4] sm:$0xf] }
  0x71   : > { %886 = vmatpush.bf16.msra.mxu1 %v1252_v63  ;;  %v1352_v42 = vor.u32 %v1420_v38, %v1349_v39  ;;  %v1277_v44 = vld [vmem:[%s1760_s7 + $0xc8] sm:$0xf0]  ;;  %v1418_v45 = vld [vmem:[%s1760_s7 + $0x144] sm:$0xf]  ;;  %v1400_v49 = vld [vmem:[%s1760_s7 + $0xb4] sm:$0xf] }
  0x72   : > { %900 = vmatpush.bf16.msra.mxu2 %v1316_v0  ;;  %v1341_v46 = vld [vmem:[%s1760_s7 + $0x148] sm:$0xf0]  ;;  %v1280_v47 = vor.u32 %v1402_v43, %v1277_v44  ;;  %v1269_v50 = vld [vmem:[%s1760_s7 + $0xb8] sm:$0xf0]  ;;  %v1416_v51 = vld [vmem:[%s1760_s7 + $0x134] sm:$0xf] }
  0x73   : > { %913 = vmatpush.bf16.msra.mxu3 %v1200_v12  ;;  %v1344_v48 = vor.u32 %v1418_v45, %v1341_v46  ;;  %v1333_v52 = vld [vmem:[%s1760_s7 + $0x138] sm:$0xf0]  ;;  %v1272_v53 = vor.u32 %v1400_v49, %v1269_v50  ;;  %v1398_v55 = vld [vmem:[%s1760_s7 + $0xa4] sm:$0xf]  ;;  %v1261_v56 = vld [vmem:[%s1760_s7 + $0xa8] sm:$0xf0] }
  0x74   : > { %873 = vmatpush.bf16.msra.mxu0 %v1180_v10  ;;  %v1336_v54 = vor.u32 %v1416_v51, %v1333_v52  ;;  %v1414_v57 = vld [vmem:[%s1760_s7 + $0x124] sm:$0xf]  ;;  %v1325_v58 = vld [vmem:[%s1760_s7 + $0x128] sm:$0xf0]  ;;  %v1264_v59 = vor.u32 %v1398_v55, %v1261_v56  ;;  %v1396_v61 = vld [vmem:[%s1760_s7 + $0x94] sm:$0xf] }
  0x75   : > { %887 = vmatpush.bf16.msra.mxu1 %v1244_v15  ;;  %v1328_v60 = vor.u32 %v1414_v57, %v1325_v58  ;;  %v1253_v62 = vld [vmem:[%s1760_s7 + $0x98] sm:$0xf0]  ;;  %v1412_v63 = vld [vmem:[%s1760_s7 + $0x114] sm:$0xf]  ;;  %v1394_v3 = vld [vmem:[%s1760_s7 + $0x84] sm:$0xf] }
  0x76   : > { %901 = vmatpush.bf16.msra.mxu2 %v1308_v16  ;;  %v1317_v0 = vld [vmem:[%s1760_s7 + $0x118] sm:$0xf0]  ;;  %v1256_v1 = vor.u32 %v1396_v61, %v1253_v62  ;;  %v1245_v4 = vld [vmem:[%s1760_s7 + $0x88] sm:$0xf0]  ;;  %v1410_v5 = vld [vmem:[%s1760_s7 + $0x104] sm:$0xf] }
  0x77   : > { %874 = vmatmul.bf16.vlgmr.msra.gmra.mxu0 %v1168_v28  ;;  %914 = vmatpush.bf16.msra.mxu3 %v1192_v31  ;;  %v1320_v2 = vor.u32 %v1412_v63, %v1317_v0  ;;  %v1309_v6 = vld [vmem:[%s1760_s7 + $0x108] sm:$0xf0]  ;;  %v1248_v7 = vor.u32 %v1394_v3, %v1245_v4  ;;  %p539_p0 = scmp.lt.s32.totalorder %s1164_s5, 15  ;;  %v975_v13 = vld [vmem:[%s1763_s8] sm:$0x3]  ;;  %s1163_s26 = sshll.u32 %s1756_s30, 5 }
  0x78   : > { %922 = vmatpush.bf16.msrb.mxu0 %v1304_v20  ;;  %888 = vmatmul.bf16.vlgmr.msra.gmra.mxu1 %v1859_v30  ;;  %v1312_v8 = vor.u32 %v1410_v5, %v1309_v6  ;;  %v977_v17 = vperm.slane %v975_v13, 0  ;;  %s1897_s9 = scalar_lea.vmem [#allocation6], %s1163_s26  ;;  %s1426_s30 = sshll.u32 (%p1634_p9), %s1549_s18, 4 }
  0x79   : > { %936 = vmatpush.bf16.msrb.mxu1 %v1368_v21  ;;  %902 = vmatmul.bf16.vlgmr.msra.gmra.mxu2 %v1857_v29  ;;  %s1947_s5 = smov (!%p539_p0, %s1164_s5), 15  ;;  %s1001_s11 = scalar_lea.vmem (%p1634_p9), %s1935_s4, %s1426_s30 }
  0x7a   : > { %s541_s7 = scalar_lea.vmem %s1933_s2, %s1947_s5 }
  0x7b   : > { %915 = vmatpush.bf16.msra.mxu3 %v1184_v40  ;;  %v965_v11 = vld [vmem:[%s541_s7] sm:$0x3] }
  0x7c   : > { %923 = vmatpush.bf16.msrb.mxu0 %v1296_v32  ;;  %v967_v14 = vperm.slane %v965_v11, 0  ;;  %v968_v31 = vperm.slane %v965_v11, 1 }
  0x7d   : > { %937 = vmatpush.bf16.msrb.mxu1 %v1360_v33  ;;  %v978_v33 = vperm.slane %v975_v13, 1 }
  0x7e   : > { %916 = vmatmul.bf16.vlgmr.msra.gmra.mxu3 %v1168_v28 }
  0x80   : > { %924 = vmatpush.bf16.msrb.mxu0 %v1288_v41 }
  0x81   : > { %938 = vmatpush.bf16.msrb.mxu1 %v1352_v42 }
  0x84   : > { %925 = vmatpush.bf16.msrb.mxu0 %v1280_v47 }
  0x85   : > { %939 = vmatpush.bf16.msrb.mxu1 %v1344_v48 }
  0x88   : > { %926 = vmatpush.bf16.msrb.mxu0 %v1272_v53 }
  0x89   : > { %940 = vmatpush.bf16.msrb.mxu1 %v1336_v54 }
  0x8c   : > { %927 = vmatpush.bf16.msrb.mxu0 %v1264_v59 }
  0x8d   : > { %941 = vmatpush.bf16.msrb.mxu1 %v1328_v60 }
  0x90   : > { %928 = vmatpush.bf16.msrb.mxu0 %v1256_v1 }
  0x91   : > { %942 = vmatpush.bf16.msrb.mxu1 %v1320_v2 }
  0x94   : > { %929 = vmatpush.bf16.msrb.mxu0 %v1248_v7 }
  0x95   : > { %943 = vmatpush.bf16.msrb.mxu1 %v1312_v8 }
  0x97   : > { %930 = vmatmul.bf16.vlgmr.msrb.gmra.mxu0 %v1859_v30 }
  0x98   : > { %944 = vmatmul.bf16.vlgmr.msrb.gmra.mxu1 %v1857_v29 }
  0xf4   : > { %v875_v9 = vpop.f32.mrf.mxu0 }
  0xf5   : > { %v889_v10 = vpop.f32.mrf.mxu1 }
  0xf6   : > { %v890_v12 = vadd.f32 %v889_v10, %v875_v9 }
  0xfc   : > { %v903_v15 = vpop.f32.mrf.mxu2  ;;  %v877_v18 = vpop.f32.mrf.mxu0 }
  0xfd   : > { %v904_v16 = vadd.f32 %v903_v15, %v890_v12  ;;  %v891_v19 = vpop.f32.mrf.mxu1 }
  0xfe   : > { %v892_v22 = vadd.f32 %v891_v19, %v877_v18 }
  0xff   : > { %v971_v20 = vmul.f32 %v967_v14, %v904_v16 }
 0x101   : > { %v981_v21 = vadd.f32 %v977_v17, %v971_v20  ;;  %v917_v27 = vpop.f32.mrf.mxu3 }
 0x103   : > { %985 = vst [vmem:[%s1897_s9] sm:$0xff] %v981_v21 }
 0x104   : > { %v905_v23 = vpop.f32.mrf.mxu2 }
 0x105   : > { %v906_v24 = vadd.f32 %v905_v23, %v892_v22 }
 0x107   : > { %v973_v25 = vmul.f32 %v967_v14, %v906_v24 }
 0x109   : > { %v983_v26 = vadd.f32 %v977_v17, %v973_v25  ;;  %v919_v36 = vpop.f32.mrf.mxu3 }
 0x10a   : > { %v1014_v43 = vld [vmem:[%s1897_s9] sm:$0xff] (%p1634_p9) }
 0x10b   : > { %987 = vst [vmem:[%s1897_s9 + $0x10] sm:$0xff] %v983_v26 }
 0x10c   : > { %1015 = vst [vmem:[%s1001_s11] sm:$0xff] (%p1634_p9), %v1014_v43 }
 0x112   : > { %v1018_v45 = vld [vmem:[%s1897_s9 + $0x10] sm:$0xff] (%p1634_p9) }
 0x113   : > { %1019 = vst [vmem:[%s1001_s11 + $0x80] sm:$0xff] (%p1634_p9), %v1018_v45 }
 0x114   : > { %v931_v28 = vpop.f32.mrf.mxu0 }
 0x115   : > { %v945_v29 = vpop.f32.mrf.mxu1  ;;  %v932_v30 = vadd.f32 %v931_v28, %v917_v27 }
 0x117   : > { %v946_v32 = vadd.f32 %v945_v29, %v932_v30 }
 0x119   : > { %v972_v34 = vmul.f32 %v968_v31, %v946_v32 }
 0x11b   : > { %v982_v35 = vadd.f32 %v978_v33, %v972_v34 }
 0x11c   : > { %v933_v37 = vpop.f32.mrf.mxu0 }
 0x11d   : > { %986 = vst [vmem:[%s1897_s9 + $0x8] sm:$0xff] %v982_v35  ;;  %v934_v38 = vadd.f32 %v933_v37, %v919_v36  ;;  %v947_v39 = vpop.f32.mrf.mxu1 }
 0x11f   : > { %v948_v40 = vadd.f32 %v947_v39, %v934_v38 }
 0x121   : > { %v974_v41 = vmul.f32 %v968_v31, %v948_v40  ;;  %995 = sbr.rel (!%p1634_p9) target bundleno = 302 (0x12e), region = 90 }
 0x123   : > { %v984_v42 = vadd.f32 %v978_v33, %v974_v41 }
 0x124   : > { %v1016_v44 = vld [vmem:[%s1897_s9 + $0x8] sm:$0xff] (%p1634_p9) }
 0x125   : > { %988 = vst [vmem:[%s1897_s9 + $0x18] sm:$0xff] %v984_v42 }
 0x126   : > { %1017 = vst [vmem:[%s1001_s11 + $0x8] sm:$0xff] %v1016_v44 }
 0x12c   : > { %v1020_v46 = vld [vmem:[%s1897_s9 + $0x18] sm:$0xff] }
 0x12d   : > { %1021 = vst [vmem:[%s1001_s11 + $0x88] sm:$0xff] %v1020_v46 }
 0x12e PF: > { %s17_s20 = sadd.s32 1, %s1557_s20   ;;  %s1939_s15 = smov %s1541_s16 }
 0x12f   : > { %p14_p1 = scmp.ge.s32.totalorder %s17_s20, 10   ;;  %s1940_s16 = smov %s1545_s17 }
 0x130   : > { %s1941_s17 = smov %s1632_s27  ;;  %s1942_s18 = smov %s1553_s19 }
 0x131   : > { %s1943_s19 = smov %s1945_s22  ;;  %16 = sbr.rel (!%p14_p1) target bundleno = 4 (0x4), region = 159 }
 0x136   :  { %1037 = vsyncpa [#allocation5], 1 }
 0x137   :  { %1039 = vsyncpa [#allocation5 + $0x1], 1 }

</bundles_post_ra>
